<compile_context>
chip_gen: v7x
topology: tpu7x:2x2x1
jax: 0.10.0
libtpu: 0.0.40
codegen_flags: <defaults>
</compile_context>

<pallas_src>
import functools

import jax
import jax.numpy as jnp
from jax.experimental import pallas as pl
from jax.experimental.pallas import tpu as pltpu

F32 = jnp.float32
BF16 = jnp.bfloat16

# ---- hyperparameters (mirror FragSizeGNN.__init__ defaults) ------------------
LIG_NF = 8
POCKET_NF = 8
JOINT_NF = 16
HIDDEN_NF = 32
OUT_NODE_NF = 8
N_LAYERS = 3                 # forward only uses the (n_layers - 1) gcl_layers (gcl1 unused)
NUM_GAUSSIANS = 16
GAUSS_START, GAUSS_STOP = 0.0, 5.0
NORM_FACTOR = 100.0          # aggregation_method='sum' -> sum / normalization_factor
EDGE_CUTOFF_P = 5.0
EDGE_CUTOFF_I = 5.0          # edge_cutoff_ligand = None -> no cutoff for ligand-ligand
CONTEXT_NF = 3               # CrossDock: [anchor, scaffold, pocket] flags

# packed per-node input columns (lane axis):
#   [mol_onehot(8) | pocket_onehot(8) | is_lig | is_poc | anchor | valid | x y z]
_CF = LIG_NF + POCKET_NF     # 16: flag columns start here
COL_LIG = _CF
COL_POC = _CF + 1
COL_ANC = _CF + 2
COL_VAL = _CF + 3
COL_X = _CF + 4
NODE_F = _CF + 7             # 23

OUT_PAD = 128                # lane-dense output store; wrapper slices the 8 real channels


# ----------------------------- fused kernel body ------------------------------
def _fused_forward_kernel(nodes_ref, enc1_ref, enc2_ref, benc_ref,
                          wh_ref, wg_ref, we_ref, gclb_ref,
                          wout_ref, bout_ref, out_ref):
    M = nodes_ref.shape[0]                       # padded node slots of this batch element
    E = M * M                                    # dense per-batch edge count
    H = HIDDEN_NF
    G = NUM_GAUSSIANS
    dot = functools.partial(jnp.dot, preferred_element_type=F32)

    nodes = nodes_ref[...]                                        # (M, NODE_F) f32

    # ---- mol/pocket encoders + embed_both (split matmuls, no input concat) ----
    # enc1 rows: [w_mol; w_poc; b_mol; b_poc] -> bias selected exactly by is_lig / is_poc.
    joint = dot(nodes[:, 0:_CF + 2], enc1_ref[...])               # (M, JOINT_NF)
    h = (dot(joint, enc2_ref[0:JOINT_NF, :])
         + nodes[:, COL_LIG:COL_LIG + 1] * enc2_ref[JOINT_NF + 0:JOINT_NF + 1, :]
         + nodes[:, COL_POC:COL_POC + 1] * enc2_ref[JOINT_NF + 1:JOINT_NF + 2, :]
         + nodes[:, COL_ANC:COL_ANC + 1] * enc2_ref[JOINT_NF + 2:JOINT_NF + 3, :]
         + benc_ref[...])                                         # (M, H) f32

    # ---- per-batch geometry + cutoff adjacency, edge-scalar (M, M, 1) orientation ----
    # (this is the orientation both consumers -- the Gaussian smearing over G lanes and the
    #  message gate over H lanes -- need, so no (E, 1) columns are carried around).
    x = nodes[:, COL_X:COL_X + 3]                                 # (M, 3)
    diff = x[:, None, :] - x[None, :, :]                          # (M, M, 3)
    d2 = jnp.sum(diff * diff, axis=-1, keepdims=True)             # (M, M, 1) squared distance
    lig = nodes[:, COL_LIG:COL_LIG + 1]
    poc = nodes[:, COL_POC:COL_POC + 1]
    val = nodes[:, COL_VAL:COL_VAL + 1]
    both_lig = lig[:, None, :] * lig[None, :, :]                  # (M, M, 1)
    both_poc = poc[:, None, :] * poc[None, :, :]
    cross = 1.0 - both_lig - both_poc
    vpair = val[:, None, :] * val[None, :, :]
    w_p = (d2 <= EDGE_CUTOFF_P * EDGE_CUTOFF_P).astype(F32)
    w_i = (d2 <= EDGE_CUTOFF_I * EDGE_CUTOFF_I).astype(F32)
    # dense equivalent of torch.where(adj); self-edges kept (the reference adjacency keeps the
    # diagonal); non-edges carry weight 0 into the aggregation.
    adj = vpair * (both_lig + both_poc * w_p + cross * w_i)       # (M, M, 1)

    # ---- Gaussian smearing of the coord2diff radial -------------------------------
    # TODO(synk): coord2diff returns the *squared* distance and it is smeared unchanged here;
    # verify against the exact upstream coord2diff/GaussianSmearing pair.
    step = (GAUSS_STOP - GAUSS_START) / (G - 1)
    offs = GAUSS_START + step * jax.lax.broadcasted_iota(jnp.int32, (1, 1, G), 2).astype(F32)
    gauss = jnp.exp((-0.5 / (step * step)) * (d2 - offs) ** 2)    # (M, M, G)

    # Gaussian projection for ALL layers in one wide matmul: (E, G) @ (G, L*H).
    gproj = dot(gauss.reshape(E, G).astype(BF16), wg_ref[...])    # (E, L*H) f32
    gproj = gproj.reshape(M, M, -1)                               # (M, M, L*H)

    # ---- EGNN GCL layers: edge MLP + attention gate + masked sum-agg/norm + residual ----
    # TODO(synk): GCL(normalization=True) is carried through, but the reference GCL applies
    # no extra norm to h, so none is applied here.
    n_layers = wh_ref.shape[0]
    for li in range(n_layers):
        wh = wh_ref[li]                    # (H, 3H)  [w1_src | w1_tgt | wn1_h]    bf16
        we = we_ref[li]                    # (3H, H)  [w2 ; wn1_agg ; wn2]         bf16
        bl = gclb_ref[li]                  # (6, H)   f32
        b1, b2, bn1, bn2 = bl[0:1], bl[1:2], bl[2:3], bl[3:4]     # (1, H) each
        w_att = bl[4:5]                    # (1, H) attention row
        b_att = bl[5:6, 0:1]               # (1, 1)

        # per-node halves of edge-MLP layer 1 + node-MLP h-half: one (M, 3H)-wide matmul
        hw = dot(h.astype(BF16), wh)                              # (M, 3H) f32
        p_s = hw[:, 0:H]                                          # source-node projection
        p_t = hw[:, H:2 * H]                                      # target-node projection
        nh = hw[:, 2 * H:3 * H]                                   # node-MLP h-half

        # edge MLP (messages): broadcast per-node terms into (M, M, H) edge space
        pre = (p_s[:, None, :] + p_t[None, :, :]
               + gproj[:, :, li * H:(li + 1) * H] + b1[None])
        m1 = jnp.maximum(pre, 0.0)                                # (M, M, H)
        m2 = dot(m1.reshape(E, H).astype(BF16), we[0:H, :]).reshape(M, M, H) + b2[None]
        m2 = jnp.maximum(m2, 0.0)                                 # (M, M, H)

        # attention gate (VPU multiply + lane reduce + EUP sigmoid); adjacency folded in
        logit = jnp.sum(m2 * w_att[None], axis=-1, keepdims=True) + b_att   # (M, M, 1)
        gate = jax.nn.sigmoid(logit) * adj                        # (M, M, 1)

        # masked sum aggregation over target nodes (axis 1) + 1/normalization_factor
        agg = jnp.sum(m2 * gate, axis=1) * (1.0 / NORM_FACTOR)    # (M, H)

        # node MLP + residual
        n1 = jnp.maximum(nh + dot(agg.astype(BF16), we[H:2 * H, :]) + bn1, 0.0)
        h = h + dot(n1.astype(BF16), we[2 * H:3 * H, :]) + bn2    # (M, H)

    # ---- embedding_out + ReLU, padded to 128 lanes for an unmasked lane-dense store ----
    out_ref[...] = jnp.maximum(dot(h.astype(BF16), wout_ref[...]) + bout_ref[...], 0.0)


# ----------------------------- parameter packing ------------------------------
def pack_params(p):
    """Pack the module parameters into the dense slabs the fused kernel consumes."""
    H, G = HIDDEN_NF, NUM_GAUSSIANS
    enc1 = jnp.concatenate([p['w_mol'], p['w_poc'], p['b_mol'], p['b_poc']], axis=0)  # (18, J)
    wctx = p['w_embed_ctx']                       # rows: [anchor, scaffold, pocket]
    # reorder ctx rows to the node-flag order [is_lig(scaffold), is_poc(pocket), anchor]
    enc2 = jnp.concatenate([p['w_embed_joint'], wctx[1:2], wctx[2:3], wctx[0:1]], axis=0)
    wh, wg, we, bb = [], [], [], []
    for lp in p['gcl_layers']:
        w1 = lp['w1']                             # (2H+G, H): [src rows | tgt rows | gauss rows]
        wn1 = lp['wn1']                           # (2H, H):   [h rows | agg rows]
        wh.append(jnp.concatenate([w1[0:H], w1[H:2 * H], wn1[0:H]], axis=1))      # (H, 3H)
        wg.append(w1[2 * H:2 * H + G])                                            # (G, H)
        we.append(jnp.concatenate([lp['w2'], wn1[H:2 * H], lp['wn2']], axis=0))   # (3H, H)
        bb.append(jnp.concatenate([lp['b1'], lp['b2'], lp['bn1'], lp['bn2'],
                                   lp['w_att'].T,
                                   jnp.broadcast_to(lp['b_att'], (1, H))], axis=0))  # (6, H)
    wout = jnp.zeros((H, OUT_PAD), F32).at[:, :OUT_NODE_NF].set(p['w_out'])
    bout = jnp.zeros((1, OUT_PAD), F32).at[:, :OUT_NODE_NF].set(p['b_out'])
    return (enc1.astype(F32),                        # (18, J)
            enc2.astype(F32),                        # (J + 3, H)
            p['b_embed'].astype(F32),                # (1, H)
            jnp.stack(wh).astype(BF16),              # (L, H, 3H)
            jnp.concatenate(wg, axis=1).astype(BF16),  # (G, L*H)
            jnp.stack(we).astype(BF16),              # (L, 3H, H)
            jnp.stack(bb).astype(F32),               # (L, 6, H)
            wout.astype(BF16),                       # (H, 128)
            bout)                                    # (1, 128) f32


# ----------------------------- forward pass -----------------------------------
def frag_size_gnn_forward(params, mol_x, mol_h, node_mask, pocket_x, pocket_h,
                          pocket_mask, anchors, pocket_anchors):
    B, n_lig = mol_h.shape[0], mol_h.shape[1]
    n_p = pocket_h.shape[1]
    M = n_lig + n_p                               # == N in the torch module
    M_pad = ((M + 7) // 8) * 8                    # multiple of 8 -> clean sublane layouts

    node_mask = node_mask.astype(F32)
    pocket_mask = pocket_mask.astype(F32)

    mol_rows = jnp.concatenate([
        mol_h.astype(F32),
        jnp.zeros((B, n_lig, POCKET_NF), F32),
        jnp.ones((B, n_lig, 1), F32),              # is_lig (scaffold flag)
        jnp.zeros((B, n_lig, 1), F32),             # is_poc
        anchors.astype(F32)[..., None],            # anchor flag
        node_mask[..., None],                      # valid
        mol_x.astype(F32),                         # x, y, z
    ], axis=-1)                                    # (B, n_lig, NODE_F)
    poc_rows = jnp.concatenate([
        jnp.zeros((B, n_p, LIG_NF), F32),
        pocket_h.astype(F32),
        jnp.zeros((B, n_p, 1), F32),
        jnp.ones((B, n_p, 1), F32),
        pocket_anchors.astype(F32)[..., None],
        pocket_mask[..., None],
        pocket_x.astype(F32),
    ], axis=-1)                                    # (B, n_p, NODE_F)
    nodes = jnp.concatenate([mol_rows, poc_rows], axis=1)          # (B, M, NODE_F)
    if M_pad > M:
        nodes = jnp.concatenate(
            [nodes, jnp.zeros((B, M_pad - M, NODE_F), F32)], axis=1)

    packed = pack_params(params)
    operands = (nodes,) + packed

    def _const_map(nd):
        return lambda b, _n=nd: (0,) * _n

    in_specs = [pl.BlockSpec((None, M_pad, NODE_F), lambda b: (b, 0, 0))]
    in_specs += [pl.BlockSpec(w.shape, _const_map(w.ndim)) for w in packed]

    h_out = pl.pallas_call(
        _fused_forward_kernel,
        grid=(B,),                                 # one grid step per batch element
        in_specs=in_specs,
        out_specs=pl.BlockSpec((None, M_pad, OUT_PAD), lambda b: (b, 0, 0)),
        out_shape=jax.ShapeDtypeStruct((B, M_pad, OUT_PAD), F32),
        compiler_params=pltpu.CompilerParams(
            dimension_semantics=("parallel",),     # independent batch steps (v7x megacore)
            vmem_limit_bytes=64 * 1024 * 1024),
    )(*operands)

    # pack real nodes to the front of each batch row (ligand first, then pocket);
    # padded slots stay zero -- equivalent to the torch scatter with `positions`.
    h_final = h_out[:, :, :OUT_NODE_NF]                            # (B, M_pad, 8)
    valid = jnp.concatenate([node_mask, pocket_mask], axis=1)      # (B, M)
    if M_pad > M:
        valid = jnp.concatenate([valid, jnp.zeros((B, M_pad - M), F32)], axis=1)
    pos = jnp.clip(jnp.cumsum(valid, axis=1).astype(jnp.int32) - 1, 0, M - 1)
    bidx = jnp.broadcast_to(jnp.arange(B, dtype=jnp.int32)[:, None], (B, M_pad))
    out = jnp.zeros((B, M, OUT_NODE_NF), F32)
    out = out.at[bidx, pos].add(h_final * valid[..., None])
    return out


# ----------------------------- params -----------------------------------------
def init_params(key):
    keys = jax.random.split(key, 16)
    kit = iter(keys)

    def lin(fan_in, fan_out):
        kw, kb = jax.random.split(next(kit))
        bound = 1.0 / (fan_in ** 0.5)
        w = jax.random.uniform(kw, (fan_in, fan_out), F32, -bound, bound)
        b = jax.random.uniform(kb, (1, fan_out), F32, -bound, bound)
        return w, b

    params = {}
    params['w_mol'], params['b_mol'] = lin(LIG_NF, JOINT_NF)
    params['w_poc'], params['b_poc'] = lin(POCKET_NF, JOINT_NF)
    w_e, b_e = lin(JOINT_NF + CONTEXT_NF, HIDDEN_NF)
    params['w_embed_joint'] = w_e[:JOINT_NF]
    params['w_embed_ctx'] = w_e[JOINT_NF:]            # rows: [anchor, scaffold, pocket]
    params['b_embed'] = b_e

    layers = []
    for _ in range(N_LAYERS - 1):
        w1, b1 = lin(2 * HIDDEN_NF + NUM_GAUSSIANS, HIDDEN_NF)   # edge MLP 1  [h_i|h_j|gauss]
        w2, b2 = lin(HIDDEN_NF, HIDDEN_NF)                       # edge MLP 2
        w_att, b_att = lin(HIDDEN_NF, 1)                         # attention gate
        wn1, bn1 = lin(2 * HIDDEN_NF, HIDDEN_NF)                 # node MLP 1  [h|agg]
        wn2, bn2 = lin(HIDDEN_NF, HIDDEN_NF)                     # node MLP 2
        layers.append(dict(w1=w1, b1=b1, w2=w2, b2=b2, w_att=w_att, b_att=b_att,
                           wn1=wn1, bn1=bn1, wn2=wn2, bn2=bn2))
    params['gcl_layers'] = layers
    params['w_out'], params['b_out'] = lin(HIDDEN_NF, OUT_NODE_NF)
    return params


# ----------------------------- main --------------------------------------------
if __name__ == "__main__":
    key = jax.random.PRNGKey(0)
    kp, kx1, kh1, kx2, kh2, ka1, ka2 = jax.random.split(key, 7)
    B, N_LIG, N_P = 2, 8, 8

    params = init_params(kp)

    mol_x = jax.random.normal(kx1, (B, N_LIG, 3), F32) * 2.0
    mol_h = jax.nn.one_hot(jax.random.randint(kh1, (B, N_LIG), 0, LIG_NF), LIG_NF, dtype=F32)
    pocket_x = jax.random.normal(kx2, (B, N_P, 3), F32) * 2.0
    pocket_h = jax.nn.one_hot(jax.random.randint(kh2, (B, N_P), 0, POCKET_NF), POCKET_NF,
                              dtype=F32)
    node_mask = jnp.array([[1.0] * 8, [1.0] * 6 + [0.0] * 2], F32)
    pocket_mask = jnp.array([[1.0] * 8, [1.0] * 7 + [0.0] * 1], F32)
    anchors = (jax.random.uniform(ka1, (B, N_LIG)) < 0.25).astype(F32)
    pocket_anchors = (jax.random.uniform(ka2, (B, N_P)) < 0.1).astype(F32)

    fwd = jax.jit(frag_size_gnn_forward)
    out = fwd(params, mol_x, mol_h, node_mask, pocket_x, pocket_h,
              pocket_mask, anchors, pocket_anchors)
    jax.block_until_ready(out)
    assert out.shape == (B, N_LIG + N_P, OUT_NODE_NF)
    assert jnp.all(jnp.isfinite(out))
    print("KERNEL_OK")
</pallas_src>

<mosaic_0001>
module attributes {stable_mosaic.version = 11 : i64} {
  func.func @_fused_forward_kernel(%arg0: i32, %arg1: memref<1x16x23xf32, #tpu.memory_space<vmem>>, %arg2: memref<18x16xf32, #tpu.memory_space<vmem>>, %arg3: memref<19x32xf32, #tpu.memory_space<vmem>>, %arg4: memref<1x32xf32, #tpu.memory_space<vmem>>, %arg5: memref<2x32x96xbf16, #tpu.memory_space<vmem>>, %arg6: memref<16x64xbf16, #tpu.memory_space<vmem>>, %arg7: memref<2x96x32xbf16, #tpu.memory_space<vmem>>, %arg8: memref<2x6x32xf32, #tpu.memory_space<vmem>>, %arg9: memref<32x128xbf16, #tpu.memory_space<vmem>>, %arg10: memref<1x128xf32, #tpu.memory_space<vmem>>, %arg11: memref<1x16x128xf32, #tpu.memory_space<vmem>>) attributes {dimension_semantics = [#tpu.dimension_semantics<parallel>], iteration_bounds = array<i64: 2>, scalar_prefetch = 0 : i64, scratch_operands = 0 : i64, tpu.core_type = #tpu.core_type<tc>, window_params = [{transform_indices = @transform_0, window_bounds = array<i64: 1, 16, 23>}, {pipeline_mode = #tpu.pipeline_mode<synchronous>, transform_indices = @transform_1, window_bounds = array<i64: 18, 16>}, {pipeline_mode = #tpu.pipeline_mode<synchronous>, transform_indices = @transform_2, window_bounds = array<i64: 19, 32>}, {pipeline_mode = #tpu.pipeline_mode<synchronous>, transform_indices = @transform_3, window_bounds = array<i64: 1, 32>}, {pipeline_mode = #tpu.pipeline_mode<synchronous>, transform_indices = @transform_4, window_bounds = array<i64: 2, 32, 96>}, {pipeline_mode = #tpu.pipeline_mode<synchronous>, transform_indices = @transform_5, window_bounds = array<i64: 16, 64>}, {pipeline_mode = #tpu.pipeline_mode<synchronous>, transform_indices = @transform_6, window_bounds = array<i64: 2, 96, 32>}, {pipeline_mode = #tpu.pipeline_mode<synchronous>, transform_indices = @transform_7, window_bounds = array<i64: 2, 6, 32>}, {pipeline_mode = #tpu.pipeline_mode<synchronous>, transform_indices = @transform_8, window_bounds = array<i64: 32, 128>}, {pipeline_mode = #tpu.pipeline_mode<synchronous>, transform_indices = @transform_9, window_bounds = array<i64: 1, 128>}, {transform_indices = @transform_10, window_bounds = array<i64: 1, 16, 128>}]} {
    %c0 = arith.constant 0 : index
    %c0_0 = arith.constant 0 : index
    %c0_1 = arith.constant 0 : index
    %0 = vector.load %arg1[%c0, %c0_0, %c0_1] : memref<1x16x23xf32, #tpu.memory_space<vmem>>, vector<1x16x23xf32>
    %1 = vector.shape_cast %0 : vector<1x16x23xf32> to vector<16x23xf32>
    %2 = vector.extract_strided_slice %1 {offsets = [0, 0], sizes = [16, 18], strides = [1, 1]} : vector<16x23xf32> to vector<16x18xf32>
    %c0_2 = arith.constant 0 : index
    %c0_3 = arith.constant 0 : index
    %3 = vector.load %arg2[%c0_2, %c0_3] : memref<18x16xf32, #tpu.memory_space<vmem>>, vector<18x16xf32>
    %cst = arith.constant dense<0.000000e+00> : vector<16x16xf32>
    %4 = tpu.matmul %2, %3, %cst {dimension_numbers = #tpu.dot_dimension_numbers<[1], [0], [0], [1], [0, 0, 1, 1], [], []>} : vector<16x18xf32>, vector<18x16xf32>, vector<16x16xf32> -> vector<16x16xf32>
    %c0_4 = arith.constant 0 : index
    %c0_5 = arith.constant 0 : index
    %5 = vector.load %arg3[%c0_4, %c0_5] : memref<19x32xf32, #tpu.memory_space<vmem>>, vector<16x32xf32>
    %cst_6 = arith.constant dense<0.000000e+00> : vector<16x32xf32>
    %6 = tpu.matmul %4, %5, %cst_6 {dimension_numbers = #tpu.dot_dimension_numbers<[1], [0], [0], [1], [0, 0, 1, 1], [], []>} : vector<16x16xf32>, vector<16x32xf32>, vector<16x32xf32> -> vector<16x32xf32>
    %7 = vector.extract_strided_slice %1 {offsets = [0, 16], sizes = [16, 1], strides = [1, 1]} : vector<16x23xf32> to vector<16x1xf32>
    %c16 = arith.constant 16 : index
    %c0_7 = arith.constant 0 : index
    %8 = vector.load %arg3[%c16, %c0_7] : memref<19x32xf32, #tpu.memory_space<vmem>>, vector<1x32xf32>
    %9 = vector.broadcast %7 : vector<16x1xf32> to vector<16x32xf32>
    %10 = vector.broadcast %8 : vector<1x32xf32> to vector<16x32xf32>
    %11 = arith.mulf %9, %10 : vector<16x32xf32>
    %12 = arith.addf %6, %11 : vector<16x32xf32>
    %13 = vector.extract_strided_slice %1 {offsets = [0, 17], sizes = [16, 1], strides = [1, 1]} : vector<16x23xf32> to vector<16x1xf32>
    %c17 = arith.constant 17 : index
    %c0_8 = arith.constant 0 : index
    %14 = vector.load %arg3[%c17, %c0_8] : memref<19x32xf32, #tpu.memory_space<vmem>>, vector<1x32xf32>
    %15 = vector.broadcast %13 : vector<16x1xf32> to vector<16x32xf32>
    %16 = vector.broadcast %14 : vector<1x32xf32> to vector<16x32xf32>
    %17 = arith.mulf %15, %16 : vector<16x32xf32>
    %18 = arith.addf %12, %17 : vector<16x32xf32>
    %19 = vector.extract_strided_slice %1 {offsets = [0, 18], sizes = [16, 1], strides = [1, 1]} : vector<16x23xf32> to vector<16x1xf32>
    %c18 = arith.constant 18 : index
    %c0_9 = arith.constant 0 : index
    %20 = vector.load %arg3[%c18, %c0_9] : memref<19x32xf32, #tpu.memory_space<vmem>>, vector<1x32xf32>
    %21 = vector.broadcast %19 : vector<16x1xf32> to vector<16x32xf32>
    %22 = vector.broadcast %20 : vector<1x32xf32> to vector<16x32xf32>
    %23 = arith.mulf %21, %22 : vector<16x32xf32>
    %24 = arith.addf %18, %23 : vector<16x32xf32>
    %c0_10 = arith.constant 0 : index
    %c0_11 = arith.constant 0 : index
    %25 = vector.load %arg4[%c0_10, %c0_11] : memref<1x32xf32, #tpu.memory_space<vmem>>, vector<1x32xf32>
    %26 = vector.broadcast %25 : vector<1x32xf32> to vector<16x32xf32>
    %27 = arith.addf %24, %26 : vector<16x32xf32>
    %28 = vector.extract_strided_slice %1 {offsets = [0, 20], sizes = [16, 3], strides = [1, 1]} : vector<16x23xf32> to vector<16x3xf32>
    %29 = vector.shape_cast %28 : vector<16x3xf32> to vector<16x1x3xf32>
    %30 = vector.shape_cast %28 : vector<16x3xf32> to vector<1x16x3xf32>
    %31 = vector.broadcast %29 : vector<16x1x3xf32> to vector<16x16x3xf32>
    %32 = vector.broadcast %30 : vector<1x16x3xf32> to vector<16x16x3xf32>
    %33 = arith.subf %31, %32 : vector<16x16x3xf32>
    %34 = arith.mulf %33, %33 : vector<16x16x3xf32>
    %cst_12 = arith.constant dense<0.000000e+00> : vector<16x16xf32>
    %35 = vector.multi_reduction <add>, %34, %cst_12 [2] : vector<16x16x3xf32> to vector<16x16xf32>
    %36 = vector.shape_cast %35 : vector<16x16xf32> to vector<16x16x1xf32>
    %37 = vector.extract_strided_slice %1 {offsets = [0, 16], sizes = [16, 1], strides = [1, 1]} : vector<16x23xf32> to vector<16x1xf32>
    %38 = vector.extract_strided_slice %1 {offsets = [0, 17], sizes = [16, 1], strides = [1, 1]} : vector<16x23xf32> to vector<16x1xf32>
    %39 = vector.extract_strided_slice %1 {offsets = [0, 19], sizes = [16, 1], strides = [1, 1]} : vector<16x23xf32> to vector<16x1xf32>
    %40 = vector.shape_cast %37 : vector<16x1xf32> to vector<16x1x1xf32>
    %41 = vector.shape_cast %37 : vector<16x1xf32> to vector<1x16x1xf32>
    %42 = vector.broadcast %40 : vector<16x1x1xf32> to vector<16x16x1xf32>
    %43 = vector.broadcast %41 : vector<1x16x1xf32> to vector<16x16x1xf32>
    %44 = arith.mulf %42, %43 : vector<16x16x1xf32>
    %45 = vector.shape_cast %38 : vector<16x1xf32> to vector<16x1x1xf32>
    %46 = vector.shape_cast %38 : vector<16x1xf32> to vector<1x16x1xf32>
    %47 = vector.broadcast %45 : vector<16x1x1xf32> to vector<16x16x1xf32>
    %48 = vector.broadcast %46 : vector<1x16x1xf32> to vector<16x16x1xf32>
    %49 = arith.mulf %47, %48 : vector<16x16x1xf32>
    %cst_13 = arith.constant 1.000000e+00 : f32
    %50 = vector.broadcast %cst_13 : f32 to vector<16x16x1xf32>
    %51 = arith.subf %50, %44 : vector<16x16x1xf32>
    %52 = arith.subf %51, %49 : vector<16x16x1xf32>
    %53 = vector.shape_cast %39 : vector<16x1xf32> to vector<16x1x1xf32>
    %54 = vector.shape_cast %39 : vector<16x1xf32> to vector<1x16x1xf32>
    %55 = vector.broadcast %53 : vector<16x1x1xf32> to vector<16x16x1xf32>
    %56 = vector.broadcast %54 : vector<1x16x1xf32> to vector<16x16x1xf32>
    %57 = arith.mulf %55, %56 : vector<16x16x1xf32>
    %cst_14 = arith.constant 2.500000e+01 : f32
    %58 = vector.broadcast %cst_14 : f32 to vector<16x16x1xf32>
    %59 = arith.cmpf ole, %36, %58 : vector<16x16x1xf32>
    %60 = arith.extui %59 : vector<16x16x1xi1> to vector<16x16x1xi32>
    %61 = arith.sitofp %60 : vector<16x16x1xi32> to vector<16x16x1xf32>
    %cst_15 = arith.constant 2.500000e+01 : f32
    %62 = vector.broadcast %cst_15 : f32 to vector<16x16x1xf32>
    %63 = arith.cmpf ole, %36, %62 : vector<16x16x1xf32>
    %64 = arith.extui %63 : vector<16x16x1xi1> to vector<16x16x1xi32>
    %65 = arith.sitofp %64 : vector<16x16x1xi32> to vector<16x16x1xf32>
    %66 = arith.mulf %49, %61 : vector<16x16x1xf32>
    %67 = arith.addf %44, %66 : vector<16x16x1xf32>
    %68 = arith.mulf %52, %65 : vector<16x16x1xf32>
    %69 = arith.addf %67, %68 : vector<16x16x1xf32>
    %70 = arith.mulf %57, %69 : vector<16x16x1xf32>
    %71 = tpu.iota {dimensions = array<i32: 2>} : vector<1x1x16xi32>
    %72 = arith.sitofp %71 : vector<1x1x16xi32> to vector<1x1x16xf32>
    %cst_16 = arith.constant 0.333333343 : f32
    %73 = vector.broadcast %cst_16 : f32 to vector<1x1x16xf32>
    %74 = arith.mulf %73, %72 : vector<1x1x16xf32>
    %cst_17 = arith.constant 0.000000e+00 : f32
    %75 = vector.broadcast %cst_17 : f32 to vector<1x1x16xf32>
    %76 = arith.addf %75, %74 : vector<1x1x16xf32>
    %77 = vector.broadcast %36 : vector<16x16x1xf32> to vector<16x16x16xf32>
    %78 = vector.broadcast %76 : vector<1x1x16xf32> to vector<16x16x16xf32>
    %79 = arith.subf %77, %78 : vector<16x16x16xf32>
    %80 = arith.mulf %79, %79 : vector<16x16x16xf32>
    %cst_18 = arith.constant -4.500000e+00 : f32
    %81 = vector.broadcast %cst_18 : f32 to vector<16x16x16xf32>
    %82 = arith.mulf %81, %80 : vector<16x16x16xf32>
    %83 = math.exp %82 : vector<16x16x16xf32>
    %84 = vector.shape_cast %83 : vector<16x16x16xf32> to vector<256x16xf32>
    %85 = arith.truncf %84 : vector<256x16xf32> to vector<256x16xbf16>
    %c0_19 = arith.constant 0 : index
    %c0_20 = arith.constant 0 : index
    %86 = vector.load %arg6[%c0_19, %c0_20] : memref<16x64xbf16, #tpu.memory_space<vmem>>, vector<16x64xbf16>
    %cst_21 = arith.constant dense<0.000000e+00> : vector<256x64xf32>
    %87 = tpu.matmul %85, %86, %cst_21 {dimension_numbers = #tpu.dot_dimension_numbers<[1], [0], [0], [1], [0, 0, 1, 1], [], []>} : vector<256x16xbf16>, vector<16x64xbf16>, vector<256x64xf32> -> vector<256x64xf32>
    %88 = vector.shape_cast %87 : vector<256x64xf32> to vector<16x16x64xf32>
    %c0_22 = arith.constant 0 : index
    %c0_23 = arith.constant 0 : index
    %c0_24 = arith.constant 0 : index
    %89 = vector.load %arg5[%c0_22, %c0_23, %c0_24] : memref<2x32x96xbf16, #tpu.memory_space<vmem>>, vector<1x32x96xbf16>
    %90 = vector.shape_cast %89 : vector<1x32x96xbf16> to vector<32x96xbf16>
    %c0_25 = arith.constant 0 : index
    %c0_26 = arith.constant 0 : index
    %c0_27 = arith.constant 0 : index
    %91 = vector.load %arg7[%c0_25, %c0_26, %c0_27] : memref<2x96x32xbf16, #tpu.memory_space<vmem>>, vector<1x96x32xbf16>
    %92 = vector.shape_cast %91 : vector<1x96x32xbf16> to vector<96x32xbf16>
    %c0_28 = arith.constant 0 : index
    %c0_29 = arith.constant 0 : index
    %c0_30 = arith.constant 0 : index
    %93 = vector.load %arg8[%c0_28, %c0_29, %c0_30] : memref<2x6x32xf32, #tpu.memory_space<vmem>>, vector<1x6x32xf32>
    %94 = vector.shape_cast %93 : vector<1x6x32xf32> to vector<6x32xf32>
    %95 = vector.extract_strided_slice %94 {offsets = [0, 0], sizes = [1, 32], strides = [1, 1]} : vector<6x32xf32> to vector<1x32xf32>
    %96 = vector.extract_strided_slice %94 {offsets = [1, 0], sizes = [1, 32], strides = [1, 1]} : vector<6x32xf32> to vector<1x32xf32>
    %97 = vector.extract_strided_slice %94 {offsets = [2, 0], sizes = [1, 32], strides = [1, 1]} : vector<6x32xf32> to vector<1x32xf32>
    %98 = vector.extract_strided_slice %94 {offsets = [3, 0], sizes = [1, 32], strides = [1, 1]} : vector<6x32xf32> to vector<1x32xf32>
    %99 = vector.extract_strided_slice %94 {offsets = [4, 0], sizes = [1, 32], strides = [1, 1]} : vector<6x32xf32> to vector<1x32xf32>
    %100 = vector.extract_strided_slice %94 {offsets = [5, 0], sizes = [1, 1], strides = [1, 1]} : vector<6x32xf32> to vector<1x1xf32>
    %101 = arith.truncf %27 : vector<16x32xf32> to vector<16x32xbf16>
    %cst_31 = arith.constant dense<0.000000e+00> : vector<16x96xf32>
    %102 = tpu.matmul %101, %90, %cst_31 {dimension_numbers = #tpu.dot_dimension_numbers<[1], [0], [0], [1], [0, 0, 1, 1], [], []>} : vector<16x32xbf16>, vector<32x96xbf16>, vector<16x96xf32> -> vector<16x96xf32>
    %103 = vector.extract_strided_slice %102 {offsets = [0, 0], sizes = [16, 32], strides = [1, 1]} : vector<16x96xf32> to vector<16x32xf32>
    %104 = vector.extract_strided_slice %102 {offsets = [0, 32], sizes = [16, 32], strides = [1, 1]} : vector<16x96xf32> to vector<16x32xf32>
    %105 = vector.extract_strided_slice %102 {offsets = [0, 64], sizes = [16, 32], strides = [1, 1]} : vector<16x96xf32> to vector<16x32xf32>
    %106 = vector.shape_cast %103 : vector<16x32xf32> to vector<16x1x32xf32>
    %107 = vector.shape_cast %104 : vector<16x32xf32> to vector<1x16x32xf32>
    %108 = vector.broadcast %106 : vector<16x1x32xf32> to vector<16x16x32xf32>
    %109 = vector.broadcast %107 : vector<1x16x32xf32> to vector<16x16x32xf32>
    %110 = arith.addf %108, %109 : vector<16x16x32xf32>
    %111 = vector.extract_strided_slice %88 {offsets = [0, 0, 0], sizes = [16, 16, 32], strides = [1, 1, 1]} : vector<16x16x64xf32> to vector<16x16x32xf32>
    %112 = arith.addf %110, %111 : vector<16x16x32xf32>
    %113 = vector.shape_cast %95 : vector<1x32xf32> to vector<1x1x32xf32>
    %114 = vector.broadcast %113 : vector<1x1x32xf32> to vector<16x16x32xf32>
    %115 = arith.addf %112, %114 : vector<16x16x32xf32>
    %cst_32 = arith.constant 0.000000e+00 : f32
    %116 = vector.broadcast %cst_32 : f32 to vector<16x16x32xf32>
    %117 = arith.maximumf %115, %116 : vector<16x16x32xf32>
    %118 = vector.shape_cast %117 : vector<16x16x32xf32> to vector<256x32xf32>
    %119 = arith.truncf %118 : vector<256x32xf32> to vector<256x32xbf16>
    %120 = vector.extract_strided_slice %92 {offsets = [0, 0], sizes = [32, 32], strides = [1, 1]} : vector<96x32xbf16> to vector<32x32xbf16>
    %cst_33 = arith.constant dense<0.000000e+00> : vector<256x32xf32>
    %121 = tpu.matmul %119, %120, %cst_33 {dimension_numbers = #tpu.dot_dimension_numbers<[1], [0], [0], [1], [0, 0, 1, 1], [], []>} : vector<256x32xbf16>, vector<32x32xbf16>, vector<256x32xf32> -> vector<256x32xf32>
    %122 = vector.shape_cast %121 : vector<256x32xf32> to vector<16x16x32xf32>
    %123 = vector.shape_cast %96 : vector<1x32xf32> to vector<1x1x32xf32>
    %124 = vector.broadcast %123 : vector<1x1x32xf32> to vector<16x16x32xf32>
    %125 = arith.addf %122, %124 : vector<16x16x32xf32>
    %cst_34 = arith.constant 0.000000e+00 : f32
    %126 = vector.broadcast %cst_34 : f32 to vector<16x16x32xf32>
    %127 = arith.maximumf %125, %126 : vector<16x16x32xf32>
    %128 = vector.shape_cast %99 : vector<1x32xf32> to vector<1x1x32xf32>
    %129 = vector.broadcast %128 : vector<1x1x32xf32> to vector<16x16x32xf32>
    %130 = arith.mulf %127, %129 : vector<16x16x32xf32>
    %cst_35 = arith.constant dense<0.000000e+00> : vector<16x16xf32>
    %131 = vector.multi_reduction <add>, %130, %cst_35 [2] : vector<16x16x32xf32> to vector<16x16xf32>
    %132 = vector.shape_cast %131 : vector<16x16xf32> to vector<16x16x1xf32>
    %133 = vector.shape_cast %100 : vector<1x1xf32> to vector<1x1x1xf32>
    %134 = vector.broadcast %133 : vector<1x1x1xf32> to vector<16x16x1xf32>
    %135 = arith.addf %132, %134 : vector<16x16x1xf32>
    %136 = arith.negf %135 : vector<16x16x1xf32>
    %137 = math.exp %136 : vector<16x16x1xf32>
    %cst_36 = arith.constant 1.000000e+00 : f32
    %138 = vector.broadcast %cst_36 : f32 to vector<16x16x1xf32>
    %139 = arith.addf %138, %137 : vector<16x16x1xf32>
    %140 = arith.divf %138, %139 : vector<16x16x1xf32>
    %141 = arith.mulf %140, %70 : vector<16x16x1xf32>
    %142 = vector.broadcast %141 : vector<16x16x1xf32> to vector<16x16x32xf32>
    %143 = arith.mulf %127, %142 : vector<16x16x32xf32>
    %cst_37 = arith.constant dense<0.000000e+00> : vector<16x32xf32>
    %144 = vector.multi_reduction <add>, %143, %cst_37 [1] : vector<16x16x32xf32> to vector<16x32xf32>
    %cst_38 = arith.constant 0.00999999977 : f32
    %145 = vector.broadcast %cst_38 : f32 to vector<16x32xf32>
    %146 = arith.mulf %144, %145 : vector<16x32xf32>
    %147 = arith.truncf %146 : vector<16x32xf32> to vector<16x32xbf16>
    %148 = vector.extract_strided_slice %92 {offsets = [32, 0], sizes = [32, 32], strides = [1, 1]} : vector<96x32xbf16> to vector<32x32xbf16>
    %cst_39 = arith.constant dense<0.000000e+00> : vector<16x32xf32>
    %149 = tpu.matmul %147, %148, %cst_39 {dimension_numbers = #tpu.dot_dimension_numbers<[1], [0], [0], [1], [0, 0, 1, 1], [], []>} : vector<16x32xbf16>, vector<32x32xbf16>, vector<16x32xf32> -> vector<16x32xf32>
    %150 = arith.addf %105, %149 : vector<16x32xf32>
    %151 = vector.broadcast %97 : vector<1x32xf32> to vector<16x32xf32>
    %152 = arith.addf %150, %151 : vector<16x32xf32>
    %cst_40 = arith.constant 0.000000e+00 : f32
    %153 = vector.broadcast %cst_40 : f32 to vector<16x32xf32>
    %154 = arith.maximumf %152, %153 : vector<16x32xf32>
    %155 = arith.truncf %154 : vector<16x32xf32> to vector<16x32xbf16>
    %156 = vector.extract_strided_slice %92 {offsets = [64, 0], sizes = [32, 32], strides = [1, 1]} : vector<96x32xbf16> to vector<32x32xbf16>
    %cst_41 = arith.constant dense<0.000000e+00> : vector<16x32xf32>
    %157 = tpu.matmul %155, %156, %cst_41 {dimension_numbers = #tpu.dot_dimension_numbers<[1], [0], [0], [1], [0, 0, 1, 1], [], []>} : vector<16x32xbf16>, vector<32x32xbf16>, vector<16x32xf32> -> vector<16x32xf32>
    %158 = arith.addf %27, %157 : vector<16x32xf32>
    %159 = vector.broadcast %98 : vector<1x32xf32> to vector<16x32xf32>
    %160 = arith.addf %158, %159 : vector<16x32xf32>
    %c1 = arith.constant 1 : index
    %c0_42 = arith.constant 0 : index
    %c0_43 = arith.constant 0 : index
    %161 = vector.load %arg5[%c1, %c0_42, %c0_43] : memref<2x32x96xbf16, #tpu.memory_space<vmem>>, vector<1x32x96xbf16>
    %162 = vector.shape_cast %161 : vector<1x32x96xbf16> to vector<32x96xbf16>
    %c1_44 = arith.constant 1 : index
    %c0_45 = arith.constant 0 : index
    %c0_46 = arith.constant 0 : index
    %163 = vector.load %arg7[%c1_44, %c0_45, %c0_46] : memref<2x96x32xbf16, #tpu.memory_space<vmem>>, vector<1x96x32xbf16>
    %164 = vector.shape_cast %163 : vector<1x96x32xbf16> to vector<96x32xbf16>
    %c1_47 = arith.constant 1 : index
    %c0_48 = arith.constant 0 : index
    %c0_49 = arith.constant 0 : index
    %165 = vector.load %arg8[%c1_47, %c0_48, %c0_49] : memref<2x6x32xf32, #tpu.memory_space<vmem>>, vector<1x6x32xf32>
    %166 = vector.shape_cast %165 : vector<1x6x32xf32> to vector<6x32xf32>
    %167 = vector.extract_strided_slice %166 {offsets = [0, 0], sizes = [1, 32], strides = [1, 1]} : vector<6x32xf32> to vector<1x32xf32>
    %168 = vector.extract_strided_slice %166 {offsets = [1, 0], sizes = [1, 32], strides = [1, 1]} : vector<6x32xf32> to vector<1x32xf32>
    %169 = vector.extract_strided_slice %166 {offsets = [2, 0], sizes = [1, 32], strides = [1, 1]} : vector<6x32xf32> to vector<1x32xf32>
    %170 = vector.extract_strided_slice %166 {offsets = [3, 0], sizes = [1, 32], strides = [1, 1]} : vector<6x32xf32> to vector<1x32xf32>
    %171 = vector.extract_strided_slice %166 {offsets = [4, 0], sizes = [1, 32], strides = [1, 1]} : vector<6x32xf32> to vector<1x32xf32>
    %172 = vector.extract_strided_slice %166 {offsets = [5, 0], sizes = [1, 1], strides = [1, 1]} : vector<6x32xf32> to vector<1x1xf32>
    %173 = arith.truncf %160 : vector<16x32xf32> to vector<16x32xbf16>
    %cst_50 = arith.constant dense<0.000000e+00> : vector<16x96xf32>
    %174 = tpu.matmul %173, %162, %cst_50 {dimension_numbers = #tpu.dot_dimension_numbers<[1], [0], [0], [1], [0, 0, 1, 1], [], []>} : vector<16x32xbf16>, vector<32x96xbf16>, vector<16x96xf32> -> vector<16x96xf32>
    %175 = vector.extract_strided_slice %174 {offsets = [0, 0], sizes = [16, 32], strides = [1, 1]} : vector<16x96xf32> to vector<16x32xf32>
    %176 = vector.extract_strided_slice %174 {offsets = [0, 32], sizes = [16, 32], strides = [1, 1]} : vector<16x96xf32> to vector<16x32xf32>
    %177 = vector.extract_strided_slice %174 {offsets = [0, 64], sizes = [16, 32], strides = [1, 1]} : vector<16x96xf32> to vector<16x32xf32>
    %178 = vector.shape_cast %175 : vector<16x32xf32> to vector<16x1x32xf32>
    %179 = vector.shape_cast %176 : vector<16x32xf32> to vector<1x16x32xf32>
    %180 = vector.broadcast %178 : vector<16x1x32xf32> to vector<16x16x32xf32>
    %181 = vector.broadcast %179 : vector<1x16x32xf32> to vector<16x16x32xf32>
    %182 = arith.addf %180, %181 : vector<16x16x32xf32>
    %183 = vector.extract_strided_slice %88 {offsets = [0, 0, 32], sizes = [16, 16, 32], strides = [1, 1, 1]} : vector<16x16x64xf32> to vector<16x16x32xf32>
    %184 = arith.addf %182, %183 : vector<16x16x32xf32>
    %185 = vector.shape_cast %167 : vector<1x32xf32> to vector<1x1x32xf32>
    %186 = vector.broadcast %185 : vector<1x1x32xf32> to vector<16x16x32xf32>
    %187 = arith.addf %184, %186 : vector<16x16x32xf32>
    %cst_51 = arith.constant 0.000000e+00 : f32
    %188 = vector.broadcast %cst_51 : f32 to vector<16x16x32xf32>
    %189 = arith.maximumf %187, %188 : vector<16x16x32xf32>
    %190 = vector.shape_cast %189 : vector<16x16x32xf32> to vector<256x32xf32>
    %191 = arith.truncf %190 : vector<256x32xf32> to vector<256x32xbf16>
    %192 = vector.extract_strided_slice %164 {offsets = [0, 0], sizes = [32, 32], strides = [1, 1]} : vector<96x32xbf16> to vector<32x32xbf16>
    %cst_52 = arith.constant dense<0.000000e+00> : vector<256x32xf32>
    %193 = tpu.matmul %191, %192, %cst_52 {dimension_numbers = #tpu.dot_dimension_numbers<[1], [0], [0], [1], [0, 0, 1, 1], [], []>} : vector<256x32xbf16>, vector<32x32xbf16>, vector<256x32xf32> -> vector<256x32xf32>
    %194 = vector.shape_cast %193 : vector<256x32xf32> to vector<16x16x32xf32>
    %195 = vector.shape_cast %168 : vector<1x32xf32> to vector<1x1x32xf32>
    %196 = vector.broadcast %195 : vector<1x1x32xf32> to vector<16x16x32xf32>
    %197 = arith.addf %194, %196 : vector<16x16x32xf32>
    %cst_53 = arith.constant 0.000000e+00 : f32
    %198 = vector.broadcast %cst_53 : f32 to vector<16x16x32xf32>
    %199 = arith.maximumf %197, %198 : vector<16x16x32xf32>
    %200 = vector.shape_cast %171 : vector<1x32xf32> to vector<1x1x32xf32>
    %201 = vector.broadcast %200 : vector<1x1x32xf32> to vector<16x16x32xf32>
    %202 = arith.mulf %199, %201 : vector<16x16x32xf32>
    %cst_54 = arith.constant dense<0.000000e+00> : vector<16x16xf32>
    %203 = vector.multi_reduction <add>, %202, %cst_54 [2] : vector<16x16x32xf32> to vector<16x16xf32>
    %204 = vector.shape_cast %203 : vector<16x16xf32> to vector<16x16x1xf32>
    %205 = vector.shape_cast %172 : vector<1x1xf32> to vector<1x1x1xf32>
    %206 = vector.broadcast %205 : vector<1x1x1xf32> to vector<16x16x1xf32>
    %207 = arith.addf %204, %206 : vector<16x16x1xf32>
    %208 = arith.negf %207 : vector<16x16x1xf32>
    %209 = math.exp %208 : vector<16x16x1xf32>
    %cst_55 = arith.constant 1.000000e+00 : f32
    %210 = vector.broadcast %cst_55 : f32 to vector<16x16x1xf32>
    %211 = arith.addf %210, %209 : vector<16x16x1xf32>
    %212 = arith.divf %210, %211 : vector<16x16x1xf32>
    %213 = arith.mulf %212, %70 : vector<16x16x1xf32>
    %214 = vector.broadcast %213 : vector<16x16x1xf32> to vector<16x16x32xf32>
    %215 = arith.mulf %199, %214 : vector<16x16x32xf32>
    %cst_56 = arith.constant dense<0.000000e+00> : vector<16x32xf32>
    %216 = vector.multi_reduction <add>, %215, %cst_56 [1] : vector<16x16x32xf32> to vector<16x32xf32>
    %cst_57 = arith.constant 0.00999999977 : f32
    %217 = vector.broadcast %cst_57 : f32 to vector<16x32xf32>
    %218 = arith.mulf %216, %217 : vector<16x32xf32>
    %219 = arith.truncf %218 : vector<16x32xf32> to vector<16x32xbf16>
    %220 = vector.extract_strided_slice %164 {offsets = [32, 0], sizes = [32, 32], strides = [1, 1]} : vector<96x32xbf16> to vector<32x32xbf16>
    %cst_58 = arith.constant dense<0.000000e+00> : vector<16x32xf32>
    %221 = tpu.matmul %219, %220, %cst_58 {dimension_numbers = #tpu.dot_dimension_numbers<[1], [0], [0], [1], [0, 0, 1, 1], [], []>} : vector<16x32xbf16>, vector<32x32xbf16>, vector<16x32xf32> -> vector<16x32xf32>
    %222 = arith.addf %177, %221 : vector<16x32xf32>
    %223 = vector.broadcast %169 : vector<1x32xf32> to vector<16x32xf32>
    %224 = arith.addf %222, %223 : vector<16x32xf32>
    %cst_59 = arith.constant 0.000000e+00 : f32
    %225 = vector.broadcast %cst_59 : f32 to vector<16x32xf32>
    %226 = arith.maximumf %224, %225 : vector<16x32xf32>
    %227 = arith.truncf %226 : vector<16x32xf32> to vector<16x32xbf16>
    %228 = vector.extract_strided_slice %164 {offsets = [64, 0], sizes = [32, 32], strides = [1, 1]} : vector<96x32xbf16> to vector<32x32xbf16>
    %cst_60 = arith.constant dense<0.000000e+00> : vector<16x32xf32>
    %229 = tpu.matmul %227, %228, %cst_60 {dimension_numbers = #tpu.dot_dimension_numbers<[1], [0], [0], [1], [0, 0, 1, 1], [], []>} : vector<16x32xbf16>, vector<32x32xbf16>, vector<16x32xf32> -> vector<16x32xf32>
    %230 = arith.addf %160, %229 : vector<16x32xf32>
    %231 = vector.broadcast %170 : vector<1x32xf32> to vector<16x32xf32>
    %232 = arith.addf %230, %231 : vector<16x32xf32>
    %233 = arith.truncf %232 : vector<16x32xf32> to vector<16x32xbf16>
    %c0_61 = arith.constant 0 : index
    %c0_62 = arith.constant 0 : index
    %234 = vector.load %arg9[%c0_61, %c0_62] : memref<32x128xbf16, #tpu.memory_space<vmem>>, vector<32x128xbf16>
    %cst_63 = arith.constant dense<0.000000e+00> : vector<16x128xf32>
    %235 = tpu.matmul %233, %234, %cst_63 {dimension_numbers = #tpu.dot_dimension_numbers<[1], [0], [0], [1], [0, 0, 1, 1], [], []>} : vector<16x32xbf16>, vector<32x128xbf16>, vector<16x128xf32> -> vector<16x128xf32>
    %c0_64 = arith.constant 0 : index
    %c0_65 = arith.constant 0 : index
    %236 = vector.load %arg10[%c0_64, %c0_65] : memref<1x128xf32, #tpu.memory_space<vmem>>, vector<1x128xf32>
    %237 = vector.broadcast %236 : vector<1x128xf32> to vector<16x128xf32>
    %238 = arith.addf %235, %237 : vector<16x128xf32>
    %cst_66 = arith.constant 0.000000e+00 : f32
    %239 = vector.broadcast %cst_66 : f32 to vector<16x128xf32>
    %240 = arith.maximumf %238, %239 : vector<16x128xf32>
    %c0_67 = arith.constant 0 : index
    %c0_68 = arith.constant 0 : index
    %c0_69 = arith.constant 0 : index
    %241 = vector.load %arg11[%c0_67, %c0_68, %c0_69] : memref<1x16x128xf32, #tpu.memory_space<vmem>>, vector<1x16x128xf32>
    %242 = vector.shape_cast %241 : vector<1x16x128xf32> to vector<16x128xf32>
    %243 = vector.shape_cast %240 : vector<16x128xf32> to vector<1x16x128xf32>
    tpu.vector_store %arg11[%c0_67, %c0_68, %c0_69], %243 {strides = array<i32>} : memref<1x16x128xf32, #tpu.memory_space<vmem>>, vector<1x16x128xf32>,
    return
  }
  func.func @transform_0(%arg0: i32) -> (i32, i32, i32) {
    %c0_i32 = arith.constant 0 : i32
    %c0_i32_0 = arith.constant 0 : i32
    %c0_i32_1 = arith.constant 0 : i32
    return %arg0, %c0_i32, %c0_i32_0 : i32, i32, i32
  }
  func.func @transform_1(%arg0: i32) -> (i32, i32) {
    %c0_i32 = arith.constant 0 : i32
    %c0_i32_0 = arith.constant 0 : i32
    %c0_i32_1 = arith.constant 0 : i32
    return %c0_i32, %c0_i32_0 : i32, i32
  }
  func.func @transform_2(%arg0: i32) -> (i32, i32) {
    %c0_i32 = arith.constant 0 : i32
    %c0_i32_0 = arith.constant 0 : i32
    %c0_i32_1 = arith.constant 0 : i32
    return %c0_i32, %c0_i32_0 : i32, i32
  }
  func.func @transform_3(%arg0: i32) -> (i32, i32) {
    %c0_i32 = arith.constant 0 : i32
    %c0_i32_0 = arith.constant 0 : i32
    %c0_i32_1 = arith.constant 0 : i32
    return %c0_i32, %c0_i32_0 : i32, i32
  }
  func.func @transform_4(%arg0: i32) -> (i32, i32, i32) {
    %c0_i32 = arith.constant 0 : i32
    %c0_i32_0 = arith.constant 0 : i32
    %c0_i32_1 = arith.constant 0 : i32
    %c0_i32_2 = arith.constant 0 : i32
    return %c0_i32, %c0_i32_0, %c0_i32_1 : i32, i32, i32
  }
  func.func @transform_5(%arg0: i32) -> (i32, i32) {
    %c0_i32 = arith.constant 0 : i32
    %c0_i32_0 = arith.constant 0 : i32
    %c0_i32_1 = arith.constant 0 : i32
    return %c0_i32, %c0_i32_0 : i32, i32
  }
  func.func @transform_6(%arg0: i32) -> (i32, i32, i32) {
    %c0_i32 = arith.constant 0 : i32
    %c0_i32_0 = arith.constant 0 : i32
    %c0_i32_1 = arith.constant 0 : i32
    %c0_i32_2 = arith.constant 0 : i32
    return %c0_i32, %c0_i32_0, %c0_i32_1 : i32, i32, i32
  }
  func.func @transform_7(%arg0: i32) -> (i32, i32, i32) {
    %c0_i32 = arith.constant 0 : i32
    %c0_i32_0 = arith.constant 0 : i32
    %c0_i32_1 = arith.constant 0 : i32
    %c0_i32_2 = arith.constant 0 : i32
    return %c0_i32, %c0_i32_0, %c0_i32_1 : i32, i32, i32
  }
  func.func @transform_8(%arg0: i32) -> (i32, i32) {
    %c0_i32 = arith.constant 0 : i32
    %c0_i32_0 = arith.constant 0 : i32
    %c0_i32_1 = arith.constant 0 : i32
    return %c0_i32, %c0_i32_0 : i32, i32
  }
  func.func @transform_9(%arg0: i32) -> (i32, i32) {
    %c0_i32 = arith.constant 0 : i32
    %c0_i32_0 = arith.constant 0 : i32
    %c0_i32_1 = arith.constant 0 : i32
    return %c0_i32, %c0_i32_0 : i32, i32
  }
  func.func @transform_10(%arg0: i32) -> (i32, i32, i32) {
    %c0_i32 = arith.constant 0 : i32
    %c0_i32_0 = arith.constant 0 : i32
    %c0_i32_1 = arith.constant 0 : i32
    return %arg0, %c0_i32, %c0_i32_0 : i32, i32, i32
  }
}

</mosaic_0001>

<bundles_post_ra>
// kernel: frag_size_gnn_forward.1
= control target key start
LH: loop header
LB: loop body
LE: loop exit
PB: predicated region body
PF: predicated region fallthrough
CT: control target
= control target key end

     0   :  { %s10739_s0 = inlined_call_operand.hbm [shape: f32[2,16,23], index: 0, kind: input, shape index: {}]   ;;  %s10740_s1 = inlined_call_operand.hbm [shape: f32[18,16], index: 1, kind: input, shape index: {}]   ;;  %s10741_s2 = inlined_call_operand.hbm [shape: f32[19,32], index: 2, kind: input, shape index: {}]   ;;  %s10742_s3 = inlined_call_operand.hbm [shape: f32[1,32], index: 3, kind: input, shape index: {}]   ;;  %s10743_s4 = inlined_call_operand.hbm [shape: bf16[2,32,96], index: 4, kind: input, shape index: {}]   ;;  %s10744_s5 = inlined_call_operand.hbm [shape: bf16[16,64], index: 5, kind: input, shape index: {}]   ;;  %s10745_s6 = inlined_call_operand.hbm [shape: bf16[2,96,32], index: 6, kind: input, shape index: {}]   ;;  %s10746_s7 = inlined_call_operand.hbm [shape: f32[2,6,32], index: 7, kind: input, shape index: {}]   ;;  %s10747_s8 = inlined_call_operand.hbm [shape: bf16[32,128], index: 8, kind: input, shape index: {}]   ;;  %s10748_s9 = inlined_call_operand.hbm [shape: f32[1,128], index: 9, kind: input, shape index: {}]   ;;  %s10749_s10 = inlined_call_operand.hbm [shape: f32[2,16,128], index: 10, kind: output, shape index: {}]  }
   0x1   :  { %11003 = sst [smem:[#allocation120_spill]] %s10740_s1 }
   0x2   :  { %11004 = sst [smem:[#allocation121_spill]] %s10741_s2 }
   0x3   :  { %11005 = sst [smem:[#allocation122_spill]] %s10742_s3 }
   0x4   :  { %11006 = sst [smem:[#allocation123_spill]] %s10749_s10 }
   0x5   :  { %15 = vsyncpa [#allocation3], 0 }
   0x6   :  { %17 = vsyncpa [#allocation3 + $0x1], 0 }
   0x7   :  { %18 = vsyncpa [#allocation6], 0 }
   0x8   :  { %19 = vsyncpa [#allocation9], 0 }
   0x9   :  { %20 = vsyncpa [#allocation12], 0 }
   0xa   :  { %21 = vsyncpa [#allocation15], 0 }
   0xb   :  { %22 = vsyncpa [#allocation18], 0 }
   0xc   :  { %23 = vsyncpa [#allocation4], 0 }
   0xd   :  { %25 = vsyncpa [#allocation4 + $0x1], 0  ;;  %s7601_s13 = smov 0   ;;  %s7603_s14 = smov 0  }
   0xe   :  { %s7605_s15 = smov 0   ;;  %s7607_s16 = smov 0  }
   0xf LB: > { %s7516_s17 = smov [#allocation5]   ;;  %s7622_s19 = sadd.s32 4294967295, %s7514_s16   ;;  %s7514_s16 = sphi %s7607_s16, %s11422_s16   ;;  %s7510_s15 = sphi %s7605_s15, %s11421_s15   ;;  %s7506_s14 = sphi %s7603_s14, %s11420_s14   ;;  %s7502_s13 = sphi %s7601_s13, %s11419_s13  }
  0x10   : > { %s289_s18 = sshll.u32 %s7516_s17, 4  ;;  %p6153_p0 = scmp.ge.s32.totalorder %s7514_s16, 1  ;;  %s7627_s18 = int_to_ptr.vmem [resolvable:$true] %s289_s18 }
  0x11   : > { %p10752_p1 = scmp.eq.s32.totalorder %s7622_s19, 0  ;;  %p277_p2 = scmp.lt.s32.totalorder %s7514_s16, 3 }
  0x12   : > { %s7517_s21 = smov [#allocation8]   ;;  %s7518_s24 = smov [#allocation11]  }
  0x13   : > { %p7629_p3 = pnand %p6153_p0, %p277_p2  ;;  %s316_s22 = sshll.u32 %s7517_s21, 4  ;;  %s7642_s22 = int_to_ptr.vmem [resolvable:$true] %s316_s22 }
  0x14   : > { %s7644_s25 = sshll.u32 %s7518_s24, 4  ;;  %s11010_s1 = sld [smem:[#allocation120_spill]]  ;;  %s340_s25 = int_to_ptr.vmem [resolvable:$true] %s7644_s25 }
  0x15   : > { %s11007_s20 = scalar_select %p7629_p3, 1, 0 }
  0x16   : > { %p6677_p5 = pneg %p7629_p3 }
  0x17   : > { %11008 = sst [smem:[#allocation27_spill]] %s11007_s20 }
  0x18   : > { %p7638_p6 = pnand %p6677_p5, %p10752_p1 }
  0x1a   : > { %s7146_s28 = scalar_lea.hbm %s11010_s1, 384  ;;  %p7654_p8 = pneg %p7638_p6 }
  0x1b   : > { %p7147_p7 = scmp.ne.s32.totalorder %s11010_s1, %s7146_s28  ;;  %p7153_p11 = scmp.lt.u32.totalorder %s7146_s28, %s11010_s1 }
  0x1d   : > { %p7149_p9 = pnand %p7654_p8, %p7147_p7 }
  0x1f   : > { %p7150_p10 = pneg %p7149_p9 }
  0x21   : > { %p7155_p12 = pnand %p7153_p11, %p7150_p10 }
  0x23   : > { %7158 = shalt.err (!%p7155_p12)
}
  0x24   : > { %s7159_s21 = scalar_lea.vmem %s7627_s18, 384  ;;  %p7167_p5 = scmp.lt.s32.totalorder %s7627_s18, %s7627_s18 }
  0x25   : > { %p7160_p13 = scmp.ne.s32.totalorder %s7627_s18, %s7159_s21  ;;  %p7168_p4 = scmp.lt.s32.totalorder %s7159_s21, %s7159_s21 }
  0x27   : > { %p7162_p0 = pnand %p7160_p13, %p7654_p8  ;;  %p7169_p7 = por %p7168_p4, %p7167_p5 }
  0x29   : > { %p7163_p2 = pneg %p7162_p0 }
  0x2b   : > { %p7170_p9 = pnand %p7169_p7, %p7163_p2 }
  0x2d   : > { %7173 = shalt.err (!%p7170_p9)
}
  0x2e   : > { %s10754_s24 = smov 128   ;;  %s10756_s26 = smov 8  }
  0x2f   : > { %6680 = dma.hbm_to_vmem [thread:$0]  (!%p7638_p6), %s11010_s1, 384, %s7627_s18, [#allocation6], %s10754_s24, %s10754_s24, %s10756_s26  }
  0x30   : > { %s11012_s3 = sld [smem:[#allocation122_spill]] }
  0x36   : > { %s7174_s12 = scalar_lea.hbm %s11012_s3, 16 }
  0x37   : > { %p7175_p4 = scmp.ne.s32.totalorder %s11012_s3, %s7174_s12  ;;  %p7181_p12 = scmp.lt.u32.totalorder %s7174_s12, %s11012_s3 }
  0x39   : > { %p7177_p10 = pnand %p7175_p4, %p7654_p8 }
  0x3b   : > { %p7178_p11 = pneg %p7177_p10 }
  0x3d   : > { %p7183_p13 = pnand %p7181_p12, %p7178_p11 }
  0x3f   : > { %7186 = shalt.err (!%p7183_p13)
}
  0x40   : > { %s7187_s18 = scalar_lea.vmem %s7642_s22, 16  ;;  %s7194_s27 = scalar_lea.vmem %s7642_s22, 32 }
  0x41   : > { %p7188_p0 = scmp.ne.s32.totalorder %s7642_s22, %s7187_s18  ;;  %p7195_p7 = scmp.lt.s32.totalorder %s7642_s22, %s7642_s22 }
  0x42   : > { %p7196_p9 = scmp.lt.s32.totalorder %s7194_s27, %s7187_s18 }
  0x43   : > { %p7190_p2 = pnand %p7188_p0, %p7654_p8 }
  0x44   : > { %p7197_p4 = por %p7196_p9, %p7195_p7 }
  0x45   : > { %p7191_p5 = pneg %p7190_p2 }
  0x47   : > { %p7198_p10 = pnand %p7197_p4, %p7191_p5 }
  0x49   : > { %7201 = shalt.err (!%p7198_p10)
}
  0x4a   : > { %6686 = dma.hbm_to_vmem [thread:$0]  (!%p7638_p6), %s11012_s3, 16, %s7642_s22, [#allocation9]  }
  0x4b   : > { %s7202_s30 = scalar_lea.hbm %s10744_s5, 128 }
  0x4c   : > { %p7203_p11 = scmp.ne.s32.totalorder %s10744_s5, %s7202_s30  ;;  %p7209_p0 = scmp.lt.u32.totalorder %s7202_s30, %s10744_s5 }
  0x4e   : > { %p7205_p12 = pnand %p7203_p11, %p7654_p8 }
  0x50   : > { %p7206_p13 = pneg %p7205_p12 }
  0x52   : > { %p7211_p2 = pnand %p7209_p0, %p7206_p13 }
  0x54   : > { %7214 = shalt.err (!%p7211_p2)
}
  0x55   : > { %s7215_s27 = scalar_lea.vmem %s340_s25, 128  ;;  %p7223_p4 = scmp.lt.s32.totalorder %s340_s25, %s340_s25 }
  0x56   : > { %p7216_p5 = scmp.ne.s32.totalorder %s340_s25, %s7215_s27  ;;  %p7224_p10 = scmp.lt.s32.totalorder %s7215_s27, %s7215_s27 }
  0x58   : > { %p7218_p7 = pnand %p7216_p5, %p7654_p8  ;;  %p7225_p1 = por %p7224_p10, %p7223_p4 }
  0x5a   : > { %p7219_p9 = pneg %p7218_p7 }
  0x5c   : > { %p7226_p3 = pnand %p7225_p1, %p7219_p9 }
  0x5e   : > { %7229 = shalt.err (!%p7226_p3)
}
  0x5f   : > { %s10758_s22 = smov 64   ;;  %s7522_s10 = smov 4  }
  0x60   : > { %6692 = dma.hbm_to_vmem [thread:$0]  (!%p7638_p6), %s10744_s5, 128, %s340_s25, [#allocation12], %s10758_s22, %s10758_s22, %s7522_s10  }
  0x61   : > { %s7523_s29 = smov [#allocation14]   ;;  %s7524_s12 = smov [#allocation7]  }
  0x62   : > { %s365_s30 = sshll.u32 %s7523_s29, 4  ;;  %s302_s17 = sshll.u32 %s7524_s12, 4  ;;  %s366_s30 = int_to_ptr.vmem [resolvable:$true] %s365_s30  ;;  %s303_s17 = int_to_ptr.vmem [resolvable:$true] %s302_s17 }
  0x63   : > { %s7230_s27 = scalar_lea.hbm %s10746_s7, 256 }
  0x64   : > { %p7231_p1 = scmp.ne.s32.totalorder %s10746_s7, %s7230_s27  ;;  %p7237_p12 = scmp.lt.u32.totalorder %s7230_s27, %s10746_s7 }
  0x66   : > { %p7233_p3 = pnand %p7231_p1, %p7654_p8 }
  0x68   : > { %p7234_p11 = pneg %p7233_p3 }
  0x6a   : > { %p7239_p13 = pnand %p7237_p12, %p7234_p11 }
  0x6c   : > { %7242 = shalt.err (!%p7239_p13)
}
  0x6d   : > { %s7243_s25 = scalar_lea.vmem %s366_s30, 256  ;;  %p7251_p7 = scmp.lt.s32.totalorder %s366_s30, %s366_s30 }
  0x6e   : > { %p7244_p0 = scmp.ne.s32.totalorder %s366_s30, %s7243_s25  ;;  %p7252_p9 = scmp.lt.s32.totalorder %s7243_s25, %s7243_s25 }
  0x70   : > { %p7246_p2 = pnand %p7244_p0, %p7654_p8  ;;  %p7253_p4 = por %p7252_p9, %p7251_p7 }
  0x72   : > { %p7247_p5 = pneg %p7246_p2 }
  0x74   : > { %p7254_p10 = pnand %p7253_p4, %p7247_p5 }
  0x76   : > { %7257 = shalt.err (!%p7254_p10)
}
  0x77   : > { %s11013_s24 = smov 8   ;;  %s11014_s26 = smov 128  }
  0x78   : > { %6698 = dma.hbm_to_vmem [thread:$0]  (!%p7638_p6), %s10746_s7, 256, %s366_s30, [#allocation15], %s11014_s26, %s11014_s26, %s11013_s24  }
  0x79   : > { %s11015_s2 = sld [smem:[#allocation121_spill]] }
  0x7f   : > { %s7258_s29 = scalar_lea.hbm %s11015_s2, 384 }
  0x80   : > { %p7259_p1 = scmp.ne.s32.totalorder %s11015_s2, %s7258_s29  ;;  %p7265_p12 = scmp.lt.u32.totalorder %s7258_s29, %s11015_s2 }
  0x82   : > { %p7261_p3 = pnand %p7259_p1, %p7654_p8 }
  0x84   : > { %p7262_p11 = pneg %p7261_p3 }
  0x86   : > { %p7267_p13 = pnand %p7265_p12, %p7262_p11 }
  0x88   : > { %7270 = shalt.err (!%p7267_p13)
}
  0x89   : > { %s7271_s25 = scalar_lea.vmem %s303_s17, 384  ;;  %p7279_p7 = scmp.lt.s32.totalorder %s303_s17, %s303_s17 }
  0x8a   : > { %p7272_p0 = scmp.ne.s32.totalorder %s303_s17, %s7271_s25  ;;  %p7280_p9 = scmp.lt.s32.totalorder %s7271_s25, %s7271_s25 }
  0x8c   : > { %p7274_p2 = pnand %p7272_p0, %p7654_p8  ;;  %p7281_p4 = por %p7280_p9, %p7279_p7 }
  0x8e   : > { %p7275_p5 = pneg %p7274_p2 }
  0x90   : > { %p7282_p10 = pnand %p7281_p4, %p7275_p5 }
  0x92   : > { %7285 = shalt.err (!%p7282_p10)
}
  0x93   : > { %6683 = dma.hbm_to_vmem [thread:$0]  (!%p7638_p6), %s11015_s2, 384, %s303_s17, [#allocation6], %s11014_s26, %s11014_s26, %s11013_s24  }
  0x94   : > { %s7525_s3 = smov [#allocation10]   ;;  %s7526_s28 = smov [#allocation13]  }
  0x95   : > { %s326_s20 = sshll.u32 %s7525_s3, 4  ;;  %s352_s29 = sshll.u32 %s7526_s28, 4  ;;  %s327_s20 = int_to_ptr.vmem [resolvable:$true] %s326_s20  ;;  %s353_s29 = int_to_ptr.vmem [resolvable:$true] %s352_s29 }
  0x96   : > { %s7286_s18 = scalar_lea.hbm %s10743_s4, 512 }
  0x97   : > { %p7287_p1 = scmp.ne.s32.totalorder %s10743_s4, %s7286_s18  ;;  %p7293_p12 = scmp.lt.u32.totalorder %s7286_s18, %s10743_s4 }
  0x99   : > { %p7289_p3 = pnand %p7287_p1, %p7654_p8 }
  0x9b   : > { %p7290_p11 = pneg %p7289_p3 }
  0x9d   : > { %p7295_p13 = pnand %p7293_p12, %p7290_p11 }
  0x9f   : > { %7298 = shalt.err (!%p7295_p13)
}
  0xa0   : > { %s7299_s17 = scalar_lea.vmem %s327_s20, 512  ;;  %p7307_p7 = scmp.lt.s32.totalorder %s327_s20, %s327_s20 }
  0xa1   : > { %p7300_p0 = scmp.ne.s32.totalorder %s327_s20, %s7299_s17  ;;  %p7308_p9 = scmp.lt.s32.totalorder %s7299_s17, %s7299_s17 }
  0xa3   : > { %p7302_p2 = pnand %p7300_p0, %p7654_p8  ;;  %p7309_p4 = por %p7308_p9, %p7307_p7 }
  0xa5   : > { %p7303_p5 = pneg %p7302_p2 }
  0xa7   : > { %p7310_p10 = pnand %p7309_p4, %p7303_p5 }
  0xa9   : > { %7313 = shalt.err (!%p7310_p10)
}
  0xaa   : > { %s11016_s1 = smov 64   ;;  %s7314_s21 = scalar_lea.hbm %s10745_s6, 1536 }
  0xab   : > { %6689 = dma.hbm_to_vmem [thread:$0]  (!%p7638_p6), %s10743_s4, 512, %s327_s20, [#allocation9], %s11016_s1, %s11016_s1, %s7522_s10  }
  0xac   : > { %p7315_p1 = scmp.ne.s32.totalorder %s10745_s6, %s7314_s21  ;;  %p7321_p12 = scmp.lt.u32.totalorder %s7314_s21, %s10745_s6 }
  0xae   : > { %p7317_p3 = pnand %p7315_p1, %p7654_p8 }
  0xb0   : > { %p7318_p11 = pneg %p7317_p3 }
  0xb2   : > { %p7323_p13 = pnand %p7321_p12, %p7318_p11 }
  0xb4   : > { %7326 = shalt.err (!%p7323_p13)
}
  0xb5   : > { %s7327_s17 = scalar_lea.vmem %s353_s29, 1536  ;;  %p7335_p7 = scmp.lt.s32.totalorder %s353_s29, %s353_s29 }
  0xb6   : > { %p7328_p0 = scmp.ne.s32.totalorder %s353_s29, %s7327_s17  ;;  %p7336_p9 = scmp.lt.s32.totalorder %s7327_s17, %s7327_s17 }
  0xb8   : > { %p7330_p2 = pnand %p7328_p0, %p7654_p8  ;;  %p7337_p4 = por %p7336_p9, %p7335_p7 }
  0xba   : > { %p7331_p5 = pneg %p7330_p2 }
  0xbc   : > { %p7338_p10 = pnand %p7337_p4, %p7331_p5 }
  0xbe   : > { %7341 = shalt.err (!%p7338_p10)
}
  0xbf   : > { %6695 = dma.hbm_to_vmem [thread:$0]  (!%p7638_p6), %s10745_s6, 1536, %s353_s29, [#allocation12], %s11016_s1, %s11016_s1, %s7522_s10  }
  0xc0   : > { %s7527_s3 = smov [#allocation16]   ;;  %s7528_s12 = smov [#allocation17]  }
  0xc1   : > { %s378_s28 = sshll.u32 %s7527_s3, 4  ;;  %s392_s21 = sshll.u32 %s7528_s12, 4  ;;  %s379_s28 = int_to_ptr.vmem [resolvable:$true] %s378_s28  ;;  %s393_s21 = int_to_ptr.vmem [resolvable:$true] %s392_s21 }
  0xc2   : > { %s7342_s25 = scalar_lea.hbm %s10747_s8, 256 }
  0xc3   : > { %p7343_p1 = scmp.ne.s32.totalorder %s10747_s8, %s7342_s25  ;;  %p7349_p12 = scmp.lt.u32.totalorder %s7342_s25, %s10747_s8 }
  0xc5   : > { %p7345_p3 = pnand %p7343_p1, %p7654_p8 }
  0xc7   : > { %p7346_p11 = pneg %p7345_p3 }
  0xc9   : > { %p7351_p13 = pnand %p7349_p12, %p7346_p11 }
  0xcb   : > { %7354 = shalt.err (!%p7351_p13)
}
  0xcc   : > { %s7355_s29 = scalar_lea.vmem %s379_s28, 256  ;;  %p7363_p7 = scmp.lt.s32.totalorder %s379_s28, %s379_s28 }
  0xcd   : > { %p7356_p0 = scmp.ne.s32.totalorder %s379_s28, %s7355_s29  ;;  %p7364_p9 = scmp.lt.s32.totalorder %s7355_s29, %s7355_s29 }
  0xcf   : > { %p7358_p2 = pnand %p7356_p0, %p7654_p8  ;;  %p7365_p4 = por %p7364_p9, %p7363_p7 }
  0xd1   : > { %p7359_p5 = pneg %p7358_p2 }
  0xd3   : > { %p7366_p10 = pnand %p7365_p4, %p7359_p5 }
  0xd5   : > { %7369 = shalt.err (!%p7366_p10)
}
  0xd6   : > { %6701 = dma.hbm_to_vmem [thread:$0]  (!%p7638_p6), %s10747_s8, 256, %s379_s28, [#allocation15], %s11016_s1, %s11016_s1, %s7522_s10  }
  0xd7   : > { %s7370_s18 = scalar_lea.hbm %s10748_s9, 16 }
  0xd8   : > { %p7371_p1 = scmp.ne.s32.totalorder %s10748_s9, %s7370_s18  ;;  %p7377_p12 = scmp.lt.u32.totalorder %s7370_s18, %s10748_s9 }
  0xda   : > { %p7373_p3 = pnand %p7371_p1, %p7654_p8 }
  0xdc   : > { %p7374_p11 = pneg %p7373_p3 }
  0xde   : > { %p7379_p13 = pnand %p7377_p12, %p7374_p11 }
  0xe0   : > { %7382 = shalt.err (!%p7379_p13)
}
  0xe1   : > { %s7383_s20 = scalar_lea.vmem %s393_s21, 16  ;;  %s7390_s10 = scalar_lea.vmem %s393_s21, 32 }
  0xe2   : > { %p7384_p0 = scmp.ne.s32.totalorder %s393_s21, %s7383_s20  ;;  %p7391_p7 = scmp.lt.s32.totalorder %s393_s21, %s393_s21 }
  0xe3   : > { %p7392_p9 = scmp.lt.s32.totalorder %s7390_s10, %s7383_s20 }
  0xe4   : > { %p7386_p2 = pnand %p7384_p0, %p7654_p8 }
  0xe5   : > { %p7393_p4 = por %p7392_p9, %p7391_p7 }
  0xe6   : > { %p7387_p5 = pneg %p7386_p2 }
  0xe8   : > { %p7394_p10 = pnand %p7393_p4, %p7387_p5 }
  0xea   : > { %7397 = shalt.err (!%p7394_p10)
}
  0xeb   : > { %6704 = dma.hbm_to_vmem [thread:$0]  (!%p7638_p6), %s10748_s9, 16, %s393_s21, [#allocation18]  }
  0xec   : > { %s6152_s11 = sadd.s32 4294967294, %s7514_s16   ;;  %s7849_s23 = sadd.s32 1, %s7514_s16  }
  0xed   : > { %s38_s29 = sadd.s32 1, %s7510_s15  ;;  %s35_s2 = ssub.s32 %s7514_s16, %s7849_s23 }
  0xee   : > { %p45_p8 = scmp.ne.s32.totalorder %s7510_s15, %s7506_s14  ;;  %p36_p1 = scmp.eq.s32.totalorder %s35_s2, 0 }
  0xef   : > { %p46_p3 = scmp.eq.s32.totalorder %s7514_s16, 0  ;;  %p51_p11 = scmp.ne.s32.totalorder %s7506_s14, %s7502_s13 }
  0xf0   : > { %p264_p12 = scmp.eq.s32.totalorder %s7622_s19, 1  ;;  %p11017_p0 = scmp.eq.s32.totalorder %s7622_s19, 0 }
  0xf1   : > { %s7861_s22 = scalar_select %p36_p1, %s7510_s15, %s38_s29  }
  0xf2   : > { %p47_p13 = por %p46_p3, %p45_p8  ;;  %p7865_p2 = por %p11017_p0, %p51_p11 }
  0xf3   : > { %p7869_p6 = por %p264_p12, %p45_p8  ;;  %p270_p5 = scmp.eq.s32.totalorder %s6152_s11, 1 }
  0xf4   : > { %p6722_p7 = scmp.lt.s32.totalorder %s7514_s16, 2  ;;  %s403_s12 = sand.u32 1, %s7510_s15  }
  0xf5   : > { %s11019_s21 = scalar_select %p7869_p6, 1, 0 }
  0xf6   : > { %p7875_p9 = por %p270_p5, %p51_p11  ;;  %s6164_s27 = sshll.u32 %s403_s12, 4 }
  0xf7   : > { %s6364_s25 = sshll.u32 %s7514_s16, 8  ;;  %s407_s10 = scalar_lea.vmem [#allocation2], %s6164_s27 }
  0xf8   : > { %s11020_s18 = scalar_select %p7875_p9, 1, 0 }
  0xf9   : > { %s7883_s20 = scalar_lea.hbm %s10739_s0, %s6364_s25  ;;  %s414_s1 = sshll.u32 %s407_s10, 4  ;;  %s7889_s1 = int_to_ptr.vmem [resolvable:$true] %s414_s1 }
  0xfa   : > { %p7885_p4 = pnand %p6722_p7, %p47_p13  ;;  %s7891_s11 = scalar_lea.sflag [#allocation3], %s403_s12 }
  0xfb   : > { %s7398_s29 = scalar_lea.hbm %s7883_s20, 256  ;;  %s7403_s25 = scalar_lea.hbm %s10739_s0, 512 }
  0xfc   : > { %p7399_p10 = scmp.ne.s32.totalorder %s7883_s20, %s7398_s29  ;;  %p7400_p8 = pneg %p7885_p4 }
  0xfd   : > { %p7404_p11 = scmp.lt.u32.totalorder %s7883_s20, %s10739_s0  ;;  %p7405_p12 = scmp.lt.u32.totalorder %s7403_s25, %s7398_s29 }
  0xfe   : > { %p7401_p1 = pnand %p7400_p8, %p7399_p10  ;;  %p7407_p0 = scmp.lt.u32.totalorder %s7398_s29, %s7883_s20 }
  0xff   : > { %p7406_p13 = por %p7405_p12, %p7404_p11 }
 0x100   : > { %p7402_p3 = pneg %p7401_p1 }
 0x101   : > { %p7408_p5 = por %p7407_p0, %p7406_p13 }
 0x103   : > { %p7409_p7 = pnand %p7408_p5, %p7402_p3 }
 0x105   : > { %7412 = shalt.err (!%p7409_p7)
}
 0x106   : > { %s7413_s12 = scalar_lea.vmem %s7889_s1, 256  ;;  %s7529_s10 = smov [#allocation2]  }
 0x107   : > { %p7414_p10 = scmp.ne.s32.totalorder %s7889_s1, %s7413_s12  ;;  %s7418_s2 = sshll.u32 %s7529_s10, 4  ;;  %s7419_s2 = int_to_ptr.vmem [resolvable:$false] %s7418_s2 }
 0x108   : > { %s7420_s27 = scalar_lea.vmem %s7419_s2, 512  ;;  %p7421_p6 = scmp.lt.s32.totalorder %s7889_s1, %s7419_s2 }
 0x109   : > { %p7416_p1 = pnand %p7414_p10, %p7400_p8  ;;  %p7422_p11 = scmp.lt.s32.totalorder %s7420_s27, %s7413_s12 }
 0x10b   : > { %p7417_p9 = pneg %p7416_p1  ;;  %p7423_p12 = por %p7422_p11, %p7421_p6 }
 0x10d   : > { %p7424_p13 = pnand %p7423_p12, %p7417_p9 }
 0x10f   : > { %7427 = shalt.err (!%p7424_p13)
}
 0x110   : > { %6708 = dma.hbm_to_vmem [thread:$0]  (!%p7885_p4), %s7883_s20, 256, %s7889_s1, %s7891_s11, %s11014_s26, %s11014_s26, %s11013_s24  }
 0x111   : > { %s11022_s29 = sld [smem:[#allocation27_spill]] }
 0x117   : > { %p11023_p8 = scmp.ne.s32.totalorder %s11022_s29, 0 }
 0x119   : > { %426 = sbr.rel (%p11023_p8) target bundleno = 4286 (0x10be), region = 60 }
 0x120   : > { %s7925_s25 = sand.u32 1, %s7506_s14  }
 0x121   : > { %s6168_s30 = sshll.u32 %s7925_s25, 4  ;;  %s429_s17 = scalar_lea.sflag [#allocation3], %s7925_s25 }
 0x122   : > { %s7931_s28 = scalar_lea.vmem [#allocation2], %s6168_s30 }
 0x123   : > { %7473 = dma.done.wait (%p7865_p2), %s429_s17, 256  }
 0x124   : > { %7475 = vsyncadd (%p7865_p2), %s429_s17, 4294967040  ;;  %p11024_p6 = scmp.eq.s32.totalorder %s7622_s19, 0 }
 0x126   : > { %7477 = dma.done.wait (%p11024_p6), [#allocation6], 768   ;;  %p11025_p9 = pmov %p11024_p6 }
 0x127   : > { %p11026_p4 = pmov %p11024_p6 }
 0x128   : > { %7479 = vsyncadd (%p11025_p9), [#allocation6], 4294966528 }
 0x129   : > { %7481 = dma.done.wait (%p11026_p4), [#allocation9], 528   ;;  %p11027_p3 = pmov %p11026_p4 }
 0x12b   : > { %7483 = vsyncadd (%p11027_p3), [#allocation9], 4294966768  ;;  %p11028_p0 = pmov %p11027_p3 }
 0x12d   : > { %7485 = dma.done.wait (%p11028_p0), [#allocation12], 1664   ;;  %p11029_p5 = pmov %p11028_p0 }
 0x12e   : > { %p11030_p2 = pmov %p11028_p0 }
 0x12f   : > { %7487 = vsyncadd (%p11029_p5), [#allocation12], 4294965632 }
 0x130   : > { %7489 = dma.done.wait (%p11030_p2), [#allocation15], 512   ;;  %p11031_p7 = pmov %p11028_p0 }
 0x131   : > { %p11032_p10 = pmov %p11028_p0 }
 0x132   : > { %7491 = vsyncadd (%p11031_p7), [#allocation15], 4294966784 }
 0x133   : > { %7493 = dma.done.wait (%p11032_p10), [#allocation18], 16   ;;  %p11033_p1 = pmov %p11028_p0 }
 0x134   : > { %v743_v0 = vlaneseq  ;;  %v7530_v1 = vmov 1966171168   ;;  %v7531_v4 = vmov 16   ;;  %v7532_v5 = vmov 17   ;;  %v508_v8 = vld [vmem:[#allocation5] sm:$0xff]  ;;  %v509_v9 = vld [vmem:[#allocation5 + $0x8] sm:$0xff] }
 0x135   : > { %7495 = vsyncadd (%p11033_p1), [#allocation18], 4294967280  ;;  %v741_v2 = vunpack.c.l.s4 %v7530_v1  ;;  %6793 = vset.pattern.permute.xlu1 %v7531_v4  ;;  %6794 = vset.pattern.permute.xlu0 %v7532_v5  ;;  %vm511_vm0 = vcmask 146432   ;;  %vm518_vm1 = vcmask 1041408   ;;  %v6627_v10 = vpack.c.bf16 %v509_v9, %v508_v8  ;;  %v510_v11 = vld [vmem:[#allocation5 + $0x10] sm:$0x3] }
 0x136   : > { %v7958_v3 = vshrl.u32 %v743_v0, 7  ;;  %v7965_v12 = vld [vmem:[%s7931_s28] sm:$0xff]  ;;  %v7975_v15 = vld [vmem:[%s7931_s28 + $0x8] sm:$0xff]  ;;  %s7533_s24 = smov 108   ;;  %v7534_v60 = vmov 18   ;;  %vm1109_vm2 = vcmask 23552  }
 0x137   : > { %v742_v6 = vunpack.c.0.s8 %v741_v2  ;;  %6455 = vmatprep.mubr.msk.f32.mxu0 %vm511_vm0, %v7965_v12  ;;  %6628 = vmatprep.subr.bf16.mxu0 %v6627_v10  ;;  %v739_v18 = vcombine.high %v7965_v12, %v7965_v12  ;;  %vm614_vm3 = vcmask 130048   ;;  %vm7536_vm4 = vmmov 0   ;;  %s7537_s26 = smov 96   ;;  %s7538_s3 = smov 127  }
 0x138   : > { %11034 = vst [vmem:[#allocation28_spill] sm:$0xff] %v7958_v3  ;;  %v7968_v13 = vsub.s32 0, %v7958_v3  ;;  %6630 = vmatpush3.bf16.msra.mxu0 %v6627_v10  ;;  %vm2370_vm5 = vcmask 261120   ;;  %s7539_s20 = smov 3   ;;  %s7540_s1 = smov 109  }
 0x139   : > { %v7962_v7 = vsub.s32 %v742_v6, %v7958_v3  ;;  %6453 = vmatprep.subr.msk.mxu0 %vm518_vm1, %v510_v11  ;;  %v598_v6 = vld [vmem:[#allocation7 + $0x8] sm:$0xff]  ;;  %s7542_s11 = smov 64   ;;  %s504_s12 = scalar_lea.vmem [#allocation19], %s6168_s30 }
 0x13a   : > { %11036 = vst [vmem:[#allocation30_spill] sm:$0xff] %v7968_v13  ;;  %s5993_s10 = sshll.u32 %s504_s12, 4  ;;  %s6365_s2 = sshll.u32 %s7622_s19, 8  ;;  %s10690_s10 = int_to_ptr.vmem [resolvable:$true] %s5993_s10 }
 0x13b   : > { %11035 = vst [vmem:[#allocation29_spill] sm:$0xff] %v7962_v7  ;;  %v746_v14 = vrot.slane %v7965_v12, %v7962_v7  ;;  %v753_v26 = vrot.slane %v739_v18, %v7962_v7  ;;  %s11415_s17 = sld [smem:[#allocation123_spill]]  ;;  %s5980_s30 = scalar_lea.sflag [#allocation4], %s7925_s25 }
 0x13c   : > { %6454 = vmatpush3.msk.msra.mxu0 %vm518_vm1, %v510_v11  ;;  %p11416_p12 = scmp.ne.s32.totalorder %s11019_s21, 0  ;;  %s7543_s19 = smov [#allocation19]  }
 0x13d   : > { %v762_v16 = vrot.slane %v746_v14, %v7962_v7  ;;  %v754_v17 = vcombine.high %v746_v14, %v746_v14  ;;  %6456 = vmatmul.mubr.msk.f32.vlgmr.msra.gmra.mrb[0].mxu0 %vm511_vm0, %v7975_v15  ;;  %v769_v34 = vrot.slane %v753_v26, %v7962_v7  ;;  %v755_v38 = vcombine.high %v753_v26, %v753_v26 }
 0x13e   : > { %v795_v14 = vrot.slane %v7975_v15, %v7962_v7 }
 0x13f   : > { %v7982_v19 = vrot.slane %v762_v16, %v7968_v13  ;;  %v784_v20 = vcombine.high %v762_v16, %v762_v16  ;;  %v776_v21 = vrot.slane %v754_v17, %v7962_v7  ;;  %v8020_v43 = vrot.slane %v769_v34, %v7968_v13 }
 0x140   : > { %v783_v44 = vrot.slane %v755_v38, %v7962_v7  ;;  %v785_v59 = vcombine.high %v769_v34, %v769_v34  ;;  %v811_v17 = vrot.slane %v795_v14, %v7962_v7  ;;  %v803_v38 = vcombine.high %v795_v14, %v795_v14 }
 0x141   : > { %v917_v22 = vsub.f32 %v7982_v19, %v7965_v12  ;;  %v918_v23 = vsub.f32 %v7982_v19, %v7975_v15  ;;  %v7991_v24 = vrot.slane %v776_v21, %v7968_v13  ;;  %v786_v25 = vcombine.high %v776_v21, %v776_v21 }
 0x142   : > { %v8001_v30 = vrot.slane %v784_v20, %v7968_v13  ;;  %v926_v46 = vsub.f32 %v8020_v43, %v7975_v15  ;;  %v925_v48 = vsub.f32 %v8020_v43, %v7965_v12  ;;  %v8030_v49 = vrot.slane %v783_v44, %v7968_v13 }
 0x143   : > { %v949_v27 = vmul.f32 %v917_v22, %v917_v22  ;;  %v919_v28 = vsub.f32 %v7991_v24, %v7965_v12  ;;  %v920_v29 = vsub.f32 %v7991_v24, %v7975_v15  ;;  %v950_v31 = vmul.f32 %v918_v23, %v918_v23 }
 0x144   : > { %v921_v33 = vsub.f32 %v8001_v30, %v7965_v12  ;;  %v922_v36 = vsub.f32 %v8001_v30, %v7975_v15  ;;  %v8011_v37 = vrot.slane %v786_v25, %v7968_v13  ;;  %v958_v50 = vmul.f32 %v926_v46, %v926_v46 }
 0x145   : > { %1013 = vrot.lane.b32.xlu0 %v949_v27, %s7533_s24  ;;  %v951_v32 = vmul.f32 %v919_v28, %v919_v28  ;;  %v952_v35 = vmul.f32 %v920_v29, %v920_v29  ;;  %v927_v51 = vsub.f32 %v8030_v49, %v7965_v12  ;;  %v957_v52 = vmul.f32 %v925_v48, %v925_v48 }
 0x146   : > { %v953_v39 = vmul.f32 %v921_v33, %v921_v33  ;;  %v923_v40 = vsub.f32 %v8011_v37, %v7965_v12  ;;  %v954_v41 = vmul.f32 %v922_v36, %v922_v36  ;;  %v924_v42 = vsub.f32 %v8011_v37, %v7975_v15 }
 0x147   : > { %1017 = vrot.lane.b32.xlu1 %v951_v32, %s7533_s24  ;;  %v959_v53 = vmul.f32 %v927_v51, %v927_v51  ;;  %v787_v54 = vcombine.high %v783_v44, %v783_v44  ;;  %v928_v56 = vsub.f32 %v8030_v49, %v7975_v15  ;;  %v8053_v62 = vrot.slane %v785_v59, %v7968_v13 }
 0x148   : > { %v955_v45 = vmul.f32 %v923_v40, %v923_v40  ;;  %v956_v47 = vmul.f32 %v924_v42, %v924_v42  ;;  %v8070_v18 = vrot.slane %v811_v17, %v7968_v13  ;;  %v825_v40 = vrot.slane %v803_v38, %v7962_v7 }
 0x149   : > { %1015 = vrot.lane.b32.xlu0 %v950_v31, %s7533_s24  ;;  %v8040_v55 = vrot.slane %v787_v54, %v7968_v13  ;;  %v960_v58 = vmul.f32 %v928_v56, %v928_v56  ;;  %v929_v63 = vsub.f32 %v8053_v62, %v7965_v12  ;;  %v930_v2 = vsub.f32 %v8053_v62, %v7975_v15 }
 0x14a   : > { %v933_v21 = vsub.f32 %v8070_v18, %v7965_v12  ;;  %v934_v42 = vsub.f32 %v8070_v18, %v7975_v15  ;;  %v833_v44 = vcombine.high %v811_v17, %v811_v17 }
 0x14b   : > { %1019 = vrot.lane.b32.xlu1 %v952_v35, %s7533_s24  ;;  %v931_v57 = vsub.f32 %v8040_v55, %v7965_v12  ;;  %v961_v1 = vmul.f32 %v929_v63, %v929_v63  ;;  %v962_v4 = vmul.f32 %v930_v2, %v930_v2  ;;  %v932_v20 = vsub.f32 %v8040_v55, %v7975_v15 }
 0x14c   : > { %v965_v23 = vmul.f32 %v933_v21, %v933_v21  ;;  %v8095_v48 = vrot.slane %v833_v44, %v7968_v13 }
 0x14d   : > { %1021 = vrot.lane.b32.xlu0 %v953_v39, %s7533_s24  ;;  %v963_v61 = vmul.f32 %v931_v57, %v931_v57  ;;  %v964_v22 = vmul.f32 %v932_v20, %v932_v20 }
 0x14e   : > { %v937_v2 = vsub.f32 %v8095_v48, %v7965_v12 }
 0x14f   : > { %1023 = vrot.lane.b32.xlu1 %v954_v41, %s7533_s24  ;;  %v8086_v41 = vrot.slane %v825_v40, %v7968_v13 }
 0x151   : > { %1025 = vrot.lane.b32.xlu0 %v955_v45, %s7533_s24  ;;  %v788_v45 = vcombine.high %v7975_v15, %v7975_v15  ;;  %v936_v46 = vsub.f32 %v8086_v41, %v7975_v15 }
 0x153   : > { %1027 = vrot.lane.b32.xlu1 %v956_v47, %s7533_s24  ;;  %v966_v47 = vmul.f32 %v934_v42, %v934_v42  ;;  %v802_v51 = vrot.slane %v788_v45, %v7962_v7  ;;  %v6802_v42 = vld [vmem:[#allocation11] sm:$0xff]   ;;  %v10761_v45 = vmov 0.0  }
 0x154   : > { %6635 = vmatprep.subr.bf16.mxu1 %v6802_v42 }
 0x155   : > { %1031 = vrot.lane.b32.xlu0 %v958_v50, %s7533_s24  ;;  %v835_v50 = vcombine.high %v825_v40, %v825_v40  ;;  %v818_v56 = vrot.slane %v802_v51, %v7962_v7  ;;  %v804_v57 = vcombine.high %v802_v51, %v802_v51  ;;  %6636 = vmatpush3.bf16.msra.mxu1 %v6802_v42 }
 0x156   : > { %6543 = vmatprep.subr.bf16.mxu1 %v10761_v45 }
 0x157   : > { %1029 = vrot.lane.b32.xlu1 %v957_v52, %s7533_s24  ;;  %v968_v52 = vmul.f32 %v936_v46, %v936_v46  ;;  %v8102_v54 = vrot.slane %v835_v50, %v7968_v13  ;;  %v832_v63 = vrot.slane %v804_v57, %v7962_v7 }
 0x159   : > { %1033 = vrot.lane.b32.xlu0 %v959_v53, %s7533_s24  ;;  %v938_v53 = vsub.f32 %v8095_v48, %v7975_v15  ;;  %v836_v17 = vcombine.high %v832_v63, %v832_v63 }
 0x15b   : > { %601 = vperm.xlu1 %6793, %v7965_v12   ;;  %v970_v59 = vmul.f32 %v938_v53, %v938_v53  ;;  %v1943_v53 = vand.u32 127, %v743_v0 }
 0x15d   : > { %698 = vperm.xlu0 %6794, %v7965_v12  }
 0x15f   : > { %605 = vperm.xlu1 %6793, %v7975_v15  }
 0x161   : > { %6797 = vset.pattern.permute.xlu0 %v7534_v60 }
 0x162   : > { %719 = vperm.xlu0 %6797, %v7975_v15  }
 0x163   : > { %1035 = vrot.lane.b32.xlu1 %v960_v58, %s7533_s24  ;;  %v935_v58 = vsub.f32 %v8086_v41, %v7965_v12 }
 0x164   : > { %6795 = vset.pattern.permute.xlu1 %v7532_v5  ;;  %v597_v5 = vld [vmem:[#allocation7] sm:$0xff] }
 0x165   : > { %v6631_v8 = vpack.c.bf16 %v598_v6, %v597_v5  ;;  %v8120_v6 = vrot.slane %v832_v63, %v7968_v13 }
 0x166   : > { %1041 = vrot.lane.b32.xlu0 %v963_v61, %s7533_s24  ;;  %v8111_v61 = vrot.slane %v818_v56, %v7968_v13 }
 0x167   : > { %702 = vperm.xlu1 %6795, %v7975_v15   ;;  %6632 = vmatprep.subr.bf16.mxu0 %v6631_v8  ;;  %v944_v14 = vsub.f32 %v8120_v6, %v7975_v15 }
 0x168   : > { %6634 = vmatpush3.bf16.msra.mxu0 %v6631_v8  ;;  %v942_v5 = vsub.f32 %v8111_v61, %v7975_v15  ;;  %v834_v8 = vcombine.high %v818_v56, %v818_v56  ;;  %v941_v21 = vsub.f32 %v8111_v61, %v7965_v12 }
 0x169   : > { %6465 = vmatprep.subr.bf16.mxu0 %v6802_v42 }
 0x16b   : > { %6796 = vset.pattern.permute.xlu1 %v7534_v60  ;;  %v940_v60 = vsub.f32 %v8102_v54, %v7975_v15 }
 0x16c   : > { %715 = vperm.xlu1 %6796, %v7965_v12  }
 0x170   : > { %1037 = vrot.lane.b32.xlu1 %v961_v1, %s7533_s24  ;;  %v967_v1 = vmul.f32 %v935_v58, %v935_v58  ;;  %v1944_v58 = vcvt.s32.f32 %v1943_v53 }
 0x174   : > { %1039 = vrot.lane.b32.xlu1 %v962_v4, %s7533_s24  ;;  %v972_v4 = vmul.f32 %v940_v60, %v940_v60  ;;  %v8173_v60 = vmul.f32 0.33333334, %v1944_v58 }
 0x1b7   : > { %v1014_v9 = vpop.permute.xlu0 %1013 }
 0x1b8   : > { %v1110_v10 = vsel %vm1109_vm2, %v1014_v9, 0.0  ;;  %v969_v9 = vmul.f32 %v937_v2, %v937_v2 }
 0x1b9   : > { %1111 = vadd.xlane.f32.xlu0 %v1110_v10  ;;  %v1018_v25 = vpop.permute.xlu1 %1017  ;;  %v939_v10 = vsub.f32 %v8102_v54, %v7965_v12 }
 0x1ba   : > { %v1116_v28 = vsel %vm1109_vm2, %v1018_v25, 0.0  ;;  %v976_v25 = vmul.f32 %v944_v14, %v944_v14 }
 0x1bb   : > { %v1016_v11 = vpop.permute.xlu0 %1015  ;;  %v971_v20 = vmul.f32 %v939_v10, %v939_v10 }
 0x1bc   : > { %v1113_v16 = vsel %vm1109_vm2, %v1016_v11, 0.0  ;;  %v974_v11 = vmul.f32 %v942_v5, %v942_v5 }
 0x1bd   : > { %1114 = vadd.xlane.f32.xlu1 %v1113_v16  ;;  %v1020_v26 = vpop.permute.xlu1 %1019  ;;  %v8129_v16 = vrot.slane %v834_v8, %v7968_v13 }
 0x1be   : > { %v1119_v32 = vsel %vm1109_vm2, %v1020_v26, 0.0 }
 0x1bf   : > { %v1022_v27 = vpop.permute.xlu0 %1021  ;;  %v946_v26 = vsub.f32 %v8129_v16, %v7975_v15 }
 0x1c0   : > { %v1122_v31 = vsel %vm1109_vm2, %v1022_v27, 0.0  ;;  %v8139_v27 = vrot.slane %v836_v17, %v7968_v13 }
 0x1c1   : > { %v1024_v29 = vpop.permute.xlu1 %1023 }
 0x1c2   : > { %v1125_v35 = vsel %vm1109_vm2, %v1024_v29, 0.0  ;;  %v943_v29 = vsub.f32 %v8120_v6, %v7965_v12 }
 0x1c3   : > { %v1026_v33 = vpop.permute.xlu0 %1025 }
 0x1c4   : > { %v1128_v34 = vsel %vm1109_vm2, %v1026_v33, 0.0  ;;  %v948_v33 = vsub.f32 %v8139_v27, %v7975_v15 }
 0x1c5   : > { %v1028_v36 = vpop.permute.xlu1 %1027 }
 0x1c6   : > { %v1131_v39 = vsel %vm1109_vm2, %v1028_v36, 0.0  ;;  %v980_v36 = vmul.f32 %v948_v33, %v948_v33 }
 0x1c7   : > { %v1032_v46 = vpop.permute.xlu0 %1031 }
 0x1c8   : > { %v1137_v63 = vsel %vm1109_vm2, %v1032_v46, 0.0 }
 0x1cb   : > { %v1034_v50 = vpop.permute.xlu0 %1033 }
 0x1cc   : > { %v1140_v0 = vsel %vm1109_vm2, %v1034_v50, 0.0 }
 0x1ce   : > { %1043 = vrot.lane.b32.xlu1 %v964_v22, %s7533_s24 }
 0x1cf   : > { %1045 = vrot.lane.b32.xlu0 %v965_v23, %s7533_s24 }
 0x1dc   : > { %v8166_v51 = vpop.permute.xlu0 %698 }
 0x1e1   : > { %v8171_v56 = vpop.permute.xlu0 %719 }
 0x1ee   : > { %1117 = vadd.xlane.f32.xlu0 %v1116_v28  ;;  %v973_v28 = vmul.f32 %v941_v21, %v941_v21 }
 0x1f2   : > { %1123 = vadd.xlane.f32.xlu1 %v1122_v31  ;;  %1120 = vadd.xlane.f32.xlu0 %v1119_v32  ;;  %v1030_v31 = vpop.permute.xlu1 %1029  ;;  %v978_v32 = vmul.f32 %v946_v26, %v946_v26 }
 0x1f6   : > { %1129 = vadd.xlane.f32.xlu1 %v1128_v34  ;;  %1126 = vadd.xlane.f32.xlu0 %v1125_v35  ;;  %v975_v34 = vmul.f32 %v943_v29, %v943_v29  ;;  %v945_v35 = vsub.f32 %v8129_v16, %v7965_v12  ;;  %v8155_v40 = vpop.permute.xlu1 %601 }
 0x1f8   : > { %v977_v38 = vmul.f32 %v945_v35, %v945_v35 }
 0x1fa   : > { %1132 = vadd.xlane.f32.xlu0 %v1131_v39  ;;  %v947_v39 = vsub.f32 %v8139_v27, %v7965_v12  ;;  %v8159_v44 = vpop.permute.xlu1 %605 }
 0x1fc   : > { %v979_v15 = vmul.f32 %v947_v39, %v947_v39 }
 0x1fe   : > { %v1036_v12 = vpop.permute.xlu1 %1035 }
 0x1ff   : > { %v1143_v17 = vsel %vm1109_vm2, %v1036_v12, 0.0 }
 0x207   : > { %1047 = vrot.lane.b32.xlu1 %v966_v47, %s7533_s24  ;;  %v8164_v47 = vpop.permute.xlu1 %702 }
 0x20b   : > { %1051 = vrot.lane.b32.xlu1 %v968_v52, %s7533_s24  ;;  %v8168_v52 = vpop.permute.xlu1 %715 }
 0x20f   : > { %1055 = vrot.lane.b32.xlu1 %v970_v59, %s7533_s24  ;;  %v1038_v57 = vpop.permute.xlu1 %1037  ;;  %v1042_v59 = vpop.permute.xlu0 %1041 }
 0x210   : > { %1049 = vrot.lane.b32.xlu0 %v967_v1, %s7533_s24  ;;  %v6457_v22 = vpop.f32.mrb[0].mxu0  ;;  %v1134_v1 = vsel %vm1109_vm2, %v1030_v31, 0.0  ;;  %v1146_v8 = vsel %vm1109_vm2, %v1038_v57, 0.0 }
 0x211   : > { %v588_v23 = vpop.f32.mrb[1].mxu0 }
 0x212   : > { %6462 = vmatprep.mubr.msk.f32.mxu0 %vm614_vm3, %v588_v23 }
 0x213   : > { %1059 = vrot.lane.b32.xlu1 %v972_v4, %s7533_s24  ;;  %6463 = vmatmul.mubr.msk.f32.vlgmr.msra.gmra.mrb[2].mxu0 %vm614_vm3, %v6457_v22  ;;  %v1040_v2 = vpop.permute.xlu1 %1039 }
 0x214   : > { %1053 = vrot.lane.b32.xlu0 %v969_v9, %s7533_s24  ;;  %6466 = vmatpush3.bf16.msra.mxu0 %v6802_v42  ;;  %v1149_v26 = vsel %vm1109_vm2, %v1040_v2, 0.0 }
 0x215   : > { %6499 = vmatprep.subr.bf16.mxu0 %v10761_v45 }
 0x217   : > { %1063 = vrot.lane.b32.xlu1 %v974_v11, %s7533_s24 }
 0x218   : > { %1057 = vrot.lane.b32.xlu0 %v971_v20, %s7533_s24  ;;  %v1152_v20 = vsel %vm1109_vm2, %v1042_v59, 0.0 }
 0x21b   : > { %1067 = vrot.lane.b32.xlu1 %v976_v25, %s7533_s24 }
 0x21c   : > { %1061 = vrot.lane.b32.xlu0 %v973_v28, %s7533_s24 }
 0x21f   : > { %1071 = vrot.lane.b32.xlu1 %v978_v32, %s7533_s24 }
 0x220   : > { %1065 = vrot.lane.b32.xlu0 %v975_v34, %s7533_s24 }
 0x223   : > { %1075 = vrot.lane.b32.xlu1 %v980_v36, %s7533_s24 }
 0x224   : > { %1069 = vrot.lane.b32.xlu0 %v977_v38, %s7533_s24 }
 0x228   : > { %1073 = vrot.lane.b32.xlu0 %v979_v15, %s7533_s24  ;;  %s7428_s24 = scalar_lea.vmem %s10690_s10, 256 }
 0x229   : > { %p7429_p11 = scmp.ne.s32.totalorder %s10690_s10, %s7428_s24 }
 0x22b   : > { %p7430_p13 = pnand %p7429_p11, %p11416_p12 }
 0x22d   : > { %p7431_p8 = pneg %p7430_p13 }
 0x246   : > { %v8177_v4 = vpop.xlane.xlu0 %1111 }
 0x247   : > { %1138 = vadd.xlane.f32.xlu1 %v1137_v63  ;;  %1135 = vadd.xlane.f32.xlu0 %v1134_v1  ;;  %v1947_v5 = vsub.f32 %v8177_v4, %v8173_v60  ;;  %vm1430_vm6 = vcmp.le.f32.partialorder %v8177_v4, 25.0 }
 0x249   : > { %v1979_v9 = vmul.f32 %v1947_v5, %v1947_v5 }
 0x24a   : > { %v8183_v10 = vpop.xlane.xlu1 %1114  ;;  %v1046_v23 = vpop.permute.xlu0 %1045 }
 0x24b   : > { %1141 = vadd.xlane.f32.xlu0 %v1140_v0  ;;  %v1948_v11 = vsub.f32 %v8183_v10, %v8173_v60  ;;  %1147 = vadd.xlane.f32.xlu1 %v1146_v8  ;;  %v2011_v14 = vmul.f32 -4.5, %v1979_v9  ;;  %v1158_v28 = vsel %vm1109_vm2, %v1046_v23, 0.0  ;;  %vm1431_vm8 = vcmp.le.f32.partialorder %v8183_v10, 25.0 }
 0x24d   : > { %v1980_v21 = vmul.f32 %v1948_v11, %v1948_v11  ;;  %v2043_v22 = vmul.f32 1.442695, %v2011_v14 }
 0x24e   : > { %v1044_v31 = vpop.permute.xlu1 %1043 }
 0x24f   : > { %1144 = vadd.xlane.f32.xlu0 %v1143_v17  ;;  %v2012_v25 = vmul.f32 -4.5, %v1980_v21  ;;  %1153 = vadd.xlane.f32.xlu1 %v1152_v20  ;;  %6821 = vpow2.f32 %v2043_v22  ;;  %v1155_v32 = vsel %vm1109_vm2, %v1044_v31, 0.0 }
 0x251   : > { %v2045_v29 = vmul.f32 1.442695, %v2012_v25 }
 0x253   : > { %6823 = vpow2.f32 %v2045_v29  ;;  %1150 = vadd.xlane.f32.xlu0 %v1149_v26  ;;  %1159 = vadd.xlane.f32.xlu1 %v1158_v28 }
 0x257   : > { %1156 = vadd.xlane.f32.xlu0 %v1155_v32 }
 0x259   : > { %v6822_v33 = vpop.eup %6821 }
 0x25d   : > { %v6824_v34 = vpop.eup %6823 }
 0x25e   : > { %v2107_v35 = vpack.c.bf16 %v6824_v34, %v6822_v33 }
 0x260   : > { %6467 = vmatprep.mubr.msk.bf16.mxu0 %vm614_vm3, %v2107_v35 }
 0x27b   : > { %v8193_v36 = vpop.xlane.xlu0 %1117 }
 0x27c   : > { %v1949_v38 = vsub.f32 %v8193_v36, %v8173_v60  ;;  %vm1432_vm7 = vcmp.le.f32.partialorder %v8193_v36, 25.0 }
 0x27e   : > { %v1981_v39 = vmul.f32 %v1949_v38, %v1949_v38 }
 0x27f   : > { %v8197_v15 = vpop.xlane.xlu1 %1123  ;;  %v8199_v42 = vpop.xlane.xlu0 %1120 }
 0x280   : > { %v1951_v12 = vsub.f32 %v8197_v15, %v8173_v60  ;;  %v2013_v46 = vmul.f32 -4.5, %v1981_v39  ;;  %v1950_v50 = vsub.f32 %v8199_v42, %v8173_v60  ;;  %vm1433_vm10 = vcmp.le.f32.partialorder %v8199_v42, 25.0 }
 0x281   : > { %vm1434_vm14 = vcmp.le.f32.partialorder %v8197_v15, 25.0 }
 0x282   : > { %v1983_v53 = vmul.f32 %v1951_v12, %v1951_v12  ;;  %v2047_v58 = vmul.f32 1.442695, %v2013_v46  ;;  %v1982_v59 = vmul.f32 %v1950_v50, %v1950_v50 }
 0x283   : > { %v8205_v57 = vpop.xlane.xlu1 %1129  ;;  %v8207_v63 = vpop.xlane.xlu0 %1126 }
 0x284   : > { %v2015_v1 = vmul.f32 -4.5, %v1983_v53  ;;  %v1953_v2 = vsub.f32 %v8205_v57, %v8173_v60  ;;  %v2014_v5 = vmul.f32 -4.5, %v1982_v59  ;;  %v1952_v0 = vsub.f32 %v8207_v63, %v8173_v60 }
 0x285   : > { %6825 = vpow2.f32 %v2047_v58  ;;  %vm1435_vm0 = vcmp.le.f32.partialorder %v8207_v63, 25.0 }
 0x286   : > { %v1985_v8 = vmul.f32 %v1953_v2, %v1953_v2  ;;  %v2051_v9 = vmul.f32 1.442695, %v2015_v1  ;;  %v2049_v14 = vmul.f32 1.442695, %v2014_v5  ;;  %v1984_v17 = vmul.f32 %v1952_v0, %v1952_v0  ;;  %v6803_v2 = vld [vmem:[#allocation10] sm:$0xff]  }
 0x287   : > { %v1048_v11 = vpop.permute.xlu1 %1047  ;;  %v8213_v20 = vpop.xlane.xlu0 %1132 }
 0x288   : > { %v2017_v21 = vmul.f32 -4.5, %v1985_v8  ;;  %v1161_v22 = vsel %vm1109_vm2, %v1048_v11, 0.0  ;;  %6827 = vpow2.f32 %v2049_v14  ;;  %v2016_v23 = vmul.f32 -4.5, %v1984_v17 }
 0x289   : > { %1162 = vadd.xlane.f32.xlu0 %v1161_v22  ;;  %v1954_v25 = vsub.f32 %v8213_v20, %v8173_v60  ;;  %6829 = vpow2.f32 %v2051_v9 }
 0x28a   : > { %v2055_v26 = vmul.f32 1.442695, %v2017_v21  ;;  %v2053_v28 = vmul.f32 1.442695, %v2016_v23  ;;  %v6804_v21 = vld [vmem:[#allocation10 + $0x8] sm:$0xff]  }
 0x28b   : > { %v1986_v29 = vmul.f32 %v1954_v25, %v1954_v25  ;;  %v1052_v31 = vpop.permute.xlu1 %1051  ;;  %v1050_v32 = vpop.permute.xlu0 %1049 }
 0x28c   : > { %v1167_v33 = vsel %vm1109_vm2, %v1052_v31, 0.0  ;;  %v1164_v34 = vsel %vm1109_vm2, %v1050_v32, 0.0  ;;  %6831 = vpow2.f32 %v2053_v28 }
 0x28d   : > { %v2018_v35 = vmul.f32 -4.5, %v1986_v29  ;;  %1168 = vadd.xlane.f32.xlu0 %v1167_v33  ;;  %1165 = vadd.xlane.f32.xlu1 %v1164_v34  ;;  %6833 = vpow2.f32 %v2055_v26 }
 0x28f   : > { %v2057_v38 = vmul.f32 1.442695, %v2018_v35  ;;  %v1056_v39 = vpop.permute.xlu1 %1055  ;;  %v1054_v12 = vpop.permute.xlu0 %1053 }
 0x290   : > { %v1173_v46 = vsel %vm1109_vm2, %v1056_v39, 0.0  ;;  %v1170_v50 = vsel %vm1109_vm2, %v1054_v12, 0.0  ;;  %v6826_v53 = vpop.eup %6825 }
 0x291   : > { %6835 = vpow2.f32 %v2057_v38  ;;  %1174 = vadd.xlane.f32.xlu0 %v1173_v46  ;;  %1171 = vadd.xlane.f32.xlu1 %v1170_v50 }
 0x292   : > { %v6828_v58 = vpop.eup %6827 }
 0x293   : > { %v1060_v59 = vpop.permute.xlu1 %1059  ;;  %v1058_v1 = vpop.permute.xlu0 %1057  ;;  %v2108_v8 = vpack.c.bf16 %v6828_v58, %v6826_v53 }
 0x294   : > { %v1179_v5 = vsel %vm1109_vm2, %v1060_v59, 0.0  ;;  %v1176_v0 = vsel %vm1109_vm2, %v1058_v1, 0.0  ;;  %v6830_v9 = vpop.eup %6829 }
 0x295   : > { %1180 = vadd.xlane.f32.xlu0 %v1179_v5  ;;  %1177 = vadd.xlane.f32.xlu1 %v1176_v0 }
 0x296   : > { %6468 = vmatmul.mubr.msk.bf16.vlgmr.msra.gmra.mrb[4].mxu0 %vm614_vm3, %v2108_v8  ;;  %v6832_v11 = vpop.eup %6831 }
 0x297   : > { %v1064_v14 = vpop.permute.xlu1 %1063  ;;  %v1062_v17 = vpop.permute.xlu0 %1061  ;;  %6500 = vmatpush3.bf16.msra.mxu0 %v6803_v2  ;;  %v2109_v25 = vpack.c.bf16 %v6832_v11, %v6830_v9 }
 0x298   : > { %v1185_v22 = vsel %vm1109_vm2, %v1064_v14, 0.0  ;;  %v1182_v23 = vsel %vm1109_vm2, %v1062_v17, 0.0  ;;  %6501 = vmatprep.subr.bf16.mxu0 %v10761_v45  ;;  %v6834_v26 = vpop.eup %6833 }
 0x299   : > { %1186 = vadd.xlane.f32.xlu0 %v1185_v22  ;;  %1183 = vadd.xlane.f32.xlu1 %v1182_v23 }
 0x29a   : > { %6471 = vmatprep.mubr.msk.bf16.mxu0 %vm614_vm3, %v2109_v25 }
 0x29b   : > { %v6836_v28 = vpop.eup %6835  ;;  %v1068_v29 = vpop.permute.xlu1 %1067  ;;  %6502 = vmatpush3.bf16.msra.mxu0 %v6804_v21 }
 0x29c   : > { %v1066_v31 = vpop.permute.xlu0 %1065  ;;  %v1191_v32 = vsel %vm1109_vm2, %v1068_v29, 0.0  ;;  %v2110_v34 = vpack.c.bf16 %v6836_v28, %v6834_v26 }
 0x29d   : > { %v1188_v33 = vsel %vm1109_vm2, %v1066_v31, 0.0  ;;  %1192 = vadd.xlane.f32.xlu0 %v1191_v32 }
 0x29e   : > { %1189 = vadd.xlane.f32.xlu1 %v1188_v33  ;;  %6472 = vmatmul.mubr.msk.bf16.gmra.mrb[8].mxu0 %vm614_vm3, %v2110_v34 }
 0x29f   : > { %v1072_v35 = vpop.permute.xlu1 %1071  ;;  %6503 = vmatprep.mubr.msk.bf16.mxu0 %vm7536_vm4, %v10761_v45 }
 0x2a0   : > { %v1070_v38 = vpop.permute.xlu0 %1069  ;;  %v1197_v39 = vsel %vm1109_vm2, %v1072_v35, 0.0 }
 0x2a1   : > { %v1194_v12 = vsel %vm1109_vm2, %v1070_v38, 0.0  ;;  %1198 = vadd.xlane.f32.xlu0 %v1197_v39 }
 0x2a2   : > { %1195 = vadd.xlane.f32.xlu1 %v1194_v12 }
 0x2a3   : > { %v1076_v46 = vpop.permute.xlu1 %1075 }
 0x2a4   : > { %v1074_v50 = vpop.permute.xlu0 %1073  ;;  %v1203_v53 = vsel %vm1109_vm2, %v1076_v46, 0.0 }
 0x2a5   : > { %v1200_v58 = vsel %vm1109_vm2, %v1074_v50, 0.0  ;;  %1204 = vadd.xlane.f32.xlu0 %v1203_v53  ;;  %vm1436_vm2 = vcmp.le.f32.partialorder %v8205_v57, 25.0 }
 0x2a6   : > { %1201 = vadd.xlane.f32.xlu1 %v1200_v58 }
 0x2d4   : > { %v8238_v59 = vpop.xlane.xlu1 %1138  ;;  %v8240_v1 = vpop.xlane.xlu0 %1135 }
 0x2d5   : > { %v1956_v2 = vsub.f32 %v8238_v59, %v8173_v60  ;;  %v1955_v5 = vsub.f32 %v8240_v1, %v8173_v60 }
 0x2d7   : > { %v1988_v0 = vmul.f32 %v1956_v2, %v1956_v2  ;;  %v1987_v8 = vmul.f32 %v1955_v5, %v1955_v5 }
 0x2d8   : > { %v8246_v9 = vpop.xlane.xlu0 %1141  ;;  %v8248_v11 = vpop.xlane.xlu1 %1147 }
 0x2d9   : > { %v2020_v14 = vmul.f32 -4.5, %v1988_v0  ;;  %v2019_v17 = vmul.f32 -4.5, %v1987_v8  ;;  %v1957_v21 = vsub.f32 %v8246_v9, %v8173_v60  ;;  %v1959_v22 = vsub.f32 %v8248_v11, %v8173_v60 }
 0x2db   : > { %v2061_v23 = vmul.f32 1.442695, %v2020_v14  ;;  %v2059_v25 = vmul.f32 1.442695, %v2019_v17  ;;  %v1989_v26 = vmul.f32 %v1957_v21, %v1957_v21  ;;  %v1991_v29 = vmul.f32 %v1959_v22, %v1959_v22  ;;  %v6182_v22 = vld [vmem:[#allocation7 + $0x10] ss:$0 sm:$0xff] }
 0x2dc   : > { %v8254_v28 = vpop.xlane.xlu0 %1144  ;;  %v8258_v33 = vpop.xlane.xlu1 %1153 }
 0x2dd   : > { %6837 = vpow2.f32 %v2061_v23  ;;  %v2021_v31 = vmul.f32 -4.5, %v1989_v26  ;;  %v1958_v32 = vsub.f32 %v8254_v28, %v8173_v60  ;;  %v2023_v38 = vmul.f32 -4.5, %v1991_v29 }
 0x2de   : > { %6839 = vpow2.f32 %v2059_v25  ;;  %v1961_v12 = vsub.f32 %v8258_v33, %v8173_v60 }
 0x2df   : > { %v2063_v34 = vmul.f32 1.442695, %v2021_v31  ;;  %v1990_v35 = vmul.f32 %v1958_v32, %v1958_v32  ;;  %v2067_v2 = vmul.f32 1.442695, %v2023_v38  ;;  %v6185_v31 = vld [vmem:[#allocation7 + $0x11] ss:$0 sm:$0xff]  ;;  %v612_v38 = vmul.f32 %v6182_v22, %v8155_v40 }
 0x2e0   : > { %v8260_v39 = vpop.xlane.xlu0 %1150  ;;  %v1993_v53 = vmul.f32 %v1961_v12, %v1961_v12  ;;  %v6186_v12 = vld [vmem:[#allocation7 + $0x12] ss:$0 sm:$0xff] }
 0x2e1   : > { %11037 = vst [vmem:[#allocation31_spill] sm:$0xff] %v8260_v39  ;;  %v2022_v46 = vmul.f32 -4.5, %v1990_v35  ;;  %v1960_v50 = vsub.f32 %v8260_v39, %v8173_v60  ;;  %6841 = vpow2.f32 %v2063_v34  ;;  %v613_v35 = vmul.f32 %v6182_v22, %v8159_v44  ;;  %v6187_v22 = vld [vmem:[#allocation8] ss:$0 sm:$0xff] }
 0x2e2   : > { %v2025_v0 = vmul.f32 -4.5, %v1993_v53  ;;  %v710_v53 = vmul.f32 %v6185_v31, %v8164_v47  ;;  %v726_v40 = vmul.f32 %v6186_v12, %v8168_v52 }
 0x2e3   : > { %v2065_v58 = vmul.f32 1.442695, %v2022_v46  ;;  %v1992_v5 = vmul.f32 %v1960_v50, %v1960_v50 }
 0x2e4   : > { %v8266_v8 = vpop.xlane.xlu0 %1156  ;;  %v2071_v25 = vmul.f32 1.442695, %v2025_v0  ;;  %v709_v0 = vmul.f32 %v6185_v31, %v8166_v51 }
 0x2e5   : > { %11038 = vst [vmem:[#allocation32_spill] sm:$0xff] %v8266_v8  ;;  %6843 = vpow2.f32 %v2065_v58  ;;  %v2024_v14 = vmul.f32 -4.5, %v1992_v5  ;;  %v1962_v17 = vsub.f32 %v8266_v8, %v8173_v60 }
 0x2e6   : > { %6845 = vpow2.f32 %v2067_v2  ;;  %v6464_v50 = vpop.f32.mrb[2].mxu0 }
 0x2e7   : > { %v6838_v21 = vpop.eup %6837  ;;  %v2069_v23 = vmul.f32 1.442695, %v2024_v14  ;;  %v1994_v26 = vmul.f32 %v1962_v17, %v1962_v17  ;;  %v693_v58 = vadd.f32 %v6464_v50, %v613_v35  ;;  %v687_v2 = vpop.f32.mrb[3].mxu0  ;;  %v727_v17 = vmul.f32 %v6186_v12, %v8171_v56 }
 0x2e8   : > { %v6840_v29 = vpop.eup %6839  ;;  %v688_v14 = vadd.f32 %v687_v2, %v612_v38  ;;  %v8287_v12 = vpop.xlane.xlu1 %1159 }
 0x2e9   : > { %6847 = vpow2.f32 %v2069_v23  ;;  %v2111_v32 = vpack.c.bf16 %v6838_v21, %v6840_v29  ;;  %v2026_v34 = vmul.f32 -4.5, %v1994_v26  ;;  %v712_v44 = vadd.f32 %v710_v53, %v693_v58 }
 0x2ea   : > { %6849 = vpow2.f32 %v2071_v25  ;;  %v711_v23 = vadd.f32 %v709_v0, %v688_v14  ;;  %vm1446_vm9 = vcmp.le.f32.partialorder %v8287_v12, 25.0 }
 0x2eb   : > { %6475 = vmatprep.mubr.msk.bf16.mxu1 %vm614_vm3, %v2111_v32  ;;  %v2073_v46 = vmul.f32 1.442695, %v2026_v34  ;;  %v6842_v5 = vpop.eup %6841  ;;  %v729_v25 = vadd.f32 %v727_v17, %v712_v44 }
 0x2ec   : > { %v728_v32 = vadd.f32 %v726_v40, %v711_v23 }
 0x2ed   : > { %6851 = vpow2.f32 %v2073_v46  ;;  %v8277_v47 = vadd.f32 %v6187_v22, %v729_v25  ;;  %v1963_v46 = vsub.f32 %v8287_v12, %v8173_v60 }
 0x2ee   : > { %v8280_v51 = vadd.f32 %v6187_v22, %v728_v32 }
 0x2ef   : > { %v6844_v21 = vpop.eup %6843  ;;  %11039 = vst [vmem:[#allocation33_spill] sm:$0xff] %v8277_v47  ;;  %v1995_v50 = vmul.f32 %v1963_v46, %v1963_v46 }
 0x2f0   : > { %v2112_v26 = vpack.c.bf16 %v6844_v21, %v6842_v5  ;;  %v6846_v29 = vpop.eup %6845  ;;  %11040 = vst [vmem:[#allocation34_spill] sm:$0xff] %v8280_v51  ;;  %v2357_v35 = vpack.c.bf16 %v8277_v47, %v8280_v51 }
 0x2f1   : > { %v2027_v53 = vmul.f32 -4.5, %v1995_v50 }
 0x2f2   : > { %6476 = vmatmul.mubr.msk.bf16.vlgmr.msra.gmra.mrb[0].mxu1 %vm614_vm3, %v2112_v26  ;;  %6504 = vmatmul.mubr.msk.bf16.vlgmr.msra.gmra.mrb[12].mxu0 %vm2370_vm5, %v2357_v35 }
 0x2f3   : > { %v6848_v34 = vpop.eup %6847  ;;  %v2075_v5 = vmul.f32 1.442695, %v2027_v53 }
 0x2f4   : > { %v2113_v31 = vpack.c.bf16 %v6848_v34, %v6846_v29  ;;  %v6850_v56 = vpop.eup %6849 }
 0x2f5   : > { %6853 = vpow2.f32 %v2075_v5 }
 0x2f6   : > { %6479 = vmatprep.mubr.msk.bf16.mxu1 %vm614_vm3, %v2113_v31 }
 0x2f7   : > { %v6852_v52 = vpop.eup %6851 }
 0x2f8   : > { %v2114_v38 = vpack.c.bf16 %v6852_v52, %v6850_v56 }
 0x2fa   : > { %6480 = vmatmul.mubr.msk.bf16.gmra.mrb[4].mxu1 %vm614_vm3, %v2114_v38 }
 0x316   : > { %v8291_v58 = vpop.xlane.xlu0 %1162 }
 0x317   : > { %v1964_v2 = vsub.f32 %v8291_v58, %v8173_v60  ;;  %vm1447_vm12 = vcmp.le.f32.partialorder %v8291_v58, 25.0 }
 0x319   : > { %v1996_v0 = vmul.f32 %v1964_v2, %v1964_v2 }
 0x31a   : > { %v8295_v14 = vpop.xlane.xlu1 %1165  ;;  %v8297_v17 = vpop.xlane.xlu0 %1168 }
 0x31b   : > { %v2028_v44 = vmul.f32 -4.5, %v1996_v0  ;;  %v1965_v21 = vsub.f32 %v8295_v14, %v8173_v60  ;;  %v1966_v40 = vsub.f32 %v8297_v17, %v8173_v60  ;;  %vm1448_vm11 = vcmp.le.f32.partialorder %v8295_v14, 25.0 }
 0x31c   : > { %vm1449_vm13 = vcmp.le.f32.partialorder %v8297_v17, 25.0 }
 0x31d   : > { %v2077_v22 = vmul.f32 1.442695, %v2028_v44  ;;  %v1997_v23 = vmul.f32 %v1965_v21, %v1965_v21  ;;  %v1998_v25 = vmul.f32 %v1966_v40, %v1966_v40 }
 0x31e   : > { %v8303_v26 = vpop.xlane.xlu1 %1171  ;;  %v8305_v29 = vpop.xlane.xlu0 %1174 }
 0x31f   : > { %6855 = vpow2.f32 %v2077_v22  ;;  %v2029_v32 = vmul.f32 -4.5, %v1997_v23  ;;  %v1967_v34 = vsub.f32 %v8303_v26, %v8173_v60  ;;  %v2030_v31 = vmul.f32 -4.5, %v1998_v25 }
 0x320   : > { %v1968_v56 = vsub.f32 %v8305_v29, %v8173_v60  ;;  %vm1450_vm15 = vcmp.le.f32.partialorder %v8303_v26, 25.0  ;;  %vm1451_vm1 = vcmp.le.f32.partialorder %v8305_v29, 25.0 }
 0x321   : > { %v2079_v35 = vmul.f32 1.442695, %v2029_v32  ;;  %v1999_v52 = vmul.f32 %v1967_v34, %v1967_v34  ;;  %v2081_v38 = vmul.f32 1.442695, %v2030_v31  ;;  %v6854_v32 = vpop.eup %6853 }
 0x322   : > { %v2000_v46 = vmul.f32 %v1968_v56, %v1968_v56  ;;  %v8311_v50 = vpop.xlane.xlu1 %1177  ;;  %v8313_v53 = vpop.xlane.xlu0 %1180 }
 0x323   : > { %v2031_v2 = vmul.f32 -4.5, %v1999_v52  ;;  %v1969_v5 = vsub.f32 %v8311_v50, %v8173_v60  ;;  %6857 = vpow2.f32 %v2079_v35  ;;  %v1970_v22 = vsub.f32 %v8313_v53, %v8173_v60 }
 0x324   : > { %v2032_v0 = vmul.f32 -4.5, %v2000_v46  ;;  %6859 = vpow2.f32 %v2081_v38 }
 0x325   : > { %v2083_v44 = vmul.f32 1.442695, %v2031_v2  ;;  %v2001_v21 = vmul.f32 %v1969_v5, %v1969_v5  ;;  %v2002_v56 = vmul.f32 %v1970_v22, %v1970_v22 }
 0x326   : > { %v2085_v40 = vmul.f32 1.442695, %v2032_v0  ;;  %v8319_v23 = vpop.xlane.xlu1 %1183  ;;  %v8321_v25 = vpop.xlane.xlu0 %1186 }
 0x327   : > { %v2033_v34 = vmul.f32 -4.5, %v2001_v21  ;;  %v1971_v31 = vsub.f32 %v8319_v23, %v8173_v60  ;;  %6861 = vpow2.f32 %v2083_v44  ;;  %v2034_v38 = vmul.f32 -4.5, %v2002_v56 }
 0x328   : > { %6863 = vpow2.f32 %v2085_v40  ;;  %v1972_v5 = vsub.f32 %v8321_v25, %v8173_v60 }
 0x329   : > { %v6856_v52 = vpop.eup %6855  ;;  %v2087_v35 = vmul.f32 1.442695, %v2033_v34  ;;  %v2003_v46 = vmul.f32 %v1971_v31, %v1971_v31  ;;  %v2089_v44 = vmul.f32 1.442695, %v2034_v38 }
 0x32a   : > { %v2115_v2 = vpack.c.bf16 %v6856_v52, %v6854_v32  ;;  %v8329_v45 = vpop.xlane.xlu0 %1192  ;;  %v2004_v22 = vmul.f32 %v1972_v5, %v1972_v5 }
 0x32b   : > { %v8327_v0 = vpop.xlane.xlu1 %1189  ;;  %11042 = vst [vmem:[#allocation36_spill] sm:$0xff] %v8329_v45  ;;  %v2035_v47 = vmul.f32 -4.5, %v2003_v46  ;;  %6865 = vpow2.f32 %v2087_v35  ;;  %v1974_v31 = vsub.f32 %v8329_v45, %v8173_v60 }
 0x32c   : > { %11041 = vst [vmem:[#allocation35_spill] sm:$0xff] %v8327_v0  ;;  %v1973_v21 = vsub.f32 %v8327_v0, %v8173_v60  ;;  %6483 = vmatprep.mubr.msk.bf16.mxu1 %vm614_vm3, %v2115_v2  ;;  %6867 = vpow2.f32 %v2089_v44  ;;  %v2036_v40 = vmul.f32 -4.5, %v2004_v22 }
 0x32d   : > { %v2091_v34 = vmul.f32 1.442695, %v2035_v47  ;;  %v6858_v46 = vpop.eup %6857  ;;  %v2006_v38 = vmul.f32 %v1974_v31, %v1974_v31 }
 0x32e   : > { %v2005_v32 = vmul.f32 %v1973_v21, %v1973_v21  ;;  %v8338_v52 = vpop.xlane.xlu0 %1198  ;;  %v6860_v2 = vpop.eup %6859  ;;  %v2093_v35 = vmul.f32 1.442695, %v2036_v40 }
 0x32f   : > { %v8336_v56 = vpop.xlane.xlu1 %1195  ;;  %11044 = vst [vmem:[#allocation38_spill] sm:$0xff] %v8338_v52  ;;  %6869 = vpow2.f32 %v2091_v34  ;;  %v2038_v21 = vmul.f32 -4.5, %v2006_v38  ;;  %v1976_v44 = vsub.f32 %v8338_v52, %v8173_v60  ;;  %v2116_v0 = vpack.c.bf16 %v6860_v2, %v6858_v46 }
 0x330   : > { %11043 = vst [vmem:[#allocation37_spill] sm:$0xff] %v8336_v56  ;;  %v2037_v51 = vmul.f32 -4.5, %v2005_v32  ;;  %v1975_v3 = vsub.f32 %v8336_v56, %v8173_v60  ;;  %6871 = vpow2.f32 %v2093_v35 }
 0x331   : > { %v6862_v45 = vpop.eup %6861  ;;  %v2097_v56 = vmul.f32 1.442695, %v2038_v21  ;;  %v2008_v34 = vmul.f32 %v1976_v44, %v1976_v44  ;;  %6484 = vmatmul.mubr.msk.bf16.gmra.mrb[8].mxu1 %vm614_vm3, %v2116_v0 }
 0x332   : > { %v2095_v47 = vmul.f32 1.442695, %v2037_v51  ;;  %v2007_v5 = vmul.f32 %v1975_v3, %v1975_v3  ;;  %v8346_v13 = vpop.xlane.xlu0 %1204  ;;  %v6864_v8 = vpop.eup %6863 }
 0x333   : > { %v8344_v22 = vpop.xlane.xlu1 %1201  ;;  %v1978_v40 = vsub.f32 %v8346_v13, %v8173_v60  ;;  %v2040_v35 = vmul.f32 -4.5, %v2008_v34 }
 0x334   : > { %11045 = vst [vmem:[#allocation39_spill] sm:$0xff] %v8344_v22  ;;  %v2039_v32 = vmul.f32 -4.5, %v2007_v5  ;;  %6873 = vpow2.f32 %v2095_v47  ;;  %v1977_v51 = vsub.f32 %v8344_v22, %v8173_v60  ;;  %v2117_v5 = vpack.c.bf16 %v6864_v8, %v6862_v45 }
 0x335   : > { %v6866_v31 = vpop.eup %6865  ;;  %6875 = vpow2.f32 %v2097_v56  ;;  %v2010_v52 = vmul.f32 %v1978_v40, %v1978_v40  ;;  %v2101_v2 = vmul.f32 1.442695, %v2040_v35 }
 0x336   : > { %v2099_v3 = vmul.f32 1.442695, %v2039_v32  ;;  %v2009_v38 = vmul.f32 %v1977_v51, %v1977_v51  ;;  %v6868_v46 = vpop.eup %6867  ;;  %6487 = vmatprep.mubr.msk.bf16.mxu1 %vm614_vm3, %v2117_v5 }
 0x337   : > { %v2042_v21 = vmul.f32 -4.5, %v2010_v52  ;;  %v2118_v44 = vpack.c.bf16 %v6868_v46, %v6866_v31 }
 0x338   : > { %6877 = vpow2.f32 %v2099_v3  ;;  %v2041_v47 = vmul.f32 -4.5, %v2009_v38 }
 0x339   : > { %v6870_v32 = vpop.eup %6869  ;;  %6879 = vpow2.f32 %v2101_v2  ;;  %v2105_v22 = vmul.f32 1.442695, %v2042_v21  ;;  %6488 = vmatmul.mubr.msk.bf16.gmra.mrb[12].mxu1 %vm614_vm3, %v2118_v44 }
 0x33a   : > { %v2103_v0 = vmul.f32 1.442695, %v2041_v47  ;;  %v6872_v39 = vpop.eup %6871 }
 0x33b   : > { %v2119_v60 = vpack.c.bf16 %v6872_v39, %v6870_v32  ;;  %v6805_v32 = vld [vmem:[#allocation13] sm:$0xff]  }
 0x33c   : > { %6881 = vpow2.f32 %v2103_v0  ;;  %6507 = vmatprep.subr.bf16.mxu0 %v6805_v32 }
 0x33d   : > { %6883 = vpow2.f32 %v2105_v22  ;;  %6491 = vmatprep.mubr.msk.bf16.mxu1 %vm614_vm3, %v2119_v60  ;;  %v11046_v22 = vmov 0.0   ;;  %6508 = vmatpush3.bf16.msra.mxu0 %v6805_v32 }
 0x33e   : > { %v6874_v56 = vpop.eup %6873  ;;  %v8516_v36 = vsel %vm1431_vm8, 1.0, %v11046_v22  ;;  %v8531_v12 = vsel %vm1433_vm10, 1.0, %v11046_v22  ;;  %v8595_v26 = vsel %vm1435_vm0, 1.0, %v11046_v22  ;;  %vm1438_vm8 = vcmp.le.f32.partialorder %v8240_v1, 25.0 }
 0x33f   : > { %v6876_v45 = vpop.eup %6875  ;;  %11074 = vst [vmem:[#allocation67_spill] sm:$0xff] %v8531_v12  ;;  %11084 = vst [vmem:[#allocation77_spill] sm:$0xff] %v8595_v26  ;;  %vm1439_vm10 = vcmp.le.f32.partialorder %v8238_v59, 25.0 }
 0x340   : > { %v2120_v8 = vpack.c.bf16 %v6876_v45, %v6874_v56  ;;  %v6806_v45 = vld [vmem:[#allocation13 + $0x8] sm:$0xff]  }
 0x341   : > { %6509 = vmatprep.subr.bf16.mxu0 %v6806_v45 }
 0x342   : > { %v6878_v34 = vpop.eup %6877  ;;  %6492 = vmatmul.mubr.msk.bf16.gmra.mrb[16].mxu1 %vm614_vm3, %v2120_v8  ;;  %6510 = vmatpush3.bf16.msra.mxu0 %v6806_v45 }
 0x343   : > { %v6880_v52 = vpop.eup %6879  ;;  %6559 = vmatprep.subr.bf16.mxu0 %v11046_v22 }
 0x344   : > { %v2121_v51 = vpack.c.bf16 %v6880_v52, %v6878_v34 }
 0x346   : > { %v6882_v3 = vpop.eup %6881  ;;  %6495 = vmatprep.mubr.msk.bf16.mxu1 %vm614_vm3, %v2121_v51 }
 0x347   : > { %v6884_v40 = vpop.eup %6883 }
 0x348   : > { %v2122_v31 = vpack.c.bf16 %v6884_v40, %v6882_v3  ;;  %v8394_v3 = vld [vmem:[%s7931_s28] sm:$0xff] }
 0x349   : > { %v8398_v40 = vmul.f32 %v8394_v3, %v7982_v19  ;;  %v8409_v45 = vmul.f32 %v8394_v3, %v7991_v24  ;;  %v8616_v29 = vmul.f32 %v8394_v3, %v8030_v49 }
 0x34a   : > { %6496 = vmatmul.mubr.msk.bf16.gmra.mrb[20].mxu1 %vm614_vm3, %v2122_v31  ;;  %vm1452_vm3 = vcmp.le.f32.partialorder %v8311_v50, 25.0 }
 0x34b   : > { %6547 = vmatprep.mubr.msk.bf16.mxu1 %vm7536_vm4, %v11046_v22  ;;  %11089 = vst [vmem:[#allocation82_spill] sm:$0xff] %v8616_v29 }
 0x369   : > { %v8361_v39 = vpop.f32.mrb[4].mxu0 }
 0x36a   : > { %11047 = vst [vmem:[#allocation40_spill] sm:$0xff] %v8361_v39  ;;  %v8363_v35 = vpop.f32.mrb[5].mxu0 }
 0x36b   : > { %11048 = vst [vmem:[#allocation41_spill] sm:$0xff] %v8363_v35  ;;  %v8365_v38 = vpop.f32.mrb[6].mxu0 }
 0x36c   : > { %11049 = vst [vmem:[#allocation42_spill] sm:$0xff] %v8365_v38  ;;  %v8367_v5 = vpop.f32.mrb[7].mxu0 }
 0x36d   : > { %11050 = vst [vmem:[#allocation43_spill] sm:$0xff] %v8367_v5 }
 0x371   : > { %v8369_v46 = vpop.f32.mrb[8].mxu0 }
 0x372   : > { %11051 = vst [vmem:[#allocation44_spill] sm:$0xff] %v8369_v46  ;;  %v8371_v2 = vpop.f32.mrb[9].mxu0  ;;  %v8507_v46 = vsel %vm1432_vm7, 1.0, %v11046_v22  ;;  %vm1453_vm7 = vcmp.le.f32.partialorder %v8313_v53, 25.0  ;;  %v8684_v53 = vmul.f32 %v8394_v3, %v8053_v62 }
 0x373   : > { %11052 = vst [vmem:[#allocation45_spill] sm:$0xff] %v8371_v2  ;;  %v8373_v47 = vpop.f32.mrb[10].mxu0  ;;  %v1528_v10 = vmul.f32 %v8507_v46, %v8409_v45 }
 0x374   : > { %11053 = vst [vmem:[#allocation46_spill] sm:$0xff] %v8373_v47  ;;  %v8375_v21 = vpop.f32.mrb[11].mxu0  ;;  %v8492_v47 = vsel %vm1430_vm6, 1.0, %v11046_v22  ;;  %vm1437_vm6 = vcmp.le.f32.partialorder %v8213_v20, 25.0  ;;  %11105 = vst [vmem:[#allocation98_spill] sm:$0xff] %v8684_v53 }
 0x375   : > { %11054 = vst [vmem:[#allocation47_spill] sm:$0xff] %v8375_v21  ;;  %11071 = vst [vmem:[#allocation64_spill] sm:$0xff] %v8492_v47 }
 0x3c5   : > { %v8377_v44 = vpop.f32.mrb[0].mxu1  ;;  %v8385_v8 = vpop.f32.mrb[12].mxu0 }
 0x3c6   : > { %11055 = vst [vmem:[#allocation48_spill] sm:$0xff] %v8377_v44  ;;  %v8379_v0 = vpop.f32.mrb[1].mxu1  ;;  %11059 = vst [vmem:[#allocation52_spill] sm:$0xff] %v8385_v8  ;;  %2595 = vrot.lane.b32.xlu1 %v8385_v8, %s7537_s26  ;;  %v6505_v34 = vpop.f32.mrb[13].mxu0  ;;  %v8450_v44 = vmul.f32 %v8394_v3, %v8001_v30 }
 0x3c7   : > { %11056 = vst [vmem:[#allocation49_spill] sm:$0xff] %v8379_v0  ;;  %v8381_v60 = vpop.f32.mrb[2].mxu1  ;;  %v8389_v52 = vpop.f32.mrb[14].mxu0  ;;  %v8474_v0 = vmul.f32 %v8394_v3, %v8011_v37 }
 0x3c8   : > { %11057 = vst [vmem:[#allocation50_spill] sm:$0xff] %v8381_v60  ;;  %v8383_v56 = vpop.f32.mrb[3].mxu1  ;;  %11060 = vst [vmem:[#allocation53_spill] sm:$0xff] %v8389_v52  ;;  %2597 = vrot.lane.b32.xlu0 %v8389_v52, %s7537_s26  ;;  %v6506_v51 = vpop.f32.mrb[15].mxu0  ;;  %v8428_v60 = vmul.f32 %v8394_v3, %v8070_v18 }
 0x3c9   : > { %11058 = vst [vmem:[#allocation51_spill] sm:$0xff] %v8383_v56  ;;  %11065 = vst [vmem:[#allocation58_spill] sm:$0xff] %v8450_v44  ;;  %v8462_v56 = vmul.f32 %v8394_v3, %v8095_v48 }
 0x3ca   : > { %1302 = vrot.lane.b32.xlu1 %v8398_v40, %s7538_s3  ;;  %11068 = vst [vmem:[#allocation61_spill] sm:$0xff] %v8474_v0 }
 0x3cb   : > { %11066 = vst [vmem:[#allocation59_spill] sm:$0xff] %v8462_v56 }
 0x3cc   : > { %1306 = vrot.lane.b32.xlu0 %v8409_v45, %s7538_s3 }
 0x3cd   : > { %v8400_v31 = vpop.f32.mrb[4].mxu1 }
 0x3ce   : > { %11061 = vst [vmem:[#allocation54_spill] sm:$0xff] %v8400_v31  ;;  %v8402_v32 = vpop.f32.mrb[5].mxu1  ;;  %v8418_v31 = vld [vmem:[%s7931_s28 + $0x8] sm:$0xff]  ;;  %s10695_s28 = scalar_lea.hbm %s11415_s17, %s6365_s2 }
 0x3cf   : > { %11062 = vst [vmem:[#allocation55_spill] sm:$0xff] %v8402_v32  ;;  %v8411_v34 = vpop.f32.mrb[6].mxu1  ;;  %v8422_v32 = vmul.f32 %v8418_v31, %v7982_v19  ;;  %v8440_v19 = vmul.f32 %v8394_v3, %v8086_v41  ;;  %v8497_v4 = vmul.f32 %v8418_v31, %v8011_v37  ;;  %v8512_v37 = vmul.f32 %v8418_v31, %v8102_v54 }
 0x3d0   : > { %11063 = vst [vmem:[#allocation56_spill] sm:$0xff] %v8411_v34  ;;  %v8413_v51 = vpop.f32.mrb[7].mxu1  ;;  %1334 = vrot.lane.b32.xlu0 %v8428_v60, %s7538_s3  ;;  %v8434_v34 = vmul.f32 %v8418_v31, %v7991_v24  ;;  %v8458_v24 = vmul.f32 %v8418_v31, %v8086_v41  ;;  %v8481_v41 = vmul.f32 %v8418_v31, %v8095_v48 }
 0x3d1   : > { %11064 = vst [vmem:[#allocation57_spill] sm:$0xff] %v8413_v51  ;;  %1304 = vrot.lane.b32.xlu1 %v8422_v32, %s7538_s3  ;;  %v8446_v51 = vmul.f32 %v8418_v31, %v8070_v18  ;;  %v8468_v18 = vmul.f32 %v8418_v31, %v8001_v30  ;;  %v8487_v30 = vmul.f32 %v8394_v3, %v8102_v54  ;;  %11072 = vst [vmem:[#allocation65_spill] sm:$0xff] %v8497_v4 }
 0x3d2   : > { %11069 = vst [vmem:[#allocation62_spill] sm:$0xff] %v8481_v41  ;;  %v1526_v48 = vmul.f32 %v8492_v47, %v8398_v40  ;;  %11073 = vst [vmem:[#allocation66_spill] sm:$0xff] %v8512_v37  ;;  %v8524_v47 = vsel %vm1446_vm9, 1.0, %v11046_v22  ;;  %v1527_v54 = vmul.f32 %v8516_v36, %v8422_v32  ;;  %v1529_v14 = vmul.f32 %v8531_v12, %v8434_v34 }
 0x3d3   : > { %11067 = vst [vmem:[#allocation60_spill] sm:$0xff] %v8468_v18  ;;  %11070 = vst [vmem:[#allocation63_spill] sm:$0xff] %v8487_v30  ;;  %v1542_v42 = vmul.f32 %v8524_v47, %v8428_v60  ;;  %v8558_v12 = vmul.f32 %v8394_v3, %v8020_v43  ;;  %v8638_v57 = vmul.f32 %v8418_v31, %v8030_v49  ;;  %v8655_v49 = vsel %vm1452_vm3, 1.0, %v11046_v22 }
 0x3d4   : > { %1338 = vrot.lane.b32.xlu0 %v8440_v19, %s7538_s3  ;;  %11098 = vst [vmem:[#allocation91_spill] sm:$0xff] %v8655_v49  ;;  %v8659_v50 = vmul.f32 %v8418_v31, %v8120_v6  ;;  %v1548_v20 = vmul.f32 %v8655_v49, %v8487_v30  ;;  %v8706_v1 = vmul.f32 %v8418_v31, %v8053_v62  ;;  %vm1454_vm9 = vcmp.le.f32.partialorder %v8319_v23, 25.0 }
 0x3d5   : > { %1308 = vrot.lane.b32.xlu1 %v8434_v34, %s7538_s3  ;;  %11078 = vst [vmem:[#allocation71_spill] sm:$0xff] %v8558_v12  ;;  %11094 = vst [vmem:[#allocation87_spill] sm:$0xff] %v8638_v57  ;;  %v8723_v62 = vsel %vm1454_vm9, 1.0, %v11046_v22  ;;  %v8727_v23 = vmul.f32 %v8418_v31, %v8129_v16  ;;  %vm1461_vm9 = vcmp.le.f32.partialorder %v8346_v13, 25.0 }
 0x3d6   : > { %11099 = vst [vmem:[#allocation92_spill] sm:$0xff] %v8659_v50  ;;  %11110 = vst [vmem:[#allocation103_spill] sm:$0xff] %v8706_v1 }
 0x3d7   : > { %11114 = vst [vmem:[#allocation107_spill] sm:$0xff] %v8723_v62  ;;  %11115 = vst [vmem:[#allocation108_spill] sm:$0xff] %v8727_v23 }
 0x3d8   : > { %1310 = vrot.lane.b32.xlu0 %v8450_v44, %s7538_s3 }
 0x3d9   : > { %1336 = vrot.lane.b32.xlu1 %v8446_v51, %s7538_s3 }
 0x3dc   : > { %1342 = vrot.lane.b32.xlu0 %v8462_v56, %s7538_s3 }
 0x3dd   : > { %1340 = vrot.lane.b32.xlu1 %v8458_v24, %s7538_s3 }
 0x3e0   : > { %1314 = vrot.lane.b32.xlu0 %v8474_v0, %s7538_s3 }
 0x3e1   : > { %1312 = vrot.lane.b32.xlu1 %v8468_v18, %s7538_s3 }
 0x3e4   : > { %1346 = vrot.lane.b32.xlu0 %v8487_v30, %s7538_s3 }
 0x3e5   : > { %1344 = vrot.lane.b32.xlu1 %v8481_v41, %s7538_s3 }
 0x3e8   : > { %1590 = vrot.lane.b32.xlu0 %v1526_v48, %s7538_s3  ;;  %v8538_v48 = vsel %vm1448_vm11, 1.0, %v11046_v22  ;;  %vm1455_vm11 = vcmp.le.f32.partialorder %v8321_v25, 25.0  ;;  %v8751_v25 = vmul.f32 %v8394_v3, %v8040_v55 }
 0x3e9   : > { %1316 = vrot.lane.b32.xlu1 %v8497_v4, %s7538_s3  ;;  %11075 = vst [vmem:[#allocation68_spill] sm:$0xff] %v8538_v48  ;;  %v1544_v58 = vmul.f32 %v8538_v48, %v8440_v19 }
 0x3ea   : > { %11118 = vst [vmem:[#allocation111_spill] sm:$0xff] %v8751_v25 }
 0x3ec   : > { %1594 = vrot.lane.b32.xlu0 %v1528_v10, %s7538_s3  ;;  %v8544_v10 = vsel %vm1447_vm12, 1.0, %v11046_v22  ;;  %vm1440_vm12 = vcmp.le.f32.partialorder %v8246_v9, 25.0 }
 0x3ed   : > { %1348 = vrot.lane.b32.xlu1 %v8512_v37, %s7538_s3  ;;  %11076 = vst [vmem:[#allocation69_spill] sm:$0xff] %v8544_v10 }
 0x3f0   : > { %1622 = vrot.lane.b32.xlu0 %v1542_v42, %s7538_s3  ;;  %v8554_v42 = vsel %vm1449_vm13, 1.0, %v11046_v22  ;;  %vm1441_vm13 = vcmp.le.f32.partialorder %v8254_v28, 25.0 }
 0x3f1   : > { %1592 = vrot.lane.b32.xlu1 %v1527_v54, %s7538_s3  ;;  %v1543_v54 = vmul.f32 %v8544_v10, %v8446_v51  ;;  %11077 = vst [vmem:[#allocation70_spill] sm:$0xff] %v8554_v42  ;;  %v1545_v17 = vmul.f32 %v8554_v42, %v8458_v24  ;;  %v1531_v42 = vmul.f32 %v8595_v26, %v8468_v18  ;;  %v8632_v18 = vsel %vm1436_vm2, 1.0, %v11046_v22 }
 0x3f2   : > { %v8628_v26 = vmul.f32 %v8394_v3, %v8120_v6  ;;  %11092 = vst [vmem:[#allocation85_spill] sm:$0xff] %v8632_v18  ;;  %v8663_v10 = vsel %vm1437_vm6, 1.0, %v11046_v22  ;;  %v8763_v28 = vsel %vm1441_vm13, 1.0, %v11046_v22  ;;  %vm3964_vm13 = vcmask 1044484  }
 0x3f3   : > { %11100 = vst [vmem:[#allocation93_spill] sm:$0xff] %v8663_v10  ;;  %11120 = vst [vmem:[#allocation113_spill] sm:$0xff] %v8763_v28 }
 0x3f4   : > { %1626 = vrot.lane.b32.xlu0 %v1544_v58, %s7538_s3  ;;  %v8572_v58 = vsel %vm1434_vm14, 1.0, %v11046_v22  ;;  %11091 = vst [vmem:[#allocation84_spill] sm:$0xff] %v8628_v26  ;;  %vm1442_vm14 = vcmp.le.f32.partialorder %v8248_v11, 25.0 }
 0x3f5   : > { %1596 = vrot.lane.b32.xlu1 %v1529_v14, %s7538_s3  ;;  %v8568_v14 = vmul.f32 %v8394_v3, %v8111_v61  ;;  %11080 = vst [vmem:[#allocation73_spill] sm:$0xff] %v8572_v58  ;;  %v1530_v15 = vmul.f32 %v8572_v58, %v8450_v44  ;;  %v8766_v11 = vsel %vm1442_vm14, 1.0, %v11046_v22  ;;  %vm3966_vm14 = vcmask 1045509  }
 0x3f6   : > { %11121 = vst [vmem:[#allocation114_spill] sm:$0xff] %v8766_v11 }
 0x3f7   : > { %11079 = vst [vmem:[#allocation72_spill] sm:$0xff] %v8568_v14  ;;  %v1550_v59 = vmul.f32 %v8723_v62, %v8568_v14 }
 0x3f8   : > { %1318 = vrot.lane.b32.xlu0 %v8558_v12, %s7538_s3 }
 0x3f9   : > { %1624 = vrot.lane.b32.xlu1 %v1543_v54, %s7538_s3  ;;  %v8576_v54 = vmul.f32 %v8418_v31, %v8020_v43  ;;  %v8591_v43 = vmul.f32 %v8418_v31, %v8111_v61 }
 0x3fb   : > { %11081 = vst [vmem:[#allocation74_spill] sm:$0xff] %v8576_v54  ;;  %11083 = vst [vmem:[#allocation76_spill] sm:$0xff] %v8591_v43 }
 0x3fc   : > { %1350 = vrot.lane.b32.xlu0 %v8568_v14, %s7538_s3  ;;  %v11127_v14 = vld [vmem:[#allocation35_spill] sm:$0xff] }
 0x3fd   : > { %1628 = vrot.lane.b32.xlu1 %v1545_v17, %s7538_s3  ;;  %v8587_v17 = vsel %vm1450_vm15, 1.0, %v11046_v22  ;;  %vm1444_vm15 = vcmp.le.f32.partialorder %v8258_v33, 25.0  ;;  %v11126_v33 = vld [vmem:[#allocation32_spill] sm:$0xff]  ;;  %vm1456_vm2 = vcmp.le.f32.partialorder %v11127_v14, 25.0 }
 0x3fe   : > { %11082 = vst [vmem:[#allocation75_spill] sm:$0xff] %v8587_v17  ;;  %v1546_v58 = vmul.f32 %v8587_v17, %v8462_v56 }
 0x400   : > { %1598 = vrot.lane.b32.xlu0 %v1530_v15, %s7538_s3  ;;  %v8610_v15 = vsel %vm1451_vm1, 1.0, %v11046_v22  ;;  %vm1445_vm1 = vcmp.le.f32.partialorder %v11126_v33, 25.0  ;;  %v2417_v33 = vcombine.high %v8385_v8, %v8385_v8 }
 0x401   : > { %1320 = vrot.lane.b32.xlu1 %v8576_v54, %s7538_s3  ;;  %11087 = vst [vmem:[#allocation80_spill] sm:$0xff] %v8610_v15  ;;  %v8806_v14 = vsel %vm1445_vm1, 1.0, %v11046_v22 }
 0x402   : > { %11132 = vst [vmem:[#allocation35_spill] sm:$0xff] %v8806_v14 }
 0x404   : > { %v8602_v63 = vpop.f32.mrb[8].mxu1  ;;  %1630 = vrot.lane.b32.xlu0 %v1546_v58, %s7538_s3  ;;  %v1547_v58 = vmul.f32 %v8610_v15, %v8481_v41 }
 0x405   : > { %1352 = vrot.lane.b32.xlu1 %v8591_v43, %s7538_s3  ;;  %11085 = vst [vmem:[#allocation78_spill] sm:$0xff] %v8602_v63  ;;  %v8607_v61 = vpop.f32.mrb[9].mxu1 }
 0x406   : > { %11086 = vst [vmem:[#allocation79_spill] sm:$0xff] %v8607_v61  ;;  %v8612_v44 = vpop.f32.mrb[10].mxu1 }
 0x407   : > { %11088 = vst [vmem:[#allocation81_spill] sm:$0xff] %v8612_v44  ;;  %v8619_v17 = vpop.f32.mrb[11].mxu1 }
 0x408   : > { %11090 = vst [vmem:[#allocation83_spill] sm:$0xff] %v8619_v17  ;;  %1322 = vrot.lane.b32.xlu0 %v8616_v29, %s7538_s3 }
 0x409   : > { %1600 = vrot.lane.b32.xlu1 %v1531_v42, %s7538_s3 }
 0x40c   : > { %v8634_v42 = vpop.f32.mrb[12].mxu1  ;;  %1354 = vrot.lane.b32.xlu0 %v8628_v26, %s7538_s3 }
 0x40d   : > { %1632 = vrot.lane.b32.xlu1 %v1547_v58, %s7538_s3  ;;  %11093 = vst [vmem:[#allocation86_spill] sm:$0xff] %v8634_v42  ;;  %v8643_v15 = vpop.f32.mrb[13].mxu1  ;;  %v1532_v58 = vmul.f32 %v8632_v18, %v8474_v0  ;;  %v1533_v0 = vmul.f32 %v8663_v10, %v8497_v4  ;;  %v8696_v10 = vmul.f32 %v8394_v3, %v8129_v16  ;;  %v8700_v4 = vsel %vm1438_vm8, 1.0, %v11046_v22 }
 0x40e   : > { %11095 = vst [vmem:[#allocation88_spill] sm:$0xff] %v8643_v15  ;;  %v8645_v41 = vpop.f32.mrb[14].mxu1  ;;  %11108 = vst [vmem:[#allocation101_spill] sm:$0xff] %v8700_v4 }
 0x40f   : > { %11096 = vst [vmem:[#allocation89_spill] sm:$0xff] %v8645_v41  ;;  %v8652_v56 = vpop.f32.mrb[15].mxu1  ;;  %11107 = vst [vmem:[#allocation100_spill] sm:$0xff] %v8696_v10 }
 0x410   : > { %11097 = vst [vmem:[#allocation90_spill] sm:$0xff] %v8652_v56  ;;  %1602 = vrot.lane.b32.xlu0 %v1532_v58, %s7538_s3  ;;  %v8678_v58 = vsel %vm1453_vm7, 1.0, %v11046_v22 }
 0x411   : > { %1324 = vrot.lane.b32.xlu1 %v8638_v57, %s7538_s3  ;;  %11103 = vst [vmem:[#allocation96_spill] sm:$0xff] %v8678_v58 }
 0x414   : > { %1634 = vrot.lane.b32.xlu0 %v1548_v20, %s7538_s3  ;;  %v1549_v20 = vmul.f32 %v8678_v58, %v8512_v37 }
 0x415   : > { %1356 = vrot.lane.b32.xlu1 %v8659_v50, %s7538_s3  ;;  %v8670_v18 = vpop.f32.mrb[16].mxu1 }
 0x416   : > { %11101 = vst [vmem:[#allocation94_spill] sm:$0xff] %v8670_v18  ;;  %v8675_v6 = vpop.f32.mrb[17].mxu1 }
 0x417   : > { %11102 = vst [vmem:[#allocation95_spill] sm:$0xff] %v8675_v6  ;;  %v8680_v48 = vpop.f32.mrb[18].mxu1 }
 0x418   : > { %11104 = vst [vmem:[#allocation97_spill] sm:$0xff] %v8680_v48  ;;  %v8687_v49 = vpop.f32.mrb[19].mxu1  ;;  %1326 = vrot.lane.b32.xlu0 %v8684_v53, %s7538_s3  ;;  %v8731_v48 = vsel %vm1439_vm10, 1.0, %v11046_v22  ;;  %vm3958_vm10 = vcmask 1041409  }
 0x419   : > { %1604 = vrot.lane.b32.xlu1 %v1533_v0, %s7538_s3  ;;  %11106 = vst [vmem:[#allocation99_spill] sm:$0xff] %v8687_v49  ;;  %11116 = vst [vmem:[#allocation109_spill] sm:$0xff] %v8731_v48  ;;  %v1535_v16 = vmul.f32 %v8731_v48, %v8576_v54  ;;  %v8756_v48 = vsel %vm1440_vm12, 1.0, %v11046_v22  ;;  %vm3962_vm12 = vcmask 1043459  }
 0x41a   : > { %11119 = vst [vmem:[#allocation112_spill] sm:$0xff] %v8756_v48 }
 0x41c   : > { %1358 = vrot.lane.b32.xlu0 %v8696_v10, %s7538_s3 }
 0x41d   : > { %1636 = vrot.lane.b32.xlu1 %v1549_v20, %s7538_s3  ;;  %v8702_v0 = vpop.f32.mrb[20].mxu1  ;;  %v1534_v20 = vmul.f32 %v8700_v4, %v8558_v12  ;;  %v2466_v4 = vcombine.high %v8389_v52, %v8389_v52 }
 0x41e   : > { %11109 = vst [vmem:[#allocation102_spill] sm:$0xff] %v8702_v0  ;;  %v8711_v58 = vpop.f32.mrb[21].mxu1 }
 0x41f   : > { %11111 = vst [vmem:[#allocation104_spill] sm:$0xff] %v8711_v58  ;;  %v8713_v37 = vpop.f32.mrb[22].mxu1  ;;  %v2480_v62 = vrot.slane %v2466_v4, %v7962_v7  ;;  %v8771_v4 = vmul.f32 %v8418_v31, %v8040_v55  ;;  %v1537_v55 = vmul.f32 %v8763_v28, %v8638_v57  ;;  %v11133_v28 = vld [vmem:[#allocation38_spill] sm:$0xff] }
 0x420   : > { %11112 = vst [vmem:[#allocation105_spill] sm:$0xff] %v8713_v37  ;;  %v8720_v30 = vpop.f32.mrb[23].mxu1  ;;  %1606 = vrot.lane.b32.xlu0 %v1534_v20, %s7538_s3  ;;  %v8745_v20 = vsel %vm1455_vm11, 1.0, %v11046_v22  ;;  %vm1459_vm7 = vcmp.le.f32.partialorder %v11133_v28, 25.0  ;;  %vm3960_vm11 = vcmask 1042434  }
 0x421   : > { %1328 = vrot.lane.b32.xlu1 %v8706_v1, %s7538_s3  ;;  %11113 = vst [vmem:[#allocation106_spill] sm:$0xff] %v8720_v30  ;;  %11117 = vst [vmem:[#allocation110_spill] sm:$0xff] %v8745_v20  ;;  %v1551_v9 = vmul.f32 %v8745_v20, %v8591_v43  ;;  %v1536_v20 = vmul.f32 %v8756_v48, %v8616_v29  ;;  %v11125_v43 = vld [vmem:[#allocation31_spill] sm:$0xff]  ;;  %v2482_v54 = vcombine.high %v2480_v62, %v2480_v62 }
 0x422   : > { %11122 = vst [vmem:[#allocation115_spill] sm:$0xff] %v8771_v4  ;;  %vm1443_vm0 = vcmp.le.f32.partialorder %v11125_v43, 25.0  ;;  %v11129_v43 = vld [vmem:[#allocation36_spill] sm:$0xff] }
 0x423   : > { %vm1457_vm3 = vcmp.le.f32.partialorder %v11129_v43, 25.0  ;;  %v8813_v43 = vsel %vm1456_vm2, 1.0, %v11046_v22 }
 0x424   : > { %1638 = vrot.lane.b32.xlu0 %v1550_v59, %s7538_s3  ;;  %v8775_v59 = vmul.f32 %v8394_v3, %v8139_v27  ;;  %v1538_v3 = vmul.f32 %v8766_v11, %v8684_v53  ;;  %v8803_v11 = vsel %vm1443_vm0, 1.0, %v11046_v22  ;;  %v11134_v53 = vld [vmem:[#allocation39_spill] sm:$0xff]  ;;  %11135 = vst [vmem:[#allocation36_spill] sm:$0xff] %v8813_v43  ;;  %v1552_v29 = vmul.f32 %v8813_v43, %v8628_v26 }
 0x425   : > { %1360 = vrot.lane.b32.xlu1 %v8727_v23, %s7538_s3  ;;  %11131 = vst [vmem:[#allocation32_spill] sm:$0xff] %v8803_v11  ;;  %vm1460_vm8 = vcmp.le.f32.partialorder %v11134_v53, 25.0  ;;  %v8827_v53 = vsel %vm1457_vm3, 1.0, %v11046_v22  ;;  %v8835_v13 = vmul.f32 %v8803_v11, %v8706_v1  ;;  %v2356_v1 = vld [vmem:[#allocation14] sm:$0x3f]  ;;  %vm3970_vm0 = vcmask 1047559  }
 0x426   : > { %11123 = vst [vmem:[#allocation116_spill] sm:$0xff] %v8775_v59  ;;  %v1553_v12 = vmul.f32 %v8827_v53, %v8659_v50 }
 0x428   : > { %1330 = vrot.lane.b32.xlu0 %v8751_v25, %s7538_s3 }
 0x429   : > { %1608 = vrot.lane.b32.xlu1 %v1535_v16, %s7538_s3  ;;  %v8779_v16 = vmul.f32 %v8418_v31, %v8139_v27  ;;  %v2424_v27 = vrot.slane %v8385_v8, %v7962_v7  ;;  %v8796_v31 = vsel %vm1444_vm15, 1.0, %v11046_v22  ;;  %v8820_v8 = vrot.slane %v2480_v62, %v7962_v7 }
 0x42a   : > { %11128 = vst [vmem:[#allocation31_spill] sm:$0xff] %v8796_v31  ;;  %v8824_v48 = vmul.f32 %v8796_v31, %v8751_v25  ;;  %v8841_v62 = vsel %vm1460_vm8, 1.0, %v11046_v22  ;;  %v2431_v31 = vrot.slane %v2417_v33, %v7962_v7  ;;  %v8846_v25 = vmul.f32 %v8806_v14, %v8771_v4 }
 0x42b   : > { %11124 = vst [vmem:[#allocation117_spill] sm:$0xff] %v8779_v16  ;;  %v2432_v57 = vcombine.high %v2424_v27, %v2424_v27  ;;  %11139 = vst [vmem:[#allocation118_spill] sm:$0xff] %v8841_v62  ;;  %v2440_v11 = vrot.slane %v2424_v27, %v7962_v7  ;;  %v8870_v27 = vmul.f32 %v8841_v62, %v8775_v59  ;;  %vm3968_vm15 = vcmask 1046534  }
 0x42c   : > { %1362 = vrot.lane.b32.xlu0 %v8775_v59, %s7538_s3  ;;  %v8881_v50 = vrot.slane %v2431_v31, %v7962_v7 }
 0x42d   : > { %1640 = vrot.lane.b32.xlu1 %v1551_v9, %s7538_s3  ;;  %v11130_v9 = vld [vmem:[#allocation37_spill] sm:$0xff]  ;;  %v2454_v26 = vrot.slane %v2432_v57, %v7962_v7  ;;  %v2462_v62 = vcombine.high %v2440_v11, %v2440_v11 }
 0x42e   : > { %vm1458_vm6 = vcmp.le.f32.partialorder %v11130_v9, 25.0  ;;  %v8817_v9 = vrot.slane %v2482_v54, %v7962_v7  ;;  %11136 = vst [vmem:[#allocation37_spill] sm:$0xff] %v8827_v53  ;;  %v8838_v54 = vsel %vm1459_vm7, 1.0, %v11046_v22  ;;  %v2473_v53 = vrot.slane %v8389_v52, %v7962_v7 }
 0x42f   : > { %v8830_v28 = vsel %vm1458_vm6, 1.0, %v11046_v22  ;;  %11138 = vst [vmem:[#allocation39_spill] sm:$0xff] %v8838_v54  ;;  %v8866_v43 = vmul.f32 %v8838_v54, %v8727_v23  ;;  %v11141_v54 = vld [vmem:[#allocation30_spill] sm:$0xff] }
 0x430   : > { %11137 = vst [vmem:[#allocation38_spill] sm:$0xff] %v8830_v28  ;;  %1610 = vrot.lane.b32.xlu0 %v1536_v20, %s7538_s3  ;;  %v8851_v20 = vsel %vm1461_vm9, 1.0, %v11046_v22  ;;  %v1554_v33 = vmul.f32 %v8830_v28, %v8696_v10  ;;  %v2514_v14 = vcombine.high %v8817_v9, %v8817_v9  ;;  %v2433_v10 = vcombine.high %v2431_v31, %v2431_v31 }
 0x431   : > { %1332 = vrot.lane.b32.xlu1 %v8771_v4, %s7538_s3  ;;  %11140 = vst [vmem:[#allocation119_spill] sm:$0xff] %v8851_v20  ;;  %v2512_v4 = vcombine.high %v8820_v8, %v8820_v8  ;;  %v8878_v28 = vmul.f32 %v8851_v20, %v8779_v16  ;;  %v8884_v23 = vrot.slane %v2356_v1, %v11141_v54 }
 0x432   : > { %v2578_v59 = vrot.slane %v2514_v14, %v11141_v54  ;;  %v2518_v1 = vrot.slane %v2440_v11, %v11141_v54  ;;  %v2522_v22 = vrot.slane %v2454_v26, %v11141_v54  ;;  %v2481_v18 = vcombine.high %v2473_v53, %v2473_v53 }
 0x433   : > { %v2574_v20 = vrot.slane %v2512_v4, %v11141_v54  ;;  %v8903_v14 = vrot.slane %v2433_v10, %v7962_v7  ;;  %v2463_v4 = vcombine.high %v8881_v50, %v8881_v50 }
 0x434   : > { %1642 = vrot.lane.b32.xlu0 %v1552_v29, %s7538_s3  ;;  %v2526_v29 = vrot.slane %v2462_v62, %v11141_v54 }
 0x435   : > { %1364 = vrot.lane.b32.xlu1 %v8779_v16, %s7538_s3  ;;  %v2464_v16 = vcombine.high %v2454_v26, %v2454_v26 }
 0x438   : > { %v8899_v57 = vpop.permute.xlu1 %2595  ;;  %1614 = vrot.lane.b32.xlu0 %v1538_v3, %s7538_s3 }
 0x439   : > { %1612 = vrot.lane.b32.xlu1 %v1537_v55, %s7538_s3  ;;  %v8897_v55 = vrot.slane %v2473_v53, %v7962_v7  ;;  %v2631_v31 = vadd.f32 %v8899_v57, %v2578_v59  ;;  %v2629_v11 = vadd.f32 %v8899_v57, %v2574_v20  ;;  %v2601_v52 = vadd.f32 %v8899_v57, %v2518_v1 }
 0x43a   : > { %v8911_v53 = vpop.permute.xlu0 %2597  ;;  %v2603_v3 = vadd.f32 %v8899_v57, %v2522_v22 }
 0x43b   : > { %v2663_v10 = vadd.f32 %v8702_v0, %v2631_v31  ;;  %v2661_v49 = vadd.f32 %v2629_v11, %v8711_v58  ;;  %v2632_v6 = vadd.f32 %v8911_v53, %v2578_v59  ;;  %v2630_v41 = vadd.f32 %v8911_v53, %v2574_v20 }
 0x43c   : > { %v8919_v42 = vpop.permute.xlu1 %1302  ;;  %1646 = vrot.lane.b32.xlu0 %v1554_v33, %s7538_s3  ;;  %v2633_v26 = vadd.f32 %v2601_v52, %v8363_v35  ;;  %v2604_v62 = vadd.f32 %v8911_v53, %v2522_v22  ;;  %v2635_v56 = vadd.f32 %v8361_v39, %v2603_v3  ;;  %v2530_v0 = vrot.slane %v2464_v16, %v11141_v54 }
 0x43d   : > { %1644 = vrot.lane.b32.xlu1 %v1553_v12, %s7538_s3  ;;  %v2602_v12 = vadd.f32 %v8911_v53, %v2518_v1  ;;  %v2699_v31 = vadd.f32 %v8884_v23, %v2663_v10  ;;  %v2697_v11 = vadd.f32 %v8884_v23, %v2661_v49  ;;  %v2664_v59 = vadd.f32 %v8713_v37, %v2632_v6 }
 0x43e   : > { %v2662_v20 = vadd.f32 %v2630_v41, %v8720_v30  ;;  %v8933_v33 = vpop.permute.xlu0 %1306  ;;  %v2669_v22 = vadd.f32 %v8884_v23, %v2633_v26  ;;  %v2636_v1 = vadd.f32 %v8365_v38, %v2604_v62  ;;  %v2534_v49 = vrot.slane %v8881_v50, %v11141_v54 }
 0x43f   : > { %v2634_v52 = vadd.f32 %v2602_v12, %v8367_v5  ;;  %v8941_v6 = vrot.slane %v2481_v18, %v7962_v7  ;;  %v2700_v41 = vadd.f32 %v8884_v23, %v2664_v59  ;;  %v2731_v3 = vmax.f32 %v2699_v31, 0.0 }
 0x440   : > { %v2698_v16 = vadd.f32 %v8884_v23, %v2662_v20  ;;  %1618 = vrot.lane.b32.xlu0 %v8824_v48, %s7538_s3  ;;  %v2605_v12 = vadd.f32 %v8899_v57, %v2526_v29  ;;  %v2607_v26 = vadd.f32 %v8899_v57, %v2530_v0  ;;  %v2729_v50 = vmax.f32 %v2697_v11, 0.0 }
 0x441   : > { %1616 = vrot.lane.b32.xlu1 %v8835_v13, %s7538_s3  ;;  %v2670_v10 = vadd.f32 %v8884_v23, %v2634_v52  ;;  %v2732_v62 = vmax.f32 %v2700_v41, 0.0  ;;  %v2671_v7 = vadd.f32 %v8884_v23, %v2635_v56  ;;  %v2701_v59 = vmax.f32 %v2669_v22, 0.0 }
 0x442   : > { %v2730_v18 = vmax.f32 %v2698_v16, 0.0  ;;  %v8955_v31 = vpop.permute.xlu0 %1334  ;;  %v2672_v48 = vadd.f32 %v8884_v23, %v2636_v1  ;;  %v2606_v52 = vadd.f32 %v8911_v53, %v2526_v29  ;;  %v2465_v37 = vcombine.high %v8903_v14, %v8903_v14 }
 0x443   : > { %v8945_v13 = vpop.permute.xlu1 %1304  ;;  %v2702_v20 = vmax.f32 %v2670_v10, 0.0  ;;  %v2538_v11 = vrot.slane %v8903_v14, %v11141_v54  ;;  %v8963_v41 = vpack.c.bf16 %v2732_v62, %v2731_v3  ;;  %v2703_v22 = vmax.f32 %v2671_v7, 0.0 }
 0x444   : > { %v8965_v56 = vpack.c.bf16 %v2730_v18, %v2729_v50  ;;  %1650 = vrot.lane.b32.xlu0 %v8870_v27, %s7538_s3  ;;  %v2704_v1 = vmax.f32 %v2672_v48, 0.0  ;;  %v2637_v29 = vadd.f32 %v2605_v12, %v8371_v2  ;;  %v2542_v10 = vrot.slane %v2463_v4, %v11141_v54  ;;  %v11142_v4 = vld [vmem:[#allocation44_spill] sm:$0xff] }
 0x445   : > { %1648 = vrot.lane.b32.xlu1 %v8866_v43, %s7538_s3  ;;  %v2733_v43 = vpack.c.bf16 %v2702_v20, %v2701_v59  ;;  %v2511_v30 = vcombine.high %v8897_v55, %v8897_v55  ;;  %v2638_v14 = vadd.f32 %v2606_v52, %v8375_v21  ;;  %v2608_v3 = vadd.f32 %v8911_v53, %v2530_v0  ;;  %v11143_v20 = vld [vmem:[#allocation46_spill] sm:$0xff]  ;;  %v11146_v21 = vld [vmem:[#allocation48_spill] sm:$0xff] }
 0x446   : > { %v2734_v27 = vpack.c.bf16 %v2704_v1, %v2703_v22  ;;  %v8981_v50 = vpop.permute.xlu0 %1338  ;;  %v2673_v12 = vadd.f32 %v8884_v23, %v2637_v29  ;;  %v2639_v62 = vadd.f32 %v11142_v4, %v2607_v26  ;;  %v2513_v18 = vcombine.high %v8941_v6, %v8941_v6 }
 0x447   : > { %v8967_v16 = vpop.permute.xlu1 %1308  ;;  %6511 = vmatprep.mubr.msk.bf16.mxu0 %vm2370_vm5, %v2733_v43  ;;  %v8989_v0 = vrot.slane %v8897_v55, %v11141_v54  ;;  %v2674_v59 = vadd.f32 %v8884_v23, %v2638_v14  ;;  %v8995_v48 = vrot.slane %v8941_v6, %v11141_v54  ;;  %v2609_v43 = vadd.f32 %v8899_v57, %v2534_v49 }
 0x448   : > { %6512 = vmatmul.mubr.msk.bf16.vlgmr.msra.gmra.mrb[16].mxu0 %vm2370_vm5, %v2734_v27  ;;  %v2675_v26 = vadd.f32 %v8884_v23, %v2639_v62  ;;  %v2610_v22 = vadd.f32 %v8911_v53, %v2534_v49  ;;  %v2546_v55 = vrot.slane %v2465_v37, %v11141_v54  ;;  %v2705_v1 = vmax.f32 %v2673_v12, 0.0  ;;  %v11144_v27 = vld [vmem:[#allocation49_spill] sm:$0xff]  ;;  %v11145_v62 = vld [vmem:[#allocation51_spill] sm:$0xff] }
 0x449   : > { %1620 = vrot.lane.b32.xlu1 %v8846_v25, %s7538_s3  ;;  %v2640_v25 = vadd.f32 %v11143_v20, %v2608_v3  ;;  %v2706_v29 = vmax.f32 %v2674_v59, 0.0  ;;  %v2641_v7 = vadd.f32 %v2609_v43, %v11144_v27  ;;  %v2611_v20 = vadd.f32 %v8899_v57, %v2538_v11 }
 0x44a   : > { %v9008_v6 = vpop.permute.xlu0 %1310  ;;  %v2642_v58 = vadd.f32 %v2610_v22, %v11145_v62  ;;  %v9014_v49 = vrot.slane %v2511_v30, %v11141_v54  ;;  %v2707_v12 = vmax.f32 %v2675_v26, 0.0  ;;  %v2612_v4 = vadd.f32 %v8911_v53, %v2538_v11  ;;  %v11147_v62 = vld [vmem:[#allocation50_spill] sm:$0xff] }
 0x44b   : > { %v8998_v52 = vpop.permute.xlu1 %1336  ;;  %v2676_v14 = vadd.f32 %v8884_v23, %v2640_v25  ;;  %v2735_v37 = vpack.c.bf16 %v2706_v29, %v2705_v1  ;;  %v2677_v3 = vadd.f32 %v8884_v23, %v2641_v7  ;;  %v2643_v43 = vadd.f32 %v11146_v21, %v2611_v20  ;;  %v11154_v21 = vld [vmem:[#allocation56_spill] sm:$0xff] }
 0x44c   : > { %v9023_v22 = vrot.slane %v2513_v18, %v11141_v54  ;;  %v2613_v26 = vadd.f32 %v8899_v57, %v2542_v10  ;;  %v9034_v20 = vrot.slane %v8817_v9, %v11141_v54  ;;  %v11148_v18 = vsub.f32 1.0, %v8398_v40 }
 0x44d   : > { %1652 = vrot.lane.b32.xlu1 %v8878_v28, %s7538_s3  ;;  %v2708_v59 = vmax.f32 %v2676_v14, 0.0  ;;  %v2678_v28 = vadd.f32 %v8884_v23, %v2642_v58  ;;  %6515 = vmatprep.mubr.msk.bf16.mxu0 %vm2370_vm5, %v2735_v37  ;;  %v2709_v14 = vmax.f32 %v2677_v3, 0.0  ;;  %v2644_v58 = vadd.f32 %v11147_v62, %v2612_v4 }
 0x44e   : > { %v9028_v29 = vpop.permute.xlu0 %1342  ;;  %v2679_v11 = vadd.f32 %v8884_v23, %v2643_v43  ;;  %v1398_v37 = vsub.f32 %v11148_v18, %v8919_v42  ;;  %v9043_v3 = vrot.slane %v8820_v8, %v11141_v54  ;;  %v2615_v43 = vadd.f32 %v8899_v57, %v2546_v55  ;;  %v11150_v18 = vld [vmem:[#allocation57_spill] sm:$0xff] }
 0x44f   : > { %v9016_v25 = vpop.permute.xlu1 %1340  ;;  %v2736_v1 = vpack.c.bf16 %v2708_v59, %v2707_v12  ;;  %v2710_v7 = vmax.f32 %v2678_v28, 0.0  ;;  %v2614_v12 = vadd.f32 %v8911_v53, %v2542_v10  ;;  %v11149_v59 = vld [vmem:[#allocation55_spill] sm:$0xff]  ;;  %v2680_v9 = vadd.f32 %v8884_v23, %v2644_v58 }
 0x450   : > { %v2645_v30 = vadd.f32 %v2613_v26, %v11149_v59  ;;  %v9052_v42 = vadd.f32 %v8899_v57, %v9034_v20  ;;  %v2711_v10 = vmax.f32 %v2679_v11, 0.0  ;;  %v2617_v54 = vadd.f32 %v8899_v57, %v8989_v0  ;;  %v11152_v11 = vld [vmem:[#allocation64_spill] sm:$0xff] }
 0x451   : > { %6516 = vmatmul.mubr.msk.bf16.gmra.mrb[20].mxu0 %vm2370_vm5, %v2736_v1  ;;  %v2737_v4 = vpack.c.bf16 %v2710_v7, %v2709_v14  ;;  %v2646_v26 = vadd.f32 %v2614_v12, %v11150_v18  ;;  %v2712_v1 = vmax.f32 %v2680_v9, 0.0  ;;  %v2616_v14 = vadd.f32 %v8911_v53, %v2546_v55  ;;  %v11151_v7 = vld [vmem:[#allocation54_spill] sm:$0xff] }
 0x452   : > { %v2681_v59 = vadd.f32 %v8884_v23, %v2645_v30  ;;  %v9057_v8 = vpop.permute.xlu0 %1314  ;;  %v2647_v58 = vadd.f32 %v11151_v7, %v2615_v43  ;;  %v9065_v62 = vadd.f32 %v8899_v57, %v9043_v3  ;;  %v1718_v12 = vmul.f32 %v11152_v11, %v1398_v37 }
 0x453   : > { %v9046_v28 = vpop.permute.xlu1 %1312  ;;  %6519 = vmatprep.mubr.msk.bf16.mxu0 %vm2370_vm5, %v2737_v4  ;;  %v11153_v30 = vsub.f32 1.0, %v8409_v45  ;;  %v2682_v18 = vadd.f32 %v8884_v23, %v2646_v26  ;;  %v2738_v55 = vpack.c.bf16 %v2712_v1, %v2711_v10  ;;  %v2648_v43 = vadd.f32 %v11154_v21, %v2616_v14 }
 0x454   : > { %v2683_v7 = vadd.f32 %v8884_v23, %v2647_v58  ;;  %v2618_v27 = vadd.f32 %v8911_v53, %v8989_v0  ;;  %v11155_v2 = vsub.f32 1.0, %v8422_v32  ;;  %v2713_v11 = vmax.f32 %v2681_v59, 0.0 }
 0x455   : > { %v1400_v4 = vsub.f32 %v11153_v30, %v8933_v33  ;;  %v2714_v38 = vmax.f32 %v2682_v18, 0.0  ;;  %v2649_v33 = vadd.f32 %v2617_v54, %v8607_v61  ;;  %v11156_v26 = vsub.f32 1.0, %v8428_v60 }
 0x456   : > { %v1399_v37 = vsub.f32 %v11155_v2, %v8945_v13  ;;  %v9085_v10 = vpop.permute.xlu0 %1346  ;;  %v2684_v1 = vadd.f32 %v8884_v23, %v2648_v43  ;;  %v2650_v14 = vadd.f32 %v2618_v27, %v8619_v17  ;;  %v2619_v0 = vadd.f32 %v8899_v57, %v8995_v48 }
 0x457   : > { %v9072_v9 = vpop.permute.xlu1 %1344  ;;  %v1414_v30 = vsub.f32 %v11156_v26, %v8955_v31  ;;  %v11157_v2 = vsub.f32 1.0, %v8434_v34  ;;  %v2739_v59 = vpack.c.bf16 %v2714_v38, %v2713_v11  ;;  %v2715_v18 = vmax.f32 %v2683_v7, 0.0 }
 0x458   : > { %v2685_v54 = vadd.f32 %v8884_v23, %v2649_v33  ;;  %v2716_v58 = vmax.f32 %v2684_v1, 0.0  ;;  %v2686_v43 = vadd.f32 %v8884_v23, %v2650_v14  ;;  %v2620_v27 = vadd.f32 %v8911_v53, %v8995_v48 }
 0x459   : > { %v1401_v13 = vsub.f32 %v11157_v2, %v8967_v16  ;;  %6520 = vmatmul.mubr.msk.bf16.gmra.mrb[24].mxu0 %vm2370_vm5, %v2738_v55  ;;  %v2651_v26 = vadd.f32 %v8602_v63, %v2619_v0  ;;  %v1720_v17 = vmul.f32 %v8507_v46, %v1400_v4  ;;  %v1719_v16 = vmul.f32 %v8516_v36, %v1399_v37  ;;  %v11158_v4 = vld [vmem:[#allocation67_spill] sm:$0xff] }
 0x45a   : > { %6523 = vmatprep.mubr.msk.bf16.mxu0 %vm2370_vm5, %v2739_v59  ;;  %v2717_v38 = vmax.f32 %v2685_v54, 0.0  ;;  %v2621_v7 = vadd.f32 %v8899_v57, %v9014_v49  ;;  %v1591_v55 = vpop.permute.xlu0 %1590  ;;  %v2740_v11 = vpack.c.bf16 %v2716_v58, %v2715_v18  ;;  %v2718_v33 = vmax.f32 %v2686_v43, 0.0 }
 0x45b   : > { %v9096_v31 = vpop.permute.xlu1 %1316  ;;  %v2652_v1 = vadd.f32 %v8612_v44, %v2620_v27  ;;  %v2687_v14 = vadd.f32 %v8884_v23, %v2651_v26  ;;  %v1734_v48 = vmul.f32 %v8524_v47, %v1414_v30  ;;  %v1686_v0 = vadd.f32 %v1591_v55, %v8398_v40  ;;  %v11159_v47 = vld [vmem:[#allocation90_spill] sm:$0xff]  ;;  %v11209_v44 = vld [vmem:[#allocation108_spill] sm:$0xff] }
 0x45c   : > { %v2622_v46 = vadd.f32 %v8911_v53, %v9014_v49  ;;  %v2653_v36 = vadd.f32 %v2621_v7, %v8643_v15  ;;  %v1721_v37 = vmul.f32 %v11158_v4, %v1401_v13  ;;  %v2741_v59 = vpack.c.bf16 %v2718_v33, %v2717_v38  ;;  %v11160_v13 = vld [vmem:[#allocation86_spill] sm:$0xff]  ;;  %v11163_v4 = vld [vmem:[#allocation95_spill] sm:$0xff] }
 0x45d   : > { %v2688_v18 = vadd.f32 %v8884_v23, %v2652_v1  ;;  %v2623_v54 = vadd.f32 %v8899_v57, %v9023_v22  ;;  %v1750_v58 = vadd.f32 %v1718_v12, %v1686_v0  ;;  %v2719_v43 = vmax.f32 %v2687_v14, 0.0 }
 0x45e   : > { %v2654_v30 = vadd.f32 %v2622_v46, %v11159_v47  ;;  %v2689_v27 = vadd.f32 %v8884_v23, %v2653_v36  ;;  %v1595_v26 = vpop.permute.xlu0 %1594  ;;  %v2624_v7 = vadd.f32 %v8911_v53, %v9023_v22  ;;  %v2626_v38 = vadd.f32 %v8911_v53, %v9043_v3  ;;  %v11162_v46 = vld [vmem:[#allocation89_spill] sm:$0xff] }
 0x45f   : > { %v9115_v2 = vpop.permute.xlu1 %1348  ;;  %v2720_v49 = vmax.f32 %v2688_v18, 0.0  ;;  %v2655_v55 = vadd.f32 %v11160_v13, %v2623_v54  ;;  %v11161_v33 = vsub.f32 1.0, %v8440_v19  ;;  %v1688_v12 = vadd.f32 %v1595_v26, %v8409_v45  ;;  %1814 = vrot.lane.b32.xlu0 %v1750_v58, %s7539_s20  ;;  %v11164_v26 = vld [vmem:[#allocation99_spill] sm:$0xff] }
 0x460   : > { %v2690_v1 = vadd.f32 %v8884_v23, %v2654_v30  ;;  %v2721_v14 = vmax.f32 %v2689_v27, 0.0  ;;  %v2656_v36 = vadd.f32 %v11162_v46, %v2624_v7  ;;  %v2657_v18 = vadd.f32 %v9065_v62, %v11163_v4  ;;  %v11204_v46 = vld [vmem:[#allocation100_spill] sm:$0xff] }
 0x461   : > { %v1416_v57 = vsub.f32 %v11161_v33, %v8981_v50  ;;  %6524 = vmatmul.mubr.msk.bf16.gmra.mrb[28].mxu0 %vm2370_vm5, %v2740_v11  ;;  %v2742_v0 = vpack.c.bf16 %v2720_v49, %v2719_v43  ;;  %v2691_v3 = vadd.f32 %v8884_v23, %v2655_v55  ;;  %v1752_v50 = vadd.f32 %v1720_v17, %v1688_v12 }
 0x462   : > { %6527 = vmatprep.mubr.msk.bf16.mxu0 %vm2370_vm5, %v2741_v59  ;;  %v2722_v58 = vmax.f32 %v2690_v1, 0.0  ;;  %v2658_v30 = vadd.f32 %v2626_v38, %v11164_v26  ;;  %v11165_v11 = vsub.f32 1.0, %v8446_v51  ;;  %v1623_v43 = vpop.permute.xlu0 %1622  ;;  %v2692_v49 = vadd.f32 %v8884_v23, %v2656_v36  ;;  %v11167_v36 = vld [vmem:[#allocation97_spill] sm:$0xff] }
 0x463   : > { %v1593_v22 = vpop.permute.xlu1 %1592  ;;  %v2693_v7 = vadd.f32 %v8884_v23, %v2657_v18  ;;  %v2628_v62 = vadd.f32 %v8911_v53, %v9034_v20  ;;  %v1702_v59 = vadd.f32 %v1623_v43, %v8428_v60  ;;  %1818 = vrot.lane.b32.xlu0 %v1752_v50, %s7539_s20  ;;  %v2723_v12 = vmax.f32 %v2691_v3, 0.0  ;;  %v11168_v3 = vld [vmem:[#allocation68_spill] sm:$0xff]  ;;  %v11169_v43 = vld [vmem:[#allocation69_spill] sm:$0xff] }
 0x464   : > { %v1687_v54 = vadd.f32 %v1593_v22, %v8422_v32  ;;  %v1415_v27 = vsub.f32 %v11165_v11, %v8998_v52  ;;  %v2743_v55 = vpack.c.bf16 %v2722_v58, %v2721_v14  ;;  %v2694_v38 = vadd.f32 %v8884_v23, %v2658_v30  ;;  %v11166_v52 = vld [vmem:[#allocation94_spill] sm:$0xff] }
 0x465   : > { %v2724_v1 = vmax.f32 %v2692_v49, 0.0  ;;  %v2659_v22 = vadd.f32 %v11166_v52, %v9052_v42  ;;  %v2660_v11 = vadd.f32 %v11167_v36, %v2628_v62  ;;  %v1766_v18 = vadd.f32 %v1734_v48, %v1702_v59  ;;  %v11203_v52 = vld [vmem:[#allocation36_spill] sm:$0xff] }
 0x466   : > { %v1751_v17 = vadd.f32 %v1719_v16, %v1687_v54  ;;  %v2725_v53 = vmax.f32 %v2693_v7, 0.0  ;;  %v2726_v20 = vmax.f32 %v2694_v38, 0.0  ;;  %v1627_v16 = vpop.permute.xlu0 %1626  ;;  %v1736_v58 = vmul.f32 %v11168_v3, %v1416_v57 }
 0x467   : > { %v1597_v33 = vpop.permute.xlu1 %1596  ;;  %v2744_v50 = vpack.c.bf16 %v2724_v1, %v2723_v12  ;;  %v2695_v14 = vadd.f32 %v8884_v23, %v2659_v22  ;;  %v2696_v54 = vadd.f32 %v8884_v23, %v2660_v11  ;;  %v1704_v42 = vadd.f32 %v1627_v16, %v8440_v19  ;;  %1846 = vrot.lane.b32.xlu0 %v1766_v18, %s7539_s20  ;;  %v11172_v1 = vld [vmem:[#allocation70_spill] sm:$0xff]  ;;  %v11173_v18 = vld [vmem:[#allocation59_spill] sm:$0xff] }
 0x468   : > { %v1689_v26 = vadd.f32 %v1597_v33, %v8434_v34  ;;  %1816 = vrot.lane.b32.xlu1 %v1751_v17, %s7539_s20  ;;  %v2745_v48 = vpack.c.bf16 %v2726_v20, %v2725_v53  ;;  %v1735_v49 = vmul.f32 %v11169_v43, %v1415_v27  ;;  %v11170_v59 = vsub.f32 1.0, %v8458_v24  ;;  %v11171_v27 = vld [vmem:[#allocation58_spill] sm:$0xff] }
 0x469   : > { %6528 = vmatmul.mubr.msk.bf16.gmra.mrb[32].mxu0 %vm2370_vm5, %v2742_v0  ;;  %v2727_v62 = vmax.f32 %v2695_v14, 0.0  ;;  %v2728_v17 = vmax.f32 %v2696_v54, 0.0  ;;  %v1768_v23 = vadd.f32 %v1736_v58, %v1704_v42  ;;  %v1242_v33 = vsub.f32 1.0, %v11171_v27  ;;  %v11174_v14 = vld [vmem:[#allocation60_spill] sm:$0xff]  ;;  %v11175_v58 = vld [vmem:[#allocation73_spill] sm:$0xff] }
 0x46a   : > { %v1753_v30 = vadd.f32 %v1721_v37, %v1689_v26  ;;  %v1417_v38 = vsub.f32 %v11170_v59, %v9016_v25  ;;  %6531 = vmatprep.mubr.msk.bf16.mxu0 %vm2370_vm5, %v2743_v55  ;;  %v9169_v57 = vpop.permute.xlu0 %1318  ;;  %v1258_v53 = vsub.f32 1.0, %v11173_v18  ;;  %v1243_v54 = vsub.f32 1.0, %v11174_v14  ;;  %v11177_v59 = vld [vmem:[#allocation75_spill] sm:$0xff] }
 0x46b   : > { %v1625_v7 = vpop.permute.xlu1 %1624  ;;  %v2746_v26 = vpack.c.bf16 %v2728_v17, %v2727_v62  ;;  %1850 = vrot.lane.b32.xlu0 %v1768_v23, %s7539_s20  ;;  %v1402_v11 = vsub.f32 %v1242_v33, %v9008_v6  ;;  %v1266_v13 = vsub.f32 1.0, %v11204_v46  ;;  %v1267_v63 = vsub.f32 1.0, %v11209_v44 }
 0x46c   : > { %v1703_v37 = vadd.f32 %v1625_v7, %v8446_v51  ;;  %1820 = vrot.lane.b32.xlu1 %v1753_v30, %s7539_s20  ;;  %v1737_v22 = vmul.f32 %v11172_v1, %v1417_v38  ;;  %v1418_v42 = vsub.f32 %v1258_v53, %v9028_v29  ;;  %v11178_v29 = vld [vmem:[#allocation77_spill] sm:$0xff] }
 0x46d   : > { %v1722_v30 = vmul.f32 %v11175_v58, %v1402_v11  ;;  %v11179_v1 = vld [vmem:[#allocation61_spill] sm:$0xff] }
 0x46e   : > { %v1767_v0 = vadd.f32 %v1735_v49, %v1703_v37  ;;  %v9176_v55 = vpop.permute.xlu0 %1350  ;;  %v1403_v49 = vsub.f32 %v1243_v54, %v9046_v28  ;;  %v1738_v38 = vmul.f32 %v11177_v59, %v1418_v42  ;;  %v11181_v54 = vld [vmem:[#allocation63_spill] sm:$0xff]  ;;  %v11182_v42 = vld [vmem:[#allocation65_spill] sm:$0xff] }
 0x46f   : > { %v1629_v12 = vpop.permute.xlu1 %1628 }
 0x470   : > { %v1705_v25 = vadd.f32 %v1629_v12, %v8458_v24  ;;  %1848 = vrot.lane.b32.xlu1 %v1767_v0, %s7539_s20  ;;  %v1723_v37 = vmul.f32 %v11178_v29, %v1403_v49  ;;  %v11183_v49 = vmov 0.0  }
 0x471   : > { %6532 = vmatmul.mubr.msk.bf16.gmra.mrb[36].mxu0 %vm2370_vm5, %v2744_v50  ;;  %v11176_v50 = vld [vmem:[#allocation62_spill] sm:$0xff] }
 0x472   : > { %v1769_v20 = vadd.f32 %v1737_v22, %v1705_v25  ;;  %6535 = vmatprep.mubr.msk.bf16.mxu0 %vm2370_vm5, %v2745_v48  ;;  %v1599_v3 = vpop.permute.xlu0 %1598  ;;  %v1259_v7 = vsub.f32 1.0, %v11176_v50  ;;  %v1244_v22 = vsub.f32 1.0, %v11179_v1 }
 0x473   : > { %v9181_v16 = vpop.permute.xlu1 %1320  ;;  %v1690_v6 = vadd.f32 %v1599_v3, %v11171_v27  ;;  %v1260_v3 = vsub.f32 1.0, %v11181_v54 }
 0x474   : > { %1852 = vrot.lane.b32.xlu1 %v1769_v20, %s7539_s20  ;;  %v1419_v33 = vsub.f32 %v1259_v7, %v9072_v9 }
 0x475   : > { %v1754_v62 = vadd.f32 %v1722_v30, %v1690_v6  ;;  %v1245_v6 = vsub.f32 1.0, %v11182_v42 }
 0x476   : > { %v1631_v17 = vpop.permute.xlu0 %1630 }
 0x477   : > { %v9189_v43 = vpop.permute.xlu1 %1352  ;;  %v1706_v48 = vadd.f32 %v1631_v17, %v11173_v18  ;;  %1822 = vrot.lane.b32.xlu0 %v1754_v62, %s7539_s20  ;;  %v11184_v62 = vld [vmem:[#allocation85_spill] sm:$0xff] }
 0x479   : > { %6536 = vmatmul.mubr.msk.bf16.gmra.mrb[40].mxu0 %vm2370_vm5, %v2746_v26  ;;  %v1770_v0 = vadd.f32 %v1738_v38, %v1706_v48  ;;  %v11180_v26 = vld [vmem:[#allocation80_spill] sm:$0xff]  ;;  %v11185_v48 = vld [vmem:[#allocation66_spill] sm:$0xff] }
 0x47a   : > { %6539 = vmatprep.mubr.msk.bf16.mxu0 %vm2370_vm5, %v8965_v56  ;;  %v9202_v12 = vpop.permute.xlu0 %1322  ;;  %v1739_v53 = vmul.f32 %v11180_v26, %v1419_v33  ;;  %v1404_v56 = vsub.f32 %v1244_v22, %v9057_v8  ;;  %v1420_v8 = vsub.f32 %v1260_v3, %v9085_v10  ;;  %v11186_v33 = vld [vmem:[#allocation91_spill] sm:$0xff] }
 0x47b   : > { %v1601_v23 = vpop.permute.xlu1 %1600  ;;  %1854 = vrot.lane.b32.xlu0 %v1770_v0, %s7539_s20 }
 0x47c   : > { %v1691_v28 = vadd.f32 %v1601_v23, %v11174_v14  ;;  %v1724_v17 = vmul.f32 %v11184_v62, %v1404_v56  ;;  %v1261_v23 = vsub.f32 1.0, %v11185_v48  ;;  %v1740_v0 = vmul.f32 %v11186_v33, %v1420_v8  ;;  %v11190_v8 = vld [vmem:[#allocation72_spill] sm:$0xff] }
 0x47e   : > { %v1755_v25 = vadd.f32 %v1723_v37, %v1691_v28  ;;  %v9209_v9 = vpop.permute.xlu0 %1354  ;;  %v1421_v10 = vsub.f32 %v1261_v23, %v9115_v2 }
 0x47f   : > { %v1633_v11 = vpop.permute.xlu1 %1632 }
 0x480   : > { %v1707_v20 = vadd.f32 %v1633_v11, %v11176_v50  ;;  %1824 = vrot.lane.b32.xlu1 %v1755_v25, %s7539_s20  ;;  %v11187_v25 = vld [vmem:[#allocation93_spill] sm:$0xff] }
 0x481   : > { %6540 = vmatmul.mubr.msk.bf16.gmra.mrb[44].mxu0 %vm2370_vm5, %v8963_v41  ;;  %v1405_v41 = vsub.f32 %v1245_v6, %v9096_v31  ;;  %v11188_v31 = vld [vmem:[#allocation71_spill] sm:$0xff]  ;;  %v11189_v6 = vld [vmem:[#allocation96_spill] sm:$0xff] }
 0x482   : > { %v1771_v58 = vadd.f32 %v1739_v53, %v1707_v20  ;;  %6563 = vmatprep.mubr.msk.bf16.mxu0 %vm7536_vm4, %v11183_v49  ;;  %v1603_v7 = vpop.permute.xlu0 %1602  ;;  %v1246_v56 = vsub.f32 1.0, %v11188_v31 }
 0x483   : > { %v9215_v30 = vpop.permute.xlu1 %1324  ;;  %v1692_v59 = vadd.f32 %v1603_v7, %v11179_v1  ;;  %v1725_v11 = vmul.f32 %v11187_v25, %v1405_v41  ;;  %v1741_v7 = vmul.f32 %v11189_v6, %v1421_v10  ;;  %v11193_v10 = vld [vmem:[#allocation76_spill] sm:$0xff] }
 0x484   : > { %1856 = vrot.lane.b32.xlu1 %v1771_v58, %s7539_s20  ;;  %v1406_v2 = vsub.f32 %v1246_v56, %v9169_v57 }
 0x485   : > { %v1756_v29 = vadd.f32 %v1724_v17, %v1692_v59  ;;  %v1262_v59 = vsub.f32 1.0, %v11190_v8 }
 0x486   : > { %v1635_v37 = vpop.permute.xlu0 %1634 }
 0x487   : > { %v9224_v38 = vpop.permute.xlu1 %1356  ;;  %v1708_v28 = vadd.f32 %v1635_v37, %v11181_v54  ;;  %1826 = vrot.lane.b32.xlu0 %v1756_v29, %s7539_s20  ;;  %v11191_v29 = vld [vmem:[#allocation74_spill] sm:$0xff] }
 0x488   : > { %v1247_v37 = vsub.f32 1.0, %v11191_v29 }
 0x489   : > { %v1772_v26 = vadd.f32 %v1740_v0, %v1708_v28  ;;  %v11192_v0 = vld [vmem:[#allocation101_spill] sm:$0xff] }
 0x48a   : > { %v1327_v20 = vpop.permute.xlu0 %1326  ;;  %v1726_v28 = vmul.f32 %v11192_v0, %v1406_v2  ;;  %v1407_v57 = vsub.f32 %v1247_v37, %v9181_v16  ;;  %v11196_v16 = vld [vmem:[#allocation82_spill] sm:$0xff] }
 0x48b   : > { %v1605_v22 = vpop.permute.xlu1 %1604  ;;  %1858 = vrot.lane.b32.xlu0 %v1772_v26, %s7539_s20  ;;  %v1263_v26 = vsub.f32 1.0, %v11193_v10  ;;  %v1248_v37 = vsub.f32 1.0, %v11196_v16 }
 0x48c   : > { %v1693_v53 = vadd.f32 %v1605_v22, %v11182_v42  ;;  %v1422_v22 = vsub.f32 %v1262_v59, %v9176_v55 }
 0x48d   : > { %v1423_v55 = vsub.f32 %v1263_v26, %v9189_v43  ;;  %v11198_v43 = vld [vmem:[#allocation84_spill] sm:$0xff] }
 0x48e   : > { %v1757_v3 = vadd.f32 %v1725_v11, %v1693_v53  ;;  %v9239_v17 = vpop.permute.xlu0 %1358  ;;  %v1264_v26 = vsub.f32 1.0, %v11198_v43 }
 0x48f   : > { %v1637_v58 = vpop.permute.xlu1 %1636 }
 0x490   : > { %v1709_v62 = vadd.f32 %v1637_v58, %v11185_v48  ;;  %1828 = vrot.lane.b32.xlu1 %v1757_v3, %s7539_s20  ;;  %v11194_v3 = vld [vmem:[#allocation107_spill] sm:$0xff] }
 0x491   : > { %v1742_v58 = vmul.f32 %v11194_v3, %v1422_v22  ;;  %v11197_v22 = vld [vmem:[#allocation110_spill] sm:$0xff] }
 0x492   : > { %v1773_v41 = vadd.f32 %v1741_v7, %v1709_v62  ;;  %v1607_v33 = vpop.permute.xlu0 %1606  ;;  %v11195_v62 = vld [vmem:[#allocation109_spill] sm:$0xff] }
 0x493   : > { %v9243_v23 = vpop.permute.xlu1 %1328  ;;  %v1694_v25 = vadd.f32 %v1607_v33, %v11188_v31  ;;  %v1727_v2 = vmul.f32 %v11195_v62, %v1407_v57  ;;  %v1408_v57 = vsub.f32 %v1248_v37, %v9202_v12  ;;  %v11202_v37 = vld [vmem:[#allocation92_spill] sm:$0xff] }
 0x494   : > { %1860 = vrot.lane.b32.xlu1 %v1773_v41, %s7539_s20 }
 0x495   : > { %v1758_v53 = vadd.f32 %v1726_v28, %v1694_v25  ;;  %v1743_v25 = vmul.f32 %v11197_v22, %v1423_v55  ;;  %v1424_v55 = vsub.f32 %v1264_v26, %v9209_v9  ;;  %v11205_v9 = vld [vmem:[#allocation103_spill] sm:$0xff] }
 0x496   : > { %v1639_v56 = vpop.permute.xlu0 %1638  ;;  %v1251_v26 = vsub.f32 1.0, %v11205_v9 }
 0x497   : > { %v9250_v11 = vpop.permute.xlu1 %1360  ;;  %v1710_v6 = vadd.f32 %v1639_v56, %v11190_v8  ;;  %1830 = vrot.lane.b32.xlu0 %v1758_v53, %s7539_s20  ;;  %v1744_v4 = vmul.f32 %v11203_v52, %v1424_v55 }
 0x499   : > { %v1774_v59 = vadd.f32 %v1742_v58, %v1710_v6  ;;  %v11199_v6 = vld [vmem:[#allocation87_spill] sm:$0xff] }
 0x49a   : > { %v1331_v33 = vpop.permute.xlu0 %1330 }
 0x49b   : > { %v1609_v7 = vpop.permute.xlu1 %1608  ;;  %1862 = vrot.lane.b32.xlu0 %v1774_v59, %s7539_s20 }
 0x49c   : > { %v1695_v41 = vadd.f32 %v1609_v7, %v11191_v29  ;;  %v1249_v7 = vsub.f32 1.0, %v11199_v6 }
 0x49e   : > { %v1759_v0 = vadd.f32 %v1727_v2, %v1695_v41  ;;  %v1363_v53 = vpop.permute.xlu0 %1362  ;;  %v11200_v2 = vld [vmem:[#allocation112_spill] sm:$0xff]  ;;  %v11201_v41 = vld [vmem:[#allocation98_spill] sm:$0xff]  ;;  %v1409_v12 = vsub.f32 %v1249_v7, %v9215_v30 }
 0x49f   : > { %v1641_v28 = vpop.permute.xlu1 %1640  ;;  %v1728_v59 = vmul.f32 %v11200_v2, %v1408_v57  ;;  %v11206_v2 = vld [vmem:[#allocation113_spill] sm:$0xff] }
 0x4a0   : > { %v1711_v56 = vadd.f32 %v1641_v28, %v11193_v10  ;;  %1832 = vrot.lane.b32.xlu1 %v1759_v0, %s7539_s20  ;;  %v1250_v28 = vsub.f32 1.0, %v11201_v41  ;;  %v1729_v47 = vmul.f32 %v11206_v2, %v1409_v12  ;;  %v11210_v2 = vld [vmem:[#allocation37_spill] sm:$0xff] }
 0x4a2   : > { %v1775_v3 = vadd.f32 %v1743_v25, %v1711_v56  ;;  %v1611_v62 = vpop.permute.xlu0 %1610  ;;  %v1265_v25 = vsub.f32 1.0, %v11202_v37 }
 0x4a3   : > { %v1333_v58 = vpop.permute.xlu1 %1332  ;;  %v1696_v0 = vadd.f32 %v1611_v62, %v11196_v16 }
 0x4a4   : > { %1864 = vrot.lane.b32.xlu1 %v1775_v3, %s7539_s20  ;;  %v1410_v3 = vsub.f32 %v1250_v28, %v1327_v20  ;;  %v1425_v30 = vsub.f32 %v1265_v25, %v9224_v38  ;;  %v11208_v20 = vld [vmem:[#allocation114_spill] sm:$0xff]  ;;  %v1426_v28 = vsub.f32 %v1266_v13, %v9239_v17 }
 0x4a5   : > { %v1760_v56 = vadd.f32 %v1728_v59, %v1696_v0  ;;  %v11207_v0 = vld [vmem:[#allocation111_spill] sm:$0xff] }
 0x4a6   : > { %v1643_v36 = vpop.permute.xlu0 %1642  ;;  %v1252_v15 = vsub.f32 1.0, %v11207_v0  ;;  %v1730_v55 = vmul.f32 %v11208_v20, %v1410_v3  ;;  %v1745_v38 = vmul.f32 %v11210_v2, %v1425_v30  ;;  %v11211_v3 = vld [vmem:[#allocation116_spill] sm:$0xff]  ;;  %v11213_v20 = vld [vmem:[#allocation115_spill] sm:$0xff] }
 0x4a7   : > { %v9273_v22 = vpop.permute.xlu1 %1364  ;;  %v1712_v57 = vadd.f32 %v1643_v36, %v11198_v43  ;;  %1834 = vrot.lane.b32.xlu0 %v1760_v56, %s7539_s20  ;;  %v1253_v30 = vsub.f32 1.0, %v11213_v20 }
 0x4a9   : > { %v1776_v7 = vadd.f32 %v1744_v4, %v1712_v57  ;;  %v1411_v4 = vsub.f32 %v1251_v26, %v9243_v23  ;;  %v11214_v23 = vld [vmem:[#allocation32_spill] sm:$0xff] }
 0x4aa   : > { %v1615_v52 = vpop.permute.xlu0 %1614 }
 0x4ab   : > { %v1613_v62 = vpop.permute.xlu1 %1612  ;;  %v1698_v56 = vadd.f32 %v1615_v52, %v11201_v41  ;;  %1866 = vrot.lane.b32.xlu0 %v1776_v7, %s7539_s20  ;;  %v1731_v26 = vmul.f32 %v11214_v23, %v1411_v4  ;;  %v11217_v4 = vld [vmem:[#allocation39_spill] sm:$0xff] }
 0x4ac   : > { %v1697_v59 = vadd.f32 %v1613_v62, %v11199_v6  ;;  %v1268_v62 = vsub.f32 1.0, %v11211_v3 }
 0x4ad   : > { %v1762_v25 = vadd.f32 %v1730_v55, %v1698_v56  ;;  %v1427_v55 = vsub.f32 %v1267_v63, %v9250_v11  ;;  %v1413_v63 = vsub.f32 %v1253_v30, %v1333_v58 }
 0x4ae   : > { %v1761_v36 = vadd.f32 %v1729_v47, %v1697_v59  ;;  %v1647_v13 = vpop.permute.xlu0 %1646  ;;  %v11212_v47 = vld [vmem:[#allocation38_spill] sm:$0xff]  ;;  %v1412_v59 = vsub.f32 %v1252_v15, %v1331_v33  ;;  %v1428_v33 = vsub.f32 %v1268_v62, %v1363_v53 }
 0x4af   : > { %v1645_v12 = vpop.permute.xlu1 %1644  ;;  %v1746_v17 = vmul.f32 %v11212_v47, %v1426_v28  ;;  %v1714_v7 = vadd.f32 %v1647_v13, %v11204_v46  ;;  %1838 = vrot.lane.b32.xlu0 %v1762_v25, %s7539_s20  ;;  %v11215_v28 = vld [vmem:[#allocation31_spill] sm:$0xff]  ;;  %v11216_v25 = vld [vmem:[#allocation117_spill] sm:$0xff]  ;;  %v1747_v23 = vmul.f32 %v11217_v4, %v1427_v55 }
 0x4b0   : > { %v1713_v57 = vadd.f32 %v1645_v12, %v11202_v37  ;;  %1836 = vrot.lane.b32.xlu1 %v1761_v36, %s7539_s20  ;;  %v1732_v15 = vmul.f32 %v11215_v28, %v1412_v59  ;;  %v1269_v13 = vsub.f32 1.0, %v11216_v25  ;;  %v11220_v28 = vld [vmem:[#allocation119_spill] sm:$0xff] }
 0x4b1   : > { %v1778_v56 = vadd.f32 %v1746_v17, %v1714_v7  ;;  %v11218_v7 = vld [vmem:[#allocation118_spill] sm:$0xff] }
 0x4b2   : > { %v1777_v52 = vadd.f32 %v1745_v38, %v1713_v57  ;;  %v1619_v12 = vpop.permute.xlu0 %1618  ;;  %v1748_v59 = vmul.f32 %v11218_v7, %v1428_v33 }
 0x4b3   : > { %v1617_v2 = vpop.permute.xlu1 %1616  ;;  %v1700_v57 = vadd.f32 %v1619_v12, %v11207_v0  ;;  %1870 = vrot.lane.b32.xlu0 %v1778_v56, %s7539_s20 }
 0x4b4   : > { %v1699_v36 = vadd.f32 %v1617_v2, %v11205_v9  ;;  %1868 = vrot.lane.b32.xlu1 %v1777_v52, %s7539_s20 }
 0x4b5   : > { %v1764_v11 = vadd.f32 %v1732_v15, %v1700_v57 }
 0x4b6   : > { %v1763_v38 = vadd.f32 %v1731_v26, %v1699_v36  ;;  %v1651_v52 = vpop.permute.xlu0 %1650  ;;  %v11219_v26 = vld [vmem:[#allocation35_spill] sm:$0xff]  ;;  %v1429_v36 = vsub.f32 %v1269_v13, %v9273_v22 }
 0x4b7   : > { %v1649_v47 = vpop.permute.xlu1 %1648  ;;  %v1716_v62 = vadd.f32 %v1651_v52, %v11211_v3  ;;  %1842 = vrot.lane.b32.xlu0 %v1764_v11, %s7539_s20  ;;  %v1733_v56 = vmul.f32 %v11219_v26, %v1413_v63 }
 0x4b8   : > { %v1715_v17 = vadd.f32 %v1649_v47, %v11209_v44  ;;  %1840 = vrot.lane.b32.xlu1 %v1763_v38, %s7539_s20  ;;  %v1749_v15 = vmul.f32 %v11220_v28, %v1429_v36 }
 0x4b9   : > { %v1780_v55 = vadd.f32 %v1748_v59, %v1716_v62 }
 0x4ba   : > { %v1779_v53 = vadd.f32 %v1747_v23, %v1715_v17 }
 0x4bb   : > { %v1621_v2 = vpop.permute.xlu1 %1620  ;;  %1874 = vrot.lane.b32.xlu0 %v1780_v55, %s7539_s20 }
 0x4bc   : > { %v1701_v58 = vadd.f32 %v1621_v2, %v11213_v20  ;;  %1872 = vrot.lane.b32.xlu1 %v1779_v53, %s7539_s20 }
 0x4be   : > { %v1765_v30 = vadd.f32 %v1733_v56, %v1701_v58 }
 0x4bf   : > { %v1653_v12 = vpop.permute.xlu1 %1652 }
 0x4c0   : > { %v1717_v33 = vadd.f32 %v1653_v12, %v11216_v25  ;;  %1844 = vrot.lane.b32.xlu1 %v1765_v30, %s7539_s20 }
 0x4c2   : > { %v1781_v38 = vadd.f32 %v1749_v15, %v1717_v33 }
 0x4c4   : > { %1876 = vrot.lane.b32.xlu1 %v1781_v38, %s7539_s20 }
 0x4d1   : > { %v1815_v57 = vpop.permute.xlu0 %1814 }
 0x4d2   : > { %v1910_v22 = vmul.f32 %v1815_v57, %v8398_v40 }
 0x4d4   : > { %3430 = vrot.lane.b32.xlu1 %v1910_v22, %s7540_s1 }
 0x4d5   : > { %v1819_v13 = vpop.permute.xlu0 %1818 }
 0x4d6   : > { %v1912_v47 = vmul.f32 %v1819_v13, %v8409_v45 }
 0x4d8   : > { %3434 = vrot.lane.b32.xlu1 %v1912_v47, %s7540_s1 }
 0x4d9   : > { %v1847_v63 = vpop.permute.xlu0 %1846 }
 0x4da   : > { %v1817_v4 = vpop.permute.xlu1 %1816  ;;  %v1926_v17 = vmul.f32 %v1847_v63, %v8428_v60 }
 0x4db   : > { %v1911_v23 = vmul.f32 %v1817_v4, %v8422_v32 }
 0x4dd   : > { %3432 = vrot.lane.b32.xlu0 %v1911_v23, %s7540_s1  ;;  %v1851_v40 = vpop.permute.xlu0 %1850 }
 0x4de   : > { %v1821_v11 = vpop.permute.xlu1 %1820  ;;  %v1928_v45 = vmul.f32 %v1851_v40, %v8440_v19 }
 0x4df   : > { %v1913_v52 = vmul.f32 %v1821_v11, %v8434_v34 }
 0x4e1   : > { %3436 = vrot.lane.b32.xlu1 %v1913_v52, %s7540_s1  ;;  %3462 = vrot.lane.b32.xlu0 %v1926_v17, %s7540_s1 }
 0x4e2   : > { %v1849_v7 = vpop.permute.xlu1 %1848 }
 0x4e3   : > { %v1927_v32 = vmul.f32 %v1849_v7, %v8446_v51 }
 0x4e5   : > { %3464 = vrot.lane.b32.xlu1 %v1927_v32, %s7540_s1  ;;  %3466 = vrot.lane.b32.xlu0 %v1928_v45, %s7540_s1  ;;  %v11221_v32 = vld [vmem:[#allocation28_spill] sm:$0xff] }
 0x4e6   : > { %v1853_v59 = vpop.permute.xlu1 %1852 }
 0x4e7   : > { %v1929_v53 = vmul.f32 %v1853_v59, %v8458_v24  ;;  %v10888_v59 = vsub.s32 1, %v11221_v32 }
 0x4e9   : > { %3468 = vrot.lane.b32.xlu1 %v1929_v53, %s7540_s1  ;;  %v1823_v60 = vpop.permute.xlu0 %1822 }
 0x4ea   : > { %v1914_v34 = vmul.f32 %v1823_v60, %v11171_v27  ;;  %v9378_v60 = vld [vmem:[#allocation14] sm:$0x3f] }
 0x4ec   : > { %3438 = vrot.lane.b32.xlu0 %v1914_v34, %s7540_s1 }
 0x4ed   : > { %v1855_v62 = vpop.permute.xlu0 %1854 }
 0x4ee   : > { %v1930_v2 = vmul.f32 %v1855_v62, %v11173_v18 }
 0x4f0   : > { %3470 = vrot.lane.b32.xlu0 %v1930_v2, %s7540_s1 }
 0x4f2   : > { %v1825_v19 = vpop.permute.xlu1 %1824 }
 0x4f3   : > { %v1915_v51 = vmul.f32 %v1825_v19, %v11174_v14  ;;  %v10887_v19 = vsub.s32 4, %v11221_v32 }
 0x4f5   : > { %3440 = vrot.lane.b32.xlu1 %v1915_v51, %s7540_s1 }
 0x4f6   : > { %v1857_v26 = vpop.permute.xlu1 %1856 }
 0x4f7   : > { %v1931_v24 = vmul.f32 %v1857_v26, %v11176_v50 }
 0x4f9   : > { %3472 = vrot.lane.b32.xlu1 %v1931_v24, %s7540_s1  ;;  %v1827_v56 = vpop.permute.xlu0 %1826  ;;  %v9399_v24 = vrot.slane %v9378_v60, %v10887_v19 }
 0x4fa   : > { %v1916_v27 = vmul.f32 %v1827_v56, %v11179_v1 }
 0x4fc   : > { %3442 = vrot.lane.b32.xlu0 %v1916_v27, %s7540_s1 }
 0x4fd   : > { %v1859_v36 = vpop.permute.xlu0 %1858 }
 0x4fe   : > { %v1932_v18 = vmul.f32 %v1859_v36, %v11181_v54 }
 0x500   : > { %3474 = vrot.lane.b32.xlu0 %v1932_v18, %s7540_s1 }
 0x502   : > { %v1829_v55 = vpop.permute.xlu1 %1828 }
 0x503   : > { %v1917_v14 = vmul.f32 %v1829_v55, %v11182_v42 }
 0x505   : > { %3444 = vrot.lane.b32.xlu1 %v1917_v14, %s7540_s1 }
 0x506   : > { %v1861_v58 = vpop.permute.xlu1 %1860 }
 0x507   : > { %v1933_v50 = vmul.f32 %v1861_v58, %v11185_v48 }
 0x509   : > { %3476 = vrot.lane.b32.xlu1 %v1933_v50, %s7540_s1  ;;  %v1831_v30 = vpop.permute.xlu0 %1830 }
 0x50a   : > { %v1918_v1 = vmul.f32 %v1831_v30, %v11188_v31 }
 0x50c   : > { %3446 = vrot.lane.b32.xlu0 %v1918_v1, %s7540_s1 }
 0x50d   : > { %v1863_v12 = vpop.permute.xlu0 %1862 }
 0x50e   : > { %v1934_v54 = vmul.f32 %v1863_v12, %v11190_v8 }
 0x510   : > { %3478 = vrot.lane.b32.xlu0 %v1934_v54, %s7540_s1 }
 0x512   : > { %v1833_v28 = vpop.permute.xlu1 %1832 }
 0x513   : > { %v1919_v42 = vmul.f32 %v1833_v28, %v11191_v29 }
 0x515   : > { %3448 = vrot.lane.b32.xlu1 %v1919_v42, %s7540_s1 }
 0x516   : > { %v1865_v15 = vpop.permute.xlu1 %1864 }
 0x517   : > { %v1935_v48 = vmul.f32 %v1865_v15, %v11193_v10 }
 0x519   : > { %3480 = vrot.lane.b32.xlu1 %v1935_v48, %s7540_s1  ;;  %v1835_v33 = vpop.permute.xlu0 %1834 }
 0x51a   : > { %v1920_v31 = vmul.f32 %v1835_v33, %v11196_v16 }
 0x51b   : > { %v6513_v38 = vpop.f32.mrb[16].mxu0 }
 0x51c   : > { %v2843_v57 = vpop.f32.mrb[17].mxu0  ;;  %3450 = vrot.lane.b32.xlu0 %v1920_v31, %s7540_s1 }
 0x51d   : > { %v6514_v8 = vpop.f32.mrb[18].mxu0  ;;  %v1867_v22 = vpop.permute.xlu0 %1866 }
 0x51e   : > { %v2846_v13 = vpop.f32.mrb[19].mxu0  ;;  %v1936_v29 = vmul.f32 %v1867_v22, %v11198_v43 }
 0x520   : > { %3482 = vrot.lane.b32.xlu0 %v1936_v29, %s7540_s1 }
 0x521   : > { %v1839_v10 = vpop.permute.xlu0 %1838 }
 0x522   : > { %v1837_v47 = vpop.permute.xlu1 %1836  ;;  %v1922_v23 = vmul.f32 %v1839_v10, %v11201_v41 }
 0x523   : > { %v1921_v4 = vmul.f32 %v1837_v47, %v11199_v6 }
 0x524   : > { %v6517_v16 = vpop.f32.mrb[20].mxu0  ;;  %3454 = vrot.lane.b32.xlu0 %v1922_v23, %s7540_s1 }
 0x525   : > { %3452 = vrot.lane.b32.xlu1 %v1921_v4, %s7540_s1  ;;  %v2859_v11 = vpop.f32.mrb[21].mxu0 }
 0x526   : > { %v1869_v63 = vpop.permute.xlu1 %1868  ;;  %v6518_v52 = vpop.f32.mrb[22].mxu0 }
 0x527   : > { %v1937_v17 = vmul.f32 %v1869_v63, %v11202_v37  ;;  %v2862_v40 = vpop.f32.mrb[23].mxu0  ;;  %v9383_v37 = vrot.slane %v9378_v60, %v10888_v59 }
 0x529   : > { %3484 = vrot.lane.b32.xlu1 %v1937_v17, %s7540_s1  ;;  %v9390_v2 = vadd.f32 %v6513_v38, %v9383_v37  ;;  %v9402_v56 = vadd.f32 %v9383_v37, %v2843_v57  ;;  %v9415_v58 = vadd.f32 %v6514_v8, %v9383_v37  ;;  %v9420_v30 = vadd.f32 %v9383_v37, %v2846_v13 }
 0x52a   : > { %v1841_v43 = vpop.permute.xlu1 %1840  ;;  %v9427_v54 = vadd.f32 %v6518_v52, %v9383_v37  ;;  %v9436_v33 = vadd.f32 %v6517_v16, %v9383_v37  ;;  %v9445_v8 = vadd.f32 %v9383_v37, %v2862_v40  ;;  %v9451_v29 = vadd.f32 %v9383_v37, %v2859_v11 }
 0x52b   : > { %v1923_v6 = vmul.f32 %v1841_v43, %v11205_v9  ;;  %v10919_v26 = vmax.f32 %v9390_v2, 0.0  ;;  %v10910_v14 = vmax.f32 %v9402_v56, 0.0  ;;  %v10920_v12 = vmax.f32 %v9415_v58, 0.0 }
 0x52c   : > { %v6521_v7 = vpop.f32.mrb[24].mxu0  ;;  %v10917_v48 = vmax.f32 %v9420_v30, 0.0  ;;  %v10893_v57 = vmax.f32 %v9427_v54, 0.0  ;;  %v10895_v4 = vmax.f32 %v9436_v33, 0.0  ;;  %v10889_v23 = vmax.f32 %v9445_v8, 0.0 }
 0x52d   : > { %3456 = vrot.lane.b32.xlu1 %v1923_v6, %s7540_s1  ;;  %v9375_v41 = vpop.f32.mrb[25].mxu0  ;;  %v3044_v55 = vmul.f32 %v9399_v24, %v10919_v26  ;;  %v3042_v1 = vmul.f32 %v9399_v24, %v10910_v14  ;;  %v3045_v38 = vmul.f32 %v9399_v24, %v10920_v12  ;;  %v10891_v11 = vmax.f32 %v9451_v29, 0.0 }
 0x52e   : > { %v6522_v45 = vpop.f32.mrb[26].mxu0  ;;  %v3043_v47 = vmul.f32 %v9399_v24, %v10917_v48  ;;  %v3049_v10 = vmul.f32 %v9399_v24, %v10893_v57  ;;  %v3048_v40 = vmul.f32 %v9399_v24, %v10895_v4  ;;  %v9474_v43 = vadd.f32 %v6521_v7, %v9383_v37 }
 0x52f   : > { %v2878_v53 = vpop.f32.mrb[27].mxu0  ;;  %v3080_v28 = vsel %vm2370_vm5, %v3044_v55, 0.0  ;;  %v3074_v13 = vsel %vm2370_vm5, %v3042_v1, 0.0  ;;  %v9462_v16 = vadd.f32 %v6522_v45, %v9383_v37  ;;  %v3083_v63 = vsel %vm2370_vm5, %v3045_v38, 0.0 }
 0x530   : > { %v3077_v45 = vsel %vm2370_vm5, %v3043_v47, 0.0  ;;  %v3047_v55 = vmul.f32 %v9399_v24, %v10889_v23  ;;  %v3046_v7 = vmul.f32 %v9399_v24, %v10891_v11  ;;  %v10892_v47 = vmax.f32 %v9474_v43, 0.0 }
 0x531   : > { %v10890_v1 = vmax.f32 %v9462_v16, 0.0  ;;  %v3092_v19 = vsel %vm2370_vm5, %v3048_v40, 0.0  ;;  %v10933_v26 = vsub.s32 5, %v11221_v32 }
 0x532   : > { %v3086_v40 = vsel %vm2370_vm5, %v3046_v7, 0.0 }
 0x533   : > { %v9760_v21 = vrot.slane %v9378_v60, %v10933_v26 }
 0x534   : > { %v9385_v34 = vpop.f32.mrb[28].mxu0 }
 0x535   : > { %v9387_v62 = vpop.f32.mrb[29].mxu0 }
 0x536   : > { %v6526_v9 = vpop.f32.mrb[30].mxu0  ;;  %v9541_v4 = vadd.f32 %v9383_v37, %v9387_v62 }
 0x537   : > { %v9393_v51 = vpop.f32.mrb[31].mxu0 }
 0x53c   : > { %v9404_v27 = vpop.f32.mrb[32].mxu0 }
 0x53d   : > { %v9406_v36 = vpop.f32.mrb[33].mxu0 }
 0x53e   : > { %v9408_v18 = vpop.f32.mrb[34].mxu0 }
 0x53f   : > { %v9417_v50 = vpop.f32.mrb[35].mxu0 }
 0x543   : > { %3081 = vadd.xlane.f32.xlu0 %v3080_v28  ;;  %v9484_v28 = vadd.f32 %v9383_v37, %v2878_v53  ;;  %v3053_v53 = vmul.f32 %v9399_v24, %v10890_v1  ;;  %v3052_v1 = vmul.f32 %v9399_v24, %v10892_v47 }
 0x544   : > { %v9430_v42 = vpop.f32.mrb[36].mxu0 }
 0x545   : > { %v9432_v15 = vpop.f32.mrb[37].mxu0 }
 0x546   : > { %v9438_v31 = vpop.f32.mrb[38].mxu0 }
 0x547   : > { %v9447_v22 = vpop.f32.mrb[39].mxu0  ;;  %3075 = vadd.xlane.f32.xlu0 %v3074_v13  ;;  %v3095_v13 = vsel %vm2370_vm5, %v3049_v10, 0.0  ;;  %v9503_v10 = vadd.f32 %v6526_v9, %v9383_v37  ;;  %v9516_v9 = vadd.f32 %v9385_v34, %v9383_v37  ;;  %v3107_v34 = vsel %vm2370_vm5, %v3053_v53, 0.0 }
 0x549   : > { %11222 = vst [vmem:[#allocation64_spill] sm:$0xff] %v9503_v10  ;;  %11224 = vst [vmem:[#allocation68_spill] sm:$0xff] %v9516_v9  ;;  %v10897_v7 = vmax.f32 %v9503_v10, 0.0 }
 0x54b   : > { %3084 = vadd.xlane.f32.xlu0 %v3083_v63  ;;  %v9495_v63 = vadd.f32 %v9383_v37, %v9375_v41  ;;  %v3057_v53 = vmul.f32 %v9399_v24, %v10897_v7 }
 0x54c   : > { %v9465_v17 = vpop.f32.mrb[40].mxu0 }
 0x54d   : > { %v9468_v52 = vpop.f32.mrb[41].mxu0  ;;  %v10896_v11 = vmax.f32 %v9495_v63, 0.0 }
 0x54e   : > { %v9476_v6 = vpop.f32.mrb[42].mxu0 }
 0x54f   : > { %v9486_v38 = vpop.f32.mrb[43].mxu0  ;;  %3096 = vadd.xlane.f32.xlu0 %v3095_v13  ;;  %v3089_v13 = vsel %vm2370_vm5, %v3047_v55, 0.0 }
 0x551   : > { %3078 = vadd.xlane.f32.xlu1 %v3077_v45  ;;  %v10894_v45 = vmax.f32 %v9484_v28, 0.0 }
 0x553   : > { %3090 = vadd.xlane.f32.xlu0 %v3089_v13  ;;  %v9529_v13 = vadd.f32 %v9383_v37, %v9393_v51  ;;  %v3104_v51 = vsel %vm2370_vm5, %v3052_v1, 0.0  ;;  %v10900_v1 = vmax.f32 %v9541_v4, 0.0 }
 0x554   : > { %v6541_v59 = vpop.f32.mrb[44].mxu0 }
 0x555   : > { %3093 = vadd.xlane.f32.xlu1 %v3092_v19  ;;  %v9507_v23 = vadd.f32 %v6541_v59, %v9383_v37  ;;  %v2955_v41 = vpop.f32.mrb[45].mxu0  ;;  %v3051_v59 = vmul.f32 %v9399_v24, %v10894_v45  ;;  %v10898_v45 = vmax.f32 %v9516_v9, 0.0 }
 0x556   : > { %v9519_v19 = vadd.f32 %v9383_v37, %v2955_v41  ;;  %v9521_v55 = vpop.f32.mrb[46].mxu0  ;;  %v3050_v41 = vmul.f32 %v9399_v24, %v10896_v11  ;;  %v9559_v11 = vadd.f32 %v9404_v27, %v9383_v37  ;;  %v3054_v27 = vmul.f32 %v9399_v24, %v10900_v1 }
 0x557   : > { %11223 = vst [vmem:[#allocation67_spill] sm:$0xff] %v9507_v23  ;;  %v2958_v47 = vpop.f32.mrb[47].mxu0  ;;  %3108 = vadd.xlane.f32.xlu0 %v3107_v34  ;;  %v3101_v34 = vsel %vm2370_vm5, %v3051_v59, 0.0  ;;  %v3056_v62 = vmul.f32 %v9399_v24, %v10898_v45  ;;  %v9568_v59 = vadd.f32 %v9383_v37, %v9417_v50  ;;  %v9577_v45 = vadd.f32 %v9383_v37, %v9406_v36 }
 0x558   : > { %11225 = vst [vmem:[#allocation69_spill] sm:$0xff] %v9519_v19  ;;  %v9533_v57 = vadd.f32 %v9383_v37, %v2958_v47  ;;  %v10899_v47 = vmax.f32 %v9529_v13, 0.0  ;;  %v3098_v7 = vsel %vm2370_vm5, %v3050_v41, 0.0  ;;  %v10902_v41 = vmax.f32 %v9559_v11, 0.0 }
 0x559   : > { %3087 = vadd.xlane.f32.xlu1 %v3086_v40  ;;  %v9550_v40 = vadd.f32 %v9408_v18, %v9383_v37  ;;  %11227 = vst [vmem:[#allocation70_spill] sm:$0xff] %v9568_v59  ;;  %v9595_v1 = vadd.f32 %v9430_v42, %v9383_v37 }
 0x55a   : > { %11226 = vst [vmem:[#allocation58_spill] sm:$0xff] %v9533_v57  ;;  %v3055_v18 = vmul.f32 %v9399_v24, %v10899_v47  ;;  %v3116_v47 = vsel %vm2370_vm5, %v3056_v62, 0.0  ;;  %v3060_v36 = vmul.f32 %v9399_v24, %v10902_v41  ;;  %v10904_v62 = vmax.f32 %v9577_v45, 0.0 }
 0x55b   : > { %3102 = vadd.xlane.f32.xlu0 %v3101_v34  ;;  %v3119_v34 = vsel %vm2370_vm5, %v3057_v53, 0.0  ;;  %v9586_v53 = vadd.f32 %v9438_v31, %v9383_v37  ;;  %11229 = vst [vmem:[#allocation60_spill] sm:$0xff] %v9595_v1  ;;  %v9613_v41 = vadd.f32 %v9383_v37, %v9432_v15 }
 0x55c   : > { %v3058_v42 = vmul.f32 %v9399_v24, %v10904_v62  ;;  %v9631_v62 = vadd.f32 %v9465_v17, %v9383_v37 }
 0x55d   : > { %3105 = vadd.xlane.f32.xlu1 %v3104_v51  ;;  %v10901_v51 = vmax.f32 %v9550_v40, 0.0  ;;  %11228 = vst [vmem:[#allocation59_spill] sm:$0xff] %v9586_v53  ;;  %11231 = vst [vmem:[#allocation62_spill] sm:$0xff] %v9613_v41 }
 0x55e   : > { %11233 = vst [vmem:[#allocation77_spill] sm:$0xff] %v9631_v62 }
 0x55f   : > { %3120 = vadd.xlane.f32.xlu0 %v3119_v34  ;;  %v3061_v50 = vmul.f32 %v9399_v24, %v10901_v51  ;;  %v3113_v34 = vsel %vm2370_vm5, %v3055_v18, 0.0  ;;  %v3110_v51 = vsel %vm2370_vm5, %v3054_v27, 0.0  ;;  %v9604_v18 = vadd.f32 %v9383_v37, %v9447_v22 }
 0x560   : > { %v10906_v27 = vmax.f32 %v9595_v1, 0.0 }
 0x561   : > { %3099 = vadd.xlane.f32.xlu1 %v3098_v7  ;;  %v10903_v7 = vmax.f32 %v9568_v59, 0.0  ;;  %11230 = vst [vmem:[#allocation73_spill] sm:$0xff] %v9604_v18 }
 0x562   : > { %v3064_v15 = vmul.f32 %v9399_v24, %v10906_v27  ;;  %v9649_v27 = vadd.f32 %v9383_v37, %v9468_v52 }
 0x563   : > { %3114 = vadd.xlane.f32.xlu0 %v3113_v34  ;;  %v3059_v31 = vmul.f32 %v9399_v24, %v10903_v7  ;;  %v3131_v34 = vsel %vm2370_vm5, %v3061_v50, 0.0  ;;  %v3128_v7 = vsel %vm2370_vm5, %v3060_v36, 0.0  ;;  %v9622_v50 = vadd.f32 %v9476_v6, %v9383_v37 }
 0x564   : > { %v10908_v36 = vmax.f32 %v9613_v41, 0.0  ;;  %11235 = vst [vmem:[#allocation80_spill] sm:$0xff] %v9649_v27 }
 0x565   : > { %3117 = vadd.xlane.f32.xlu1 %v3116_v47  ;;  %v10905_v47 = vmax.f32 %v9586_v53, 0.0  ;;  %11232 = vst [vmem:[#allocation75_spill] sm:$0xff] %v9622_v50 }
 0x566   : > { %v3062_v17 = vmul.f32 %v9399_v24, %v10908_v36 }
 0x567   : > { %3132 = vadd.xlane.f32.xlu0 %v3131_v34  ;;  %v3065_v22 = vmul.f32 %v9399_v24, %v10905_v47  ;;  %v3125_v34 = vsel %vm2370_vm5, %v3059_v31, 0.0  ;;  %v3122_v47 = vsel %vm2370_vm5, %v3058_v42, 0.0  ;;  %v9640_v31 = vadd.f32 %v9383_v37, %v9486_v38 }
 0x568   : > { %v10916_v42 = vmax.f32 %v9631_v62, 0.0  ;;  %v3134_v36 = vsel %vm2370_vm5, %v3062_v17, 0.0 }
 0x569   : > { %3111 = vadd.xlane.f32.xlu1 %v3110_v51  ;;  %v10907_v51 = vmax.f32 %v9604_v18, 0.0  ;;  %11234 = vst [vmem:[#allocation61_spill] sm:$0xff] %v9640_v31 }
 0x56a   : > { %v3068_v52 = vmul.f32 %v9399_v24, %v10916_v42 }
 0x56b   : > { %3126 = vadd.xlane.f32.xlu0 %v3125_v34  ;;  %v3063_v6 = vmul.f32 %v9399_v24, %v10907_v51  ;;  %v3143_v34 = vsel %vm2370_vm5, %v3065_v22, 0.0  ;;  %v3140_v51 = vsel %vm2370_vm5, %v3064_v15, 0.0  ;;  %v9658_v22 = vadd.f32 %v9521_v55, %v9383_v37 }
 0x56c   : > { %v10914_v15 = vmax.f32 %v9649_v27, 0.0 }
 0x56d   : > { %3129 = vadd.xlane.f32.xlu1 %v3128_v7  ;;  %v10909_v7 = vmax.f32 %v9622_v50, 0.0  ;;  %11236 = vst [vmem:[#allocation63_spill] sm:$0xff] %v9658_v22  ;;  %v10912_v14 = vmax.f32 %v9658_v22, 0.0 }
 0x56e   : > { %v3066_v55 = vmul.f32 %v9399_v24, %v10914_v15  ;;  %v1873_v15 = vpop.permute.xlu1 %1872 }
 0x56f   : > { %3144 = vadd.xlane.f32.xlu0 %v3143_v34  ;;  %v3069_v38 = vmul.f32 %v9399_v24, %v10909_v7  ;;  %v3137_v34 = vsel %vm2370_vm5, %v3063_v6, 0.0  ;;  %v3152_v6 = vsel %vm2370_vm5, %v3068_v52, 0.0  ;;  %v3073_v17 = vmul.f32 %v9399_v24, %v10912_v14 }
 0x571   : > { %3123 = vadd.xlane.f32.xlu1 %v3122_v47  ;;  %v10911_v47 = vmax.f32 %v9640_v31, 0.0  ;;  %v3155_v37 = vsel %vm2370_vm5, %v3069_v38, 0.0  ;;  %v3167_v14 = vsel %vm2370_vm5, %v3073_v17, 0.0 }
 0x573   : > { %3138 = vadd.xlane.f32.xlu0 %v3137_v34  ;;  %v3067_v7 = vmul.f32 %v9399_v24, %v10911_v47  ;;  %v10915_v34 = vmax.f32 %v9533_v57, 0.0  ;;  %v3146_v47 = vsel %vm2370_vm5, %v3066_v55, 0.0 }
 0x575   : > { %3141 = vadd.xlane.f32.xlu1 %v3140_v51  ;;  %v10913_v51 = vmax.f32 %v9507_v23, 0.0  ;;  %v3071_v52 = vmul.f32 %v9399_v24, %v10915_v34 }
 0x577   : > { %3156 = vadd.xlane.f32.xlu0 %v3155_v37  ;;  %v3072_v38 = vmul.f32 %v9399_v24, %v10913_v51  ;;  %v10918_v37 = vmax.f32 %v9519_v19, 0.0  ;;  %v1871_v51 = vpop.permute.xlu0 %1870  ;;  %v3161_v55 = vsel %vm2370_vm5, %v3071_v52, 0.0 }
 0x579   : > { %3135 = vadd.xlane.f32.xlu1 %v3134_v36  ;;  %v3149_v36 = vsel %vm2370_vm5, %v3067_v7, 0.0  ;;  %v3070_v7 = vmul.f32 %v9399_v24, %v10918_v37 }
 0x57b   : > { %3150 = vadd.xlane.f32.xlu0 %v3149_v36  ;;  %v7541_v36 = vmov 0   ;;  %v1843_v17 = vpop.permute.xlu0 %1842 }
 0x57c   : > { %6798 = vset.pattern.permute.xlu1 %v7541_v36  ;;  %6799 = vset.pattern.permute.xlu0 %v7541_v36  ;;  %v1938_v36 = vmul.f32 %v1871_v51, %v11204_v46 }
 0x57d   : > { %3153 = vadd.xlane.f32.xlu1 %v3152_v6  ;;  %v3164_v6 = vsel %vm2370_vm5, %v3072_v38, 0.0  ;;  %v1939_v38 = vmul.f32 %v1873_v15, %v11209_v44 }
 0x57f   : > { %3168 = vadd.xlane.f32.xlu0 %v3167_v14  ;;  %v1845_v14 = vpop.permute.xlu1 %1844  ;;  %v1875_v34 = vpop.permute.xlu0 %1874 }
 0x580   : > { %v1940_v46 = vmul.f32 %v1875_v34, %v11211_v3 }
 0x581   : > { %3147 = vadd.xlane.f32.xlu1 %v3146_v47  ;;  %v3158_v47 = vsel %vm2370_vm5, %v3070_v7, 0.0 }
 0x583   : > { %3162 = vadd.xlane.f32.xlu0 %v3161_v55  ;;  %v1877_v42 = vpop.permute.xlu1 %1876  ;;  %v9696_v48 = vpop.permute.xlu0 %3432  ;;  %v1924_v55 = vmul.f32 %v1843_v17, %v11207_v0 }
 0x585   : > { %3165 = vadd.xlane.f32.xlu1 %v3164_v6  ;;  %v1925_v6 = vmul.f32 %v1845_v14, %v11213_v20 }
 0x587   : > { %v9698_v24 = vpop.permute.xlu1 %3430  ;;  %v9703_v52 = vpop.permute.xlu0 %3462 }
 0x588   : > { %11237 = vst [vmem:[#allocation65_spill] sm:$0xff] %v9698_v24 }
 0x589   : > { %3159 = vadd.xlane.f32.xlu1 %v3158_v47  ;;  %v1941_v47 = vmul.f32 %v1877_v42, %v11216_v25 }
 0x58b   : > { %v9706_v7 = vpop.permute.xlu1 %3434  ;;  %v9715_v44 = vpop.permute.xlu0 %3466 }
 0x58c   : > { %11238 = vst [vmem:[#allocation85_spill] sm:$0xff] %v9706_v7 }
 0x58f   : > { %v9712_v37 = vpop.permute.xlu1 %3436  ;;  %v9720_v20 = vpop.permute.xlu0 %3438 }
 0x590   : > { %11239 = vst [vmem:[#allocation66_spill] sm:$0xff] %v9712_v37 }
 0x593   : > { %v9722_v15 = vpop.permute.xlu1 %3464  ;;  %v9724_v0 = vpop.permute.xlu0 %3470 }
 0x597   : > { %v9726_v51 = vpop.permute.xlu1 %3468  ;;  %v9728_v25 = vpop.permute.xlu0 %3442 }
 0x599   : > { %3486 = vrot.lane.b32.xlu0 %v1938_v36, %s7540_s1 }
 0x59a   : > { %3488 = vrot.lane.b32.xlu1 %v1939_v38, %s7540_s1 }
 0x59b   : > { %v9730_v42 = vpop.permute.xlu1 %3440  ;;  %v9732_v17 = vpop.permute.xlu0 %3474 }
 0x59d   : > { %3458 = vrot.lane.b32.xlu0 %v1924_v55, %s7540_s1 }
 0x59e   : > { %3460 = vrot.lane.b32.xlu1 %v1925_v6, %s7540_s1 }
 0x59f   : > { %v9734_v14 = vpop.permute.xlu1 %3472  ;;  %v9736_v3 = vpop.permute.xlu0 %3446 }
 0x5a1   : > { %3490 = vrot.lane.b32.xlu0 %v1940_v46, %s7540_s1 }
 0x5a2   : > { %3492 = vrot.lane.b32.xlu1 %v1941_v47, %s7540_s1 }
 0x5a3   : > { %v9738_v34 = vpop.permute.xlu1 %3444  ;;  %v9740_v38 = vpop.permute.xlu0 %3478 }
 0x5a7   : > { %v9742_v36 = vpop.permute.xlu1 %3476  ;;  %v9744_v6 = vpop.permute.xlu0 %3450 }
 0x5a8   : > { %11240 = vst [vmem:[#allocation91_spill] sm:$0xff] %v9744_v6 }
 0x5ab   : > { %v9746_v55 = vpop.permute.xlu1 %3448  ;;  %v9748_v47 = vpop.permute.xlu0 %3482 }
 0x5ac   : > { %11241 = vst [vmem:[#allocation93_spill] sm:$0xff] %v9746_v55 }
 0x5af   : > { %v9750_v46 = vpop.permute.xlu1 %3480  ;;  %v9755_v61 = vpop.permute.xlu0 %3454 }
 0x5b0   : > { %11242 = vst [vmem:[#allocation71_spill] sm:$0xff] %v9750_v46 }
 0x5b3   : > { %v9753_v12 = vpop.permute.xlu1 %3452 }
 0x5b4   : > { %11243 = vst [vmem:[#allocation96_spill] sm:$0xff] %v9753_v12 }
 0x5b7   : > { %v9762_v5 = vpop.permute.xlu1 %3484 }
 0x5bb   : > { %v9766_v19 = vpop.permute.xlu1 %3456 }
 0x5d0   : > { %v3082_v39 = vpop.xlane.xlu0 %3081 }
 0x5d1   : > { %v3176_v35 = vadd.f32 %v9760_v21, %v3082_v39 }
 0x5d3   : > { %v6260_v22 = vmul.f32 -1.442695, %v3176_v35 }
 0x5d4   : > { %v3076_v23 = vpop.xlane.xlu0 %3075 }
 0x5d5   : > { %6885 = vpow2.f32 %v6260_v22  ;;  %v3174_v57 = vadd.f32 %v9760_v21, %v3076_v23 }
 0x5d7   : > { %v6258_v31 = vmul.f32 -1.442695, %v3174_v57 }
 0x5d8   : > { %v3085_v27 = vpop.xlane.xlu0 %3084 }
 0x5d9   : > { %6887 = vpow2.f32 %v6258_v31  ;;  %v3177_v32 = vadd.f32 %v9760_v21, %v3085_v27 }
 0x5db   : > { %v6261_v50 = vmul.f32 -1.442695, %v3177_v32 }
 0x5dc   : > { %v3097_v62 = vpop.xlane.xlu0 %3096 }
 0x5dd   : > { %6889 = vpow2.f32 %v6261_v50  ;;  %v3181_v39 = vadd.f32 %v9760_v21, %v3097_v62 }
 0x5de   : > { %v3079_v60 = vpop.xlane.xlu1 %3078 }
 0x5df   : > { %v3175_v26 = vadd.f32 %v9760_v21, %v3079_v60  ;;  %v6886_v18 = vpop.eup %6885  ;;  %v6265_v22 = vmul.f32 -1.442695, %v3181_v39 }
 0x5e0   : > { %v3304_v23 = vadd.f32 1.0, %v6886_v18  ;;  %v3091_v53 = vpop.xlane.xlu0 %3090 }
 0x5e1   : > { %v6259_v35 = vmul.f32 -1.442695, %v3175_v26  ;;  %v3179_v27 = vadd.f32 %v9760_v21, %v3091_v53 }
 0x5e2   : > { %v3094_v41 = vpop.xlane.xlu1 %3093 }
 0x5e3   : > { %6891 = vpow2.f32 %v6259_v35  ;;  %v3180_v57 = vadd.f32 %v9760_v21, %v3094_v41  ;;  %v6888_v31 = vpop.eup %6887  ;;  %v6263_v60 = vmul.f32 -1.442695, %v3179_v27 }
 0x5e4   : > { %6893 = vpow2.f32 %v6265_v22  ;;  %v3302_v50 = vadd.f32 1.0, %v6888_v31  ;;  %v3109_v62 = vpop.xlane.xlu0 %3108 }
 0x5e5   : > { %6895 = vrcp.f32 %v3304_v23  ;;  %v6264_v32 = vmul.f32 -1.442695, %v3180_v57  ;;  %v3185_v18 = vadd.f32 %v9760_v21, %v3109_v62 }
 0x5e6   : > { %v3088_v1 = vpop.xlane.xlu1 %3087 }
 0x5e7   : > { %6897 = vpow2.f32 %v6264_v32  ;;  %v3178_v26 = vadd.f32 %v9760_v21, %v3088_v1  ;;  %v6890_v41 = vpop.eup %6889  ;;  %v6269_v35 = vmul.f32 -1.442695, %v3185_v18 }
 0x5e8   : > { %6899 = vpow2.f32 %v6263_v60  ;;  %v3305_v9 = vadd.f32 1.0, %v6890_v41  ;;  %v3103_v23 = vpop.xlane.xlu0 %3102 }
 0x5e9   : > { %6901 = vrcp.f32 %v3302_v50  ;;  %v6262_v39 = vmul.f32 -1.442695, %v3178_v26  ;;  %v3183_v57 = vadd.f32 %v9760_v21, %v3103_v23 }
 0x5ea   : > { %v3106_v22 = vpop.xlane.xlu1 %3105 }
 0x5eb   : > { %6903 = vpow2.f32 %v6262_v39  ;;  %v3184_v53 = vadd.f32 %v9760_v21, %v3106_v22  ;;  %v6267_v60 = vmul.f32 -1.442695, %v3183_v57 }
 0x5ec   : > { %6905 = vpow2.f32 %v6269_v35  ;;  %v3121_v41 = vpop.xlane.xlu0 %3120 }
 0x5ed   : > { %v6892_v27 = vpop.eup %6891  ;;  %6907 = vrcp.f32 %v3305_v9  ;;  %v6268_v1 = vmul.f32 -1.442695, %v3184_v53 }
 0x5ee   : > { %v6894_v32 = vpop.eup %6893  ;;  %v3303_v31 = vadd.f32 1.0, %v6892_v27  ;;  %v3100_v62 = vpop.xlane.xlu1 %3099 }
 0x5ef   : > { %v6896_v50 = vpop.eup %6895  ;;  %v3309_v26 = vadd.f32 1.0, %v6894_v32  ;;  %6909 = vpow2.f32 %v6268_v1  ;;  %v3182_v18 = vadd.f32 %v9760_v21, %v3100_v62 }
 0x5f0   : > { %6911 = vrcp.f32 %v3303_v31  ;;  %v3528_v39 = vmul.f32 %v6896_v50, %v9706_v7  ;;  %v3115_v27 = vpop.xlane.xlu0 %3114  ;;  %v3189_v31 = vadd.f32 %v9760_v21, %v3121_v41 }
 0x5f1   : > { %v6898_v22 = vpop.eup %6897  ;;  %6913 = vrcp.f32 %v3309_v26  ;;  %v6266_v35 = vmul.f32 -1.442695, %v3182_v18 }
 0x5f2   : > { %v6900_v23 = vpop.eup %6899  ;;  %v3308_v59 = vadd.f32 1.0, %v6898_v22  ;;  %6915 = vpow2.f32 %v6267_v60  ;;  %v3118_v9 = vpop.xlane.xlu1 %3117  ;;  %3570 = vperm.xlu1 %6798, %v3528_v39  }
 0x5f3   : > { %v6902_v53 = vpop.eup %6901  ;;  %v3307_v57 = vadd.f32 1.0, %v6900_v23  ;;  %6917 = vpow2.f32 %v6266_v35  ;;  %v3188_v26 = vadd.f32 %v9760_v21, %v3118_v9  ;;  %v3187_v9 = vadd.f32 %v9760_v21, %v3115_v27 }
 0x5f4   : > { %6919 = vrcp.f32 %v3308_v59  ;;  %v3526_v1 = vmul.f32 %v6902_v53, %v9698_v24  ;;  %v3133_v39 = vpop.xlane.xlu0 %3132  ;;  %v6273_v59 = vmul.f32 -1.442695, %v3189_v31 }
 0x5f5   : > { %v6904_v32 = vpop.eup %6903  ;;  %6921 = vrcp.f32 %v3307_v57  ;;  %v6272_v57 = vmul.f32 -1.442695, %v3188_v26 }
 0x5f6   : > { %v6906_v62 = vpop.eup %6905  ;;  %v3306_v50 = vadd.f32 1.0, %v6904_v32  ;;  %v3112_v18 = vpop.xlane.xlu1 %3111  ;;  %3560 = vperm.xlu0 %6799, %v3526_v1  }
 0x5f7   : > { %v6908_v60 = vpop.eup %6907  ;;  %v3313_v22 = vadd.f32 1.0, %v6906_v62  ;;  %v3186_v41 = vadd.f32 %v9760_v21, %v3112_v18 }
 0x5f8   : > { %6923 = vrcp.f32 %v3306_v50  ;;  %v3529_v35 = vmul.f32 %v6908_v60, %v9712_v37  ;;  %v3127_v1 = vpop.xlane.xlu0 %3126  ;;  %v6271_v37 = vmul.f32 -1.442695, %v3187_v9 }
 0x5f9   : > { %v6910_v23 = vpop.eup %6909  ;;  %6925 = vrcp.f32 %v3313_v22  ;;  %v6270_v18 = vmul.f32 -1.442695, %v3186_v41  ;;  %v3191_v9 = vadd.f32 %v9760_v21, %v3127_v1 }
 0x5fa   : > { %v6912_v53 = vpop.eup %6911  ;;  %v3312_v24 = vadd.f32 1.0, %v6910_v23  ;;  %v3130_v7 = vpop.xlane.xlu1 %3129  ;;  %3575 = vperm.xlu0 %6799, %v3529_v35  }
 0x5fb   : > { %v6914_v32 = vpop.eup %6913  ;;  %v3527_v62 = vmul.f32 %v6912_v53, %v9696_v48  ;;  %v3192_v35 = vadd.f32 %v9760_v21, %v3130_v7  ;;  %v3193_v53 = vadd.f32 %v9760_v21, %v3133_v39 }
 0x5fc   : > { %v6916_v10 = vpop.eup %6915  ;;  %6927 = vrcp.f32 %v3312_v24  ;;  %v3533_v50 = vmul.f32 %v6914_v32, %v9738_v34  ;;  %v3145_v24 = vpop.xlane.xlu0 %3144 }
 0x5fd   : > { %v6918_v60 = vpop.eup %6917  ;;  %v3311_v22 = vadd.f32 1.0, %v6916_v10  ;;  %6929 = vpow2.f32 %v6273_v59  ;;  %3565 = vperm.xlu1 %6798, %v3527_v62  }
 0x5fe   : > { %v6920_v31 = vpop.eup %6919  ;;  %v3310_v26 = vadd.f32 1.0, %v6918_v60  ;;  %6931 = vpow2.f32 %v6272_v57  ;;  %v3124_v23 = vpop.xlane.xlu1 %3123  ;;  %3595 = vperm.xlu0 %6799, %v3533_v50   ;;  %v6276_v57 = vmul.f32 -1.442695, %v3192_v35  ;;  %v6277_v50 = vmul.f32 -1.442695, %v3193_v53 }
 0x5ff   : > { %v6922_v27 = vpop.eup %6921  ;;  %6933 = vrcp.f32 %v3311_v22  ;;  %v3532_v32 = vmul.f32 %v6920_v31, %v9728_v25  ;;  %v3190_v41 = vadd.f32 %v9760_v21, %v3124_v23 }
 0x600   : > { %6935 = vrcp.f32 %v3310_v26  ;;  %v3531_v10 = vmul.f32 %v6922_v27, %v9730_v42  ;;  %v3139_v39 = vpop.xlane.xlu0 %3138  ;;  %v6275_v27 = vmul.f32 -1.442695, %v3191_v9 }
 0x601   : > { %3590 = vperm.xlu1 %6798, %v3532_v32   ;;  %6937 = vpow2.f32 %v6270_v18  ;;  %v6274_v26 = vmul.f32 -1.442695, %v3190_v41 }
 0x602   : > { %v6924_v59 = vpop.eup %6923  ;;  %v3142_v7 = vpop.xlane.xlu1 %3141  ;;  %3585 = vperm.xlu0 %6799, %v3531_v10   ;;  %6939 = vpow2.f32 %v6271_v37  ;;  %v3197_v37 = vadd.f32 %v9760_v21, %v3145_v24 }
 0x603   : > { %v6926_v62 = vpop.eup %6925  ;;  %v3530_v60 = vmul.f32 %v6924_v59, %v9720_v20  ;;  %6941 = vpow2.f32 %v6276_v57  ;;  %v3196_v18 = vadd.f32 %v9760_v21, %v3142_v7 }
 0x604   : > { %v3537_v22 = vmul.f32 %v6926_v62, %v9753_v12  ;;  %6943 = vpow2.f32 %v6277_v50  ;;  %v3157_v53 = vpop.xlane.xlu0 %3156 }
 0x605   : > { %3580 = vperm.xlu1 %6798, %v3530_v60   ;;  %6945 = vpow2.f32 %v6274_v26  ;;  %v6280_v62 = vmul.f32 -1.442695, %v3196_v18  ;;  %v6281_v60 = vmul.f32 -1.442695, %v3197_v37 }
 0x606   : > { %v6928_v31 = vpop.eup %6927  ;;  %v3136_v35 = vpop.xlane.xlu1 %3135  ;;  %3615 = vperm.xlu0 %6799, %v3537_v22   ;;  %6947 = vpow2.f32 %v6275_v27 }
 0x607   : > { %v6930_v23 = vpop.eup %6929  ;;  %v3536_v1 = vmul.f32 %v6928_v31, %v9744_v6  ;;  %v3194_v57 = vadd.f32 %v9760_v21, %v3136_v35  ;;  %6949 = vpow2.f32 %v6280_v62 }
 0x608   : > { %v6932_v32 = vpop.eup %6931  ;;  %v3151_v50 = vpop.xlane.xlu0 %3150  ;;  %v3317_v22 = vadd.f32 1.0, %v6930_v23  ;;  %6951 = vpow2.f32 %v6281_v60 }
 0x609   : > { %v6934_v10 = vpop.eup %6933  ;;  %3610 = vperm.xlu1 %6798, %v3536_v1   ;;  %v3316_v12 = vadd.f32 1.0, %v6932_v32  ;;  %v3195_v1 = vadd.f32 %v9760_v21, %v3139_v39  ;;  %v6278_v26 = vmul.f32 -1.442695, %v3194_v57 }
 0x60a   : > { %v6936_v59 = vpop.eup %6935  ;;  %v3154_v41 = vpop.xlane.xlu1 %3153  ;;  %v3535_v7 = vmul.f32 %v6934_v10, %v9746_v55  ;;  %6953 = vrcp.f32 %v3317_v22 }
 0x60b   : > { %v3534_v9 = vmul.f32 %v6936_v59, %v9736_v3  ;;  %v6938_v24 = vpop.eup %6937  ;;  %v3200_v18 = vadd.f32 %v9760_v21, %v3154_v41  ;;  %6955 = vrcp.f32 %v3316_v12  ;;  %v6279_v23 = vmul.f32 -1.442695, %v3195_v1 }
 0x60c   : > { %3605 = vperm.xlu0 %6799, %v3535_v7   ;;  %v6940_v31 = vpop.eup %6939  ;;  %v3314_v6 = vadd.f32 1.0, %v6938_v24  ;;  %v3169_v27 = vpop.xlane.xlu0 %3168  ;;  %v3201_v7 = vadd.f32 %v9760_v21, %v3157_v53  ;;  %6957 = vpow2.f32 %v6278_v26 }
 0x60d   : > { %3600 = vperm.xlu1 %6798, %v3534_v9   ;;  %v6942_v37 = vpop.eup %6941  ;;  %v3315_v10 = vadd.f32 1.0, %v6940_v31  ;;  %v6284_v32 = vmul.f32 -1.442695, %v3200_v18  ;;  %v3199_v31 = vadd.f32 %v9760_v21, %v3151_v50 }
 0x60e   : > { %v3148_v35 = vpop.xlane.xlu1 %3147  ;;  %v6944_v59 = vpop.eup %6943  ;;  %6959 = vrcp.f32 %v3314_v6  ;;  %v3320_v57 = vadd.f32 1.0, %v6942_v37  ;;  %v6285_v22 = vmul.f32 -1.442695, %v3201_v7 }
 0x60f   : > { %v3198_v39 = vadd.f32 %v9760_v21, %v3148_v35  ;;  %v6946_v9 = vpop.eup %6945  ;;  %6961 = vrcp.f32 %v3315_v10  ;;  %v3321_v60 = vadd.f32 1.0, %v6944_v59  ;;  %v6283_v10 = vmul.f32 -1.442695, %v3199_v31 }
 0x610   : > { %v3163_v41 = vpop.xlane.xlu0 %3162  ;;  %v6948_v24 = vpop.eup %6947  ;;  %6963 = vpow2.f32 %v6279_v23  ;;  %v3318_v53 = vadd.f32 1.0, %v6946_v9 }
 0x611   : > { %6965 = vpow2.f32 %v6284_v32  ;;  %v6282_v12 = vmul.f32 -1.442695, %v3198_v39  ;;  %v6950_v6 = vpop.eup %6949  ;;  %v3319_v35 = vadd.f32 1.0, %v6948_v24  ;;  %v3203_v59 = vadd.f32 %v9760_v21, %v3163_v41 }
 0x612   : > { %v3166_v62 = vpop.xlane.xlu1 %3165  ;;  %6967 = vrcp.f32 %v3320_v57  ;;  %v6952_v37 = vpop.eup %6951  ;;  %v3324_v57 = vadd.f32 1.0, %v6950_v6  ;;  %v3205_v41 = vadd.f32 %v9760_v21, %v3169_v27 }
 0x613   : > { %6969 = vrcp.f32 %v3321_v60  ;;  %v3204_v50 = vadd.f32 %v9760_v21, %v3166_v62  ;;  %v3325_v60 = vadd.f32 1.0, %v6952_v37  ;;  %v6287_v31 = vmul.f32 -1.442695, %v3203_v59 }
 0x614   : > { %v9807_v18 = vpop.permute.xlu0 %3486  ;;  %6971 = vpow2.f32 %v6285_v22  ;;  %v6954_v23 = vpop.eup %6953 }
 0x615   : > { %11244 = vst [vmem:[#allocation72_spill] sm:$0xff] %v9807_v18  ;;  %6973 = vpow2.f32 %v6282_v12  ;;  %v6956_v39 = vpop.eup %6955  ;;  %v6288_v62 = vmul.f32 -1.442695, %v3204_v50 }
 0x616   : > { %v3160_v1 = vpop.xlane.xlu1 %3159  ;;  %6975 = vrcp.f32 %v3318_v53 }
 0x617   : > { %v3202_v26 = vadd.f32 %v9760_v21, %v3160_v1  ;;  %v6958_v1 = vpop.eup %6957  ;;  %6977 = vrcp.f32 %v3319_v35 }
 0x618   : > { %v9813_v9 = vpop.permute.xlu0 %3458  ;;  %v6960_v22 = vpop.eup %6959  ;;  %6979 = vpow2.f32 %v6283_v10  ;;  %v3322_v6 = vadd.f32 1.0, %v6958_v1  ;;  %v6289_v10 = vmul.f32 -1.442695, %v3205_v41 }
 0x619   : > { %v6286_v7 = vmul.f32 -1.442695, %v3202_v26  ;;  %v3540_v24 = vmul.f32 %v6956_v39, %v9813_v9  ;;  %v6962_v12 = vpop.eup %6961  ;;  %v3538_v37 = vmul.f32 %v6960_v22, %v9755_v61 }
 0x61a   : > { %v9811_v32 = vpop.permute.xlu1 %3488  ;;  %v6964_v53 = vpop.eup %6963 }
 0x61b   : > { %11245 = vst [vmem:[#allocation74_spill] sm:$0xff] %v9811_v32  ;;  %6981 = vpow2.f32 %v6286_v7  ;;  %3630 = vperm.xlu1 %6798, %v3540_v24   ;;  %v6966_v35 = vpop.eup %6965  ;;  %v3323_v27 = vadd.f32 1.0, %v6964_v53  ;;  %v3539_v7 = vmul.f32 %v6962_v12, %v9766_v19 }
 0x61c   : > { %6983 = vrcp.f32 %v3324_v57  ;;  %v6968_v39 = vpop.eup %6967  ;;  %v3328_v50 = vadd.f32 1.0, %v6966_v35 }
 0x61d   : > { %6985 = vrcp.f32 %v3325_v60  ;;  %v6970_v21 = vpop.eup %6969 }
 0x61e   : > { %v9817_v26 = vpop.permute.xlu1 %3460  ;;  %6987 = vpow2.f32 %v6287_v31  ;;  %v6972_v59 = vpop.eup %6971  ;;  %v3545_v41 = vmul.f32 %v6970_v21, %v9726_v51 }
 0x61f   : > { %v3541_v55 = vmul.f32 %v6954_v23, %v9817_v26  ;;  %6989 = vpow2.f32 %v6288_v62  ;;  %3620 = vperm.xlu1 %6798, %v3538_v37   ;;  %v6974_v57 = vpop.eup %6973  ;;  %v3544_v23 = vmul.f32 %v6968_v39, %v9715_v44  ;;  %v3329_v24 = vadd.f32 1.0, %v6972_v59 }
 0x620   : > { %6991 = vrcp.f32 %v3322_v6  ;;  %v6976_v1 = vpop.eup %6975  ;;  %v3326_v22 = vadd.f32 1.0, %v6974_v57 }
 0x621   : > { %3635 = vperm.xlu0 %6799, %v3541_v55   ;;  %6993 = vpow2.f32 %v6289_v10  ;;  %v6978_v60 = vpop.eup %6977  ;;  %v3542_v62 = vmul.f32 %v6976_v1, %v9703_v52 }
 0x622   : > { %6995 = vrcp.f32 %v3323_v27  ;;  %v6980_v55 = vpop.eup %6979  ;;  %v3543_v39 = vmul.f32 %v6978_v60, %v9722_v15 }
 0x623   : > { %3650 = vperm.xlu1 %6798, %v3544_v23   ;;  %6997 = vrcp.f32 %v3328_v50  ;;  %v3327_v6 = vadd.f32 1.0, %v6980_v55 }
 0x624   : > { %6999 = vrcp.f32 %v3329_v24 }
 0x625   : > { %3625 = vperm.xlu0 %6799, %v3539_v7   ;;  %v6982_v31 = vpop.eup %6981  ;;  %7001 = vrcp.f32 %v3326_v22 }
 0x626   : > { %v6984_v53 = vpop.eup %6983  ;;  %v3330_v37 = vadd.f32 1.0, %v6982_v31  ;;  %7003 = vrcp.f32 %v3327_v6 }
 0x627   : > { %v6986_v12 = vpop.eup %6985  ;;  %3640 = vperm.xlu1 %6798, %v3542_v62   ;;  %v3548_v27 = vmul.f32 %v6984_v53, %v9732_v17 }
 0x628   : > { %v6988_v35 = vpop.eup %6987  ;;  %7005 = vrcp.f32 %v3330_v37  ;;  %v3549_v57 = vmul.f32 %v6986_v12, %v9742_v36 }
 0x629   : > { %3655 = vperm.xlu0 %6799, %v3545_v41   ;;  %v6990_v10 = vpop.eup %6989  ;;  %v3331_v21 = vadd.f32 1.0, %v6988_v35 }
 0x62a   : > { %v6992_v59 = vpop.eup %6991  ;;  %v3332_v7 = vadd.f32 1.0, %v6990_v10 }
 0x62b   : > { %3670 = vperm.xlu1 %6798, %v3548_v27   ;;  %v6994_v50 = vpop.eup %6993  ;;  %v3546_v1 = vmul.f32 %v6992_v59, %v9724_v0  ;;  %7007 = vrcp.f32 %v3331_v21  ;;  %v9836_v59 = vpop.permute.xlu0 %3490 }
 0x62c   : > { %v6996_v23 = vpop.eup %6995  ;;  %v3333_v55 = vadd.f32 1.0, %v6994_v50  ;;  %7009 = vrcp.f32 %v3332_v7  ;;  %11246 = vst [vmem:[#allocation101_spill] sm:$0xff] %v9836_v59  ;;  %v9839_v7 = vpop.permute.xlu1 %3492 }
 0x62d   : > { %3645 = vperm.xlu0 %6799, %v3543_v39   ;;  %v6998_v24 = vpop.eup %6997  ;;  %v3547_v60 = vmul.f32 %v6996_v23, %v9734_v14  ;;  %11247 = vst [vmem:[#allocation76_spill] sm:$0xff] %v9839_v7  ;;  %v6807_v23 = vld [vmem:[#allocation13 + $0x10] sm:$0xff]  }
 0x62e   : > { %v7000_v22 = vpop.eup %6999  ;;  %v3552_v41 = vmul.f32 %v6998_v24, %v9748_v47  ;;  %7011 = vrcp.f32 %v3333_v55  ;;  %6544 = vmatpush3.bf16.msra.mxu1 %v6807_v23 }
 0x62f   : > { %3660 = vperm.xlu1 %6798, %v3546_v1   ;;  %v7002_v31 = vpop.eup %7001  ;;  %v3553_v62 = vmul.f32 %v7000_v22, %v9762_v5  ;;  %6545 = vmatprep.subr.bf16.mxu1 %v11183_v49  ;;  %v6808_v1 = vld [vmem:[#allocation13 + $0x18] sm:$0xff]  }
 0x630   : > { %v7004_v53 = vpop.eup %7003  ;;  %v3550_v12 = vmul.f32 %v7002_v31, %v9740_v38 }
 0x631   : > { %3675 = vperm.xlu0 %6799, %v3549_v57   ;;  %v3551_v35 = vmul.f32 %v7004_v53, %v9750_v46 }
 0x632   : > { %v7006_v6 = vpop.eup %7005  ;;  %6546 = vmatpush3.bf16.msra.mxu1 %v6808_v1 }
 0x633   : > { %3690 = vperm.xlu1 %6798, %v3552_v41   ;;  %v3554_v39 = vmul.f32 %v7006_v6, %v9807_v18  ;;  %6551 = vmatprep.subr.bf16.mxu1 %v11183_v49  ;;  %v11248_v41 = vmax.f32 %v9415_v58, 0.0  ;;  %v11250_v6 = vmax.f32 %v9420_v30, 0.0  ;;  %v11252_v30 = vmax.f32 %v9436_v33, 0.0 }
 0x635   : > { %3665 = vperm.xlu0 %6799, %v3547_v60   ;;  %v7008_v37 = vpop.eup %7007 }
 0x636   : > { %v7010_v10 = vpop.eup %7009  ;;  %v3555_v27 = vmul.f32 %v7008_v37, %v9811_v32 }
 0x637   : > { %3680 = vperm.xlu1 %6798, %v3550_v12   ;;  %v3556_v50 = vmul.f32 %v7010_v10, %v9836_v59  ;;  %v11251_v10 = vmax.f32 %v9402_v56, 0.0 }
 0x638   : > { %v7012_v21 = vpop.eup %7011 }
 0x639   : > { %3695 = vperm.xlu0 %6799, %v3553_v62   ;;  %v3557_v57 = vmul.f32 %v7012_v21, %v9839_v7  ;;  %v11249_v62 = vmax.f32 %v9390_v2, 0.0 }
 0x63b   : > { %3700 = vperm.xlu1 %6798, %v3554_v39  }
 0x63d   : > { %3685 = vperm.xlu0 %6799, %v3551_v35  }
 0x63f   : > { %3710 = vperm.xlu1 %6798, %v3556_v50  }
 0x641   : > { %3705 = vperm.xlu0 %6799, %v3555_v27  }
 0x645   : > { %3715 = vperm.xlu0 %6799, %v3557_v57  }
 0x671   : > { %v3571_v55 = vpop.permute.xlu1 %3570 }
 0x672   : > { %v3720_v53 = vmul.f32 %v3571_v55, %v11249_v62  ;;  %v11253_v62 = vmax.f32 %v9427_v54, 0.0 }
 0x674   : > { %v3759_v39 = vsel %vm2370_vm5, %v3720_v53, 0.0 }
 0x675   : > { %v3561_v24 = vpop.permute.xlu0 %3560 }
 0x676   : > { %v3718_v27 = vmul.f32 %v3561_v24, %v11251_v10 }
 0x678   : > { %v3750_v58 = vsel %vm2370_vm5, %v3718_v27, 0.0 }
 0x679   : > { %v3576_v60 = vpop.permute.xlu0 %3575 }
 0x67a   : > { %v3721_v31 = vmul.f32 %v3576_v60, %v11248_v41 }
 0x67c   : > { %v3566_v22 = vpop.permute.xlu1 %3565  ;;  %v3760_v12 = vsel %vm2370_vm5, %v3721_v31, 0.0 }
 0x67d   : > { %v3719_v35 = vmul.f32 %v3566_v22, %v11250_v6  ;;  %v3761_v21 = vadd.f32 %v3760_v12, %v3759_v39  ;;  %v3596_v50 = vpop.permute.xlu0 %3595 }
 0x67e   : > { %v3725_v56 = vmul.f32 %v3596_v50, %v11253_v62 }
 0x67f   : > { %v3751_v57 = vsel %vm2370_vm5, %v3719_v35, 0.0  ;;  %v3762_v23 = vrot.slane %v3761_v21, 4  ;;  %v11254_v35 = vmax.f32 %v9451_v29, 0.0 }
 0x680   : > { %v3591_v37 = vpop.permute.xlu1 %3590  ;;  %v3752_v1 = vadd.f32 %v3751_v57, %v3750_v58  ;;  %v3778_v10 = vsel %vm2370_vm5, %v3725_v56, 0.0  ;;  %v11255_v57 = vmax.f32 %v9445_v8, 0.0  ;;  %v11257_v8 = vmax.f32 %v9462_v16, 0.0 }
 0x681   : > { %v3586_v55 = vpop.permute.xlu0 %3585  ;;  %v3763_v60 = vadd.f32 %v3762_v23, %v3761_v21  ;;  %v3724_v22 = vmul.f32 %v3591_v37, %v11252_v30  ;;  %v11259_v16 = vmax.f32 %v9484_v28, 0.0 }
 0x682   : > { %v3753_v41 = vrot.slane %v3752_v1, 4  ;;  %v3723_v33 = vmul.f32 %v3586_v55, %v11255_v57 }
 0x683   : > { %v3764_v24 = vrot.slane %v3763_v60, 2  ;;  %v3777_v12 = vsel %vm2370_vm5, %v3724_v22, 0.0 }
 0x684   : > { %v3581_v2 = vpop.permute.xlu1 %3580  ;;  %v3754_v53 = vadd.f32 %v3753_v41, %v3752_v1  ;;  %v3779_v21 = vadd.f32 %v3778_v10, %v3777_v12  ;;  %v3769_v41 = vsel %vm2370_vm5, %v3723_v33, 0.0 }
 0x685   : > { %v3616_v6 = vpop.permute.xlu0 %3615  ;;  %v3722_v39 = vmul.f32 %v3581_v2, %v11254_v35  ;;  %v3765_v27 = vadd.f32 %v3764_v24, %v3763_v60  ;;  %v11256_v2 = vmax.f32 %v9474_v43, 0.0 }
 0x686   : > { %v3755_v58 = vrot.slane %v3754_v53, 2  ;;  %v3780_v1 = vrot.slane %v3779_v21, 4  ;;  %v3729_v55 = vmul.f32 %v3616_v6, %v11257_v8  ;;  %v11261_v8 = vmax.f32 %v9550_v40, 0.0 }
 0x687   : > { %v3768_v54 = vsel %vm2370_vm5, %v3722_v39, 0.0  ;;  %v3766_v23 = vrot.slane %v3765_v27, 1  ;;  %v11264_v40 = vmax.f32 %v9541_v4, 0.0 }
 0x688   : > { %v3611_v31 = vpop.permute.xlu1 %3610  ;;  %v3756_v22 = vadd.f32 %v3755_v58, %v3754_v53  ;;  %v3770_v29 = vadd.f32 %v3769_v41, %v3768_v54  ;;  %v3781_v24 = vadd.f32 %v3780_v1, %v3779_v21  ;;  %v3796_v53 = vsel %vm2370_vm5, %v3729_v55, 0.0 }
 0x689   : > { %v3728_v62 = vmul.f32 %v3611_v31, %v11256_v2  ;;  %v3767_v56 = vadd.f32 %v3766_v23, %v3765_v27  ;;  %v11258_v58 = vmax.f32 %v9495_v63, 0.0  ;;  %v11260_v23 = vmax.f32 %v9559_v11, 0.0 }
 0x68a   : > { %v3757_v35 = vrot.slane %v3756_v22, 1  ;;  %v3771_v39 = vrot.slane %v3770_v29, 4  ;;  %v3782_v33 = vrot.slane %v3781_v24, 2 }
 0x68b   : > { %v3606_v50 = vpop.permute.xlu0 %3605  ;;  %v3795_v10 = vsel %vm2370_vm5, %v3728_v62, 0.0  ;;  %v3895_v7 = vmul.f32 0.01, %v3767_v56 }
 0x68c   : > { %v3601_v37 = vpop.permute.xlu1 %3600  ;;  %v3758_v54 = vadd.f32 %v3757_v35, %v3756_v22  ;;  %v3772_v27 = vadd.f32 %v3771_v39, %v3770_v29  ;;  %v3797_v21 = vadd.f32 %v3796_v53, %v3795_v10  ;;  %v3727_v6 = vmul.f32 %v3606_v50, %v11259_v16  ;;  %v11267_v16 = vld [vmem:[#allocation70_spill] sm:$0xff] }
 0x68d   : > { %v3726_v43 = vmul.f32 %v3601_v37, %v11258_v58  ;;  %v3911_v2 = vpack.c.bf16 %v3895_v7, %v3895_v7  ;;  %v3783_v62 = vadd.f32 %v3782_v33, %v3781_v24  ;;  %v11262_v29 = vmax.f32 %v9529_v13, 0.0  ;;  %v11265_v13 = vld [vmem:[#allocation64_spill] sm:$0xff] }
 0x68e   : > { %v3894_v37 = vmul.f32 0.01, %v3758_v54  ;;  %v3773_v58 = vrot.slane %v3772_v27, 2  ;;  %v3798_v22 = vrot.slane %v3797_v21, 4  ;;  %v3787_v28 = vsel %vm2370_vm5, %v3727_v6, 0.0 }
 0x68f   : > { %v3786_v56 = vsel %vm2370_vm5, %v3726_v43, 0.0  ;;  %v11263_v7 = vmax.f32 %v9577_v45, 0.0  ;;  %v3943_v43 = vunpack.c.l.b16 %v3911_v2  ;;  %v11268_v6 = vmax.f32 %v11267_v16, 0.0 }
 0x690   : > { %v3788_v39 = vadd.f32 %v3787_v28, %v3786_v56  ;;  %v3799_v56 = vadd.f32 %v3798_v22, %v3797_v21  ;;  %v11273_v21 = vld [vmem:[#allocation59_spill] sm:$0xff] }
 0x691   : > { %v11274_v22 = vmax.f32 %v11273_v21, 0.0 }
 0x692   : > { %v3789_v28 = vrot.slane %v3788_v39, 4 }
 0x69a   : > { %v3631_v30 = vpop.permute.xlu1 %3630 }
 0x69e   : > { %v3621_v12 = vpop.permute.xlu1 %3620 }
 0x69f   : > { %v3730_v10 = vmul.f32 %v3621_v12, %v11264_v40 }
 0x6a0   : > { %v3636_v60 = vpop.permute.xlu0 %3635 }
 0x6a2   : > { %v3651_v31 = vpop.permute.xlu1 %3650 }
 0x6a3   : > { %v3736_v1 = vmul.f32 %v3651_v31, %v11260_v23  ;;  %v3784_v31 = vrot.slane %v3783_v62, 1 }
 0x6a4   : > { %v3626_v57 = vpop.permute.xlu0 %3625 }
 0x6a5   : > { %v3731_v35 = vmul.f32 %v3626_v57, %v11262_v29  ;;  %v3831_v11 = vsel %vm2370_vm5, %v3736_v1, 0.0  ;;  %v11266_v57 = vmax.f32 %v11265_v13, 0.0 }
 0x6a6   : > { %v3641_v63 = vpop.permute.xlu1 %3640 }
 0x6a7   : > { %v3734_v24 = vmul.f32 %v3641_v63, %v11263_v7  ;;  %v3733_v54 = vmul.f32 %v3636_v60, %v11266_v57  ;;  %v3805_v45 = vsel %vm2370_vm5, %v3731_v35, 0.0  ;;  %v11269_v63 = vld [vmem:[#allocation68_spill] sm:$0xff]  ;;  %v3804_v60 = vsel %vm2370_vm5, %v3730_v10, 0.0 }
 0x6a8   : > { %v3656_v41 = vpop.permute.xlu0 %3655  ;;  %v11270_v4 = vmax.f32 %v11269_v63, 0.0  ;;  %v11275_v63 = vld [vmem:[#allocation62_spill] sm:$0xff] }
 0x6a9   : > { %v3737_v55 = vmul.f32 %v3656_v41, %v11261_v8  ;;  %v3910_v41 = vpack.c.bf16 %v3894_v37, %v3894_v37  ;;  %v3774_v8 = vadd.f32 %v3773_v58, %v3772_v27  ;;  %v3822_v29 = vsel %vm2370_vm5, %v3734_v24, 0.0 }
 0x6aa   : > { %v3671_v1 = vpop.permute.xlu1 %3670  ;;  %v3732_v12 = vmul.f32 %v3631_v30, %v11270_v4  ;;  %v3814_v27 = vsel %vm2370_vm5, %v3733_v54, 0.0  ;;  %v3806_v58 = vadd.f32 %v3805_v45, %v3804_v60  ;;  %v3785_v24 = vadd.f32 %v3784_v31, %v3783_v62  ;;  %v11277_v62 = vld [vmem:[#allocation73_spill] sm:$0xff] }
 0x6ab   : > { %v3832_v50 = vsel %vm2370_vm5, %v3737_v55, 0.0  ;;  %v3942_v13 = vunpack.c.l.b16 %v3910_v41  ;;  %v3775_v57 = vrot.slane %v3774_v8, 1  ;;  %v11278_v31 = vmax.f32 %v11277_v62, 0.0 }
 0x6ac   : > { %v3833_v33 = vadd.f32 %v3832_v50, %v3831_v11  ;;  %v3646_v53 = vpop.permute.xlu0 %3645  ;;  %v11271_v50 = vld [vmem:[#allocation60_spill] sm:$0xff]  ;;  %v3813_v10 = vsel %vm2370_vm5, %v3732_v12, 0.0 }
 0x6ad   : > { %v3735_v23 = vmul.f32 %v3646_v53, %v11268_v6  ;;  %v11272_v7 = vmax.f32 %v11271_v50, 0.0  ;;  %v3800_v6 = vrot.slane %v3799_v56, 2  ;;  %v3815_v54 = vadd.f32 %v3814_v27, %v3813_v10 }
 0x6ae   : > { %v3834_v55 = vrot.slane %v3833_v33, 4  ;;  %v3661_v30 = vpop.permute.xlu1 %3660  ;;  %v9915_v12 = vsel %vm3958_vm10, %v3943_v43, %v3942_v13  ;;  %v3776_v21 = vadd.f32 %v3775_v57, %v3774_v8 }
 0x6af   : > { %v3823_v2 = vsel %vm2370_vm5, %v3735_v23, 0.0  ;;  %v3740_v40 = vmul.f32 %v3671_v1, %v11272_v7  ;;  %v11276_v1 = vmax.f32 %v11275_v63, 0.0 }
 0x6b0   : > { %v3824_v11 = vadd.f32 %v3823_v2, %v3822_v29  ;;  %v3676_v37 = vpop.permute.xlu0 %3675  ;;  %v3835_v35 = vadd.f32 %v3834_v55, %v3833_v33  ;;  %v3790_v29 = vadd.f32 %v3789_v28, %v3788_v39  ;;  %v3807_v2 = vrot.slane %v3806_v58, 4 }
 0x6b1   : > { %v3741_v53 = vmul.f32 %v3676_v37, %v11274_v22  ;;  %v3738_v4 = vmul.f32 %v3661_v30, %v11276_v1  ;;  %v3849_v33 = vsel %vm2370_vm5, %v3740_v40, 0.0  ;;  %v9917_v37 = vmul.f32 0.01, %v3785_v24  ;;  %v11281_v1 = vld [vmem:[#allocation75_spill] sm:$0xff] }
 0x6b2   : > { %v3825_v16 = vrot.slane %v3824_v11, 4  ;;  %v3836_v60 = vrot.slane %v3835_v35, 2  ;;  %v3691_v7 = vpop.permute.xlu1 %3690  ;;  %v9919_v39 = vadd.f32 %v3800_v6, %v3799_v56  ;;  %v3791_v27 = vrot.slane %v3790_v29, 2 }
 0x6b3   : > { %v3850_v23 = vsel %vm2370_vm5, %v3741_v53, 0.0  ;;  %v3816_v53 = vrot.slane %v3815_v54, 4  ;;  %v3808_v43 = vadd.f32 %v3807_v2, %v3806_v58  ;;  %v11282_v8 = vmax.f32 %v11281_v1, 0.0 }
 0x6b4   : > { %v3826_v45 = vadd.f32 %v3825_v16, %v3824_v11  ;;  %v3666_v55 = vpop.permute.xlu0 %3665  ;;  %v3851_v41 = vadd.f32 %v3850_v23, %v3849_v33  ;;  %v3840_v11 = vsel %vm2370_vm5, %v3738_v4, 0.0  ;;  %v11279_v16 = vld [vmem:[#allocation77_spill] sm:$0xff]  ;;  %v3837_v13 = vadd.f32 %v3836_v60, %v3835_v35 }
 0x6b5   : > { %v3739_v50 = vmul.f32 %v3666_v55, %v11278_v31  ;;  %v11280_v10 = vmax.f32 %v11279_v16, 0.0  ;;  %v9929_v4 = vmul.f32 0.01, %v3776_v21  ;;  %v3792_v2 = vadd.f32 %v3791_v27, %v3790_v29  ;;  %v11287_v27 = vld [vmem:[#allocation69_spill] sm:$0xff] }
 0x6b6   : > { %v3827_v22 = vrot.slane %v3826_v45, 2  ;;  %v3852_v28 = vrot.slane %v3851_v41, 4  ;;  %v3681_v56 = vpop.permute.xlu1 %3680  ;;  %v3817_v60 = vadd.f32 %v3816_v53, %v3815_v54  ;;  %v3838_v16 = vrot.slane %v3837_v13, 1 }
 0x6b7   : > { %v3841_v40 = vsel %vm2370_vm5, %v3739_v50, 0.0  ;;  %v3744_v23 = vmul.f32 %v3691_v7, %v11280_v10  ;;  %v11283_v7 = vld [vmem:[#allocation80_spill] sm:$0xff]  ;;  %v11285_v10 = vld [vmem:[#allocation61_spill] sm:$0xff]  ;;  %v3912_v1 = vpack.c.bf16 %v9929_v4, %v9929_v4  ;;  %v11288_v53 = vmax.f32 %v11287_v27, 0.0  ;;  %v11289_v4 = vld [vmem:[#allocation58_spill] sm:$0xff] }
 0x6b8   : > { %v3842_v30 = vadd.f32 %v3841_v40, %v3840_v11  ;;  %v3696_v63 = vpop.permute.xlu0 %3695  ;;  %v3853_v24 = vadd.f32 %v3852_v28, %v3851_v41  ;;  %v3828_v33 = vadd.f32 %v3827_v22, %v3826_v45  ;;  %v11284_v58 = vmax.f32 %v11283_v7, 0.0 }
 0x6b9   : > { %v3745_v57 = vmul.f32 %v3696_v63, %v11282_v8  ;;  %v3867_v28 = vsel %vm2370_vm5, %v3744_v23, 0.0  ;;  %v3809_v40 = vrot.slane %v3808_v43, 2  ;;  %v11286_v45 = vmax.f32 %v11285_v10, 0.0 }
 0x6ba   : > { %v3843_v55 = vrot.slane %v3842_v30, 4  ;;  %v3854_v31 = vrot.slane %v3853_v24, 2  ;;  %v3742_v35 = vmul.f32 %v3681_v56, %v11284_v58  ;;  %v3701_v63 = vpop.permute.xlu1 %3700  ;;  %v3829_v8 = vrot.slane %v3828_v33, 1 }
 0x6bb   : > { %v3868_v50 = vsel %vm2370_vm5, %v3745_v57, 0.0  ;;  %v3793_v23 = vrot.slane %v3792_v2, 1  ;;  %v3839_v10 = vadd.f32 %v3838_v16, %v3837_v13  ;;  %v11290_v6 = vmax.f32 %v11289_v4, 0.0 }
 0x6bc   : > { %v3844_v41 = vadd.f32 %v3843_v55, %v3842_v30  ;;  %v3686_v11 = vpop.permute.xlu0 %3685  ;;  %v3869_v21 = vadd.f32 %v3868_v50, %v3867_v28  ;;  %v3855_v57 = vadd.f32 %v3854_v31, %v3853_v24  ;;  %v3858_v29 = vsel %vm2370_vm5, %v3742_v35, 0.0 }
 0x6bd   : > { %v3743_v22 = vmul.f32 %v3686_v11, %v11286_v45  ;;  %v3746_v30 = vmul.f32 %v3701_v63, %v11288_v53  ;;  %v3818_v55 = vrot.slane %v3817_v60, 2  ;;  %v3810_v11 = vadd.f32 %v3809_v40, %v3808_v43  ;;  %v11291_v53 = vld [vmem:[#allocation67_spill] sm:$0xff] }
 0x6be   : > { %v3845_v7 = vrot.slane %v3844_v41, 2  ;;  %v3870_v56 = vrot.slane %v3869_v21, 4  ;;  %v3711_v31 = vpop.permute.xlu1 %3710  ;;  %v3830_v62 = vadd.f32 %v3829_v8, %v3828_v33  ;;  %v3856_v59 = vrot.slane %v3855_v57, 1  ;;  %v11293_v8 = vld [vmem:[#allocation63_spill] sm:$0xff] }
 0x6bf   : > { %v3859_v54 = vsel %vm2370_vm5, %v3743_v22, 0.0  ;;  %v3876_v27 = vsel %vm2370_vm5, %v3746_v30, 0.0  ;;  %v3794_v43 = vadd.f32 %v3793_v23, %v3792_v2 }
 0x6c0   : > { %v3846_v50 = vadd.f32 %v3845_v7, %v3844_v41  ;;  %v3860_v58 = vadd.f32 %v3859_v54, %v3858_v29  ;;  %v3706_v28 = vpop.permute.xlu0 %3705  ;;  %v3871_v45 = vadd.f32 %v3870_v56, %v3869_v21  ;;  %v11292_v41 = vmax.f32 %v11291_v53, 0.0 }
 0x6c1   : > { %v3747_v24 = vmul.f32 %v3706_v28, %v11290_v6  ;;  %v3819_v6 = vadd.f32 %v3818_v55, %v3817_v60  ;;  %v3811_v56 = vrot.slane %v3810_v11, 1  ;;  %v11294_v29 = vmax.f32 %v11293_v8, 0.0 }
 0x6c2   : > { %v3847_v35 = vrot.slane %v3846_v50, 1  ;;  %v3861_v32 = vrot.slane %v3860_v58, 4  ;;  %v3872_v22 = vrot.slane %v3871_v45, 2  ;;  %v3748_v7 = vmul.f32 %v3711_v31, %v11292_v41 }
 0x6c3   : > { %v3877_v63 = vsel %vm2370_vm5, %v3747_v24, 0.0  ;;  %v3903_v28 = vmul.f32 0.01, %v3839_v10  ;;  %v3902_v4 = vmul.f32 0.01, %v3830_v62  ;;  %v3857_v24 = vadd.f32 %v3856_v59, %v3855_v57 }
 0x6c4   : > { %v3848_v13 = vadd.f32 %v3847_v35, %v3846_v50  ;;  %v3862_v40 = vadd.f32 %v3861_v32, %v3860_v58  ;;  %v3878_v16 = vadd.f32 %v3877_v63, %v3876_v27  ;;  %v3716_v21 = vpop.permute.xlu0 %3715  ;;  %v3873_v33 = vadd.f32 %v3872_v22, %v3871_v45 }
 0x6c5   : > { %v3749_v54 = vmul.f32 %v3716_v21, %v11294_v29  ;;  %v3885_v31 = vsel %vm2370_vm5, %v3748_v7, 0.0  ;;  %v11295_v55 = vrot.slane %v9919_v39, 1  ;;  %v3898_v45 = vmul.f32 0.01, %v3794_v43 }
 0x6c6   : > { %v3863_v30 = vrot.slane %v3862_v40, 2  ;;  %v3879_v18 = vrot.slane %v3878_v16, 4  ;;  %v3904_v46 = vmul.f32 0.01, %v3848_v13  ;;  %v3874_v32 = vrot.slane %v3873_v33, 1 }
 0x6c7   : > { %v3886_v2 = vsel %vm2370_vm5, %v3749_v54, 0.0  ;;  %v3803_v58 = vadd.f32 %v11295_v55, %v9919_v39  ;;  %v3820_v10 = vrot.slane %v3819_v6, 1  ;;  %v3812_v62 = vadd.f32 %v3811_v56, %v3810_v11 }
 0x6c8   : > { %v3864_v23 = vadd.f32 %v3863_v30, %v3862_v40  ;;  %v3880_v50 = vadd.f32 %v3879_v18, %v3878_v16  ;;  %v3887_v60 = vadd.f32 %v3886_v2, %v3885_v31  ;;  %v3918_v35 = vpack.c.bf16 %v3902_v4, %v3902_v4 }
 0x6c9   : > { %v3944_v27 = vunpack.c.l.b16 %v3912_v1  ;;  %v3919_v63 = vpack.c.bf16 %v3903_v28, %v3903_v28  ;;  %v3905_v53 = vmul.f32 0.01, %v3857_v24  ;;  %v3920_v41 = vpack.c.bf16 %v3904_v46, %v3904_v46 }
 0x6ca   : > { %v3865_v59 = vrot.slane %v3864_v23, 1  ;;  %v3881_v57 = vrot.slane %v3880_v50, 2  ;;  %v3888_v22 = vrot.slane %v3887_v60, 4  ;;  %v3875_v7 = vadd.f32 %v3874_v32, %v3873_v33 }
 0x6cb   : > { %v3899_v16 = vmul.f32 0.01, %v3803_v58  ;;  %v3914_v21 = vpack.c.bf16 %v3898_v45, %v3898_v45  ;;  %v3821_v8 = vadd.f32 %v3820_v10, %v3819_v6  ;;  %v3900_v39 = vmul.f32 0.01, %v3812_v62 }
 0x6cc   : > { %v3866_v13 = vadd.f32 %v3865_v59, %v3864_v23  ;;  %v3882_v18 = vadd.f32 %v3881_v57, %v3880_v50  ;;  %v3889_v40 = vadd.f32 %v3888_v22, %v3887_v60  ;;  %v3950_v43 = vunpack.c.l.b16 %v3918_v35 }
 0x6cd   : > { %v3961_v54 = vsel %vm3960_vm11, %v3944_v27, %v9915_v12  ;;  %v3951_v4 = vunpack.c.l.b16 %v3919_v63  ;;  %v3921_v1 = vpack.c.bf16 %v3905_v53, %v3905_v53  ;;  %v3952_v28 = vunpack.c.l.b16 %v3920_v41 }
 0x6ce   : > { %v3906_v29 = vmul.f32 0.01, %v3866_v13  ;;  %v3883_v11 = vrot.slane %v3882_v18, 1  ;;  %v3890_v56 = vrot.slane %v3889_v40, 2  ;;  %v3907_v30 = vmul.f32 0.01, %v3875_v7 }
 0x6cf   : > { %v11296_v31 = vpack.c.bf16 %v9917_v37, %v9917_v37  ;;  %v3915_v6 = vpack.c.bf16 %v3899_v16, %v3899_v16  ;;  %v3946_v32 = vunpack.c.l.b16 %v3914_v21  ;;  %v3916_v23 = vpack.c.bf16 %v3900_v39, %v3900_v39 }
 0x6d0   : > { %v3922_v46 = vpack.c.bf16 %v3906_v29, %v3906_v29  ;;  %v3884_v33 = vadd.f32 %v3883_v11, %v3882_v18  ;;  %v3891_v24 = vadd.f32 %v3890_v56, %v3889_v40  ;;  %v3901_v50 = vmul.f32 0.01, %v3821_v8 }
 0x6d1   : > { %v3945_v2 = vunpack.c.l.b16 %v11296_v31  ;;  %v3972_v60 = vsel %vm3958_vm10, %v3951_v4, %v3950_v43  ;;  %v3953_v62 = vunpack.c.l.b16 %v3921_v1  ;;  %v3923_v35 = vpack.c.bf16 %v3907_v30, %v3907_v30  ;;  %v11297_v4 = vld [vmem:[#allocation28_spill] sm:$0xff] }
 0x6d2   : > { %v3908_v55 = vmul.f32 0.01, %v3884_v33  ;;  %v3892_v58 = vrot.slane %v3891_v24, 1  ;;  %v3973_v45 = vsel %vm3960_vm11, %v3952_v28, %v3972_v60  ;;  %v3954_v10 = vunpack.c.l.b16 %v3922_v46  ;;  %v7144_v46 = vld [vmem:[#allocation14] sm:$0x3f] }
 0x6d3   : > { %v3963_v12 = vsel %vm3962_vm12, %v3945_v2, %v3961_v54  ;;  %v3948_v22 = vunpack.c.l.b16 %v3916_v23  ;;  %v3947_v27 = vunpack.c.l.b16 %v3915_v6  ;;  %v3917_v63 = vpack.c.bf16 %v3901_v50, %v3901_v50  ;;  %v6809_v31 = vld [vmem:[#allocation13 + $0x20] sm:$0xff]   ;;  %v6810_v6 = vld [vmem:[#allocation13 + $0x28] sm:$0xff]  }
 0x6d4   : > { %v3924_v59 = vpack.c.bf16 %v3908_v55, %v3908_v55  ;;  %v3893_v57 = vadd.f32 %v3892_v58, %v3891_v24  ;;  %v3965_v37 = vsel %vm3964_vm13, %v3946_v32, %v3963_v12  ;;  %v3974_v53 = vsel %vm3962_vm12, %v3953_v62, %v3973_v45  ;;  %v11298_v32 = vld [vmem:[#allocation41_spill] sm:$0xff]  ;;  %v11299_v55 = vld [vmem:[#allocation52_spill] sm:$0xff] }
 0x6d5   : > { %v3975_v7 = vsel %vm3964_vm13, %v3954_v10, %v3974_v53  ;;  %v3967_v18 = vsel %vm3966_vm14, %v3947_v27, %v3965_v37  ;;  %v3955_v40 = vunpack.c.l.b16 %v3923_v35  ;;  %v3949_v8 = vunpack.c.l.b16 %v3917_v63  ;;  %v6811_v50 = vld [vmem:[#allocation10 + $0x10] sm:$0xff]   ;;  %v6812_v10 = vld [vmem:[#allocation10 + $0x18] sm:$0xff]   ;;  %v11301_v27 = vld [vmem:[#allocation43_spill] sm:$0xff] }
 0x6d6   : > { %v3909_v41 = vmul.f32 0.01, %v3893_v57  ;;  %v3956_v13 = vunpack.c.l.b16 %v3924_v59  ;;  %v3969_v21 = vsel %vm3968_vm15, %v3948_v22, %v3967_v18  ;;  %v10954_v1 = vsub.s32 2, %v11297_v4  ;;  %v11300_v12 = vld [vmem:[#allocation53_spill] sm:$0xff]  ;;  %6560 = vmatpush3.bf16.msra.mxu0 %v6811_v50 }
 0x6d7   : > { %v3976_v39 = vsel %vm3966_vm14, %v3955_v40, %v3975_v7  ;;  %v3971_v56 = vsel %vm3970_vm0, %v3949_v8, %v3969_v21  ;;  %6561 = vmatprep.subr.bf16.mxu0 %v11183_v49  ;;  %v10953_v53 = vsub.s32 3, %v11297_v4  ;;  %v11302_v7 = vld [vmem:[#allocation34_spill] sm:$0xff]  ;;  %v11303_v21 = vld [vmem:[#allocation33_spill] sm:$0xff] }
 0x6d8   : > { %v3925_v16 = vpack.c.bf16 %v3909_v41, %v3909_v41  ;;  %v3977_v29 = vsel %vm3968_vm15, %v3956_v13, %v3976_v39  ;;  %v4049_v33 = vrot.slane %v7144_v46, %v10954_v1  ;;  %v11314_v50 = vld [vmem:[#allocation49_spill] sm:$0xff] }
 0x6d9   : > { %v4123_v18 = vrot.slane %v7144_v46, %v10953_v53 }
 0x6da   : > { %v3957_v43 = vunpack.c.l.b16 %v3925_v16  ;;  %6562 = vmatpush3.bf16.msra.mxu0 %v6812_v10  ;;  %v11320_v10 = vld [vmem:[#allocation54_spill] sm:$0xff] }
 0x6db   : > { %6603 = vmatprep.subr.bf16.mxu0 %v11183_v49 }
 0x6dc   : > { %v3978_v11 = vsel %vm3970_vm0, %v3957_v43, %v3977_v29 }
 0x6dd   : > { %v3979_v54 = vpack.c.b16 %v3978_v11, %v3971_v56  ;;  %v6813_v56 = vld [vmem:[#allocation13 + $0x30] sm:$0xff]  }
 0x6df   : > { %6548 = vmatmul.mubr.msk.bf16.vlgmr.msra.gmra.mrb[24].mxu1 %vm2370_vm5, %v3979_v54 }
 0x6e0   : > { %6555 = vmatprep.mubr.msk.bf16.mxu1 %vm7536_vm4, %v11183_v49  ;;  %6552 = vmatpush3.bf16.msra.mxu1 %v6809_v31  ;;  %v11309_v31 = vld [vmem:[#allocation42_spill] sm:$0xff] }
 0x6e1   : > { %6553 = vmatprep.subr.bf16.mxu1 %v11183_v49 }
 0x6e4   : > { %6554 = vmatpush3.bf16.msra.mxu1 %v6810_v6  ;;  %v11311_v6 = vld [vmem:[#allocation47_spill] sm:$0xff] }
 0x6e5   : > { %6567 = vmatprep.subr.bf16.mxu1 %v6813_v56 }
 0x7b2   : > { %v4029_v28 = vpop.f32.mrb[24].mxu1 }
 0x7b3   : > { %4038 = vrot.lane.b32.xlu1 %v4029_v28, %s7542_s11  ;;  %v6549_v30 = vpop.f32.mrb[25].mxu1  ;;  %v6814_v28 = vld [vmem:[#allocation13 + $0x38] sm:$0xff]  }
 0x7b4   : > { %v4032_v24 = vpop.f32.mrb[26].mxu1 }
 0x7b5   : > { %4040 = vrot.lane.b32.xlu0 %v4032_v24, %s7542_s11  ;;  %v6550_v2 = vpop.f32.mrb[27].mxu1  ;;  %v11308_v24 = vld [vmem:[#allocation40_spill] sm:$0xff] }
 0x7b6   : > { %v11310_v2 = vld [vmem:[#allocation45_spill] sm:$0xff] }
 0x7b7   : > { %4051 = vrot.lane.b32.xlu1 %v4049_v33, %s7542_s11 }
 0x7bb   : > { %4453 = vrot.lane.b32.xlu1 %v11298_v32, %s7537_s26  ;;  %v11312_v32 = vld [vmem:[#allocation44_spill] sm:$0xff] }
 0x825   : > { %v4039_v23 = vpop.permute.xlu1 %4038 }
 0x826   : > { %v4044_v58 = vadd.f32 %v4039_v23, %v11299_v55  ;;  %v11313_v23 = vld [vmem:[#allocation46_spill] sm:$0xff]  ;;  %v11316_v55 = vld [vmem:[#allocation48_spill] sm:$0xff] }
 0x827   : > { %v4041_v60 = vpop.permute.xlu0 %4040 }
 0x828   : > { %v4045_v45 = vadd.f32 %v4041_v60, %v11300_v12  ;;  %v11315_v60 = vld [vmem:[#allocation51_spill] sm:$0xff] }
 0x829   : > { %v4052_v62 = vpop.permute.xlu1 %4051  ;;  %v11318_v12 = vld [vmem:[#allocation55_spill] sm:$0xff] }
 0x82a   : > { %v4054_v35 = vadd.f32 %v4052_v62, %v4044_v58  ;;  %v4055_v59 = vadd.f32 %v4052_v62, %v4045_v45  ;;  %v11317_v58 = vld [vmem:[#allocation50_spill] sm:$0xff]  ;;  %v11319_v45 = vld [vmem:[#allocation57_spill] sm:$0xff]  ;;  %v11321_v62 = vld [vmem:[#allocation56_spill] sm:$0xff] }
 0x82c   : > { %v4056_v57 = vmax.f32 %v4054_v35, 0.0  ;;  %v4057_v37 = vmax.f32 %v4055_v59, 0.0  ;;  %v11322_v35 = vld [vmem:[#allocation79_spill] sm:$0xff] }
 0x82d   : > { %v11323_v59 = vld [vmem:[#allocation83_spill] sm:$0xff] }
 0x82e   : > { %v4058_v22 = vpack.c.bf16 %v4057_v37, %v4056_v57  ;;  %v11324_v57 = vld [vmem:[#allocation78_spill] sm:$0xff]  ;;  %v11325_v37 = vld [vmem:[#allocation81_spill] sm:$0xff] }
 0x830   : > { %4060 = vrot.lane.b32.xlu0 %v4058_v22, %s7542_s11  ;;  %v11326_v22 = vld [vmem:[#allocation88_spill] sm:$0xff] }
 0x834   : > { %4455 = vrot.lane.b32.xlu0 %v11301_v27, %s7537_s26  ;;  %v11327_v27 = vld [vmem:[#allocation90_spill] sm:$0xff] }
 0x8a2   : > { %v4061_v63 = vpop.permute.xlu0 %4060 }
 0x8a3   : > { %6556 = vmatmul.mubr.msk.bf16.vlgmr.msra.gmra.mrb[28].mxu1 %vm2370_vm5, %v4061_v63  ;;  %v11328_v63 = vld [vmem:[#allocation86_spill] sm:$0xff] }
 0x8a4   : > { %6568 = vmatpush3.bf16.msra.mxu1 %v6813_v56 }
 0x8a5   : > { %6569 = vmatprep.subr.bf16.mxu1 %v6814_v28 }
 0x8a8   : > { %6570 = vmatpush3.bf16.msra.mxu1 %v6814_v28 }
 0x976   : > { %v4111_v41 = vpop.f32.mrb[28].mxu1 }
 0x977   : > { %v4118_v13 = vadd.f32 %v4111_v41, %v11302_v7  ;;  %v6557_v40 = vpop.f32.mrb[29].mxu1  ;;  %v11329_v41 = vld [vmem:[#allocation89_spill] sm:$0xff]  ;;  %v11330_v7 = vld [vmem:[#allocation95_spill] sm:$0xff] }
 0x978   : > { %v4114_v16 = vpop.f32.mrb[30].mxu1  ;;  %v11333_v40 = vld [vmem:[#allocation97_spill] sm:$0xff] }
 0x979   : > { %v4119_v8 = vadd.f32 %v4114_v16, %v11303_v21  ;;  %v6558_v39 = vpop.f32.mrb[31].mxu1  ;;  %v9999_v43 = vadd.f32 %v4123_v18, %v4118_v13  ;;  %v11331_v13 = vld [vmem:[#allocation99_spill] sm:$0xff]  ;;  %v11334_v16 = vld [vmem:[#allocation104_spill] sm:$0xff]  ;;  %v11335_v21 = vld [vmem:[#allocation106_spill] sm:$0xff] }
 0x97a   : > { %v11337_v39 = vld [vmem:[#allocation105_spill] sm:$0xff] }
 0x97b   : > { %11304 = vst [vmem:[#allocation107_spill] sm:$0xff] %v9999_v43  ;;  %v10001_v29 = vadd.f32 %v4123_v18, %v4119_v8  ;;  %v11332_v18 = vld [vmem:[#allocation94_spill] sm:$0xff] }
 0x97c   : > { %v11336_v8 = vld [vmem:[#allocation102_spill] sm:$0xff] }
 0x97d   : > { %11305 = vst [vmem:[#allocation109_spill] sm:$0xff] %v10001_v29  ;;  %v4146_v11 = vpack.c.bf16 %v10001_v29, %v9999_v43 }
 0x97f   : > { %6564 = vmatmul.mubr.msk.bf16.vlgmr.msra.gmra.mrb[48].mxu0 %vm2370_vm5, %v4146_v11  ;;  %v11338_v11 = vld [vmem:[#allocation29_spill] sm:$0xff] }
 0x980   : > { %6607 = vmatprep.mubr.msk.bf16.mxu0 %vm7536_vm4, %v11183_v49 }
 0xa52   : > { %v10008_v54 = vpop.f32.mrb[48].mxu0 }
 0xa53   : > { %11306 = vst [vmem:[#allocation82_spill] sm:$0xff] %v10008_v54  ;;  %4383 = vrot.lane.b32.xlu1 %v10008_v54, %s7537_s26  ;;  %v6565_v30 = vpop.f32.mrb[49].mxu0  ;;  %v4212_v56 = vrot.slane %v10008_v54, %v11338_v11 }
 0xa54   : > { %v10012_v46 = vpop.f32.mrb[50].mxu0 }
 0xa55   : > { %11307 = vst [vmem:[#allocation110_spill] sm:$0xff] %v10012_v46  ;;  %4385 = vrot.lane.b32.xlu0 %v10012_v46, %s7537_s26  ;;  %v6566_v33 = vpop.f32.mrb[51].mxu0  ;;  %v4220_v28 = vcombine.high %v4212_v56, %v4212_v56  ;;  %v4228_v30 = vrot.slane %v4212_v56, %v11338_v11 }
 0xa56   : > { %v4454_v33 = vpop.permute.xlu1 %4453 }
 0xa57   : > { %4457 = vrot.lane.b32.xlu1 %v11308_v24, %s7537_s26  ;;  %v4242_v24 = vrot.slane %v4220_v28, %v11338_v11 }
 0xa59   : > { %4459 = vrot.lane.b32.xlu0 %v11309_v31, %s7537_s26  ;;  %v4456_v31 = vpop.permute.xlu0 %4455 }
 0xa5b   : > { %4461 = vrot.lane.b32.xlu1 %v11310_v2, %s7537_s26  ;;  %v10080_v2 = vld [vmem:[#allocation14 + $0x8] sm:$0x3f] }
 0xa5d   : > { %4463 = vrot.lane.b32.xlu0 %v11311_v6, %s7537_s26  ;;  %v11339_v6 = vld [vmem:[#allocation30_spill] sm:$0xff] }
 0xa5f   : > { %4465 = vrot.lane.b32.xlu1 %v11312_v32, %s7537_s26  ;;  %v4306_v32 = vrot.slane %v4228_v30, %v11339_v6 }
 0xa61   : > { %4467 = vrot.lane.b32.xlu0 %v11313_v23, %s7537_s26  ;;  %v4205_v23 = vcombine.high %v10008_v54, %v10008_v54 }
 0xa63   : > { %4469 = vrot.lane.b32.xlu1 %v11314_v50, %s7537_s26 }
 0xa65   : > { %4471 = vrot.lane.b32.xlu0 %v11315_v60, %s7537_s26  ;;  %v4250_v60 = vcombine.high %v4228_v30, %v4228_v30 }
 0xa67   : > { %4473 = vrot.lane.b32.xlu1 %v11316_v55, %s7537_s26  ;;  %v10089_v55 = vrot.slane %v10080_v2, %v11339_v6 }
 0xa69   : > { %4475 = vrot.lane.b32.xlu0 %v11317_v58, %s7537_s26  ;;  %v4310_v58 = vrot.slane %v4242_v24, %v11339_v6 }
 0xa6b   : > { %4477 = vrot.lane.b32.xlu1 %v11318_v12, %s7537_s26 }
 0xa6d   : > { %4479 = vrot.lane.b32.xlu0 %v11319_v45, %s7537_s26 }
 0xa6f   : > { %4481 = vrot.lane.b32.xlu1 %v11320_v10, %s7537_s26 }
 0xa71   : > { %4483 = vrot.lane.b32.xlu0 %v11321_v62, %s7537_s26 }
 0xa73   : > { %4485 = vrot.lane.b32.xlu1 %v11322_v35, %s7537_s26 }
 0xa75   : > { %4487 = vrot.lane.b32.xlu0 %v11323_v59, %s7537_s26  ;;  %v4219_v59 = vrot.slane %v4205_v23, %v11338_v11 }
 0xa77   : > { %4489 = vrot.lane.b32.xlu1 %v11324_v57, %s7537_s26  ;;  %v4235_v28 = vrot.slane %v4219_v59, %v11338_v11  ;;  %v4221_v30 = vcombine.high %v4219_v59, %v4219_v59 }
 0xa79   : > { %4491 = vrot.lane.b32.xlu0 %v11325_v37, %s7537_s26  ;;  %v4314_v37 = vrot.slane %v4250_v60, %v11339_v6 }
 0xa7b   : > { %4493 = vrot.lane.b32.xlu1 %v11326_v22, %s7537_s26  ;;  %v4252_v22 = vcombine.high %v4242_v24, %v4242_v24 }
 0xa7d   : > { %4495 = vrot.lane.b32.xlu0 %v11327_v27, %s7537_s26  ;;  %v4318_v56 = vrot.slane %v4252_v22, %v11339_v6  ;;  %v4249_v22 = vrot.slane %v4221_v30, %v11338_v11  ;;  %v4251_v30 = vcombine.high %v4235_v28, %v4235_v28 }
 0xa7f   : > { %4497 = vrot.lane.b32.xlu1 %v11328_v63, %s7537_s26 }
 0xa81   : > { %4499 = vrot.lane.b32.xlu0 %v11329_v41, %s7537_s26 }
 0xa83   : > { %4501 = vrot.lane.b32.xlu1 %v11330_v7, %s7537_s26 }
 0xa85   : > { %4503 = vrot.lane.b32.xlu0 %v11331_v13, %s7537_s26 }
 0xa87   : > { %4505 = vrot.lane.b32.xlu1 %v11332_v18, %s7537_s26 }
 0xa89   : > { %4507 = vrot.lane.b32.xlu0 %v11333_v40, %s7537_s26 }
 0xa8b   : > { %4509 = vrot.lane.b32.xlu1 %v11334_v16, %s7537_s26 }
 0xa8d   : > { %4511 = vrot.lane.b32.xlu0 %v11335_v21, %s7537_s26 }
 0xa8f   : > { %4513 = vrot.lane.b32.xlu1 %v11336_v8, %s7537_s26 }
 0xa91   : > { %4515 = vrot.lane.b32.xlu0 %v11337_v39, %s7537_s26  ;;  %s7432_s26 = sshll.u32 %s7543_s19, 4  ;;  %s7433_s26 = int_to_ptr.vmem [resolvable:$false] %s7432_s26 }
 0xa92   : > { %s7434_s3 = scalar_lea.vmem %s7433_s26, 512  ;;  %p7435_p6 = scmp.lt.s32.totalorder %s10690_s10, %s7433_s26 }
 0xa93   : > { %p7436_p9 = scmp.lt.s32.totalorder %s7434_s3, %s7428_s24 }
 0xa95   : > { %p7437_p4 = por %p7436_p9, %p7435_p6 }
 0xa97   : > { %p7438_p3 = pnand %p7437_p4, %p7431_p8 }
 0xac5   : > { %v10085_v50 = vpop.permute.xlu1 %4383 }
 0xac6   : > { %v4389_v12 = vadd.f32 %v10085_v50, %v4306_v32  ;;  %v4391_v10 = vadd.f32 %v10085_v50, %v4310_v58  ;;  %v4393_v16 = vadd.f32 %v10085_v50, %v4314_v37 }
 0xac7   : > { %v10093_v45 = vpop.permute.xlu0 %4385 }
 0xac8   : > { %v4390_v62 = vadd.f32 %v10093_v45, %v4306_v32  ;;  %v4549_v35 = vadd.f32 %v4454_v33, %v4389_v12  ;;  %v4392_v63 = vadd.f32 %v10093_v45, %v4310_v58  ;;  %v4394_v39 = vadd.f32 %v10093_v45, %v4314_v37 }
 0xac9   : > { %v4458_v57 = vpop.permute.xlu1 %4457  ;;  %v4395_v58 = vadd.f32 %v10085_v50, %v4318_v56  ;;  %v4322_v37 = vrot.slane %v4235_v28, %v11339_v6 }
 0xaca   : > { %v4551_v27 = vadd.f32 %v4458_v57, %v4391_v10  ;;  %v4550_v41 = vadd.f32 %v4456_v31, %v4390_v62  ;;  %v4585_v7 = vadd.f32 %v10089_v55, %v4549_v35 }
 0xacb   : > { %v4460_v13 = vpop.permute.xlu0 %4459 }
 0xacc   : > { %v4587_v18 = vadd.f32 %v10089_v55, %v4551_v27  ;;  %v4552_v40 = vadd.f32 %v4460_v13, %v4392_v63  ;;  %v4586_v21 = vadd.f32 %v10089_v55, %v4550_v41  ;;  %v4617_v31 = vmax.f32 %v4585_v7, 0.0 }
 0xacd   : > { %v4462_v8 = vpop.permute.xlu1 %4461  ;;  %v4396_v41 = vadd.f32 %v10093_v45, %v4318_v56  ;;  %v4397_v13 = vadd.f32 %v10085_v50, %v4322_v37  ;;  %v4398_v56 = vadd.f32 %v10093_v45, %v4322_v37 }
 0xace   : > { %v4588_v33 = vadd.f32 %v10089_v55, %v4552_v40  ;;  %v4553_v24 = vadd.f32 %v4462_v8, %v4393_v16  ;;  %v4618_v32 = vmax.f32 %v4586_v21, 0.0  ;;  %v4619_v23 = vmax.f32 %v4587_v18, 0.0 }
 0xacf   : > { %v4464_v60 = vpop.permute.xlu0 %4463 }
 0xad0   : > { %v4620_v12 = vmax.f32 %v4588_v33, 0.0  ;;  %v4589_v10 = vadd.f32 %v10089_v55, %v4553_v24  ;;  %v4554_v62 = vadd.f32 %v4464_v60, %v4394_v39  ;;  %v4649_v35 = vpack.c.bf16 %v4618_v32, %v4617_v31 }
 0xad1   : > { %v4466_v57 = vpop.permute.xlu1 %4465  ;;  %v4326_v39 = vrot.slane %v4249_v22, %v11339_v6 }
 0xad2   : > { %v4650_v59 = vpack.c.bf16 %v4620_v12, %v4619_v23  ;;  %v4590_v27 = vadd.f32 %v10089_v55, %v4554_v62  ;;  %v4555_v63 = vadd.f32 %v4466_v57, %v4395_v58  ;;  %6571 = vmatprep.mubr.msk.bf16.mxu1 %vm2370_vm5, %v4649_v35  ;;  %v4621_v18 = vmax.f32 %v4589_v10, 0.0 }
 0xad3   : > { %v4468_v7 = vpop.permute.xlu0 %4467  ;;  %v4399_v23 = vadd.f32 %v10085_v50, %v4326_v39  ;;  %v4261_v62 = vrot.slane %v10012_v46, %v11338_v11  ;;  %v4330_v35 = vrot.slane %v4251_v30, %v11339_v6  ;;  %v4253_v57 = vcombine.high %v4249_v22, %v4249_v22 }
 0xad4   : > { %v4622_v40 = vmax.f32 %v4590_v27, 0.0  ;;  %v4591_v16 = vadd.f32 %v10089_v55, %v4555_v63  ;;  %v4556_v21 = vadd.f32 %v4468_v7, %v4396_v41  ;;  %6572 = vmatmul.mubr.msk.bf16.vlgmr.msra.gmra.mrb[32].mxu1 %vm2370_vm5, %v4650_v59  ;;  %v4400_v63 = vadd.f32 %v10093_v45, %v4326_v39 }
 0xad5   : > { %v4470_v8 = vpop.permute.xlu1 %4469  ;;  %v4401_v7 = vadd.f32 %v10085_v50, %v4330_v35  ;;  %v4334_v22 = vrot.slane %v4253_v57, %v11339_v6  ;;  %v4277_v30 = vrot.slane %v4261_v62, %v11338_v11 }
 0xad6   : > { %v4651_v33 = vpack.c.bf16 %v4622_v40, %v4621_v18  ;;  %v4592_v24 = vadd.f32 %v10089_v55, %v4556_v21  ;;  %v4557_v31 = vadd.f32 %v4470_v8, %v4397_v13  ;;  %v4623_v60 = vmax.f32 %v4591_v16, 0.0 }
 0xad7   : > { %v4472_v32 = vpop.permute.xlu0 %4471  ;;  %v4269_v21 = vcombine.high %v4261_v62, %v4261_v62 }
 0xad8   : > { %v4624_v58 = vmax.f32 %v4592_v24, 0.0  ;;  %v4593_v12 = vadd.f32 %v10089_v55, %v4557_v31  ;;  %v4558_v10 = vadd.f32 %v4472_v32, %v4398_v56  ;;  %6575 = vmatprep.mubr.msk.bf16.mxu1 %vm2370_vm5, %v4651_v33  ;;  %v4402_v31 = vadd.f32 %v10093_v45, %v4330_v35 }
 0xad9   : > { %v4474_v28 = vpop.permute.xlu1 %4473  ;;  %v4403_v32 = vadd.f32 %v10085_v50, %v4334_v22  ;;  %v4291_v62 = vrot.slane %v4269_v21, %v11338_v11  ;;  %v4404_v35 = vadd.f32 %v10093_v45, %v4334_v22 }
 0xada   : > { %v4652_v59 = vpack.c.bf16 %v4624_v58, %v4623_v60  ;;  %v4594_v37 = vadd.f32 %v10089_v55, %v4558_v10  ;;  %v4559_v27 = vadd.f32 %v4474_v28, %v4399_v23  ;;  %v4625_v13 = vmax.f32 %v4593_v12, 0.0 }
 0xadb   : > { %v4476_v41 = vpop.permute.xlu0 %4475  ;;  %v4338_v28 = vrot.slane %v4277_v30, %v11339_v6  ;;  %v4342_v21 = vrot.slane %v4291_v62, %v11339_v6 }
 0xadc   : > { %v4626_v18 = vmax.f32 %v4594_v37, 0.0  ;;  %v4595_v40 = vadd.f32 %v10089_v55, %v4559_v27  ;;  %v4560_v16 = vadd.f32 %v4476_v41, %v4400_v63  ;;  %6576 = vmatmul.mubr.msk.bf16.gmra.mrb[36].mxu1 %vm2370_vm5, %v4652_v59 }
 0xadd   : > { %v4478_v8 = vpop.permute.xlu1 %4477  ;;  %v4405_v63 = vadd.f32 %v10085_v50, %v4338_v28 }
 0xade   : > { %v4653_v33 = vpack.c.bf16 %v4626_v18, %v4625_v13  ;;  %v4596_v24 = vadd.f32 %v10089_v55, %v4560_v16  ;;  %v4561_v39 = vadd.f32 %v4478_v8, %v4401_v7  ;;  %v4627_v23 = vmax.f32 %v4595_v40, 0.0 }
 0xadf   : > { %v4480_v56 = vpop.permute.xlu0 %4479  ;;  %v4254_v40 = vcombine.high %v10012_v46, %v10012_v46  ;;  %v4299_v8 = vcombine.high %v4277_v30, %v4277_v30 }
 0xae0   : > { %v4628_v60 = vmax.f32 %v4596_v24, 0.0  ;;  %v4597_v58 = vadd.f32 %v10089_v55, %v4561_v39  ;;  %v4562_v12 = vadd.f32 %v4480_v56, %v4402_v31  ;;  %6579 = vmatprep.mubr.msk.bf16.mxu1 %vm2370_vm5, %v4653_v33  ;;  %v4406_v39 = vadd.f32 %v10093_v45, %v4338_v28 }
 0xae1   : > { %v4482_v10 = vpop.permute.xlu1 %4481  ;;  %v4407_v56 = vadd.f32 %v10085_v50, %v4342_v21  ;;  %v4346_v30 = vrot.slane %v4299_v8, %v11339_v6 }
 0xae2   : > { %v4654_v57 = vpack.c.bf16 %v4628_v60, %v4627_v23  ;;  %v4598_v59 = vadd.f32 %v10089_v55, %v4562_v12  ;;  %v4563_v37 = vadd.f32 %v4482_v10, %v4403_v32  ;;  %v4629_v41 = vmax.f32 %v4597_v58, 0.0 }
 0xae3   : > { %v4484_v27 = vpop.permute.xlu0 %4483  ;;  %v4268_v12 = vrot.slane %v4254_v40, %v11338_v11 }
 0xae4   : > { %v4630_v7 = vmax.f32 %v4598_v59, 0.0  ;;  %v4599_v13 = vadd.f32 %v10089_v55, %v4563_v37  ;;  %v4564_v18 = vadd.f32 %v4484_v27, %v4404_v35  ;;  %6580 = vmatmul.mubr.msk.bf16.gmra.mrb[40].mxu1 %vm2370_vm5, %v4654_v57  ;;  %v4301_v57 = vcombine.high %v4291_v62, %v4291_v62 }
 0xae5   : > { %v4486_v16 = vpop.permute.xlu1 %4485  ;;  %v4408_v35 = vadd.f32 %v10093_v45, %v4342_v21  ;;  %v4284_v62 = vrot.slane %v4268_v12, %v11338_v11  ;;  %v4270_v8 = vcombine.high %v4268_v12, %v4268_v12 }
 0xae6   : > { %v4655_v33 = vpack.c.bf16 %v4630_v7, %v4629_v41  ;;  %v4600_v22 = vadd.f32 %v10089_v55, %v4564_v18  ;;  %v4565_v24 = vadd.f32 %v4486_v16, %v4405_v63  ;;  %v4631_v32 = vmax.f32 %v4599_v13, 0.0 }
 0xae7   : > { %v4488_v31 = vpop.permute.xlu0 %4487  ;;  %v4409_v63 = vadd.f32 %v10085_v50, %v4346_v30  ;;  %v4350_v16 = vrot.slane %v4301_v57, %v11339_v6  ;;  %v4298_v12 = vrot.slane %v4270_v8, %v11338_v11  ;;  %v4300_v11 = vcombine.high %v4284_v62, %v4284_v62 }
 0xae8   : > { %v4632_v23 = vmax.f32 %v4600_v22, 0.0  ;;  %v4601_v60 = vadd.f32 %v10089_v55, %v4565_v24  ;;  %v4566_v58 = vadd.f32 %v4488_v31, %v4406_v39  ;;  %6583 = vmatprep.mubr.msk.bf16.mxu1 %vm2370_vm5, %v4655_v33  ;;  %v4410_v24 = vadd.f32 %v10093_v45, %v4346_v30 }
 0xae9   : > { %v4490_v10 = vpop.permute.xlu1 %4489  ;;  %v4411_v31 = vadd.f32 %v10085_v50, %v4350_v16  ;;  %v4412_v30 = vadd.f32 %v10093_v45, %v4350_v16 }
 0xaea   : > { %v4656_v59 = vpack.c.bf16 %v4632_v23, %v4631_v32  ;;  %v4602_v37 = vadd.f32 %v10089_v55, %v4566_v58  ;;  %v4567_v28 = vadd.f32 %v4490_v10, %v4407_v56  ;;  %v4633_v41 = vmax.f32 %v4601_v60, 0.0 }
 0xaeb   : > { %v4492_v27 = vpop.permute.xlu0 %4491  ;;  %v4354_v10 = vrot.slane %v4284_v62, %v11339_v6  ;;  %v4302_v62 = vcombine.high %v4298_v12, %v4298_v12 }
 0xaec   : > { %v4634_v7 = vmax.f32 %v4602_v37, 0.0  ;;  %v4603_v13 = vadd.f32 %v10089_v55, %v4567_v28  ;;  %v4568_v18 = vadd.f32 %v4492_v27, %v4408_v35  ;;  %6584 = vmatmul.mubr.msk.bf16.gmra.mrb[44].mxu1 %vm2370_vm5, %v4656_v59 }
 0xaed   : > { %v4494_v40 = vpop.permute.xlu1 %4493  ;;  %v4413_v35 = vadd.f32 %v10085_v50, %v4354_v10  ;;  %v4414_v16 = vadd.f32 %v10093_v45, %v4354_v10 }
 0xaee   : > { %v4657_v33 = vpack.c.bf16 %v4634_v7, %v4633_v41  ;;  %v4604_v22 = vadd.f32 %v10089_v55, %v4568_v18  ;;  %v4569_v21 = vadd.f32 %v4494_v40, %v4409_v63  ;;  %v4635_v56 = vmax.f32 %v4603_v13, 0.0 }
 0xaef   : > { %v4496_v39 = vpop.permute.xlu0 %4495  ;;  %v4358_v18 = vrot.slane %v4298_v12, %v11339_v6 }
 0xaf0   : > { %v4636_v32 = vmax.f32 %v4604_v22, 0.0  ;;  %v4605_v23 = vadd.f32 %v10089_v55, %v4569_v21  ;;  %v4570_v60 = vadd.f32 %v4496_v39, %v4410_v24  ;;  %6587 = vmatprep.mubr.msk.bf16.mxu1 %vm2370_vm5, %v4657_v33 }
 0xaf1   : > { %v4498_v58 = vpop.permute.xlu1 %4497  ;;  %v4415_v21 = vadd.f32 %v10085_v50, %v4358_v18  ;;  %v4416_v10 = vadd.f32 %v10093_v45, %v4358_v18 }
 0xaf2   : > { %v4658_v57 = vpack.c.bf16 %v4636_v32, %v4635_v56  ;;  %v4606_v59 = vadd.f32 %v10089_v55, %v4570_v60  ;;  %v4571_v37 = vadd.f32 %v4498_v58, %v4411_v31  ;;  %v4637_v27 = vmax.f32 %v4605_v23, 0.0 }
 0xaf3   : > { %v4500_v28 = vpop.permute.xlu0 %4499  ;;  %v4362_v23 = vrot.slane %v4300_v11, %v11339_v6 }
 0xaf4   : > { %v4638_v63 = vmax.f32 %v4606_v59, 0.0  ;;  %v4607_v41 = vadd.f32 %v10089_v55, %v4571_v37  ;;  %v4572_v7 = vadd.f32 %v4500_v28, %v4412_v30  ;;  %6588 = vmatmul.mubr.msk.bf16.gmra.mrb[48].mxu1 %vm2370_vm5, %v4658_v57 }
 0xaf5   : > { %v4502_v13 = vpop.permute.xlu1 %4501  ;;  %v4417_v37 = vadd.f32 %v10085_v50, %v4362_v23  ;;  %v4418_v11 = vadd.f32 %v10093_v45, %v4362_v23 }
 0xaf6   : > { %v4659_v40 = vpack.c.bf16 %v4638_v63, %v4637_v27  ;;  %v4608_v8 = vadd.f32 %v10089_v55, %v4572_v7  ;;  %v4573_v33 = vadd.f32 %v4502_v13, %v4413_v35  ;;  %v4639_v24 = vmax.f32 %v4607_v41, 0.0 }
 0xaf7   : > { %v4504_v22 = vpop.permute.xlu0 %4503  ;;  %v4366_v41 = vrot.slane %v4302_v62, %v11339_v6 }
 0xaf8   : > { %v4640_v39 = vmax.f32 %v4608_v8, 0.0  ;;  %v4609_v31 = vadd.f32 %v10089_v55, %v4573_v33  ;;  %v4574_v56 = vadd.f32 %v4504_v22, %v4414_v16  ;;  %6591 = vmatprep.mubr.msk.bf16.mxu1 %vm2370_vm5, %v4659_v40 }
 0xaf9   : > { %v4506_v32 = vpop.permute.xlu1 %4505  ;;  %v4419_v40 = vadd.f32 %v10085_v50, %v4366_v41 }
 0xafa   : > { %v4660_v60 = vpack.c.bf16 %v4640_v39, %v4639_v24  ;;  %v4610_v58 = vadd.f32 %v10089_v55, %v4574_v56  ;;  %v4575_v57 = vadd.f32 %v4506_v32, %v4415_v21  ;;  %v4641_v30 = vmax.f32 %v4609_v31, 0.0 }
 0xafb   : > { %v4508_v59 = vpop.permute.xlu0 %4507  ;;  %v4420_v31 = vadd.f32 %v10093_v45, %v4366_v41  ;;  %v11340_v45 = vsub.s32 1, %v11297_v4 }
 0xafc   : > { %v4642_v28 = vmax.f32 %v4610_v58, 0.0  ;;  %v4611_v35 = vadd.f32 %v10089_v55, %v4575_v57  ;;  %v4576_v27 = vadd.f32 %v4508_v59, %v4416_v10  ;;  %6592 = vmatmul.mubr.msk.bf16.gmra.mrb[52].mxu1 %vm2370_vm5, %v4660_v60 }
 0xafd   : > { %v4510_v63 = vpop.permute.xlu1 %4509 }
 0xafe   : > { %v4661_v12 = vpack.c.bf16 %v4642_v28, %v4641_v30  ;;  %v4612_v7 = vadd.f32 %v10089_v55, %v4576_v27  ;;  %v4577_v13 = vadd.f32 %v4510_v63, %v4417_v37  ;;  %v4643_v8 = vmax.f32 %v4611_v35, 0.0 }
 0xaff   : > { %v4512_v18 = vpop.permute.xlu0 %4511  ;;  %v10203_v37 = vrot.slane %v10080_v2, %v11340_v45  ;;  %v11341_v35 = vsub.s32 4, %v11297_v4 }
 0xb00   : > { %v4644_v33 = vmax.f32 %v4612_v7, 0.0  ;;  %v4613_v16 = vadd.f32 %v10089_v55, %v4577_v13  ;;  %v4578_v22 = vadd.f32 %v4512_v18, %v4418_v11  ;;  %6595 = vmatprep.mubr.msk.bf16.mxu1 %vm2370_vm5, %v4661_v12 }
 0xb01   : > { %v4514_v21 = vpop.permute.xlu1 %4513 }
 0xb02   : > { %v4662_v24 = vpack.c.bf16 %v4644_v33, %v4643_v8  ;;  %v4614_v6 = vadd.f32 %v10089_v55, %v4578_v22  ;;  %v4579_v39 = vadd.f32 %v4514_v21, %v4419_v40  ;;  %v4645_v32 = vmax.f32 %v4613_v16, 0.0 }
 0xb03   : > { %v4516_v56 = vpop.permute.xlu0 %4515 }
 0xb04   : > { %v4646_v23 = vmax.f32 %v4614_v6, 0.0  ;;  %v4615_v62 = vadd.f32 %v10089_v55, %v4579_v39  ;;  %v4580_v50 = vadd.f32 %v4516_v56, %v4420_v31  ;;  %6596 = vmatmul.mubr.msk.bf16.gmra.mrb[56].mxu1 %vm2370_vm5, %v4662_v24 }
 0xb06   : > { %v4663_v60 = vpack.c.bf16 %v4646_v23, %v4645_v32  ;;  %v4616_v58 = vadd.f32 %v10089_v55, %v4580_v50  ;;  %v4647_v57 = vmax.f32 %v4615_v62, 0.0  ;;  %v10211_v55 = vrot.slane %v10080_v2, %v11341_v35 }
 0xb08   : > { %v4648_v10 = vmax.f32 %v4616_v58, 0.0  ;;  %6599 = vmatprep.mubr.msk.bf16.mxu1 %vm2370_vm5, %v4663_v60 }
 0xb0a   : > { %v4664_v59 = vpack.c.bf16 %v4648_v10, %v4647_v57 }
 0xb0c   : > { %6600 = vmatmul.mubr.msk.bf16.gmra.mrb[60].mxu1 %vm2370_vm5, %v4664_v59 }
 0xba7   : > { %v6573_v30 = vpop.f32.mrb[32].mxu1 }
 0xba8   : > { %v10206_v28 = vadd.f32 %v6573_v30, %v10203_v37  ;;  %v4759_v27 = vpop.f32.mrb[33].mxu1 }
 0xba9   : > { %v10214_v63 = vadd.f32 %v10203_v37, %v4759_v27  ;;  %v6574_v41 = vpop.f32.mrb[34].mxu1 }
 0xbaa   : > { %v10973_v12 = vmax.f32 %v10206_v28, 0.0  ;;  %v10218_v7 = vadd.f32 %v6574_v41, %v10203_v37  ;;  %v4762_v13 = vpop.f32.mrb[35].mxu1 }
 0xbab   : > { %v10971_v11 = vmax.f32 %v10214_v63, 0.0  ;;  %v10222_v18 = vadd.f32 %v10203_v37, %v4762_v13 }
 0xbac   : > { %v4960_v40 = vmul.f32 %v10211_v55, %v10973_v12  ;;  %v10967_v8 = vmax.f32 %v10218_v7, 0.0 }
 0xbad   : > { %v4958_v33 = vmul.f32 %v10211_v55, %v10971_v11  ;;  %v10969_v16 = vmax.f32 %v10222_v18, 0.0 }
 0xbae   : > { %v4996_v22 = vsel %vm2370_vm5, %v4960_v40, 0.0  ;;  %v4961_v21 = vmul.f32 %v10211_v55, %v10967_v8 }
 0xbaf   : > { %v4959_v24 = vmul.f32 %v10211_v55, %v10969_v16  ;;  %4997 = vadd.xlane.f32.xlu0 %v4996_v22  ;;  %v6577_v6 = vpop.f32.mrb[36].mxu1  ;;  %v4990_v39 = vsel %vm2370_vm5, %v4958_v33, 0.0 }
 0xbb0   : > { %v10241_v31 = vadd.f32 %v6577_v6, %v10203_v37  ;;  %4991 = vadd.xlane.f32.xlu1 %v4990_v39  ;;  %v4775_v56 = vpop.f32.mrb[37].mxu1  ;;  %v4999_v59 = vsel %vm2370_vm5, %v4961_v21, 0.0 }
 0xbb1   : > { %v10244_v32 = vadd.f32 %v10203_v37, %v4775_v56  ;;  %v6578_v23 = vpop.f32.mrb[38].mxu1  ;;  %v4993_v62 = vsel %vm2370_vm5, %v4959_v24, 0.0 }
 0xbb2   : > { %v10963_v50 = vmax.f32 %v10241_v31, 0.0  ;;  %v10249_v60 = vadd.f32 %v6578_v23, %v10203_v37  ;;  %v4778_v58 = vpop.f32.mrb[39].mxu1 }
 0xbb3   : > { %v10959_v57 = vmax.f32 %v10244_v32, 0.0  ;;  %v10253_v10 = vadd.f32 %v10203_v37, %v4778_v58  ;;  %4994 = vadd.xlane.f32.xlu0 %v4993_v62 }
 0xbb4   : > { %v4964_v45 = vmul.f32 %v10211_v55, %v10963_v50  ;;  %v10965_v30 = vmax.f32 %v10249_v60, 0.0  ;;  %5000 = vadd.xlane.f32.xlu1 %v4999_v59 }
 0xbb5   : > { %v10961_v35 = vmax.f32 %v10253_v10, 0.0  ;;  %v4962_v27 = vmul.f32 %v10211_v55, %v10959_v57 }
 0xbb6   : > { %v4965_v41 = vmul.f32 %v10211_v55, %v10965_v30  ;;  %v5008_v13 = vsel %vm2370_vm5, %v4964_v45, 0.0 }
 0xbb7   : > { %5009 = vadd.xlane.f32.xlu0 %v5008_v13  ;;  %v6581_v40 = vpop.f32.mrb[40].mxu1  ;;  %v4963_v33 = vmul.f32 %v10211_v55, %v10961_v35  ;;  %v5002_v58 = vsel %vm2370_vm5, %v4962_v27, 0.0 }
 0xbb8   : > { %v10272_v22 = vadd.f32 %v6581_v40, %v10203_v37  ;;  %v4791_v21 = vpop.f32.mrb[41].mxu1  ;;  %v5011_v24 = vsel %vm2370_vm5, %v4965_v41, 0.0 }
 0xbb9   : > { %v10276_v6 = vadd.f32 %v10203_v37, %v4791_v21  ;;  %5012 = vadd.xlane.f32.xlu1 %v5011_v24  ;;  %v6582_v39 = vpop.f32.mrb[42].mxu1  ;;  %v5005_v40 = vsel %vm2370_vm5, %v4963_v33, 0.0 }
 0xbba   : > { %v10956_v56 = vmax.f32 %v10272_v22, 0.0  ;;  %v10280_v23 = vadd.f32 %v6582_v39, %v10203_v37  ;;  %v4794_v62 = vpop.f32.mrb[43].mxu1 }
 0xbbb   : > { %v10955_v59 = vmax.f32 %v10276_v6, 0.0  ;;  %v10285_v45 = vadd.f32 %v10203_v37, %v4794_v62  ;;  %5003 = vadd.xlane.f32.xlu0 %v5002_v58 }
 0xbbc   : > { %v4968_v41 = vmul.f32 %v10211_v55, %v10956_v56  ;;  %v10957_v13 = vmax.f32 %v10280_v23, 0.0 }
 0xbbd   : > { %v10958_v21 = vmax.f32 %v10285_v45, 0.0  ;;  %5006 = vadd.xlane.f32.xlu1 %v5005_v40  ;;  %v4966_v27 = vmul.f32 %v10211_v55, %v10955_v59 }
 0xbbe   : > { %v4969_v24 = vmul.f32 %v10211_v55, %v10957_v13  ;;  %v5020_v39 = vsel %vm2370_vm5, %v4968_v41, 0.0 }
 0xbbf   : > { %5021 = vadd.xlane.f32.xlu0 %v5020_v39  ;;  %v6585_v62 = vpop.f32.mrb[44].mxu1  ;;  %v4967_v58 = vmul.f32 %v10211_v55, %v10958_v21  ;;  %v5014_v13 = vsel %vm2370_vm5, %v4966_v27, 0.0 }
 0xbc0   : > { %v10304_v33 = vadd.f32 %v6585_v62, %v10203_v37  ;;  %v4807_v40 = vpop.f32.mrb[45].mxu1  ;;  %v5023_v53 = vsel %vm2370_vm5, %v4969_v24, 0.0 }
 0xbc1   : > { %v10308_v1 = vadd.f32 %v10203_v37, %v4807_v40  ;;  %5024 = vadd.xlane.f32.xlu1 %v5023_v53  ;;  %v6586_v59 = vpop.f32.mrb[46].mxu1  ;;  %v5017_v40 = vsel %vm2370_vm5, %v4967_v58, 0.0 }
 0xbc2   : > { %v10960_v56 = vmax.f32 %v10304_v33, 0.0  ;;  %v10312_v41 = vadd.f32 %v6586_v59, %v10203_v37  ;;  %v4810_v39 = vpop.f32.mrb[47].mxu1 }
 0xbc3   : > { %v10962_v21 = vmax.f32 %v10308_v1, 0.0  ;;  %v10317_v62 = vadd.f32 %v10203_v37, %v4810_v39  ;;  %5015 = vadd.xlane.f32.xlu0 %v5014_v13 }
 0xbc4   : > { %v4972_v24 = vmul.f32 %v10211_v55, %v10960_v56  ;;  %v10964_v53 = vmax.f32 %v10312_v41, 0.0 }
 0xbc5   : > { %v10966_v59 = vmax.f32 %v10317_v62, 0.0  ;;  %5018 = vadd.xlane.f32.xlu1 %v5017_v40  ;;  %v4970_v27 = vmul.f32 %v10211_v55, %v10962_v21 }
 0xbc6   : > { %v4973_v39 = vmul.f32 %v10211_v55, %v10964_v53  ;;  %v5032_v13 = vsel %vm2370_vm5, %v4972_v24, 0.0 }
 0xbc7   : > { %5033 = vadd.xlane.f32.xlu0 %v5032_v13  ;;  %v6589_v57 = vpop.f32.mrb[48].mxu1  ;;  %v4971_v56 = vmul.f32 %v10211_v55, %v10966_v59  ;;  %v5026_v30 = vsel %vm2370_vm5, %v4970_v27, 0.0 }
 0xbc8   : > { %v10336_v58 = vadd.f32 %v6589_v57, %v10203_v37  ;;  %v4823_v40 = vpop.f32.mrb[49].mxu1  ;;  %v5035_v35 = vsel %vm2370_vm5, %v4973_v39, 0.0 }
 0xbc9   : > { %v10340_v21 = vadd.f32 %v10203_v37, %v4823_v40  ;;  %5036 = vadd.xlane.f32.xlu1 %v5035_v35  ;;  %v6590_v50 = vpop.f32.mrb[50].mxu1  ;;  %v5029_v40 = vsel %vm2370_vm5, %v4971_v56, 0.0 }
 0xbca   : > { %v10968_v53 = vmax.f32 %v10336_v58, 0.0  ;;  %v10344_v24 = vadd.f32 %v6590_v50, %v10203_v37  ;;  %v4826_v13 = vpop.f32.mrb[51].mxu1 }
 0xbcb   : > { %v10970_v59 = vmax.f32 %v10340_v21, 0.0  ;;  %v10349_v57 = vadd.f32 %v10203_v37, %v4826_v13  ;;  %5027 = vadd.xlane.f32.xlu0 %v5026_v30 }
 0xbcc   : > { %v4976_v39 = vmul.f32 %v10211_v55, %v10968_v53  ;;  %v10972_v35 = vmax.f32 %v10344_v24, 0.0 }
 0xbcd   : > { %v10974_v50 = vmax.f32 %v10349_v57, 0.0  ;;  %5030 = vadd.xlane.f32.xlu1 %v5029_v40  ;;  %v4974_v27 = vmul.f32 %v10211_v55, %v10970_v59 }
 0xbce   : > { %v4977_v13 = vmul.f32 %v10211_v55, %v10972_v35  ;;  %v5044_v30 = vsel %vm2370_vm5, %v4976_v39, 0.0 }
 0xbcf   : > { %5045 = vadd.xlane.f32.xlu0 %v5044_v30  ;;  %v6593_v8 = vpop.f32.mrb[52].mxu1  ;;  %v4975_v53 = vmul.f32 %v10211_v55, %v10974_v50  ;;  %v5038_v12 = vsel %vm2370_vm5, %v4974_v27, 0.0 }
 0xbd0   : > { %v10368_v56 = vadd.f32 %v6593_v8, %v10203_v37  ;;  %v4839_v40 = vpop.f32.mrb[53].mxu1  ;;  %v5047_v16 = vsel %vm2370_vm5, %v4977_v13, 0.0 }
 0xbd1   : > { %v10372_v59 = vadd.f32 %v10203_v37, %v4839_v40  ;;  %5048 = vadd.xlane.f32.xlu1 %v5047_v16  ;;  %v6594_v11 = vpop.f32.mrb[54].mxu1  ;;  %v5041_v40 = vsel %vm2370_vm5, %v4975_v53, 0.0 }
 0xbd2   : > { %v10976_v35 = vmax.f32 %v10368_v56, 0.0  ;;  %v10376_v39 = vadd.f32 %v6594_v11, %v10203_v37  ;;  %v4842_v30 = vpop.f32.mrb[55].mxu1 }
 0xbd3   : > { %11342 = vst [vmem:[#allocation84_spill] sm:$0xff] %v10372_v59  ;;  %v10978_v50 = vmax.f32 %v10372_v59, 0.0  ;;  %v10381_v8 = vadd.f32 %v10203_v37, %v4842_v30  ;;  %5039 = vadd.xlane.f32.xlu0 %v5038_v12 }
 0xbd4   : > { %11343 = vst [vmem:[#allocation87_spill] sm:$0xff] %v10376_v39  ;;  %v4980_v13 = vmul.f32 %v10211_v55, %v10976_v35  ;;  %v10980_v16 = vmax.f32 %v10376_v39, 0.0 }
 0xbd5   : > { %11344 = vst [vmem:[#allocation112_spill] sm:$0xff] %v10381_v8  ;;  %v10982_v11 = vmax.f32 %v10381_v8, 0.0  ;;  %5042 = vadd.xlane.f32.xlu1 %v5041_v40  ;;  %v4978_v27 = vmul.f32 %v10211_v55, %v10978_v50 }
 0xbd6   : > { %v4981_v30 = vmul.f32 %v10211_v55, %v10980_v16  ;;  %v5056_v12 = vsel %vm2370_vm5, %v4980_v13, 0.0 }
 0xbd7   : > { %5057 = vadd.xlane.f32.xlu0 %v5056_v12  ;;  %v6597_v29 = vpop.f32.mrb[56].mxu1  ;;  %v4979_v35 = vmul.f32 %v10211_v55, %v10982_v11  ;;  %v5050_v54 = vsel %vm2370_vm5, %v4978_v27, 0.0 }
 0xbd8   : > { %v10400_v53 = vadd.f32 %v6597_v29, %v10203_v37  ;;  %v4855_v40 = vpop.f32.mrb[57].mxu1  ;;  %v5059_v43 = vsel %vm2370_vm5, %v4981_v30, 0.0 }
 0xbd9   : > { %v10404_v50 = vadd.f32 %v10203_v37, %v4855_v40  ;;  %5060 = vadd.xlane.f32.xlu1 %v5059_v43  ;;  %v6598_v46 = vpop.f32.mrb[58].mxu1  ;;  %v5053_v40 = vsel %vm2370_vm5, %v4979_v35, 0.0 }
 0xbda   : > { %11345 = vst [vmem:[#allocation98_spill] sm:$0xff] %v10400_v53  ;;  %v10984_v16 = vmax.f32 %v10400_v53, 0.0  ;;  %v10408_v13 = vadd.f32 %v6598_v46, %v10203_v37  ;;  %v4858_v12 = vpop.f32.mrb[59].mxu1 }
 0xbdb   : > { %11346 = vst [vmem:[#allocation92_spill] sm:$0xff] %v10404_v50  ;;  %v10986_v11 = vmax.f32 %v10404_v50, 0.0  ;;  %v10413_v29 = vadd.f32 %v10203_v37, %v4858_v12  ;;  %5051 = vadd.xlane.f32.xlu0 %v5050_v54 }
 0xbdc   : > { %11347 = vst [vmem:[#allocation36_spill] sm:$0xff] %v10408_v13  ;;  %v4984_v30 = vmul.f32 %v10211_v55, %v10984_v16  ;;  %v10988_v43 = vmax.f32 %v10408_v13, 0.0 }
 0xbdd   : > { %11348 = vst [vmem:[#allocation100_spill] sm:$0xff] %v10413_v29  ;;  %v10990_v46 = vmax.f32 %v10413_v29, 0.0  ;;  %5054 = vadd.xlane.f32.xlu1 %v5053_v40  ;;  %v4982_v27 = vmul.f32 %v10211_v55, %v10986_v11 }
 0xbde   : > { %v4985_v12 = vmul.f32 %v10211_v55, %v10988_v43  ;;  %v5068_v54 = vsel %vm2370_vm5, %v4984_v30, 0.0 }
 0xbdf   : > { %5069 = vadd.xlane.f32.xlu0 %v5068_v54  ;;  %v6601_v53 = vpop.f32.mrb[60].mxu1  ;;  %v4983_v16 = vmul.f32 %v10211_v55, %v10990_v46  ;;  %v5062_v54 = vsel %vm2370_vm5, %v4982_v27, 0.0 }
 0xbe0   : > { %v10432_v35 = vadd.f32 %v6601_v53, %v10203_v37  ;;  %v4871_v40 = vpop.f32.mrb[61].mxu1  ;;  %v5071_v50 = vsel %vm2370_vm5, %v4985_v12, 0.0 }
 0xbe1   : > { %v10436_v11 = vadd.f32 %v10203_v37, %v4871_v40  ;;  %5072 = vadd.xlane.f32.xlu1 %v5071_v50  ;;  %v6602_v13 = vpop.f32.mrb[62].mxu1  ;;  %v5065_v12 = vsel %vm2370_vm5, %v4983_v16, 0.0 }
 0xbe2   : > { %11349 = vst [vmem:[#allocation103_spill] sm:$0xff] %v10432_v35  ;;  %v10439_v43 = vadd.f32 %v6602_v13, %v10203_v37  ;;  %v4874_v30 = vpop.f32.mrb[63].mxu1  ;;  %v10992_v29 = vmax.f32 %v10432_v35, 0.0 }
 0xbe3   : > { %11350 = vst [vmem:[#allocation113_spill] sm:$0xff] %v10436_v11  ;;  %v10991_v46 = vmax.f32 %v10436_v11, 0.0  ;;  %v10445_v53 = vadd.f32 %v10203_v37, %v4874_v30  ;;  %5063 = vadd.xlane.f32.xlu0 %v5062_v54 }
 0xbe4   : > { %11351 = vst [vmem:[#allocation111_spill] sm:$0xff] %v10439_v43  ;;  %v10995_v13 = vmax.f32 %v10439_v43, 0.0  ;;  %v4988_v27 = vmul.f32 %v10211_v55, %v10992_v29  ;;  %v11353_v29 = vsub.s32 5, %v11297_v4 }
 0xbe5   : > { %11352 = vst [vmem:[#allocation114_spill] sm:$0xff] %v10445_v53  ;;  %v4986_v50 = vmul.f32 %v10211_v55, %v10991_v46  ;;  %v10993_v40 = vmax.f32 %v10445_v53, 0.0  ;;  %5066 = vadd.xlane.f32.xlu1 %v5065_v12 }
 0xbe6   : > { %v4989_v16 = vmul.f32 %v10211_v55, %v10995_v13  ;;  %v5080_v12 = vsel %vm2370_vm5, %v4988_v27, 0.0 }
 0xbe7   : > { %v4987_v37 = vmul.f32 %v10211_v55, %v10993_v40  ;;  %v5074_v30 = vsel %vm2370_vm5, %v4986_v50, 0.0  ;;  %v10469_v40 = vrot.slane %v10080_v2, %v11353_v29 }
 0xbe8   : > { %5075 = vadd.xlane.f32.xlu0 %v5074_v30  ;;  %v5083_v46 = vsel %vm2370_vm5, %v4989_v16, 0.0 }
 0xbe9   : > { %v5077_v54 = vsel %vm2370_vm5, %v4987_v37, 0.0 }
 0xbea   : > { %5078 = vadd.xlane.f32.xlu1 %v5077_v54 }
 0xbec   : > { %5081 = vadd.xlane.f32.xlu0 %v5080_v12 }
 0xbee   : > { %5084 = vadd.xlane.f32.xlu1 %v5083_v46 }
 0xc3c   : > { %v4998_v50 = vpop.xlane.xlu0 %4997 }
 0xc3d   : > { %v5092_v30 = vadd.f32 %v10469_v40, %v4998_v50  ;;  %v4992_v43 = vpop.xlane.xlu1 %4991 }
 0xc3e   : > { %v5090_v55 = vadd.f32 %v10469_v40, %v4992_v43 }
 0xc3f   : > { %v6319_v13 = vmul.f32 -1.442695, %v5092_v30 }
 0xc40   : > { %v6317_v37 = vmul.f32 -1.442695, %v5090_v55  ;;  %v4995_v54 = vpop.xlane.xlu0 %4994 }
 0xc41   : > { %7013 = vpow2.f32 %v6319_v13  ;;  %v5091_v27 = vadd.f32 %v10469_v40, %v4995_v54  ;;  %v5001_v12 = vpop.xlane.xlu1 %5000 }
 0xc42   : > { %7015 = vpow2.f32 %v6317_v37  ;;  %v5093_v46 = vadd.f32 %v10469_v40, %v5001_v12 }
 0xc43   : > { %v6318_v16 = vmul.f32 -1.442695, %v5091_v27 }
 0xc44   : > { %v6320_v4 = vmul.f32 -1.442695, %v5093_v46  ;;  %v5010_v2 = vpop.xlane.xlu0 %5009 }
 0xc45   : > { %7017 = vpow2.f32 %v6318_v16  ;;  %v5096_v29 = vadd.f32 %v10469_v40, %v5010_v2 }
 0xc46   : > { %7019 = vpow2.f32 %v6320_v4  ;;  %v5013_v50 = vpop.xlane.xlu1 %5012 }
 0xc47   : > { %v6323_v35 = vmul.f32 -1.442695, %v5096_v29  ;;  %v5097_v43 = vadd.f32 %v10469_v40, %v5013_v50 }
 0xc48   : > { %v5004_v30 = vpop.xlane.xlu0 %5003 }
 0xc49   : > { %7021 = vpow2.f32 %v6323_v35  ;;  %v6324_v13 = vmul.f32 -1.442695, %v5097_v43  ;;  %v5094_v55 = vadd.f32 %v10469_v40, %v5004_v30 }
 0xc4a   : > { %v5007_v54 = vpop.xlane.xlu1 %5006 }
 0xc4b   : > { %v7014_v37 = vpop.eup %7013  ;;  %7023 = vpow2.f32 %v6324_v13  ;;  %v6321_v12 = vmul.f32 -1.442695, %v5094_v55  ;;  %v5095_v27 = vadd.f32 %v10469_v40, %v5007_v54 }
 0xc4c   : > { %v7016_v46 = vpop.eup %7015  ;;  %v5220_v16 = vadd.f32 1.0, %v7014_v37  ;;  %v5022_v53 = vpop.xlane.xlu0 %5021 }
 0xc4d   : > { %v5218_v2 = vadd.f32 1.0, %v7016_v46  ;;  %7025 = vpow2.f32 %v6321_v12  ;;  %v6322_v4 = vmul.f32 -1.442695, %v5095_v27  ;;  %v5100_v29 = vadd.f32 %v10469_v40, %v5022_v53 }
 0xc4e   : > { %7027 = vrcp.f32 %v5220_v16  ;;  %v5025_v50 = vpop.xlane.xlu1 %5024 }
 0xc4f   : > { %v7018_v35 = vpop.eup %7017  ;;  %7029 = vrcp.f32 %v5218_v2  ;;  %v6327_v43 = vmul.f32 -1.442695, %v5100_v29  ;;  %v5101_v30 = vadd.f32 %v10469_v40, %v5025_v50 }
 0xc50   : > { %v7020_v11 = vpop.eup %7019  ;;  %v5219_v13 = vadd.f32 1.0, %v7018_v35  ;;  %7031 = vpow2.f32 %v6322_v4  ;;  %v5016_v55 = vpop.xlane.xlu0 %5015 }
 0xc51   : > { %v5221_v54 = vadd.f32 1.0, %v7020_v11  ;;  %7033 = vpow2.f32 %v6327_v43  ;;  %v6328_v37 = vmul.f32 -1.442695, %v5101_v30  ;;  %v5098_v46 = vadd.f32 %v10469_v40, %v5016_v55 }
 0xc52   : > { %7035 = vrcp.f32 %v5219_v13  ;;  %v5019_v12 = vpop.xlane.xlu1 %5018 }
 0xc53   : > { %v7022_v27 = vpop.eup %7021  ;;  %7037 = vrcp.f32 %v5221_v54  ;;  %v6325_v53 = vmul.f32 -1.442695, %v5098_v46  ;;  %v5099_v16 = vadd.f32 %v10469_v40, %v5019_v12 }
 0xc54   : > { %v5224_v2 = vadd.f32 1.0, %v7022_v27  ;;  %7039 = vpow2.f32 %v6328_v37  ;;  %v5034_v29 = vpop.xlane.xlu0 %5033 }
 0xc55   : > { %v7024_v50 = vpop.eup %7023  ;;  %7041 = vpow2.f32 %v6325_v53  ;;  %v6326_v35 = vmul.f32 -1.442695, %v5099_v16  ;;  %v5104_v4 = vadd.f32 %v10469_v40, %v5034_v29  ;;  %v11354_v16 = vld [vmem:[#allocation85_spill] sm:$0xff] }
 0xc56   : > { %7043 = vrcp.f32 %v5224_v2  ;;  %v5225_v11 = vadd.f32 1.0, %v7024_v50  ;;  %v5037_v43 = vpop.xlane.xlu1 %5036  ;;  %v11355_v50 = vld [vmem:[#allocation65_spill] sm:$0xff] }
 0xc57   : > { %v7026_v30 = vpop.eup %7025  ;;  %7045 = vpow2.f32 %v6326_v35  ;;  %v6331_v13 = vmul.f32 -1.442695, %v5104_v4  ;;  %v5105_v55 = vadd.f32 %v10469_v40, %v5037_v43 }
 0xc58   : > { %v7028_v54 = vpop.eup %7027  ;;  %7047 = vrcp.f32 %v5225_v11  ;;  %v5222_v46 = vadd.f32 1.0, %v7026_v30  ;;  %v5028_v12 = vpop.xlane.xlu0 %5027 }
 0xc59   : > { %v7030_v27 = vpop.eup %7029  ;;  %7049 = vpow2.f32 %v6331_v13  ;;  %v6332_v37 = vmul.f32 -1.442695, %v5105_v55  ;;  %v5102_v53 = vadd.f32 %v10469_v40, %v5028_v12  ;;  %v5316_v8 = vmul.f32 %v7028_v54, %v11354_v16 }
 0xc5a   : > { %v7032_v29 = vpop.eup %7031  ;;  %7051 = vrcp.f32 %v5222_v46  ;;  %v5031_v2 = vpop.xlane.xlu1 %5030  ;;  %v5314_v59 = vmul.f32 %v7030_v27, %v11355_v50 }
 0xc5b   : > { %v7034_v35 = vpop.eup %7033  ;;  %v5223_v4 = vadd.f32 1.0, %v7032_v29  ;;  %7053 = vpow2.f32 %v6332_v37  ;;  %v6329_v43 = vmul.f32 -1.442695, %v5102_v53  ;;  %v5103_v11 = vadd.f32 %v10469_v40, %v5031_v2  ;;  %5358 = vperm.xlu1 %6798, %v5316_v8   ;;  %v11356_v29 = vld [vmem:[#allocation66_spill] sm:$0xff] }
 0xc5c   : > { %v7036_v30 = vpop.eup %7035  ;;  %v5228_v39 = vadd.f32 1.0, %v7034_v35  ;;  %v5046_v13 = vpop.xlane.xlu0 %5045  ;;  %5348 = vperm.xlu0 %6799, %v5314_v59  }
 0xc5d   : > { %v7038_v55 = vpop.eup %7037  ;;  %7055 = vrcp.f32 %v5223_v4  ;;  %v6330_v12 = vmul.f32 -1.442695, %v5103_v11  ;;  %v5108_v54 = vadd.f32 %v10469_v40, %v5046_v13  ;;  %v5315_v46 = vmul.f32 %v7036_v30, %v9696_v48 }
 0xc5e   : > { %v7040_v16 = vpop.eup %7039  ;;  %7057 = vrcp.f32 %v5228_v39  ;;  %v5049_v27 = vpop.xlane.xlu1 %5048  ;;  %v5317_v37 = vmul.f32 %v7038_v55, %v11356_v29 }
 0xc5f   : > { %v7042_v53 = vpop.eup %7041  ;;  %v5229_v50 = vadd.f32 1.0, %v7040_v16  ;;  %7059 = vpow2.f32 %v6329_v43  ;;  %v6335_v8 = vmul.f32 -1.442695, %v5108_v54  ;;  %v5109_v2 = vadd.f32 %v10469_v40, %v5049_v27  ;;  %5353 = vperm.xlu1 %6798, %v5315_v46  }
 0xc60   : > { %v7044_v59 = vpop.eup %7043  ;;  %v5226_v35 = vadd.f32 1.0, %v7042_v53  ;;  %7061 = vpow2.f32 %v6330_v12  ;;  %v5040_v4 = vpop.xlane.xlu0 %5039  ;;  %5363 = vperm.xlu0 %6799, %v5317_v37  }
 0xc61   : > { %v7046_v11 = vpop.eup %7045  ;;  %7063 = vrcp.f32 %v5229_v50  ;;  %v6336_v48 = vmul.f32 -1.442695, %v5109_v2  ;;  %v5106_v39 = vadd.f32 %v10469_v40, %v5040_v4  ;;  %v5320_v30 = vmul.f32 %v7044_v59, %v9728_v25 }
 0xc62   : > { %v7048_v13 = vpop.eup %7047  ;;  %7065 = vrcp.f32 %v5226_v35  ;;  %v5227_v55 = vadd.f32 1.0, %v7046_v11  ;;  %v5043_v43 = vpop.xlane.xlu1 %5042 }
 0xc63   : > { %v7050_v54 = vpop.eup %7049  ;;  %7067 = vpow2.f32 %v6335_v8  ;;  %v6333_v16 = vmul.f32 -1.442695, %v5106_v39  ;;  %v5107_v46 = vadd.f32 %v10469_v40, %v5043_v43  ;;  %5378 = vperm.xlu1 %6798, %v5320_v30   ;;  %v5321_v12 = vmul.f32 %v7048_v13, %v9738_v34 }
 0xc64   : > { %v7052_v27 = vpop.eup %7051  ;;  %7069 = vrcp.f32 %v5227_v55  ;;  %v5232_v29 = vadd.f32 1.0, %v7050_v54  ;;  %v5058_v37 = vpop.xlane.xlu0 %5057 }
 0xc65   : > { %v7054_v53 = vpop.eup %7053  ;;  %7071 = vpow2.f32 %v6336_v48  ;;  %v6334_v50 = vmul.f32 -1.442695, %v5107_v46  ;;  %v5112_v25 = vadd.f32 %v10469_v40, %v5058_v37  ;;  %5383 = vperm.xlu0 %6799, %v5321_v12   ;;  %v5318_v2 = vmul.f32 %v7052_v27, %v9720_v20  ;;  %v11357_v20 = vld [vmem:[#allocation91_spill] sm:$0xff] }
 0xc66   : > { %7073 = vrcp.f32 %v5232_v29  ;;  %v5233_v8 = vadd.f32 1.0, %v7054_v53  ;;  %v5061_v59 = vpop.xlane.xlu1 %5060 }
 0xc67   : > { %v7056_v35 = vpop.eup %7055  ;;  %7075 = vpow2.f32 %v6333_v16  ;;  %v6339_v4 = vmul.f32 -1.442695, %v5112_v25  ;;  %v5113_v34 = vadd.f32 %v10469_v40, %v5061_v59  ;;  %5368 = vperm.xlu1 %6798, %v5318_v2  }
 0xc68   : > { %v7058_v11 = vpop.eup %7057  ;;  %7077 = vrcp.f32 %v5233_v8  ;;  %v5052_v39 = vpop.xlane.xlu0 %5051  ;;  %v5319_v48 = vmul.f32 %v7056_v35, %v9730_v42 }
 0xc69   : > { %v7060_v30 = vpop.eup %7059  ;;  %7079 = vpow2.f32 %v6334_v50  ;;  %v6340_v13 = vmul.f32 -1.442695, %v5113_v34  ;;  %v5110_v55 = vadd.f32 %v10469_v40, %v5052_v39  ;;  %v5324_v43 = vmul.f32 %v7058_v11, %v11357_v20  ;;  %v11358_v50 = vld [vmem:[#allocation96_spill] sm:$0xff] }
 0xc6a   : > { %v7062_v54 = vpop.eup %7061  ;;  %v5230_v46 = vadd.f32 1.0, %v7060_v30  ;;  %7081 = vpow2.f32 %v6339_v4  ;;  %5373 = vperm.xlu0 %6799, %v5319_v48   ;;  %v5055_v16 = vpop.xlane.xlu1 %5054 }
 0xc6b   : > { %v7064_v12 = vpop.eup %7063  ;;  %v5231_v27 = vadd.f32 1.0, %v7062_v54  ;;  %7083 = vpow2.f32 %v6340_v13  ;;  %v6337_v29 = vmul.f32 -1.442695, %v5110_v55  ;;  %v5111_v37 = vadd.f32 %v10469_v40, %v5055_v16  ;;  %5398 = vperm.xlu1 %6798, %v5324_v43   ;;  %v11359_v13 = vld [vmem:[#allocation93_spill] sm:$0xff] }
 0xc6c   : > { %v7066_v42 = vpop.eup %7065  ;;  %7085 = vrcp.f32 %v5230_v46  ;;  %v5070_v53 = vpop.xlane.xlu0 %5069  ;;  %v5325_v25 = vmul.f32 %v7064_v12, %v11358_v50 }
 0xc6d   : > { %v7068_v2 = vpop.eup %7067  ;;  %7087 = vrcp.f32 %v5231_v27  ;;  %v6338_v8 = vmul.f32 -1.442695, %v5111_v37  ;;  %v5116_v59 = vadd.f32 %v10469_v40, %v5070_v53  ;;  %v5322_v35 = vmul.f32 %v7066_v42, %v9736_v3 }
 0xc6e   : > { %v7070_v4 = vpop.eup %7069  ;;  %v5236_v34 = vadd.f32 1.0, %v7068_v2  ;;  %7089 = vpow2.f32 %v6337_v29  ;;  %5403 = vperm.xlu0 %6799, %v5325_v25   ;;  %v5073_v11 = vpop.xlane.xlu1 %5072 }
 0xc6f   : > { %v7072_v39 = vpop.eup %7071  ;;  %7091 = vpow2.f32 %v6338_v8  ;;  %v6343_v48 = vmul.f32 -1.442695, %v5116_v59  ;;  %v5117_v30 = vadd.f32 %v10469_v40, %v5073_v11  ;;  %5388 = vperm.xlu1 %6798, %v5322_v35   ;;  %v5323_v55 = vmul.f32 %v7070_v4, %v11359_v13 }
 0xc70   : > { %v7074_v20 = vpop.eup %7073  ;;  %7093 = vrcp.f32 %v5236_v34  ;;  %v5237_v43 = vadd.f32 1.0, %v7072_v39  ;;  %v5064_v54 = vpop.xlane.xlu0 %5063 }
 0xc71   : > { %v7076_v46 = vpop.eup %7075  ;;  %7095 = vpow2.f32 %v6343_v48  ;;  %v6344_v3 = vmul.f32 -1.442695, %v5117_v30  ;;  %v5114_v16 = vadd.f32 %v10469_v40, %v5064_v54  ;;  %v5328_v12 = vmul.f32 %v7074_v20, %v9813_v9 }
 0xc72   : > { %v7078_v27 = vpop.eup %7077  ;;  %7097 = vrcp.f32 %v5237_v43  ;;  %v5234_v29 = vadd.f32 1.0, %v7076_v46  ;;  %5393 = vperm.xlu0 %6799, %v5323_v55   ;;  %v5067_v37 = vpop.xlane.xlu1 %5066 }
 0xc73   : > { %v7080_v42 = vpop.eup %7079  ;;  %7099 = vpow2.f32 %v6344_v3  ;;  %v6341_v53 = vmul.f32 -1.442695, %v5114_v16  ;;  %v5115_v50 = vadd.f32 %v10469_v40, %v5067_v37  ;;  %5418 = vperm.xlu1 %6798, %v5328_v12   ;;  %v5329_v25 = vmul.f32 %v7078_v27, %v9817_v26 }
 0xc74   : > { %v7082_v2 = vpop.eup %7081  ;;  %7101 = vrcp.f32 %v5234_v29  ;;  %v5235_v8 = vadd.f32 1.0, %v7080_v42 }
 0xc75   : > { %v7084_v59 = vpop.eup %7083  ;;  %v5240_v35 = vadd.f32 1.0, %v7082_v2  ;;  %7103 = vpow2.f32 %v6341_v53  ;;  %v6342_v9 = vmul.f32 -1.442695, %v5115_v50  ;;  %v5076_v4 = vpop.xlane.xlu0 %5075 }
 0xc76   : > { %v7086_v34 = vpop.eup %7085  ;;  %7105 = vrcp.f32 %v5235_v8  ;;  %v5241_v11 = vadd.f32 1.0, %v7084_v59  ;;  %5423 = vperm.xlu0 %6799, %v5329_v25   ;;  %v5118_v39 = vadd.f32 %v10469_v40, %v5076_v4 }
 0xc77   : > { %v7088_v48 = vpop.eup %7087  ;;  %7107 = vrcp.f32 %v5240_v35  ;;  %v5326_v30 = vmul.f32 %v7086_v34, %v9755_v61  ;;  %v5079_v13 = vpop.xlane.xlu1 %5078 }
 0xc78   : > { %v7090_v26 = vpop.eup %7089  ;;  %7109 = vrcp.f32 %v5241_v11  ;;  %v6345_v55 = vmul.f32 -1.442695, %v5118_v39  ;;  %v5119_v20 = vadd.f32 %v10469_v40, %v5079_v13  ;;  %v5327_v43 = vmul.f32 %v7088_v48, %v9766_v19 }
 0xc79   : > { %v7092_v54 = vpop.eup %7091  ;;  %v5238_v46 = vadd.f32 1.0, %v7090_v26  ;;  %7111 = vpow2.f32 %v6342_v9  ;;  %5408 = vperm.xlu1 %6798, %v5326_v30   ;;  %v5082_v3 = vpop.xlane.xlu0 %5081 }
 0xc7a   : > { %v7094_v16 = vpop.eup %7093  ;;  %v5239_v12 = vadd.f32 1.0, %v7092_v54  ;;  %7113 = vpow2.f32 %v6345_v55  ;;  %v6346_v27 = vmul.f32 -1.442695, %v5119_v20  ;;  %5413 = vperm.xlu0 %6799, %v5327_v43   ;;  %v5120_v61 = vadd.f32 %v10469_v40, %v5082_v3 }
 0xc7b   : > { %v7096_v29 = vpop.eup %7095  ;;  %7115 = vrcp.f32 %v5238_v46  ;;  %v5332_v37 = vmul.f32 %v7094_v16, %v9715_v44  ;;  %v5085_v42 = vpop.xlane.xlu1 %5084 }
 0xc7c   : > { %v7098_v53 = vpop.eup %7097  ;;  %7117 = vrcp.f32 %v5239_v12  ;;  %v5244_v19 = vadd.f32 1.0, %v7096_v29  ;;  %v6347_v50 = vmul.f32 -1.442695, %v5120_v61  ;;  %v5121_v25 = vadd.f32 %v10469_v40, %v5085_v42 }
 0xc7d   : > { %v7100_v2 = vpop.eup %7099  ;;  %7119 = vpow2.f32 %v6346_v27  ;;  %5438 = vperm.xlu1 %6798, %v5332_v37   ;;  %v5333_v8 = vmul.f32 %v7098_v53, %v9726_v51 }
 0xc7e   : > { %v7102_v59 = vpop.eup %7101  ;;  %7121 = vrcp.f32 %v5244_v19  ;;  %v5245_v35 = vadd.f32 1.0, %v7100_v2  ;;  %v6348_v9 = vmul.f32 -1.442695, %v5121_v25  ;;  %v11360_v19 = vld [vmem:[#allocation71_spill] sm:$0xff] }
 0xc7f   : > { %v7104_v4 = vpop.eup %7103  ;;  %7123 = vpow2.f32 %v6347_v50  ;;  %5443 = vperm.xlu0 %6799, %v5333_v8   ;;  %v5330_v44 = vmul.f32 %v7102_v59, %v9703_v52  ;;  %v11361_v50 = vld [vmem:[#allocation72_spill] sm:$0xff]  ;;  %v11362_v8 = vld [vmem:[#allocation74_spill] sm:$0xff] }
 0xc80   : > { %v7106_v34 = vpop.eup %7105  ;;  %7125 = vrcp.f32 %v5245_v35  ;;  %v5242_v11 = vadd.f32 1.0, %v7104_v4  ;;  %v11363_v35 = vld [vmem:[#allocation101_spill] sm:$0xff] }
 0xc81   : > { %v7108_v39 = vpop.eup %7107  ;;  %7127 = vpow2.f32 %v6348_v9  ;;  %5428 = vperm.xlu1 %6798, %v5330_v44   ;;  %v5331_v40 = vmul.f32 %v7106_v34, %v9722_v15  ;;  %v6815_v34 = vld [vmem:[#allocation13 + $0x40] sm:$0xff]  }
 0xc82   : > { %v7110_v48 = vpop.eup %7109  ;;  %7129 = vrcp.f32 %v5242_v11  ;;  %v5336_v51 = vmul.f32 %v7108_v39, %v9732_v17  ;;  %6604 = vmatpush3.bf16.msra.mxu0 %v6815_v34  ;;  %v6816_v11 = vld [vmem:[#allocation13 + $0x48] sm:$0xff]  }
 0xc83   : > { %v7112_v30 = vpop.eup %7111  ;;  %5433 = vperm.xlu0 %6799, %v5331_v40   ;;  %v5337_v13 = vmul.f32 %v7110_v48, %v9742_v36  ;;  %6605 = vmatprep.subr.bf16.mxu0 %v11183_v49 }
 0xc84   : > { %v7114_v26 = vpop.eup %7113  ;;  %v5243_v55 = vadd.f32 1.0, %v7112_v30 }
 0xc85   : > { %v7116_v20 = vpop.eup %7115  ;;  %v5246_v52 = vadd.f32 1.0, %v7114_v26  ;;  %5458 = vperm.xlu1 %6798, %v5336_v51   ;;  %v11365_v51 = vmax.f32 %v10206_v28, 0.0 }
 0xc86   : > { %v7118_v43 = vpop.eup %7117  ;;  %7131 = vrcp.f32 %v5243_v55  ;;  %v5334_v54 = vmul.f32 %v7116_v20, %v9724_v0  ;;  %6606 = vmatpush3.bf16.msra.mxu0 %v6816_v11  ;;  %v11367_v55 = vmax.f32 %v10222_v18, 0.0 }
 0xc87   : > { %v7120_v46 = vpop.eup %7119  ;;  %7133 = vrcp.f32 %v5246_v52  ;;  %5463 = vperm.xlu0 %6799, %v5337_v13   ;;  %v5335_v15 = vmul.f32 %v7118_v43, %v9734_v14  ;;  %6611 = vmatprep.subr.bf16.mxu0 %v11183_v49  ;;  %v11366_v13 = vmax.f32 %v10214_v63, 0.0  ;;  %v11368_v43 = vmax.f32 %v10218_v7, 0.0 }
 0xc88   : > { %v7122_v3 = vpop.eup %7121  ;;  %v5247_v17 = vadd.f32 1.0, %v7120_v46 }
 0xc89   : > { %v7124_v16 = vpop.eup %7123  ;;  %5448 = vperm.xlu1 %6798, %v5334_v54   ;;  %v5340_v36 = vmul.f32 %v7122_v3, %v9748_v47 }
 0xc8a   : > { %v7126_v12 = vpop.eup %7125  ;;  %7135 = vrcp.f32 %v5247_v17  ;;  %v5248_v27 = vadd.f32 1.0, %v7124_v16 }
 0xc8b   : > { %v7128_v61 = vpop.eup %7127  ;;  %5453 = vperm.xlu0 %6799, %v5335_v15   ;;  %v5341_v29 = vmul.f32 %v7126_v12, %v9762_v5 }
 0xc8c   : > { %v7130_v37 = vpop.eup %7129  ;;  %7137 = vrcp.f32 %v5248_v27  ;;  %v5249_v0 = vadd.f32 1.0, %v7128_v61  ;;  %v11369_v61 = vmax.f32 %v10249_v60, 0.0 }
 0xc8d   : > { %5478 = vperm.xlu1 %6798, %v5340_v36   ;;  %v5338_v42 = vmul.f32 %v7130_v37, %v9740_v38  ;;  %v11364_v38 = vld [vmem:[#allocation76_spill] sm:$0xff] }
 0xc8e   : > { %7139 = vrcp.f32 %v5249_v0  ;;  %v11370_v0 = vmax.f32 %v10241_v31, 0.0 }
 0xc8f   : > { %5483 = vperm.xlu0 %6799, %v5341_v29  }
 0xc90   : > { %v7132_v14 = vpop.eup %7131 }
 0xc91   : > { %v7134_v53 = vpop.eup %7133  ;;  %5468 = vperm.xlu1 %6798, %v5338_v42   ;;  %v5339_v47 = vmul.f32 %v7132_v14, %v11360_v19 }
 0xc92   : > { %v5342_v25 = vmul.f32 %v7134_v53, %v11361_v50  ;;  %v11371_v50 = vmax.f32 %v10253_v10, 0.0 }
 0xc93   : > { %5473 = vperm.xlu0 %6799, %v5339_v47  }
 0xc94   : > { %v7136_v2 = vpop.eup %7135 }
 0xc95   : > { %5488 = vperm.xlu1 %6798, %v5342_v25   ;;  %v5343_v5 = vmul.f32 %v7136_v2, %v11362_v8 }
 0xc96   : > { %v7138_v59 = vpop.eup %7137 }
 0xc97   : > { %5493 = vperm.xlu0 %6799, %v5343_v5   ;;  %v5344_v9 = vmul.f32 %v7138_v59, %v11363_v35  ;;  %v11372_v35 = vmax.f32 %v10244_v32, 0.0 }
 0xc98   : > { %v7140_v4 = vpop.eup %7139 }
 0xc99   : > { %5498 = vperm.xlu1 %6798, %v5344_v9   ;;  %v5345_v44 = vmul.f32 %v7140_v4, %v11364_v38 }
 0xc9b   : > { %5503 = vperm.xlu0 %6799, %v5345_v44  }
 0xcda   : > { %v5359_v39 = vpop.permute.xlu1 %5358 }
 0xcdb   : > { %v5349_v40 = vpop.permute.xlu0 %5348  ;;  %v5508_v30 = vmul.f32 %v5359_v39, %v11365_v51 }
 0xcdc   : > { %v5506_v26 = vmul.f32 %v5349_v40, %v11366_v13  ;;  %v11373_v13 = vmax.f32 %v10280_v23, 0.0 }
 0xcdd   : > { %v5547_v17 = vsel %vm2370_vm5, %v5508_v30, 0.0 }
 0xcde   : > { %v5354_v48 = vpop.permute.xlu1 %5353  ;;  %v5538_v28 = vsel %vm2370_vm5, %v5506_v26, 0.0 }
 0xcdf   : > { %v5507_v20 = vmul.f32 %v5354_v48, %v11367_v55  ;;  %v5364_v52 = vpop.permute.xlu0 %5363 }
 0xce0   : > { %v5509_v54 = vmul.f32 %v5364_v52, %v11368_v43  ;;  %v11374_v52 = vmax.f32 %v10272_v22, 0.0 }
 0xce1   : > { %v5539_v46 = vsel %vm2370_vm5, %v5507_v20, 0.0 }
 0xce2   : > { %v5548_v15 = vsel %vm2370_vm5, %v5509_v54, 0.0  ;;  %v5379_v3 = vpop.permute.xlu1 %5378  ;;  %v5540_v16 = vadd.f32 %v5539_v46, %v5538_v28  ;;  %v11375_v54 = vmax.f32 %v10285_v45, 0.0 }
 0xce3   : > { %v5549_v36 = vadd.f32 %v5548_v15, %v5547_v17  ;;  %v5512_v42 = vmul.f32 %v5379_v3, %v11370_v0  ;;  %v11378_v0 = vmax.f32 %v10344_v24, 0.0  ;;  %v11381_v24 = vmax.f32 %v10308_v1, 0.0 }
 0xce4   : > { %v5384_v63 = vpop.permute.xlu0 %5383  ;;  %v5541_v27 = vrot.slane %v5540_v16, 4 }
 0xce5   : > { %v5550_v18 = vrot.slane %v5549_v36, 4  ;;  %v5513_v29 = vmul.f32 %v5384_v63, %v11369_v61  ;;  %v5565_v8 = vsel %vm2370_vm5, %v5512_v42, 0.0  ;;  %v11376_v63 = vmax.f32 %v10276_v6, 0.0 }
 0xce6   : > { %v5369_v12 = vpop.permute.xlu1 %5368  ;;  %v5542_v14 = vadd.f32 %v5541_v27, %v5540_v16  ;;  %v11377_v27 = vmax.f32 %v10336_v58, 0.0 }
 0xce7   : > { %v5551_v53 = vadd.f32 %v5550_v18, %v5549_v36  ;;  %v5566_v19 = vsel %vm2370_vm5, %v5513_v29, 0.0  ;;  %v5510_v9 = vmul.f32 %v5369_v12, %v11372_v35 }
 0xce8   : > { %v5543_v5 = vrot.slane %v5542_v14, 2  ;;  %v5567_v60 = vadd.f32 %v5566_v19, %v5565_v8  ;;  %v11379_v19 = vmax.f32 %v10317_v62, 0.0  ;;  %v11382_v62 = vmax.f32 %v10349_v57, 0.0 }
 0xce9   : > { %v5374_v7 = vpop.permute.xlu0 %5373  ;;  %v5552_v59 = vrot.slane %v5551_v53, 2  ;;  %v5556_v39 = vsel %vm2370_vm5, %v5510_v9, 0.0  ;;  %v11385_v57 = vmax.f32 %v10304_v33, 0.0 }
 0xcea   : > { %v5399_v37 = vpop.permute.xlu1 %5398  ;;  %v5511_v25 = vmul.f32 %v5374_v7, %v11371_v50  ;;  %v5544_v44 = vadd.f32 %v5543_v5, %v5542_v14  ;;  %v5568_v11 = vrot.slane %v5567_v60, 4 }
 0xceb   : > { %v5553_v34 = vadd.f32 %v5552_v59, %v5551_v53  ;;  %v5516_v43 = vmul.f32 %v5399_v37, %v11374_v52 }
 0xcec   : > { %v5557_v31 = vsel %vm2370_vm5, %v5511_v25, 0.0  ;;  %v5545_v48 = vrot.slane %v5544_v44, 1  ;;  %v5569_v30 = vadd.f32 %v5568_v11, %v5567_v60 }
 0xced   : > { %v5404_v47 = vpop.permute.xlu0 %5403  ;;  %v5558_v10 = vadd.f32 %v5557_v31, %v5556_v39  ;;  %v5554_v51 = vrot.slane %v5553_v34, 1  ;;  %v5583_v12 = vsel %vm2370_vm5, %v5516_v43, 0.0  ;;  %v11383_v39 = vmax.f32 %v10312_v41, 0.0 }
 0xcee   : > { %v5389_v2 = vpop.permute.xlu1 %5388  ;;  %v5517_v26 = vmul.f32 %v5404_v47, %v11373_v13  ;;  %v5546_v15 = vadd.f32 %v5545_v48, %v5544_v44  ;;  %v5570_v17 = vrot.slane %v5569_v30, 2  ;;  %v11384_v13 = vmax.f32 %v10368_v56, 0.0 }
 0xcef   : > { %v5559_v32 = vrot.slane %v5558_v10, 4  ;;  %v5555_v3 = vadd.f32 %v5554_v51, %v5553_v34  ;;  %v5514_v23 = vmul.f32 %v5389_v2, %v11376_v63  ;;  %v11380_v2 = vmax.f32 %v10340_v21, 0.0 }
 0xcf0   : > { %v5584_v28 = vsel %vm2370_vm5, %v5517_v26, 0.0  ;;  %v5682_v29 = vmul.f32 0.01, %v5546_v15  ;;  %v5571_v37 = vadd.f32 %v5570_v17, %v5569_v30 }
 0xcf1   : > { %v5394_v4 = vpop.permute.xlu0 %5393  ;;  %v5560_v36 = vadd.f32 %v5559_v32, %v5558_v10  ;;  %v5585_v61 = vadd.f32 %v5584_v28, %v5583_v12  ;;  %v5683_v7 = vmul.f32 0.01, %v5555_v3  ;;  %v5574_v6 = vsel %vm2370_vm5, %v5514_v23, 0.0 }
 0xcf2   : > { %v5419_v38 = vpop.permute.xlu1 %5418  ;;  %v5515_v46 = vmul.f32 %v5394_v4, %v11375_v54  ;;  %v5698_v9 = vpack.c.bf16 %v5682_v29, %v5682_v29  ;;  %v5572_v31 = vrot.slane %v5571_v37, 1 }
 0xcf3   : > { %v5561_v53 = vrot.slane %v5560_v36, 2  ;;  %v5586_v59 = vrot.slane %v5585_v61, 4  ;;  %v5699_v4 = vpack.c.bf16 %v5683_v7, %v5683_v7 }
 0xcf4   : > { %v5575_v45 = vsel %vm2370_vm5, %v5515_v46, 0.0  ;;  %v5573_v43 = vadd.f32 %v5572_v31, %v5571_v37  ;;  %v11386_v46 = vld [vmem:[#allocation87_spill] sm:$0xff] }
 0xcf5   : > { %v5424_v40 = vpop.permute.xlu0 %5423  ;;  %v5576_v50 = vadd.f32 %v5575_v45, %v5574_v6  ;;  %v5562_v11 = vadd.f32 %v5561_v53, %v5560_v36  ;;  %v5587_v32 = vadd.f32 %v5586_v59, %v5585_v61  ;;  %v11387_v15 = vmax.f32 %v11386_v46, 0.0 }
 0xcf6   : > { %v5521_v10 = vmul.f32 %v5424_v40, %v11383_v39  ;;  %v5730_v40 = vunpack.c.l.b16 %v5698_v9  ;;  %v5731_v7 = vunpack.c.l.b16 %v5699_v4  ;;  %v11392_v9 = vld [vmem:[#allocation98_spill] sm:$0xff] }
 0xcf7   : > { %v5577_v51 = vrot.slane %v5576_v50, 4  ;;  %v5563_v28 = vrot.slane %v5562_v11, 1  ;;  %v11393_v4 = vmax.f32 %v11392_v9, 0.0  ;;  %v11404_v9 = vld [vmem:[#allocation103_spill] sm:$0xff] }
 0xcf8   : > { %v5409_v55 = vpop.permute.xlu1 %5408 }
 0xcf9   : > { %v5414_v20 = vpop.permute.xlu0 %5413  ;;  %v5518_v60 = vmul.f32 %v5409_v55, %v11381_v24  ;;  %v5578_v63 = vadd.f32 %v5577_v51, %v5576_v50 }
 0xcfa   : > { %v5519_v47 = vmul.f32 %v5414_v20, %v11379_v19  ;;  %v5520_v20 = vmul.f32 %v5419_v38, %v11385_v57  ;;  %v11388_v38 = vld [vmem:[#allocation84_spill] sm:$0xff]  ;;  %v5564_v19 = vadd.f32 %v5563_v28, %v5562_v11 }
 0xcfb   : > { %v5592_v52 = vsel %vm2370_vm5, %v5518_v60, 0.0  ;;  %v11389_v12 = vmax.f32 %v11388_v38, 0.0  ;;  %v11394_v11 = vld [vmem:[#allocation36_spill] sm:$0xff] }
 0xcfc   : > { %v5439_v16 = vpop.permute.xlu1 %5438  ;;  %v5593_v21 = vsel %vm2370_vm5, %v5519_v47, 0.0  ;;  %v5601_v61 = vsel %vm2370_vm5, %v5520_v20, 0.0  ;;  %v11395_v39 = vmax.f32 %v11394_v11, 0.0 }
 0xcfd   : > { %v5524_v18 = vmul.f32 %v5439_v16, %v11377_v27  ;;  %v5594_v54 = vadd.f32 %v5593_v21, %v5592_v52  ;;  %v5602_v16 = vsel %vm2370_vm5, %v5521_v10, 0.0 }
 0xcfe   : > { %v5444_v22 = vpop.permute.xlu0 %5443  ;;  %v5603_v37 = vadd.f32 %v5602_v16, %v5601_v61 }
 0xcff   : > { %v5525_v42 = vmul.f32 %v5444_v22, %v11378_v0  ;;  %v5619_v58 = vsel %vm2370_vm5, %v5524_v18, 0.0  ;;  %v5588_v22 = vrot.slane %v5587_v32, 2  ;;  %v5595_v0 = vrot.slane %v5594_v54, 4 }
 0xd00   : > { %v5429_v14 = vpop.permute.xlu1 %5428 }
 0xd01   : > { %v5620_v25 = vsel %vm2370_vm5, %v5525_v42, 0.0  ;;  %v5522_v8 = vmul.f32 %v5429_v14, %v11380_v2  ;;  %v11390_v42 = vld [vmem:[#allocation112_spill] sm:$0xff]  ;;  %v5579_v2 = vrot.slane %v5578_v63, 2  ;;  %v10611_v24 = vadd.f32 %v5588_v22, %v5587_v32 }
 0xd02   : > { %v5434_v5 = vpop.permute.xlu0 %5433  ;;  %v5621_v35 = vadd.f32 %v5620_v25, %v5619_v58  ;;  %v11391_v14 = vmax.f32 %v11390_v42, 0.0  ;;  %v10607_v25 = vmul.f32 0.01, %v5573_v43  ;;  %v11396_v32 = vld [vmem:[#allocation92_spill] sm:$0xff] }
 0xd03   : > { %v5523_v44 = vmul.f32 %v5434_v5, %v11382_v62  ;;  %v5610_v30 = vsel %vm2370_vm5, %v5522_v8, 0.0  ;;  %v10616_v62 = vsel %vm3958_vm10, %v5731_v7, %v5730_v40  ;;  %v11397_v57 = vmax.f32 %v11396_v32, 0.0  ;;  %v11400_v7 = vld [vmem:[#allocation113_spill] sm:$0xff] }
 0xd04   : > { %v5459_v34 = vpop.permute.xlu1 %5458  ;;  %v5622_v48 = vrot.slane %v5621_v35, 4 }
 0xd05   : > { %v5611_v1 = vsel %vm2370_vm5, %v5523_v44, 0.0  ;;  %v5528_v26 = vmul.f32 %v5459_v34, %v11384_v13  ;;  %v5604_v44 = vrot.slane %v5603_v37, 4  ;;  %v5596_v34 = vadd.f32 %v5595_v0, %v5594_v54 }
 0xd06   : > { %v5464_v55 = vpop.permute.xlu0 %5463  ;;  %v5612_v41 = vadd.f32 %v5611_v1, %v5610_v30  ;;  %v5623_v56 = vadd.f32 %v5622_v48, %v5621_v35  ;;  %v10620_v48 = vmul.f32 0.01, %v5564_v19  ;;  %v5701_v13 = vpack.c.bf16 %v10607_v25, %v10607_v25 }
 0xd07   : > { %v5529_v3 = vmul.f32 %v5464_v55, %v11387_v15  ;;  %v5637_v23 = vsel %vm2370_vm5, %v5528_v26, 0.0  ;;  %v5580_v26 = vadd.f32 %v5579_v2, %v5578_v63  ;;  %v5605_v46 = vadd.f32 %v5604_v44, %v5603_v37 }
 0xd08   : > { %v5449_v17 = vpop.permute.xlu1 %5448  ;;  %v5613_v36 = vrot.slane %v5612_v41, 4  ;;  %v5624_v47 = vrot.slane %v5623_v56, 2  ;;  %v5597_v15 = vrot.slane %v5596_v34, 2  ;;  %v11401_v37 = vmax.f32 %v11400_v7, 0.0 }
 0xd09   : > { %v5638_v33 = vsel %vm2370_vm5, %v5529_v3, 0.0  ;;  %v5526_v27 = vmul.f32 %v5449_v17, %v11389_v12  ;;  %v11398_v17 = vld [vmem:[#allocation100_spill] sm:$0xff]  ;;  %v5581_v38 = vrot.slane %v5580_v26, 1  ;;  %v5606_v42 = vrot.slane %v5605_v46, 2 }
 0xd0a   : > { %v5454_v18 = vpop.permute.xlu0 %5453  ;;  %v5614_v45 = vadd.f32 %v5613_v36, %v5612_v41  ;;  %v5639_v29 = vadd.f32 %v5638_v33, %v5637_v23  ;;  %v5625_v51 = vadd.f32 %v5624_v47, %v5623_v56  ;;  %v5590_v41 = vrot.slane %v10611_v24, 1 }
 0xd0b   : > { %v5527_v53 = vmul.f32 %v5454_v18, %v11391_v14  ;;  %v5628_v8 = vsel %vm2370_vm5, %v5526_v27, 0.0  ;;  %v11399_v28 = vmax.f32 %v11398_v17, 0.0  ;;  %v5700_v36 = vpack.c.bf16 %v10620_v48, %v10620_v48 }
 0xd0c   : > { %v5479_v6 = vpop.permute.xlu1 %5478  ;;  %v5615_v50 = vrot.slane %v5614_v45, 2  ;;  %v5640_v58 = vrot.slane %v5639_v29, 4  ;;  %v5626_v63 = vrot.slane %v5625_v51, 1  ;;  %v5598_v14 = vadd.f32 %v5597_v15, %v5596_v34 }
 0xd0d   : > { %v5629_v5 = vsel %vm2370_vm5, %v5527_v53, 0.0  ;;  %v5532_v31 = vmul.f32 %v5479_v6, %v11393_v4  ;;  %v11402_v6 = vld [vmem:[#allocation114_spill] sm:$0xff]  ;;  %v11405_v4 = vmax.f32 %v11404_v9, 0.0  ;;  %v5607_v32 = vadd.f32 %v5606_v42, %v5605_v46 }
 0xd0e   : > { %v5484_v59 = vpop.permute.xlu0 %5483  ;;  %v5641_v60 = vadd.f32 %v5640_v58, %v5639_v29  ;;  %v5630_v35 = vadd.f32 %v5629_v5, %v5628_v8  ;;  %v5616_v30 = vadd.f32 %v5615_v50, %v5614_v45  ;;  %v11403_v19 = vmax.f32 %v11402_v6, 0.0 }
 0xd0f   : > { %v5533_v10 = vmul.f32 %v5484_v59, %v11395_v39  ;;  %v5655_v54 = vsel %vm2370_vm5, %v5532_v31, 0.0  ;;  %v5627_v58 = vadd.f32 %v5626_v63, %v5625_v51  ;;  %v5582_v59 = vadd.f32 %v5581_v38, %v5580_v26  ;;  %v11406_v51 = vld [vmem:[#allocation111_spill] sm:$0xff] }
 0xd10   : > { %v5469_v21 = vpop.permute.xlu1 %5468  ;;  %v5631_v1 = vrot.slane %v5630_v35, 4  ;;  %v5642_v40 = vrot.slane %v5641_v60, 2  ;;  %v5617_v23 = vrot.slane %v5616_v30, 1 }
 0xd11   : > { %v5656_v55 = vsel %vm2370_vm5, %v5533_v10, 0.0  ;;  %v5530_v20 = vmul.f32 %v5469_v21, %v11397_v57  ;;  %v5599_v21 = vrot.slane %v5598_v14, 1  ;;  %v5691_v26 = vmul.f32 0.01, %v5627_v58 }
 0xd12   : > { %v5474_v52 = vpop.permute.xlu0 %5473  ;;  %v5632_v43 = vadd.f32 %v5631_v1, %v5630_v35  ;;  %v5657_v3 = vadd.f32 %v5656_v55, %v5655_v54  ;;  %v5643_v61 = vadd.f32 %v5642_v40, %v5641_v60  ;;  %v5618_v2 = vadd.f32 %v5617_v23, %v5616_v30 }
 0xd13   : > { %v5531_v16 = vmul.f32 %v5474_v52, %v11399_v28  ;;  %v5646_v27 = vsel %vm2370_vm5, %v5530_v20, 0.0  ;;  %v11407_v30 = vmax.f32 %v11406_v51, 0.0  ;;  %v5600_v63 = vadd.f32 %v5599_v21, %v5598_v14 }
 0xd14   : > { %v5489_v56 = vpop.permute.xlu1 %5488  ;;  %v5633_v33 = vrot.slane %v5632_v43, 2  ;;  %v5658_v12 = vrot.slane %v5657_v3, 4  ;;  %v5644_v11 = vrot.slane %v5643_v61, 1  ;;  %v5690_v57 = vmul.f32 0.01, %v5618_v2 }
 0xd15   : > { %v5647_v18 = vsel %vm2370_vm5, %v5531_v16, 0.0  ;;  %v5534_v0 = vmul.f32 %v5489_v56, %v11401_v37  ;;  %v5591_v16 = vadd.f32 %v5590_v41, %v10611_v24  ;;  %v5686_v56 = vmul.f32 0.01, %v5582_v59 }
 0xd16   : > { %v5494_v22 = vpop.permute.xlu0 %5493  ;;  %v5634_v45 = vadd.f32 %v5633_v33, %v5632_v43  ;;  %v5648_v29 = vadd.f32 %v5647_v18, %v5646_v27  ;;  %v5659_v53 = vadd.f32 %v5658_v12, %v5657_v3  ;;  %v5645_v15 = vadd.f32 %v5644_v11, %v5643_v61 }
 0xd17   : > { %v5535_v47 = vmul.f32 %v5494_v22, %v11403_v19  ;;  %v5664_v10 = vsel %vm2370_vm5, %v5534_v0, 0.0  ;;  %v5608_v33 = vrot.slane %v5607_v32, 1  ;;  %v5706_v46 = vpack.c.bf16 %v5690_v57, %v5690_v57 }
 0xd18   : > { %v5499_v50 = vpop.permute.xlu1 %5498  ;;  %v5635_v8 = vrot.slane %v5634_v45, 1  ;;  %v5649_v5 = vrot.slane %v5648_v29, 4  ;;  %v5660_v35 = vrot.slane %v5659_v53, 2  ;;  %v5732_v27 = vunpack.c.l.b16 %v5700_v36 }
 0xd19   : > { %v5665_v60 = vsel %vm2370_vm5, %v5535_v47, 0.0  ;;  %v5536_v31 = vmul.f32 %v5499_v50, %v11405_v4  ;;  %v5707_v18 = vpack.c.bf16 %v5691_v26, %v5691_v26  ;;  %v5687_v0 = vmul.f32 0.01, %v5591_v16 }
 0xd1a   : > { %v5504_v44 = vpop.permute.xlu0 %5503  ;;  %v5636_v39 = vadd.f32 %v5635_v8, %v5634_v45  ;;  %v5650_v34 = vadd.f32 %v5649_v5, %v5648_v29  ;;  %v5661_v48 = vadd.f32 %v5660_v35, %v5659_v53  ;;  %v5666_v1 = vadd.f32 %v5665_v60, %v5664_v10 }
 0xd1b   : > { %v5537_v55 = vmul.f32 %v5504_v44, %v11407_v30  ;;  %v5673_v43 = vsel %vm2370_vm5, %v5536_v31, 0.0  ;;  %v5693_v29 = vmul.f32 0.01, %v5645_v15  ;;  %v5702_v42 = vpack.c.bf16 %v5686_v56, %v5686_v56 }
 0xd1c   : > { %v5651_v20 = vrot.slane %v5650_v34, 2  ;;  %v5692_v52 = vmul.f32 0.01, %v5636_v39  ;;  %v5667_v40 = vrot.slane %v5666_v1, 4  ;;  %v5662_v3 = vrot.slane %v5661_v48, 1 }
 0xd1d   : > { %v5674_v54 = vsel %vm2370_vm5, %v5537_v55, 0.0  ;;  %v5688_v53 = vmul.f32 0.01, %v5600_v63  ;;  %v5609_v24 = vadd.f32 %v5608_v33, %v5607_v32  ;;  %v5738_v41 = vunpack.c.l.b16 %v5706_v46  ;;  %v6817_v33 = vld [vmem:[#allocation13 + $0x50] sm:$0xff]  }
 0xd1e   : > { %v5652_v17 = vadd.f32 %v5651_v20, %v5650_v34  ;;  %v5675_v28 = vadd.f32 %v5674_v54, %v5673_v43  ;;  %v5668_v23 = vadd.f32 %v5667_v40, %v5666_v1  ;;  %v5708_v22 = vpack.c.bf16 %v5692_v52, %v5692_v52 }
 0xd1f   : > { %v5663_v7 = vadd.f32 %v5662_v3, %v5661_v48  ;;  %v5733_v47 = vunpack.c.l.b16 %v5701_v13  ;;  %v5739_v36 = vunpack.c.l.b16 %v5707_v18  ;;  %v5709_v2 = vpack.c.bf16 %v5693_v29, %v5693_v29  ;;  %v11408_v18 = vld [vmem:[#allocation28_spill] sm:$0xff] }
 0xd20   : > { %v5653_v38 = vrot.slane %v5652_v17, 1  ;;  %v5676_v12 = vrot.slane %v5675_v28, 4  ;;  %v5669_v45 = vrot.slane %v5668_v23, 2  ;;  %v5740_v50 = vunpack.c.l.b16 %v5708_v22 }
 0xd21   : > { %v5695_v8 = vmul.f32 0.01, %v5663_v7  ;;  %v5747_v35 = vsel %vm3960_vm11, %v5732_v27, %v10616_v62  ;;  %v5734_v60 = vunpack.c.l.b16 %v5702_v42  ;;  %v5704_v9 = vpack.c.bf16 %v5688_v53, %v5688_v53  ;;  %v7145_v27 = vld [vmem:[#allocation14 + $0x8] sm:$0x3f]  ;;  %v11411_v53 = vld [vmem:[#allocation110_spill] sm:$0xff] }
 0xd22   : > { %v5654_v37 = vadd.f32 %v5653_v38, %v5652_v17  ;;  %v5677_v61 = vadd.f32 %v5676_v12, %v5675_v28  ;;  %v5670_v6 = vadd.f32 %v5669_v45, %v5668_v23  ;;  %v5703_v31 = vpack.c.bf16 %v5687_v0, %v5687_v0  ;;  %v6818_v38 = vld [vmem:[#allocation13 + $0x58] sm:$0xff]  }
 0xd23   : > { %v5689_v44 = vmul.f32 0.01, %v5609_v24  ;;  %v5753_v11 = vsel %vm3958_vm10, %v5739_v36, %v5738_v41  ;;  %v5748_v10 = vsel %vm3962_vm12, %v5733_v47, %v5747_v35  ;;  %v5741_v21 = vunpack.c.l.b16 %v5709_v2  ;;  %v11410_v0 = vld [vmem:[#allocation82_spill] sm:$0xff] }
 0xd24   : > { %v5694_v14 = vmul.f32 0.01, %v5654_v37  ;;  %v5678_v19 = vrot.slane %v5677_v61, 2  ;;  %v5671_v58 = vrot.slane %v5670_v6, 1  ;;  %v5754_v25 = vsel %vm3960_vm11, %v5740_v50, %v5753_v11  ;;  %v6820_v2 = vld [vmem:[#allocation16 + $0x8] sm:$0xff]  }
 0xd25   : > { %v5711_v48 = vpack.c.bf16 %v5695_v8, %v5695_v8  ;;  %v5749_v51 = vsel %vm3964_vm13, %v5734_v60, %v5748_v10  ;;  %v5736_v62 = vunpack.c.l.b16 %v5704_v9  ;;  %v5735_v55 = vunpack.c.l.b16 %v5703_v31  ;;  %v11414_v31 = vld [vmem:[#allocation109_spill] sm:$0xff] }
 0xd26   : > { %v5710_v5 = vpack.c.bf16 %v5694_v14, %v5694_v14  ;;  %v5679_v59 = vadd.f32 %v5678_v19, %v5677_v61  ;;  %v5672_v4 = vadd.f32 %v5671_v58, %v5670_v6  ;;  %v5705_v32 = vpack.c.bf16 %v5689_v44, %v5689_v44  ;;  %v6819_v58 = vld [vmem:[#allocation16] sm:$0xff]  }
 0xd27   : > { %v5755_v26 = vsel %vm3962_vm12, %v5741_v21, %v5754_v25  ;;  %v5743_v40 = vunpack.c.l.b16 %v5711_v48  ;;  %v5750_v54 = vsel %vm3966_vm14, %v5735_v55, %v5749_v51  ;;  %v11409_v22 = vsub.s32 2, %v11408_v18 }
 0xd28   : > { %v5680_v39 = vrot.slane %v5679_v59, 1  ;;  %v5742_v13 = vunpack.c.l.b16 %v5710_v5  ;;  %v5696_v34 = vmul.f32 0.01, %v5672_v4  ;;  %v5751_v15 = vsel %vm3968_vm15, %v5736_v62, %v5750_v54  ;;  %v11412_v5 = vld [vmem:[#allocation107_spill] sm:$0xff] }
 0xd29   : > { %v5737_v3 = vunpack.c.l.b16 %v5705_v32  ;;  %v5830_v45 = vrot.slane %v7145_v27, %v11409_v22  ;;  %v11413_v35 = vsub.s32 3, %v11408_v18 }
 0xd2a   : > { %v5681_v1 = vadd.f32 %v5680_v39, %v5679_v59  ;;  %v5712_v30 = vpack.c.bf16 %v5696_v34, %v5696_v34  ;;  %v5756_v20 = vsel %vm3964_vm13, %v5742_v13, %v5755_v26 }
 0xd2b   : > { %v5757_v28 = vsel %vm3966_vm14, %v5743_v40, %v5756_v20  ;;  %v5752_v56 = vsel %vm3970_vm0, %v5737_v3, %v5751_v15  ;;  %v5904_v60 = vrot.slane %v7145_v27, %v11413_v35 }
 0xd2c   : > { %v5697_v57 = vmul.f32 0.01, %v5681_v1  ;;  %v5744_v52 = vunpack.c.l.b16 %v5712_v30 }
 0xd2e   : > { %v5713_v43 = vpack.c.bf16 %v5697_v57, %v5697_v57  ;;  %v5758_v16 = vsel %vm3968_vm15, %v5744_v52, %v5757_v28 }
 0xd30   : > { %v5745_v17 = vunpack.c.l.b16 %v5713_v43 }
 0xd32   : > { %v5759_v63 = vsel %vm3970_vm0, %v5745_v17, %v5758_v16 }
 0xd33   : > { %v5760_v23 = vpack.c.b16 %v5759_v63, %v5752_v56 }
 0xd35   : > { %6608 = vmatmul.mubr.msk.bf16.vlgmr.msra.gmra.mrb[52].mxu0 %vm2370_vm5, %v5760_v23 }
 0xd36   : > { %6615 = vmatprep.mubr.msk.bf16.mxu0 %vm7536_vm4, %v11183_v49  ;;  %6612 = vmatpush3.bf16.msra.mxu0 %v6817_v33 }
 0xd37   : > { %6613 = vmatprep.subr.bf16.mxu0 %v11183_v49 }
 0xd3a   : > { %6614 = vmatpush3.bf16.msra.mxu0 %v6818_v38 }
 0xd3b   : > { %6619 = vmatprep.subr.bf16.mxu0 %v11183_v49 }
 0xe08   : > { %v5810_v46 = vpop.f32.mrb[52].mxu0 }
 0xe09   : > { %5819 = vrot.lane.b32.xlu1 %v5810_v46, %s7542_s11  ;;  %v6609_v12 = vpop.f32.mrb[53].mxu0 }
 0xe0a   : > { %v5813_v29 = vpop.f32.mrb[54].mxu0 }
 0xe0b   : > { %5821 = vrot.lane.b32.xlu0 %v5813_v29, %s7542_s11  ;;  %v6610_v7 = vpop.f32.mrb[55].mxu0 }
 0xe0d   : > { %5832 = vrot.lane.b32.xlu1 %v5830_v45, %s7542_s11 }
 0xe7b   : > { %v5820_v37 = vpop.permute.xlu1 %5819 }
 0xe7c   : > { %v5825_v42 = vadd.f32 %v5820_v37, %v11410_v0 }
 0xe7d   : > { %v5822_v61 = vpop.permute.xlu0 %5821 }
 0xe7e   : > { %v5826_v6 = vadd.f32 %v5822_v61, %v11411_v53 }
 0xe7f   : > { %v5833_v24 = vpop.permute.xlu1 %5832 }
 0xe80   : > { %v5835_v41 = vadd.f32 %v5833_v24, %v5825_v42  ;;  %v5836_v14 = vadd.f32 %v5833_v24, %v5826_v6 }
 0xe82   : > { %v5837_v19 = vmax.f32 %v5835_v41, 0.0  ;;  %v5838_v47 = vmax.f32 %v5836_v14, 0.0 }
 0xe84   : > { %v5839_v36 = vpack.c.bf16 %v5838_v47, %v5837_v19 }
 0xe86   : > { %5841 = vrot.lane.b32.xlu0 %v5839_v36, %s7542_s11 }
 0xef8   : > { %v5842_v50 = vpop.permute.xlu0 %5841 }
 0xef9   : > { %6616 = vmatmul.mubr.msk.bf16.vlgmr.msra.gmra.mrb[56].mxu0 %vm2370_vm5, %v5842_v50 }
 0xefa   : > { %6623 = vmatprep.mubr.msk.bf16.mxu0 %vm7536_vm4, %v11183_v49  ;;  %6620 = vmatpush3.bf16.msra.mxu0 %v6819_v58 }
 0xefb   : > { %6621 = vmatprep.subr.bf16.mxu0 %v11183_v49  ;;  %v6355_v49 = vld [vmem:[#allocation17] ss:$0 sm:$0xff] }
 0xefe   : > { %6622 = vmatpush3.bf16.msra.mxu0 %v6820_v2 }
 0xfcc   : > { %v5892_v8 = vpop.f32.mrb[56].mxu0 }
 0xfcd   : > { %v5899_v59 = vadd.f32 %v5892_v8, %v11412_v5  ;;  %v6617_v9 = vpop.f32.mrb[57].mxu0 }
 0xfce   : > { %v5895_v4 = vpop.f32.mrb[58].mxu0 }
 0xfcf   : > { %v5900_v44 = vadd.f32 %v5895_v4, %v11414_v31  ;;  %v6618_v11 = vpop.f32.mrb[59].mxu0  ;;  %v5905_v39 = vadd.f32 %v5904_v60, %v5899_v59 }
 0xfd1   : > { %v5906_v25 = vadd.f32 %v5904_v60, %v5900_v44 }
 0xfd3   : > { %v5907_v13 = vpack.c.bf16 %v5906_v25, %v5905_v39 }
 0xfd5   : > { %6624 = vmatmul.mubr.msk.bf16.vlgmr.msra.gmra.mrb[60].mxu0 %vm2370_vm5, %v5907_v13 }
0x10a8   : > { %v5968_v34 = vpop.f32.mrb[60].mxu0 }
0x10a9   : > { %v5969_v10 = vadd.f32 %v6355_v49, %v5968_v34  ;;  %v6625_v21 = vpop.f32.mrb[61].mxu0 }
0x10aa   : > { %v5971_v48 = vpop.f32.mrb[62].mxu0 }
0x10ab   : > { %v5975_v1 = vmax.f32 %v5969_v10, 0.0  ;;  %v5972_v51 = vadd.f32 %v6355_v49, %v5971_v48  ;;  %v6626_v62 = vpop.f32.mrb[63].mxu0 }
0x10ad   : > { %5977 = vst [vmem:[%s504_s12] sm:$0xff] %v5975_v1  ;;  %v5976_v30 = vmax.f32 %v5972_v51, 0.0 }
0x10af   : > { %5978 = vst [vmem:[%s504_s12 + $0x8] sm:$0xff] %v5976_v30 }
0x10b0   : > { %7441 = shalt.err (!%p7438_p3)
}
0x10b1   : > { %s7442_s20 = scalar_lea.hbm %s10695_s28, 256  ;;  %s7446_s12 = scalar_lea.hbm %s11415_s17, 512 }
0x10b2   : > { %p7443_p0 = scmp.ne.s32.totalorder %s10695_s28, %s7442_s20  ;;  %p7447_p7 = scmp.lt.u32.totalorder %s10695_s28, %s11415_s17 }
0x10b3   : > { %p7448_p10 = scmp.lt.u32.totalorder %s7446_s12, %s7442_s20  ;;  %p7450_p11 = scmp.lt.u32.totalorder %s7442_s20, %s10695_s28 }
0x10b4   : > { %p7444_p5 = pnand %p7443_p0, %p11416_p12 }
0x10b5   : > { %p7449_p1 = por %p7448_p10, %p7447_p7 }
0x10b6   : > { %p7445_p2 = pneg %p7444_p5 }
0x10b7   : > { %p7451_p13 = por %p7450_p11, %p7449_p1 }
0x10b9   : > { %p7452_p8 = pnand %p7451_p13, %p7445_p2 }
0x10bb   : > { %7455 = shalt.err (!%p7452_p8)
}
0x10bc   : > { %s7544_s29 = smov 128   ;;  %s7545_s24 = smov 8  }
0x10bd   : > { %6675 = dma.vmem_to_hbm [thread:$0]  (%p11416_p12), %s10690_s10, 256, %s10695_s28, %s5980_s30, %s7544_s29, %s7544_s29, %s7545_s24  }
0x10be PF: > { %s6008_s19 = sand.u32 1, %s7502_s13   ;;  %p11417_p6 = scmp.ne.s32.totalorder %s11020_s18, 0 }
0x10bf   : > { %p11418_p9 = scmp.ge.s32.totalorder %s7514_s16, 2  ;;  %s6009_s26 = scalar_lea.sflag [#allocation4], %s6008_s19 }
0x10c1   : > { %p6710_p4 = pnand %p11418_p9, %p11417_p6 }
0x10c3   : > { %7497 = dma.done.wait (!%p6710_p4), %s6009_s26, 256  }
0x10c4   : > { %7499 = vsyncadd (!%p6710_p4), %s6009_s26, 4294967040  ;;  %p28_p3 = scmp.ge.s32.totalorder %s7849_s23, 4   ;;  %s11419_s13 = smov %s7506_s14 }
0x10c5   : > { %s11420_s14 = smov %s7510_s15  ;;  %s11421_s15 = smov %s7861_s22 }
0x10c6   : > { %s11422_s16 = smov %s7849_s23  ;;  %30 = sbr.rel (!%p28_p3) target bundleno = 15 (0xf), region = 144 }
0x10cd   :  { %6014 = vsyncpa [#allocation3], 1 }
0x10ce   :  { %6016 = vsyncpa [#allocation3 + $0x1], 1 }
0x10cf   :  { %6017 = vsyncpa [#allocation6], 1 }
0x10d0   :  { %6018 = vsyncpa [#allocation9], 1 }
0x10d1   :  { %6019 = vsyncpa [#allocation12], 1 }
0x10d2   :  { %6020 = vsyncpa [#allocation15], 1 }
0x10d3   :  { %6021 = vsyncpa [#allocation18], 1 }
0x10d4   :  { %6022 = vsyncpa [#allocation4], 1 }
0x10d5   :  { %6024 = vsyncpa [#allocation4 + $0x1], 1 }

</bundles_post_ra>
